<compile_context>
chip_gen: v5e
topology: v5e:2x2
jax: 0.10.0
libtpu: 0.0.40
codegen_flags: <defaults>
</compile_context>

<pallas_src>
import functools

import jax
import jax.numpy as jnp
from jax.experimental import pallas as pl
from jax.experimental.pallas import tpu as pltpu


def _round_up(x, m):
    return ((x + m - 1) // m) * m


# ----------------------------------------------------------------------------
# Pallas kernel 1: single-K-step matmul + bias (+ optional ReLU)  — conv hot path
# ----------------------------------------------------------------------------
def _matmul_bias_kernel(a_ref, b_ref, bias_ref, o_ref, *, relu):
    acc = jnp.dot(a_ref[...], b_ref[...], preferred_element_type=jnp.float32)
    out = acc + bias_ref[...]
    if relu:
        out = jnp.maximum(out, 0.0)
    o_ref[...] = out.astype(o_ref.dtype)


# VMEM byte budget under which we run the whole matmul as one full-array block
# (no grid, no padding, no pipeline-step overhead).  Conservative vs the 16 MiB
# default scoped VMEM on v5e.
_SINGLE_BLOCK_BYTES = 6 * 1024 * 1024


def matmul_bias_pallas(a, b, bias, *, relu=False):
    """(M,K) @ (K,N) + bias[N], optional ReLU.

    Operands go to bf16 for the MXU; accumulation/epilogue stay f32.  K and N are
    kept as full blocks (single MXU pass per tile, no accumulator scratch, no K/N
    padding).  M is tiled only when the single-block form would not fit VMEM."""
    M, K = a.shape
    N = b.shape[1]

    a16 = a.astype(jnp.bfloat16)
    b16 = b.astype(jnp.bfloat16)
    bias2d = bias.astype(jnp.float32)[None, :]

    single_bytes = M * K * 2 + K * N * 2 + N * 4 + M * N * 4
    if single_bytes <= _SINGLE_BLOCK_BYTES:
        # One invocation, full-array VMEM blocks: covers every layer of this model.
        return pl.pallas_call(
            functools.partial(_matmul_bias_kernel, relu=relu),
            out_shape=jax.ShapeDtypeStruct((M, N), jnp.float32),
        )(a16, b16, bias2d)

    # Large-M fallback: tile M only (K and N stay full), megacore-parallel grid.
    tm = 512 if M % 512 == 0 else (256 if M % 256 == 0 else 128)
    Mp = _round_up(M, tm)
    if Mp != M:
        a16 = jnp.pad(a16, ((0, Mp - M), (0, 0)))
    out = pl.pallas_call(
        functools.partial(_matmul_bias_kernel, relu=relu),
        out_shape=jax.ShapeDtypeStruct((Mp, N), jnp.float32),
        grid=(Mp // tm,),
        in_specs=[
            pl.BlockSpec((tm, K), lambda i: (i, 0)),
            pl.BlockSpec((K, N), lambda i: (0, 0)),
            pl.BlockSpec((1, N), lambda i: (0, 0)),
        ],
        out_specs=pl.BlockSpec((tm, N), lambda i: (i, 0)),
        compiler_params=pltpu.CompilerParams(dimension_semantics=("parallel",)),
    )(a16, b16, bias2d)
    return out if Mp == M else out[:M]


# ----------------------------------------------------------------------------
# Pallas kernel 2: 3x3 max-pool, computed fully in VMEM (no 9x HBM stack)
# ----------------------------------------------------------------------------
def _maxpool3x3_s1_kernel(xp_ref, o_ref):
    xp = xp_ref[...]
    Ho, Wo = o_ref.shape[1], o_ref.shape[2]
    m = xp[:, 0:Ho, 0:Wo, :]
    for dh in range(3):
        for dw in range(3):
            if dh == 0 and dw == 0:
                continue
            m = jnp.maximum(m, xp[:, dh:dh + Ho, dw:dw + Wo, :])
    o_ref[...] = m


def _maxpool3x3_s2_kernel(ee_ref, eo_ref, oe_ref, oo_ref, o_ref):
    # Inputs are the four (H,W)-parity phases of the -inf padded map; every window
    # tap becomes a unit-stride static slice of one phase.
    Ho, Wo = o_ref.shape[1], o_ref.shape[2]
    ee, eo = ee_ref[...], eo_ref[...]
    oe, oo = oe_ref[...], oo_ref[...]
    m = oo[:, 0:Ho, 0:Wo, :]
    for a in (0, 1):
        for b in (0, 1):
            m = jnp.maximum(m, ee[:, a:a + Ho, b:b + Wo, :])
    for a in (0, 1):
        m = jnp.maximum(m, eo[:, a:a + Ho, 0:Wo, :])
    for b in (0, 1):
        m = jnp.maximum(m, oe[:, 0:Ho, b:b + Wo, :])
    o_ref[...] = m


def maxpool2d_pallas(x, kernel_size, stride):
    """x: NHWC f32.  PyTorch MaxPool2d(kernel_size, stride, padding=(k-1)//2)."""
    assert kernel_size == 3 and stride in (1, 2)
    N, H, W, C = x.shape
    pad = (kernel_size - 1) // 2
    Ho = (H + 2 * pad - kernel_size) // stride + 1
    Wo = (W + 2 * pad - kernel_size) // stride + 1
    xp = jnp.pad(x, ((0, 0), (pad, pad), (pad, pad), (0, 0)),
                 constant_values=-jnp.inf)
    out_shape = jax.ShapeDtypeStruct((N, Ho, Wo, C), x.dtype)
    if stride == 1:
        return pl.pallas_call(_maxpool3x3_s1_kernel, out_shape=out_shape)(xp)
    # stride == 2: parity-phase split (total bytes == padded input, not 9x).
    ee = xp[:, 0::2, 0::2, :]
    eo = xp[:, 0::2, 1::2, :]
    oe = xp[:, 1::2, 0::2, :]
    oo = xp[:, 1::2, 1::2, :]
    return pl.pallas_call(_maxpool3x3_s2_kernel, out_shape=out_shape)(ee, eo, oe, oo)


# ----------------------------------------------------------------------------
# conv2d = im2col (glue) + Pallas matmul kernel
# ----------------------------------------------------------------------------
def conv2d_pallas(x, w, b, *, stride=1, relu=False):
    """x: NHWC, w: (O, Cin, K, K) (PyTorch layout), b: (O,). padding=(K-1)//2."""
    N, H, W_, Cin = x.shape
    O, _, K, _ = w.shape
    pad = (K - 1) // 2
    Ho = (H + 2 * pad - K) // stride + 1
    Wo = (W_ + 2 * pad - K) // stride + 1
    if K == 1 and stride == 1:
        p = x.reshape(N * H * W_, Cin)                 # 1x1 conv fast path: no im2col
        wm = w.reshape(O, Cin).T
    else:
        xp = jnp.pad(x, ((0, 0), (pad, pad), (pad, pad), (0, 0)))
        patches = []
        for i in range(K):
            for j in range(K):
                patches.append(xp[:, i:i + stride * (Ho - 1) + 1:stride,
                                  j:j + stride * (Wo - 1) + 1:stride, :])
        p = jnp.stack(patches, axis=3).reshape(N * Ho * Wo, K * K * Cin)
        wm = jnp.transpose(w, (2, 3, 1, 0)).reshape(K * K * Cin, O)
    out = matmul_bias_pallas(p, wm, b, relu=relu)
    return out.reshape(N, Ho, Wo, O)


def conv2d_crelu_pallas(x, w, b, *, stride=1):
    """CReLU(conv(x)) fused: cat(relu(Wx+b), relu(-Wx-b)) along channels."""
    w2 = jnp.concatenate([w, -w], axis=0)
    b2 = jnp.concatenate([b, -b], axis=0)
    return conv2d_pallas(x, w2, b2, stride=stride, relu=True)


# ----------------------------------------------------------------------------
# deterministic parameter init (PyTorch Conv2d-style uniform bounds)
# ----------------------------------------------------------------------------
def _init_conv(key, out_c, in_c, k):
    k1, k2 = jax.random.split(key)
    fan_in = in_c * k * k
    bound = 1.0 / (fan_in ** 0.5)
    w = jax.random.uniform(k1, (out_c, in_c, k, k), jnp.float32, -bound, bound)
    b = jax.random.uniform(k2, (out_c,), jnp.float32, -bound, bound)
    return w, b


def _init_inception(key):
    spec = [("conv1", 32, 128, 1), ("conv2", 32, 128, 1), ("conv3", 24, 128, 1),
            ("conv4", 32, 24, 3), ("conv5", 24, 128, 1), ("conv6", 32, 24, 3),
            ("conv7", 32, 32, 3)]
    keys = jax.random.split(key, len(spec))
    return {n: _init_conv(kk, o, i, ks) for kk, (n, o, i, ks) in zip(keys, spec)}


def init_facebox_extractor_params(key):
    keys = jax.random.split(key, 9)
    return {
        "conv1": _init_conv(keys[0], 24, 3, 7),
        "conv2": _init_conv(keys[1], 64, 48, 5),
        "inception1": _init_inception(keys[2]),
        "inception2": _init_inception(keys[3]),
        "inception3": _init_inception(keys[4]),
        "conv3_1": _init_conv(keys[5], 128, 128, 1),
        "conv3_2": _init_conv(keys[6], 256, 128, 3),
        "conv4_1": _init_conv(keys[7], 128, 256, 1),
        "conv4_2": _init_conv(keys[8], 256, 128, 3),
    }


# ----------------------------------------------------------------------------
# forward pass (mirrors FaceBoxExtractor.forward exactly)
# ----------------------------------------------------------------------------
def _inception_forward(p, x):
    # Fuse the three shared-input 1x1 convs (conv1:32, conv3:24, conv5:24) into one
    # matmul with 80 output channels, then split.  (No activation in Inception.)
    w1, b1 = p["conv1"]
    w3, b3 = p["conv3"]
    w5, b5 = p["conv5"]
    wf = jnp.concatenate([w1, w3, w5], axis=0)
    bf = jnp.concatenate([b1, b3, b5], axis=0)
    y = conv2d_pallas(x, wf, bf)
    x1 = y[..., 0:32]
    x3 = y[..., 32:56]
    x4 = y[..., 56:80]
    x2 = maxpool2d_pallas(x, 3, 1)
    x2 = conv2d_pallas(x2, *p["conv2"])
    x3 = conv2d_pallas(x3, *p["conv4"])
    x4 = conv2d_pallas(x4, *p["conv6"])
    x4 = conv2d_pallas(x4, *p["conv7"])
    return jnp.concatenate([x1, x2, x3, x4], axis=-1)  # channel concat (NHWC)


def facebox_extractor_forward(params, x_nchw):
    x = jnp.transpose(x_nchw, (0, 2, 3, 1)).astype(jnp.float32)  # NCHW -> NHWC

    x = conv2d_crelu_pallas(x, *params["conv1"], stride=4)   # conv1 + CReLU
    x = maxpool2d_pallas(x, 3, 2)                            # pool1
    x = conv2d_crelu_pallas(x, *params["conv2"], stride=2)   # conv2 + CReLU
    x = maxpool2d_pallas(x, 3, 2)                            # pool2
    x = _inception_forward(params["inception1"], x)
    x = _inception_forward(params["inception2"], x)
    x1 = _inception_forward(params["inception3"], x)
    y = conv2d_pallas(x1, *params["conv3_1"])
    x2 = conv2d_pallas(y, *params["conv3_2"], stride=2)
    y = conv2d_pallas(x2, *params["conv4_1"])
    x3 = conv2d_pallas(y, *params["conv4_2"], stride=2)

    to_nchw = lambda t: jnp.transpose(t, (0, 3, 1, 2))       # back to PyTorch layout
    return to_nchw(x1), to_nchw(x2), to_nchw(x3)


# ----------------------------------------------------------------------------
if __name__ == "__main__":
    key = jax.random.PRNGKey(0)
    pkey, xkey = jax.random.split(key)
    params = init_facebox_extractor_params(pkey)

    # input consistent with the module (downsampling factor up to 128), NCHW like PyTorch
    x = jax.random.normal(xkey, (2, 3, 128, 128), jnp.float32)

    fwd = jax.jit(facebox_extractor_forward)
    x1, x2, x3 = fwd(params, x)
    jax.block_until_ready(x1)
    jax.block_until_ready(x2)
    jax.block_until_ready(x3)

    # feature maps: 4x4x128, 2x2x256, 1x1x256 (NCHW)
    assert x1.shape == (2, 128, 4, 4), x1.shape
    assert x2.shape == (2, 256, 2, 2), x2.shape
    assert x3.shape == (2, 256, 1, 1), x3.shape
    for t in (x1, x2, x3):
        assert bool(jnp.all(jnp.isfinite(t)))
    print("KERNEL_OK")
</pallas_src>

<mosaic_0001>
module attributes {stable_mosaic.version = 11 : i64} {
  func.func @_matmul_bias_kernel(%arg0: memref<2048x147xbf16, #tpu.memory_space<vmem>>, %arg1: memref<147x48xbf16, #tpu.memory_space<vmem>>, %arg2: memref<1x48xf32, #tpu.memory_space<vmem>>, %arg3: memref<2048x48xf32, #tpu.memory_space<vmem>>) attributes {dimension_semantics = [], scalar_prefetch = 0 : i64, scratch_operands = 0 : i64, tpu.core_type = #tpu.core_type<tc>} {
    %c0 = arith.constant 0 : index
    %c0_0 = arith.constant 0 : index
    %0 = vector.load %arg0[%c0, %c0_0] : memref<2048x147xbf16, #tpu.memory_space<vmem>>, vector<2048x147xbf16>
    %c0_1 = arith.constant 0 : index
    %c0_2 = arith.constant 0 : index
    %1 = vector.load %arg1[%c0_1, %c0_2] : memref<147x48xbf16, #tpu.memory_space<vmem>>, vector<147x48xbf16>
    %cst = arith.constant dense<0.000000e+00> : vector<2048x48xf32>
    %2 = tpu.matmul %0, %1, %cst {dimension_numbers = #tpu.dot_dimension_numbers<[1], [0], [0], [1], [0, 0, 1, 1], [], []>} : vector<2048x147xbf16>, vector<147x48xbf16>, vector<2048x48xf32> -> vector<2048x48xf32>
    %c0_3 = arith.constant 0 : index
    %c0_4 = arith.constant 0 : index
    %3 = vector.load %arg2[%c0_3, %c0_4] : memref<1x48xf32, #tpu.memory_space<vmem>>, vector<1x48xf32>
    %4 = vector.broadcast %3 : vector<1x48xf32> to vector<2048x48xf32>
    %5 = arith.addf %2, %4 : vector<2048x48xf32>
    %cst_5 = arith.constant 0.000000e+00 : f32
    %6 = vector.broadcast %cst_5 : f32 to vector<2048x48xf32>
    %7 = arith.maximumf %5, %6 : vector<2048x48xf32>
    %c0_6 = arith.constant 0 : index
    %c0_7 = arith.constant 0 : index
    %8 = vector.load %arg3[%c0_6, %c0_7] : memref<2048x48xf32, #tpu.memory_space<vmem>>, vector<2048x48xf32>
    tpu.vector_store %arg3[%c0_6, %c0_7], %7 {strides = array<i32>} : memref<2048x48xf32, #tpu.memory_space<vmem>>, vector<2048x48xf32>,
    return
  }
}

module attributes {stable_mosaic.version = 11 : i64} {
  func.func @_maxpool3x3_s2_kernel(%arg0: memref<2x17x17x48xf32, #tpu.memory_space<vmem>>, %arg1: memref<2x17x17x48xf32, #tpu.memory_space<vmem>>, %arg2: memref<2x17x17x48xf32, #tpu.memory_space<vmem>>, %arg3: memref<2x17x17x48xf32, #tpu.memory_space<vmem>>, %arg4: memref<2x16x16x48xf32, #tpu.memory_space<vmem>>) attributes {dimension_semantics = [], scalar_prefetch = 0 : i64, scratch_operands = 0 : i64, tpu.core_type = #tpu.core_type<tc>} {
    %c0 = arith.constant 0 : index
    %c0_0 = arith.constant 0 : index
    %c0_1 = arith.constant 0 : index
    %c0_2 = arith.constant 0 : index
    %0 = vector.load %arg0[%c0, %c0_0, %c0_1, %c0_2] : memref<2x17x17x48xf32, #tpu.memory_space<vmem>>, vector<2x17x17x48xf32>
    %c0_3 = arith.constant 0 : index
    %c0_4 = arith.constant 0 : index
    %c0_5 = arith.constant 0 : index
    %c0_6 = arith.constant 0 : index
    %1 = vector.load %arg1[%c0_3, %c0_4, %c0_5, %c0_6] : memref<2x17x17x48xf32, #tpu.memory_space<vmem>>, vector<2x17x17x48xf32>
    %c0_7 = arith.constant 0 : index
    %c0_8 = arith.constant 0 : index
    %c0_9 = arith.constant 0 : index
    %c0_10 = arith.constant 0 : index
    %2 = vector.load %arg2[%c0_7, %c0_8, %c0_9, %c0_10] : memref<2x17x17x48xf32, #tpu.memory_space<vmem>>, vector<2x17x17x48xf32>
    %c0_11 = arith.constant 0 : index
    %c0_12 = arith.constant 0 : index
    %c0_13 = arith.constant 0 : index
    %c0_14 = arith.constant 0 : index
    %3 = vector.load %arg3[%c0_11, %c0_12, %c0_13, %c0_14] : memref<2x17x17x48xf32, #tpu.memory_space<vmem>>, vector<2x17x17x48xf32>
    %4 = vector.extract_strided_slice %3 {offsets = [0, 0, 0, 0], sizes = [2, 16, 16, 48], strides = [1, 1, 1, 1]} : vector<2x17x17x48xf32> to vector<2x16x16x48xf32>
    %5 = vector.extract_strided_slice %0 {offsets = [0, 0, 0, 0], sizes = [2, 16, 16, 48], strides = [1, 1, 1, 1]} : vector<2x17x17x48xf32> to vector<2x16x16x48xf32>
    %6 = arith.maximumf %4, %5 : vector<2x16x16x48xf32>
    %7 = vector.extract_strided_slice %0 {offsets = [0, 0, 1, 0], sizes = [2, 16, 16, 48], strides = [1, 1, 1, 1]} : vector<2x17x17x48xf32> to vector<2x16x16x48xf32>
    %8 = arith.maximumf %6, %7 : vector<2x16x16x48xf32>
    %9 = vector.extract_strided_slice %0 {offsets = [0, 1, 0, 0], sizes = [2, 16, 16, 48], strides = [1, 1, 1, 1]} : vector<2x17x17x48xf32> to vector<2x16x16x48xf32>
    %10 = arith.maximumf %8, %9 : vector<2x16x16x48xf32>
    %11 = vector.extract_strided_slice %0 {offsets = [0, 1, 1, 0], sizes = [2, 16, 16, 48], strides = [1, 1, 1, 1]} : vector<2x17x17x48xf32> to vector<2x16x16x48xf32>
    %12 = arith.maximumf %10, %11 : vector<2x16x16x48xf32>
    %13 = vector.extract_strided_slice %1 {offsets = [0, 0, 0, 0], sizes = [2, 16, 16, 48], strides = [1, 1, 1, 1]} : vector<2x17x17x48xf32> to vector<2x16x16x48xf32>
    %14 = arith.maximumf %12, %13 : vector<2x16x16x48xf32>
    %15 = vector.extract_strided_slice %1 {offsets = [0, 1, 0, 0], sizes = [2, 16, 16, 48], strides = [1, 1, 1, 1]} : vector<2x17x17x48xf32> to vector<2x16x16x48xf32>
    %16 = arith.maximumf %14, %15 : vector<2x16x16x48xf32>
    %17 = vector.extract_strided_slice %2 {offsets = [0, 0, 0, 0], sizes = [2, 16, 16, 48], strides = [1, 1, 1, 1]} : vector<2x17x17x48xf32> to vector<2x16x16x48xf32>
    %18 = arith.maximumf %16, %17 : vector<2x16x16x48xf32>
    %19 = vector.extract_strided_slice %2 {offsets = [0, 0, 1, 0], sizes = [2, 16, 16, 48], strides = [1, 1, 1, 1]} : vector<2x17x17x48xf32> to vector<2x16x16x48xf32>
    %20 = arith.maximumf %18, %19 : vector<2x16x16x48xf32>
    %c0_15 = arith.constant 0 : index
    %c0_16 = arith.constant 0 : index
    %c0_17 = arith.constant 0 : index
    %c0_18 = arith.constant 0 : index
    %21 = vector.load %arg4[%c0_15, %c0_16, %c0_17, %c0_18] : memref<2x16x16x48xf32, #tpu.memory_space<vmem>>, vector<2x16x16x48xf32>
    tpu.vector_store %arg4[%c0_15, %c0_16, %c0_17, %c0_18], %20 {strides = array<i32>} : memref<2x16x16x48xf32, #tpu.memory_space<vmem>>, vector<2x16x16x48xf32>,
    return
  }
}

module attributes {stable_mosaic.version = 11 : i64} {
  func.func @_matmul_bias_kernel(%arg0: memref<128x1200xbf16, #tpu.memory_space<vmem>>, %arg1: memref<1200x128xbf16, #tpu.memory_space<vmem>>, %arg2: memref<1x128xf32, #tpu.memory_space<vmem>>, %arg3: memref<128x128xf32, #tpu.memory_space<vmem>>) attributes {dimension_semantics = [], scalar_prefetch = 0 : i64, scratch_operands = 0 : i64, tpu.core_type = #tpu.core_type<tc>} {
    %c0 = arith.constant 0 : index
    %c0_0 = arith.constant 0 : index
    %0 = vector.load %arg0[%c0, %c0_0] : memref<128x1200xbf16, #tpu.memory_space<vmem>>, vector<128x1200xbf16>
    %c0_1 = arith.constant 0 : index
    %c0_2 = arith.constant 0 : index
    %1 = vector.load %arg1[%c0_1, %c0_2] : memref<1200x128xbf16, #tpu.memory_space<vmem>>, vector<1200x128xbf16>
    %cst = arith.constant dense<0.000000e+00> : vector<128x128xf32>
    %2 = tpu.matmul %0, %1, %cst {dimension_numbers = #tpu.dot_dimension_numbers<[1], [0], [0], [1], [0, 0, 1, 1], [], []>} : vector<128x1200xbf16>, vector<1200x128xbf16>, vector<128x128xf32> -> vector<128x128xf32>
    %c0_3 = arith.constant 0 : index
    %c0_4 = arith.constant 0 : index
    %3 = vector.load %arg2[%c0_3, %c0_4] : memref<1x128xf32, #tpu.memory_space<vmem>>, vector<1x128xf32>
    %4 = vector.broadcast %3 : vector<1x128xf32> to vector<128x128xf32>
    %5 = arith.addf %2, %4 : vector<128x128xf32>
    %cst_5 = arith.constant 0.000000e+00 : f32
    %6 = vector.broadcast %cst_5 : f32 to vector<128x128xf32>
    %7 = arith.maximumf %5, %6 : vector<128x128xf32>
    %c0_6 = arith.constant 0 : index
    %c0_7 = arith.constant 0 : index
    %8 = vector.load %arg3[%c0_6, %c0_7] : memref<128x128xf32, #tpu.memory_space<vmem>>, vector<128x128xf32>
    tpu.vector_store %arg3[%c0_6, %c0_7], %7 {strides = array<i32>} : memref<128x128xf32, #tpu.memory_space<vmem>>, vector<128x128xf32>,
    return
  }
}

module attributes {stable_mosaic.version = 11 : i64} {
  func.func @_maxpool3x3_s2_kernel(%arg0: memref<2x5x5x128xf32, #tpu.memory_space<vmem>>, %arg1: memref<2x5x5x128xf32, #tpu.memory_space<vmem>>, %arg2: memref<2x5x5x128xf32, #tpu.memory_space<vmem>>, %arg3: memref<2x5x5x128xf32, #tpu.memory_space<vmem>>, %arg4: memref<2x4x4x128xf32, #tpu.memory_space<vmem>>) attributes {dimension_semantics = [], scalar_prefetch = 0 : i64, scratch_operands = 0 : i64, tpu.core_type = #tpu.core_type<tc>} {
    %c0 = arith.constant 0 : index
    %c0_0 = arith.constant 0 : index
    %c0_1 = arith.constant 0 : index
    %c0_2 = arith.constant 0 : index
    %0 = vector.load %arg0[%c0, %c0_0, %c0_1, %c0_2] : memref<2x5x5x128xf32, #tpu.memory_space<vmem>>, vector<2x5x5x128xf32>
    %c0_3 = arith.constant 0 : index
    %c0_4 = arith.constant 0 : index
    %c0_5 = arith.constant 0 : index
    %c0_6 = arith.constant 0 : index
    %1 = vector.load %arg1[%c0_3, %c0_4, %c0_5, %c0_6] : memref<2x5x5x128xf32, #tpu.memory_space<vmem>>, vector<2x5x5x128xf32>
    %c0_7 = arith.constant 0 : index
    %c0_8 = arith.constant 0 : index
    %c0_9 = arith.constant 0 : index
    %c0_10 = arith.constant 0 : index
    %2 = vector.load %arg2[%c0_7, %c0_8, %c0_9, %c0_10] : memref<2x5x5x128xf32, #tpu.memory_space<vmem>>, vector<2x5x5x128xf32>
    %c0_11 = arith.constant 0 : index
    %c0_12 = arith.constant 0 : index
    %c0_13 = arith.constant 0 : index
    %c0_14 = arith.constant 0 : index
    %3 = vector.load %arg3[%c0_11, %c0_12, %c0_13, %c0_14] : memref<2x5x5x128xf32, #tpu.memory_space<vmem>>, vector<2x5x5x128xf32>
    %4 = vector.extract_strided_slice %3 {offsets = [0, 0, 0, 0], sizes = [2, 4, 4, 128], strides = [1, 1, 1, 1]} : vector<2x5x5x128xf32> to vector<2x4x4x128xf32>
    %5 = vector.extract_strided_slice %0 {offsets = [0, 0, 0, 0], sizes = [2, 4, 4, 128], strides = [1, 1, 1, 1]} : vector<2x5x5x128xf32> to vector<2x4x4x128xf32>
    %6 = arith.maximumf %4, %5 : vector<2x4x4x128xf32>
    %7 = vector.extract_strided_slice %0 {offsets = [0, 0, 1, 0], sizes = [2, 4, 4, 128], strides = [1, 1, 1, 1]} : vector<2x5x5x128xf32> to vector<2x4x4x128xf32>
    %8 = arith.maximumf %6, %7 : vector<2x4x4x128xf32>
    %9 = vector.extract_strided_slice %0 {offsets = [0, 1, 0, 0], sizes = [2, 4, 4, 128], strides = [1, 1, 1, 1]} : vector<2x5x5x128xf32> to vector<2x4x4x128xf32>
    %10 = arith.maximumf %8, %9 : vector<2x4x4x128xf32>
    %11 = vector.extract_strided_slice %0 {offsets = [0, 1, 1, 0], sizes = [2, 4, 4, 128], strides = [1, 1, 1, 1]} : vector<2x5x5x128xf32> to vector<2x4x4x128xf32>
    %12 = arith.maximumf %10, %11 : vector<2x4x4x128xf32>
    %13 = vector.extract_strided_slice %1 {offsets = [0, 0, 0, 0], sizes = [2, 4, 4, 128], strides = [1, 1, 1, 1]} : vector<2x5x5x128xf32> to vector<2x4x4x128xf32>
    %14 = arith.maximumf %12, %13 : vector<2x4x4x128xf32>
    %15 = vector.extract_strided_slice %1 {offsets = [0, 1, 0, 0], sizes = [2, 4, 4, 128], strides = [1, 1, 1, 1]} : vector<2x5x5x128xf32> to vector<2x4x4x128xf32>
    %16 = arith.maximumf %14, %15 : vector<2x4x4x128xf32>
    %17 = vector.extract_strided_slice %2 {offsets = [0, 0, 0, 0], sizes = [2, 4, 4, 128], strides = [1, 1, 1, 1]} : vector<2x5x5x128xf32> to vector<2x4x4x128xf32>
    %18 = arith.maximumf %16, %17 : vector<2x4x4x128xf32>
    %19 = vector.extract_strided_slice %2 {offsets = [0, 0, 1, 0], sizes = [2, 4, 4, 128], strides = [1, 1, 1, 1]} : vector<2x5x5x128xf32> to vector<2x4x4x128xf32>
    %20 = arith.maximumf %18, %19 : vector<2x4x4x128xf32>
    %c0_15 = arith.constant 0 : index
    %c0_16 = arith.constant 0 : index
    %c0_17 = arith.constant 0 : index
    %c0_18 = arith.constant 0 : index
    %21 = vector.load %arg4[%c0_15, %c0_16, %c0_17, %c0_18] : memref<2x4x4x128xf32, #tpu.memory_space<vmem>>, vector<2x4x4x128xf32>
    tpu.vector_store %arg4[%c0_15, %c0_16, %c0_17, %c0_18], %20 {strides = array<i32>} : memref<2x4x4x128xf32, #tpu.memory_space<vmem>>, vector<2x4x4x128xf32>,
    return
  }
}

module attributes {stable_mosaic.version = 11 : i64} {
  func.func @_matmul_bias_kernel(%arg0: memref<32x128xbf16, #tpu.memory_space<vmem>>, %arg1: memref<128x80xbf16, #tpu.memory_space<vmem>>, %arg2: memref<1x80xf32, #tpu.memory_space<vmem>>, %arg3: memref<32x80xf32, #tpu.memory_space<vmem>>) attributes {dimension_semantics = [], scalar_prefetch = 0 : i64, scratch_operands = 0 : i64, tpu.core_type = #tpu.core_type<tc>} {
    %c0 = arith.constant 0 : index
    %c0_0 = arith.constant 0 : index
    %0 = vector.load %arg0[%c0, %c0_0] : memref<32x128xbf16, #tpu.memory_space<vmem>>, vector<32x128xbf16>
    %c0_1 = arith.constant 0 : index
    %c0_2 = arith.constant 0 : index
    %1 = vector.load %arg1[%c0_1, %c0_2] : memref<128x80xbf16, #tpu.memory_space<vmem>>, vector<128x80xbf16>
    %cst = arith.constant dense<0.000000e+00> : vector<32x80xf32>
    %2 = tpu.matmul %0, %1, %cst {dimension_numbers = #tpu.dot_dimension_numbers<[1], [0], [0], [1], [0, 0, 1, 1], [], []>} : vector<32x128xbf16>, vector<128x80xbf16>, vector<32x80xf32> -> vector<32x80xf32>
    %c0_3 = arith.constant 0 : index
    %c0_4 = arith.constant 0 : index
    %3 = vector.load %arg2[%c0_3, %c0_4] : memref<1x80xf32, #tpu.memory_space<vmem>>, vector<1x80xf32>
    %4 = vector.broadcast %3 : vector<1x80xf32> to vector<32x80xf32>
    %5 = arith.addf %2, %4 : vector<32x80xf32>
    %c0_5 = arith.constant 0 : index
    %c0_6 = arith.constant 0 : index
    %6 = vector.load %arg3[%c0_5, %c0_6] : memref<32x80xf32, #tpu.memory_space<vmem>>, vector<32x80xf32>
    tpu.vector_store %arg3[%c0_5, %c0_6], %5 {strides = array<i32>} : memref<32x80xf32, #tpu.memory_space<vmem>>, vector<32x80xf32>,
    return
  }
}

module attributes {stable_mosaic.version = 11 : i64} {
  func.func @_matmul_bias_kernel(%arg0: memref<32x216xbf16, #tpu.memory_space<vmem>>, %arg1: memref<216x32xbf16, #tpu.memory_space<vmem>>, %arg2: memref<1x32xf32, #tpu.memory_space<vmem>>, %arg3: memref<32x32xf32, #tpu.memory_space<vmem>>) attributes {dimension_semantics = [], scalar_prefetch = 0 : i64, scratch_operands = 0 : i64, tpu.core_type = #tpu.core_type<tc>} {
    %c0 = arith.constant 0 : index
    %c0_0 = arith.constant 0 : index
    %0 = vector.load %arg0[%c0, %c0_0] : memref<32x216xbf16, #tpu.memory_space<vmem>>, vector<32x216xbf16>
    %c0_1 = arith.constant 0 : index
    %c0_2 = arith.constant 0 : index
    %1 = vector.load %arg1[%c0_1, %c0_2] : memref<216x32xbf16, #tpu.memory_space<vmem>>, vector<216x32xbf16>
    %cst = arith.constant dense<0.000000e+00> : vector<32x32xf32>
    %2 = tpu.matmul %0, %1, %cst {dimension_numbers = #tpu.dot_dimension_numbers<[1], [0], [0], [1], [0, 0, 1, 1], [], []>} : vector<32x216xbf16>, vector<216x32xbf16>, vector<32x32xf32> -> vector<32x32xf32>
    %c0_3 = arith.constant 0 : index
    %c0_4 = arith.constant 0 : index
    %3 = vector.load %arg2[%c0_3, %c0_4] : memref<1x32xf32, #tpu.memory_space<vmem>>, vector<1x32xf32>
    %4 = vector.broadcast %3 : vector<1x32xf32> to vector<32x32xf32>
    %5 = arith.addf %2, %4 : vector<32x32xf32>
    %c0_5 = arith.constant 0 : index
    %c0_6 = arith.constant 0 : index
    %6 = vector.load %arg3[%c0_5, %c0_6] : memref<32x32xf32, #tpu.memory_space<vmem>>, vector<32x32xf32>
    tpu.vector_store %arg3[%c0_5, %c0_6], %5 {strides = array<i32>} : memref<32x32xf32, #tpu.memory_space<vmem>>, vector<32x32xf32>,
    return
  }
}

module attributes {stable_mosaic.version = 11 : i64} {
  func.func @_matmul_bias_kernel(%arg0: memref<32x288xbf16, #tpu.memory_space<vmem>>, %arg1: memref<288x32xbf16, #tpu.memory_space<vmem>>, %arg2: memref<1x32xf32, #tpu.memory_space<vmem>>, %arg3: memref<32x32xf32, #tpu.memory_space<vmem>>) attributes {dimension_semantics = [], scalar_prefetch = 0 : i64, scratch_operands = 0 : i64, tpu.core_type = #tpu.core_type<tc>} {
    %c0 = arith.constant 0 : index
    %c0_0 = arith.constant 0 : index
    %0 = vector.load %arg0[%c0, %c0_0] : memref<32x288xbf16, #tpu.memory_space<vmem>>, vector<32x288xbf16>
    %c0_1 = arith.constant 0 : index
    %c0_2 = arith.constant 0 : index
    %1 = vector.load %arg1[%c0_1, %c0_2] : memref<288x32xbf16, #tpu.memory_space<vmem>>, vector<288x32xbf16>
    %cst = arith.constant dense<0.000000e+00> : vector<32x32xf32>
    %2 = tpu.matmul %0, %1, %cst {dimension_numbers = #tpu.dot_dimension_numbers<[1], [0], [0], [1], [0, 0, 1, 1], [], []>} : vector<32x288xbf16>, vector<288x32xbf16>, vector<32x32xf32> -> vector<32x32xf32>
    %c0_3 = arith.constant 0 : index
    %c0_4 = arith.constant 0 : index
    %3 = vector.load %arg2[%c0_3, %c0_4] : memref<1x32xf32, #tpu.memory_space<vmem>>, vector<1x32xf32>
    %4 = vector.broadcast %3 : vector<1x32xf32> to vector<32x32xf32>
    %5 = arith.addf %2, %4 : vector<32x32xf32>
    %c0_5 = arith.constant 0 : index
    %c0_6 = arith.constant 0 : index
    %6 = vector.load %arg3[%c0_5, %c0_6] : memref<32x32xf32, #tpu.memory_space<vmem>>, vector<32x32xf32>
    tpu.vector_store %arg3[%c0_5, %c0_6], %5 {strides = array<i32>} : memref<32x32xf32, #tpu.memory_space<vmem>>, vector<32x32xf32>,
    return
  }
}

module attributes {stable_mosaic.version = 11 : i64} {
  func.func @_maxpool3x3_s1_kernel(%arg0: memref<2x6x6x128xf32, #tpu.memory_space<vmem>>, %arg1: memref<2x4x4x128xf32, #tpu.memory_space<vmem>>) attributes {dimension_semantics = [], scalar_prefetch = 0 : i64, scratch_operands = 0 : i64, tpu.core_type = #tpu.core_type<tc>} {
    %c0 = arith.constant 0 : index
    %c0_0 = arith.constant 0 : index
    %c0_1 = arith.constant 0 : index
    %c0_2 = arith.constant 0 : index
    %0 = vector.load %arg0[%c0, %c0_0, %c0_1, %c0_2] : memref<2x6x6x128xf32, #tpu.memory_space<vmem>>, vector<2x6x6x128xf32>
    %1 = vector.extract_strided_slice %0 {offsets = [0, 0, 0, 0], sizes = [2, 4, 4, 128], strides = [1, 1, 1, 1]} : vector<2x6x6x128xf32> to vector<2x4x4x128xf32>
    %2 = vector.extract_strided_slice %0 {offsets = [0, 0, 1, 0], sizes = [2, 4, 4, 128], strides = [1, 1, 1, 1]} : vector<2x6x6x128xf32> to vector<2x4x4x128xf32>
    %3 = arith.maximumf %1, %2 : vector<2x4x4x128xf32>
    %4 = vector.extract_strided_slice %0 {offsets = [0, 0, 2, 0], sizes = [2, 4, 4, 128], strides = [1, 1, 1, 1]} : vector<2x6x6x128xf32> to vector<2x4x4x128xf32>
    %5 = arith.maximumf %3, %4 : vector<2x4x4x128xf32>
    %6 = vector.extract_strided_slice %0 {offsets = [0, 1, 0, 0], sizes = [2, 4, 4, 128], strides = [1, 1, 1, 1]} : vector<2x6x6x128xf32> to vector<2x4x4x128xf32>
    %7 = arith.maximumf %5, %6 : vector<2x4x4x128xf32>
    %8 = vector.extract_strided_slice %0 {offsets = [0, 1, 1, 0], sizes = [2, 4, 4, 128], strides = [1, 1, 1, 1]} : vector<2x6x6x128xf32> to vector<2x4x4x128xf32>
    %9 = arith.maximumf %7, %8 : vector<2x4x4x128xf32>
    %10 = vector.extract_strided_slice %0 {offsets = [0, 1, 2, 0], sizes = [2, 4, 4, 128], strides = [1, 1, 1, 1]} : vector<2x6x6x128xf32> to vector<2x4x4x128xf32>
    %11 = arith.maximumf %9, %10 : vector<2x4x4x128xf32>
    %12 = vector.extract_strided_slice %0 {offsets = [0, 2, 0, 0], sizes = [2, 4, 4, 128], strides = [1, 1, 1, 1]} : vector<2x6x6x128xf32> to vector<2x4x4x128xf32>
    %13 = arith.maximumf %11, %12 : vector<2x4x4x128xf32>
    %14 = vector.extract_strided_slice %0 {offsets = [0, 2, 1, 0], sizes = [2, 4, 4, 128], strides = [1, 1, 1, 1]} : vector<2x6x6x128xf32> to vector<2x4x4x128xf32>
    %15 = arith.maximumf %13, %14 : vector<2x4x4x128xf32>
    %16 = vector.extract_strided_slice %0 {offsets = [0, 2, 2, 0], sizes = [2, 4, 4, 128], strides = [1, 1, 1, 1]} : vector<2x6x6x128xf32> to vector<2x4x4x128xf32>
    %17 = arith.maximumf %15, %16 : vector<2x4x4x128xf32>
    %c0_3 = arith.constant 0 : index
    %c0_4 = arith.constant 0 : index
    %c0_5 = arith.constant 0 : index
    %c0_6 = arith.constant 0 : index
    %18 = vector.load %arg1[%c0_3, %c0_4, %c0_5, %c0_6] : memref<2x4x4x128xf32, #tpu.memory_space<vmem>>, vector<2x4x4x128xf32>
    tpu.vector_store %arg1[%c0_3, %c0_4, %c0_5, %c0_6], %17 {strides = array<i32>} : memref<2x4x4x128xf32, #tpu.memory_space<vmem>>, vector<2x4x4x128xf32>,
    return
  }
}

module attributes {stable_mosaic.version = 11 : i64} {
  func.func @_matmul_bias_kernel(%arg0: memref<32x128xbf16, #tpu.memory_space<vmem>>, %arg1: memref<128x32xbf16, #tpu.memory_space<vmem>>, %arg2: memref<1x32xf32, #tpu.memory_space<vmem>>, %arg3: memref<32x32xf32, #tpu.memory_space<vmem>>) attributes {dimension_semantics = [], scalar_prefetch = 0 : i64, scratch_operands = 0 : i64, tpu.core_type = #tpu.core_type<tc>} {
    %c0 = arith.constant 0 : index
    %c0_0 = arith.constant 0 : index
    %0 = vector.load %arg0[%c0, %c0_0] : memref<32x128xbf16, #tpu.memory_space<vmem>>, vector<32x128xbf16>
    %c0_1 = arith.constant 0 : index
    %c0_2 = arith.constant 0 : index
    %1 = vector.load %arg1[%c0_1, %c0_2] : memref<128x32xbf16, #tpu.memory_space<vmem>>, vector<128x32xbf16>
    %cst = arith.constant dense<0.000000e+00> : vector<32x32xf32>
    %2 = tpu.matmul %0, %1, %cst {dimension_numbers = #tpu.dot_dimension_numbers<[1], [0], [0], [1], [0, 0, 1, 1], [], []>} : vector<32x128xbf16>, vector<128x32xbf16>, vector<32x32xf32> -> vector<32x32xf32>
    %c0_3 = arith.constant 0 : index
    %c0_4 = arith.constant 0 : index
    %3 = vector.load %arg2[%c0_3, %c0_4] : memref<1x32xf32, #tpu.memory_space<vmem>>, vector<1x32xf32>
    %4 = vector.broadcast %3 : vector<1x32xf32> to vector<32x32xf32>
    %5 = arith.addf %2, %4 : vector<32x32xf32>
    %c0_5 = arith.constant 0 : index
    %c0_6 = arith.constant 0 : index
    %6 = vector.load %arg3[%c0_5, %c0_6] : memref<32x32xf32, #tpu.memory_space<vmem>>, vector<32x32xf32>
    tpu.vector_store %arg3[%c0_5, %c0_6], %5 {strides = array<i32>} : memref<32x32xf32, #tpu.memory_space<vmem>>, vector<32x32xf32>,
    return
  }
}

module attributes {stable_mosaic.version = 11 : i64} {
  func.func @_matmul_bias_kernel(%arg0: memref<32x128xbf16, #tpu.memory_space<vmem>>, %arg1: memref<128x128xbf16, #tpu.memory_space<vmem>>, %arg2: memref<1x128xf32, #tpu.memory_space<vmem>>, %arg3: memref<32x128xf32, #tpu.memory_space<vmem>>) attributes {dimension_semantics = [], scalar_prefetch = 0 : i64, scratch_operands = 0 : i64, tpu.core_type = #tpu.core_type<tc>} {
    %c0 = arith.constant 0 : index
    %c0_0 = arith.constant 0 : index
    %0 = vector.load %arg0[%c0, %c0_0] : memref<32x128xbf16, #tpu.memory_space<vmem>>, vector<32x128xbf16>
    %c0_1 = arith.constant 0 : index
    %c0_2 = arith.constant 0 : index
    %1 = vector.load %arg1[%c0_1, %c0_2] : memref<128x128xbf16, #tpu.memory_space<vmem>>, vector<128x128xbf16>
    %cst = arith.constant dense<0.000000e+00> : vector<32x128xf32>
    %2 = tpu.matmul %0, %1, %cst {dimension_numbers = #tpu.dot_dimension_numbers<[1], [0], [0], [1], [0, 0, 1, 1], [], []>} : vector<32x128xbf16>, vector<128x128xbf16>, vector<32x128xf32> -> vector<32x128xf32>
    %c0_3 = arith.constant 0 : index
    %c0_4 = arith.constant 0 : index
    %3 = vector.load %arg2[%c0_3, %c0_4] : memref<1x128xf32, #tpu.memory_space<vmem>>, vector<1x128xf32>
    %4 = vector.broadcast %3 : vector<1x128xf32> to vector<32x128xf32>
    %5 = arith.addf %2, %4 : vector<32x128xf32>
    %c0_5 = arith.constant 0 : index
    %c0_6 = arith.constant 0 : index
    %6 = vector.load %arg3[%c0_5, %c0_6] : memref<32x128xf32, #tpu.memory_space<vmem>>, vector<32x128xf32>
    tpu.vector_store %arg3[%c0_5, %c0_6], %5 {strides = array<i32>} : memref<32x128xf32, #tpu.memory_space<vmem>>, vector<32x128xf32>,
    return
  }
}

module attributes {stable_mosaic.version = 11 : i64} {
  func.func @_matmul_bias_kernel(%arg0: memref<8x1152xbf16, #tpu.memory_space<vmem>>, %arg1: memref<1152x256xbf16, #tpu.memory_space<vmem>>, %arg2: memref<1x256xf32, #tpu.memory_space<vmem>>, %arg3: memref<8x256xf32, #tpu.memory_space<vmem>>) attributes {dimension_semantics = [], scalar_prefetch = 0 : i64, scratch_operands = 0 : i64, tpu.core_type = #tpu.core_type<tc>} {
    %c0 = arith.constant 0 : index
    %c0_0 = arith.constant 0 : index
    %0 = vector.load %arg0[%c0, %c0_0] : memref<8x1152xbf16, #tpu.memory_space<vmem>>, vector<8x1152xbf16>
    %c0_1 = arith.constant 0 : index
    %c0_2 = arith.constant 0 : index
    %1 = vector.load %arg1[%c0_1, %c0_2] : memref<1152x256xbf16, #tpu.memory_space<vmem>>, vector<1152x256xbf16>
    %cst = arith.constant dense<0.000000e+00> : vector<8x256xf32>
    %2 = tpu.matmul %0, %1, %cst {dimension_numbers = #tpu.dot_dimension_numbers<[1], [0], [0], [1], [0, 0, 1, 1], [], []>} : vector<8x1152xbf16>, vector<1152x256xbf16>, vector<8x256xf32> -> vector<8x256xf32>
    %c0_3 = arith.constant 0 : index
    %c0_4 = arith.constant 0 : index
    %3 = vector.load %arg2[%c0_3, %c0_4] : memref<1x256xf32, #tpu.memory_space<vmem>>, vector<1x256xf32>
    %4 = vector.broadcast %3 : vector<1x256xf32> to vector<8x256xf32>
    %5 = arith.addf %2, %4 : vector<8x256xf32>
    %c0_5 = arith.constant 0 : index
    %c0_6 = arith.constant 0 : index
    %6 = vector.load %arg3[%c0_5, %c0_6] : memref<8x256xf32, #tpu.memory_space<vmem>>, vector<8x256xf32>
    tpu.vector_store %arg3[%c0_5, %c0_6], %5 {strides = array<i32>} : memref<8x256xf32, #tpu.memory_space<vmem>>, vector<8x256xf32>,
    return
  }
}

module attributes {stable_mosaic.version = 11 : i64} {
  func.func @_matmul_bias_kernel(%arg0: memref<8x256xbf16, #tpu.memory_space<vmem>>, %arg1: memref<256x128xbf16, #tpu.memory_space<vmem>>, %arg2: memref<1x128xf32, #tpu.memory_space<vmem>>, %arg3: memref<8x128xf32, #tpu.memory_space<vmem>>) attributes {dimension_semantics = [], scalar_prefetch = 0 : i64, scratch_operands = 0 : i64, tpu.core_type = #tpu.core_type<tc>} {
    %c0 = arith.constant 0 : index
    %c0_0 = arith.constant 0 : index
    %0 = vector.load %arg0[%c0, %c0_0] : memref<8x256xbf16, #tpu.memory_space<vmem>>, vector<8x256xbf16>
    %c0_1 = arith.constant 0 : index
    %c0_2 = arith.constant 0 : index
    %1 = vector.load %arg1[%c0_1, %c0_2] : memref<256x128xbf16, #tpu.memory_space<vmem>>, vector<256x128xbf16>
    %cst = arith.constant dense<0.000000e+00> : vector<8x128xf32>
    %2 = tpu.matmul %0, %1, %cst {dimension_numbers = #tpu.dot_dimension_numbers<[1], [0], [0], [1], [0, 0, 1, 1], [], []>} : vector<8x256xbf16>, vector<256x128xbf16>, vector<8x128xf32> -> vector<8x128xf32>
    %c0_3 = arith.constant 0 : index
    %c0_4 = arith.constant 0 : index
    %3 = vector.load %arg2[%c0_3, %c0_4] : memref<1x128xf32, #tpu.memory_space<vmem>>, vector<1x128xf32>
    %4 = vector.broadcast %3 : vector<1x128xf32> to vector<8x128xf32>
    %5 = arith.addf %2, %4 : vector<8x128xf32>
    %c0_5 = arith.constant 0 : index
    %c0_6 = arith.constant 0 : index
    %6 = vector.load %arg3[%c0_5, %c0_6] : memref<8x128xf32, #tpu.memory_space<vmem>>, vector<8x128xf32>
    tpu.vector_store %arg3[%c0_5, %c0_6], %5 {strides = array<i32>} : memref<8x128xf32, #tpu.memory_space<vmem>>, vector<8x128xf32>,
    return
  }
}

module attributes {stable_mosaic.version = 11 : i64} {
  func.func @_matmul_bias_kernel(%arg0: memref<2x1152xbf16, #tpu.memory_space<vmem>>, %arg1: memref<1152x256xbf16, #tpu.memory_space<vmem>>, %arg2: memref<1x256xf32, #tpu.memory_space<vmem>>, %arg3: memref<2x256xf32, #tpu.memory_space<vmem>>) attributes {dimension_semantics = [], scalar_prefetch = 0 : i64, scratch_operands = 0 : i64, tpu.core_type = #tpu.core_type<tc>} {
    %c0 = arith.constant 0 : index
    %c0_0 = arith.constant 0 : index
    %0 = vector.load %arg0[%c0, %c0_0] : memref<2x1152xbf16, #tpu.memory_space<vmem>>, vector<2x1152xbf16>
    %c0_1 = arith.constant 0 : index
    %c0_2 = arith.constant 0 : index
    %1 = vector.load %arg1[%c0_1, %c0_2] : memref<1152x256xbf16, #tpu.memory_space<vmem>>, vector<1152x256xbf16>
    %cst = arith.constant dense<0.000000e+00> : vector<2x256xf32>
    %2 = tpu.matmul %0, %1, %cst {dimension_numbers = #tpu.dot_dimension_numbers<[1], [0], [0], [1], [0, 0, 1, 1], [], []>} : vector<2x1152xbf16>, vector<1152x256xbf16>, vector<2x256xf32> -> vector<2x256xf32>
    %c0_3 = arith.constant 0 : index
    %c0_4 = arith.constant 0 : index
    %3 = vector.load %arg2[%c0_3, %c0_4] : memref<1x256xf32, #tpu.memory_space<vmem>>, vector<1x256xf32>
    %4 = vector.broadcast %3 : vector<1x256xf32> to vector<2x256xf32>
    %5 = arith.addf %2, %4 : vector<2x256xf32>
    %c0_5 = arith.constant 0 : index
    %c0_6 = arith.constant 0 : index
    %6 = vector.load %arg3[%c0_5, %c0_6] : memref<2x256xf32, #tpu.memory_space<vmem>>, vector<2x256xf32>
    tpu.vector_store %arg3[%c0_5, %c0_6], %5 {strides = array<i32>} : memref<2x256xf32, #tpu.memory_space<vmem>>, vector<2x256xf32>,
    return
  }
}

</mosaic_0001>

<bundles_post_ra>
// kernel: neg.5
= control target key start
LH: loop header
LB: loop body
LE: loop exit
PB: predicated region body
PF: predicated region fallthrough
CT: control target
= control target key end

     0   :  { %s24_s0 = inlined_call_operand.vmem [shape: f32[24], index: 0, kind: input, shape index: {}]   ;;  %s25_s1 = inlined_call_operand.vmem [shape: f32[24], index: 1, kind: output, shape index: {}]  }
   0x1   :  { %v2_v0 = vld [vmem:[%s24_s0] sm:$0x1] }
   0x2   :  { %v5_v1 = vxor.u32 2147483648, %v2_v0 }
   0x4   :  { %7 = vst [vmem:[%s25_s1] sm:$0x1] %v5_v1 }

// kernel: facebox_extractor_forward.27
= control target key start
LH: loop header
LB: loop body
LE: loop exit
PB: predicated region body
PF: predicated region fallthrough
CT: control target
= control target key end

     0   :  { %vm507_vm0 = vcmask 1046528   ;;  %vm1520_vm1 = vcmask 392192   ;;  %s3254_s0 = inlined_call_operand.vmem [shape: f32[2,17,17,48], index: 0, kind: input, shape index: {}]   ;;  %s3255_s2 = inlined_call_operand.vmem [shape: f32[2,17,17,48], index: 2, kind: input, shape index: {}]   ;;  %s3256_s3 = inlined_call_operand.vmem [shape: f32[2,17,17,48], index: 3, kind: input, shape index: {}]   ;;  %s3257_s1 = inlined_call_operand.vmem [shape: f32[2,17,17,48], index: 1, kind: input, shape index: {}]   ;;  %s3258_s4 = inlined_call_operand.vmem [shape: f32[2,16,16,48], index: 4, kind: output, shape index: {}]  }
   0x1   :  { %v17_v0 = vld [vmem:[%s3254_s0] sm:$0xff]  ;;  %v18_v1 = vld [vmem:[%s3254_s0 + $0x8] sm:$0xff]  ;;  %v20_v2 = vld [vmem:[%s3254_s0 + $0x18] sm:$0xff] }
   0x2   :  { %v1626_v3 = vld [vmem:[%s3254_s0 + $0x20] sm:$0xff]  ;;  %v508_v4 = vrot.slane %v17_v0, 1  ;;  %v509_v5 = vrot.slane %v18_v1, 1  ;;  %v513_v6 = vrot.slane %v20_v2, 1  ;;  %v1636_v8 = vld [vmem:[%s3255_s2 + $0x8] sm:$0xff]  ;;  %v285_v11 = vld [vmem:[%s3256_s3 + $0x18] sm:$0xff] }
   0x3   :  { %v1631_v7 = vld [vmem:[%s3255_s2] sm:$0xff]  ;;  %v514_v10 = vrot.slane %v1626_v3, 1  ;;  %v1233_v15 = vrot.slane %v1636_v8, 1  ;;  %v19_v16 = vld [vmem:[%s3254_s0 + $0x10] sm:$0x1]  ;;  %v349_v17 = vmax.f32 %v285_v11, %v20_v2  ;;  %v284_v24 = vld [vmem:[%s3256_s3 + $0x8] sm:$0xff] }
   0x4   :  { %v283_v9 = vld [vmem:[%s3256_s3] sm:$0xff]  ;;  %v510_v13 = vsel %vm507_vm0, %v508_v4, %v509_v5  ;;  %v1232_v14 = vrot.slane %v1631_v7, 1  ;;  %v22_v19 = vld [vmem:[%s3254_s0 + $0x28] sm:$0x1]  ;;  %v189_v20 = vld [vmem:[%s3255_s2 + $0x10] sm:$0x1]  ;;  %v348_v29 = vmax.f32 %v284_v24, %v18_v1 }
   0x5   :  { %v347_v12 = vmax.f32 %v283_v9, %v17_v0  ;;  %v515_v18 = vsel %vm507_vm0, %v513_v6, %v514_v10  ;;  %v511_v21 = vrot.slane %v19_v16, 1  ;;  %v286_v25 = vld [vmem:[%s3256_s3 + $0x20] sm:$0xff]  ;;  %v516_v26 = vrot.slane %v22_v19, 1  ;;  %v23_v27 = vld [vmem:[%s3254_s0 + $0x30] sm:$0xff]  ;;  %v24_v32 = vld [vmem:[%s3254_s0 + $0x38] sm:$0xff] }
   0x6   :  { %v1659_v23 = vsel %vm507_vm0, %v1232_v14, %v1233_v15  ;;  %v734_v28 = vmax.f32 %v349_v17, %v515_v18  ;;  %v350_v30 = vmax.f32 %v286_v25, %v1626_v3  ;;  %v1678_v33 = vld [vmem:[%s3255_s2 + $0x18] sm:$0xff]  ;;  %v1235_v36 = vrot.slane %v189_v20, 1  ;;  %v1684_v37 = vld [vmem:[%s3255_s2 + $0x20] sm:$0xff]  ;;  %v287_v38 = vld [vmem:[%s3256_s3 + $0x30] sm:$0xff] }
   0x7   :  { %v732_v22 = vmax.f32 %v347_v12, %v510_v13  ;;  %v512_v31 = vsel %vm507_vm0, %v509_v5, %v511_v21  ;;  %v517_v35 = vsel %vm507_vm0, %v514_v10, %v516_v26  ;;  %v518_v39 = vrot.slane %v23_v27, 1  ;;  %v25_v40 = vld [vmem:[%s3254_s0 + $0x40] sm:$0x1]  ;;  %v288_v46 = vld [vmem:[%s3256_s3 + $0x38] sm:$0xff]  ;;  %v192_v51 = vld [vmem:[%s3255_s2 + $0x28] sm:$0x1] }
   0x8   :  { %v119_v41 = vld [vmem:[%s3257_s1] sm:$0xff]  ;;  %v733_v42 = vmax.f32 %v348_v29, %v512_v31  ;;  %v735_v43 = vmax.f32 %v350_v30, %v517_v35  ;;  %v351_v44 = vmax.f32 %v287_v38, %v23_v27  ;;  %v519_v45 = vrot.slane %v24_v32, 1  ;;  %v121_v52 = vld [vmem:[%s3257_s1 + $0x18] sm:$0xff]  ;;  %v120_v58 = vld [vmem:[%s3257_s1 + $0x8] sm:$0xff] }
   0x9   :  { %v796_v34 = vmax.f32 %v732_v22, %v20_v2  ;;  %v798_v48 = vmax.f32 %v734_v28, %v23_v27  ;;  %v1237_v49 = vrot.slane %v1678_v33, 1  ;;  %v1238_v50 = vrot.slane %v1684_v37, 1  ;;  %v26_v62 = vld [vmem:[%s3254_s0 + $0x48] sm:$0xff]  ;;  %v27_v4 = vld [vmem:[%s3254_s0 + $0x50] sm:$0xff]  ;;  %v122_v6 = vld [vmem:[%s3257_s1 + $0x20] sm:$0xff] }
   0xa   :  { %v797_v53 = vmax.f32 %v733_v42, %v1626_v3  ;;  %v520_v54 = vsel %vm507_vm0, %v518_v39, %v519_v45  ;;  %v352_v55 = vmax.f32 %v288_v46, %v24_v32  ;;  %v521_v56 = vrot.slane %v25_v40, 1  ;;  %v289_v63 = vld [vmem:[%s3256_s3 + $0x48] sm:$0xff]  ;;  %v1729_v12 = vld [vmem:[%s3255_s2 + $0x30] sm:$0xff]  ;;  %v1737_v16 = vld [vmem:[%s3255_s2 + $0x38] sm:$0xff] }
   0xb   :  { %v880_v47 = vmax.f32 %v796_v34, %v515_v18  ;;  %v1236_v59 = vsel %vm507_vm0, %v1233_v15, %v1235_v36  ;;  %v736_v60 = vmax.f32 %v351_v44, %v520_v54  ;;  %v882_v61 = vmax.f32 %v798_v48, %v520_v54  ;;  %v123_v14 = vld [vmem:[%s3257_s1 + $0x30] sm:$0xff]  ;;  %v28_v29 = vld [vmem:[%s3254_s0 + $0x58] sm:$0x1] }
   0xc   :  { %v881_v0 = vmax.f32 %v797_v53, %v517_v35  ;;  %v522_v1 = vsel %vm507_vm0, %v519_v45, %v521_v56  ;;  %v799_v2 = vmax.f32 %v735_v43, %v24_v32  ;;  %v1240_v3 = vrot.slane %v192_v51, 1  ;;  %v290_v24 = vld [vmem:[%s3256_s3 + $0x50] sm:$0xff]  ;;  %v124_v31 = vld [vmem:[%s3257_s1 + $0x38] sm:$0xff]  ;;  %v195_v35 = vld [vmem:[%s3255_s2 + $0x40] sm:$0x1] }
   0xd   :  { %v944_v57 = vmax.f32 %v880_v47, %v119_v41  ;;  %v946_v9 = vmax.f32 %v882_v61, %v121_v52  ;;  %v1239_v10 = vsel %vm507_vm0, %v1237_v49, %v1238_v50  ;;  %v737_v11 = vmax.f32 %v352_v55, %v522_v1  ;;  %v291_v41 = vld [vmem:[%s3256_s3 + $0x60] sm:$0xff]  ;;  %v1776_v49 = vld [vmem:[%s3255_s2 + $0x48] sm:$0xff] }
   0xe   :  { %v945_v13 = vmax.f32 %v881_v0, %v120_v58  ;;  %v883_v15 = vmax.f32 %v799_v2, %v522_v1  ;;  %v353_v17 = vmax.f32 %v289_v63, %v26_v62  ;;  %v523_v18 = vrot.slane %v26_v62, 1 }
   0xf   :  { %v1008_v5 = vmax.f32 %v944_v57, %v121_v52  ;;  %v1010_v20 = vmax.f32 %v946_v9, %v123_v14  ;;  %v524_v21 = vrot.slane %v27_v4, 1  ;;  %v800_v22 = vmax.f32 %v736_v60, %v26_v62  ;;  %v292_v60 = vld [vmem:[%s3256_s3 + $0x68] sm:$0xff]  ;;  %v126_v9 = vld [vmem:[%s3257_s1 + $0x50] sm:$0xff] }
  0x10   :  { %v1009_v25 = vmax.f32 %v945_v13, %v122_v6  ;;  %v947_v26 = vmax.f32 %v883_v15, %v122_v6  ;;  %v1241_v27 = vsel %vm507_vm0, %v1238_v50, %v1240_v3  ;;  %v1242_v28 = vrot.slane %v1729_v12, 1  ;;  %v125_v50 = vld [vmem:[%s3257_s1 + $0x48] sm:$0xff]  ;;  %v32_v6 = vld [vmem:[%s3254_s0 + $0x78] sm:$0xff] }
  0x11   :  { %v1072_v19 = vmax.f32 %v1008_v5, %v1631_v7  ;;  %v1074_v7 = vmax.f32 %v1010_v20, %v1678_v33  ;;  %v525_v32 = vsel %vm507_vm0, %v523_v18, %v524_v21  ;;  %v1243_v34 = vrot.slane %v1737_v16, 1  ;;  %v30_v33 = vld [vmem:[%s3254_s0 + $0x68] sm:$0xff]  ;;  %v198_v5 = vld [vmem:[%s3255_s2 + $0x58] sm:$0x1]  ;;  %v33_v20 = vld [vmem:[%s3254_s0 + $0x80] sm:$0xff] }
  0x12   :  { %v1073_v36 = vmax.f32 %v1009_v25, %v1636_v8  ;;  %v1011_v38 = vmax.f32 %v947_v26, %v124_v31  ;;  %v884_v39 = vmax.f32 %v800_v22, %v525_v32  ;;  %v354_v40 = vmax.f32 %v290_v24, %v27_v4  ;;  %v1836_v26 = vld [vmem:[%s3255_s2 + $0x68] sm:$0xff] }
  0x13   :  { %v1456_v30 = vmax.f32 %v1072_v19, %v1659_v23  ;;  %v29_v23 = vld [vmem:[%s3254_s0 + $0x60] sm:$0xff]  ;;  %v1458_v8 = vmax.f32 %v1074_v7, %v1239_v10  ;;  %v738_v42 = vmax.f32 %v353_v17, %v525_v32  ;;  %v526_v43 = vrot.slane %v28_v29, 1 }
  0x14   :  { %v801_v44 = vmax.f32 %v737_v11, %v27_v4  ;;  %v1457_v45 = vmax.f32 %v1073_v36, %v1236_v59  ;;  %v1075_v46 = vmax.f32 %v1011_v38, %v1684_v37  ;;  %v948_v47 = vmax.f32 %v884_v39, %v123_v14  ;;  %v1789_v37 = vld [vmem:[%s3255_s2 + $0x50] sm:$0xff]  ;;  %v293_v14 = vld [vmem:[%s3256_s3 + $0x78] sm:$0xff] }
  0x15   :  { %1521 = vst.msk [vmem:[%s3258_s4] sm:$0xff] %vm1520_vm1, %v1456_v30  ;;  %v1245_v48 = vrot.slane %v195_v35, 1  ;;  %v527_v51 = vsel %vm507_vm0, %v524_v21, %v526_v43  ;;  %v355_v52 = vmax.f32 %v291_v41, %v29_v23  ;;  %v528_v53 = vrot.slane %v29_v23, 1  ;;  %v31_v59 = vld [vmem:[%s3254_s0 + $0x70] sm:$0x1]  ;;  %v1830_v21 = vld [vmem:[%s3255_s2 + $0x60] sm:$0xff] }
  0x16   :  { %1523 = vst.msk [vmem:[%s3258_s4 + $0x10] sm:$0xff] %vm1520_vm1, %v1458_v8  ;;  %v529_v54 = vrot.slane %v30_v33, 1  ;;  %v1459_v55 = vmax.f32 %v1075_v46, %v1241_v27  ;;  %v1012_v56 = vmax.f32 %v948_v47, %v125_v50  ;;  %v739_v57 = vmax.f32 %v354_v40, %v527_v51  ;;  %v127_v30 = vld [vmem:[%s3257_s1 + $0x60] sm:$0xff]  ;;  %v35_v46 = vld [vmem:[%s3254_s0 + $0x90] sm:$0xff] }
  0x17   :  { %1522 = vst.msk [vmem:[%s3258_s4 + $0x8] sm:$0xff] %vm1520_vm1, %v1457_v45  ;;  %v885_v58 = vmax.f32 %v801_v44, %v527_v51  ;;  %v1244_v61 = vsel %vm507_vm0, %v1242_v28, %v1243_v34  ;;  %v802_v63 = vmax.f32 %v738_v42, %v29_v23  ;;  %v1247_v0 = vrot.slane %v1776_v49, 1  ;;  %v294_v28 = vld [vmem:[%s3256_s3 + $0x80] sm:$0xff]  ;;  %v128_v42 = vld [vmem:[%s3257_s1 + $0x68] sm:$0xff]  ;;  %v295_v47 = vld [vmem:[%s3256_s3 + $0x90] sm:$0xff] }
  0x18   :  { %v530_v62 = vsel %vm507_vm0, %v528_v53, %v529_v54  ;;  %1524 = vst.msk [vmem:[%s3258_s4 + $0x18] sm:$0xff] %vm1520_vm1, %v1459_v55  ;;  %v1076_v1 = vmax.f32 %v1012_v56, %v1729_v12  ;;  %v1248_v4 = vrot.slane %v1789_v37, 1  ;;  %v356_v11 = vmax.f32 %v292_v60, %v30_v33 }
  0x19   :  { %v949_v2 = vmax.f32 %v885_v58, %v124_v31  ;;  %v740_v3 = vmax.f32 %v355_v52, %v530_v62  ;;  %v886_v10 = vmax.f32 %v802_v63, %v530_v62  ;;  %v531_v13 = vrot.slane %v31_v59, 1  ;;  %v36_v52 = vld [vmem:[%s3254_s0 + $0x98] sm:$0xff]  ;;  %v37_v63 = vld [vmem:[%s3254_s0 + $0xa0] sm:$0x1] }
  0x1a   :  { %v803_v12 = vmax.f32 %v739_v57, %v30_v33  ;;  %v1460_v15 = vmax.f32 %v1076_v1, %v1244_v61  ;;  %v1246_v18 = vsel %vm507_vm0, %v1243_v34, %v1245_v48  ;;  %v1249_v19 = vsel %vm507_vm0, %v1247_v0, %v1248_v4  ;;  %v34_v34 = vld [vmem:[%s3254_s0 + $0x88] sm:$0x1]  ;;  %v201_v33 = vld [vmem:[%s3255_s2 + $0x70] sm:$0x1]  ;;  %v1881_v57 = vld [vmem:[%s3255_s2 + $0x78] sm:$0xff] }
  0x1b   :  { %v1013_v17 = vmax.f32 %v949_v2, %v126_v9  ;;  %v950_v22 = vmax.f32 %v886_v10, %v125_v50  ;;  %v532_v24 = vsel %vm507_vm0, %v529_v54, %v531_v13  ;;  %v1250_v25 = vrot.slane %v198_v5, 1  ;;  %v1887_v61 = vld [vmem:[%s3255_s2 + $0x80] sm:$0xff]  ;;  %v296_v0 = vld [vmem:[%s3256_s3 + $0x98] sm:$0xff] }
  0x1c   :  { %v533_v27 = vrot.slane %v32_v6, 1  ;;  %1525 = vst.msk [vmem:[%s3258_s4 + $0x20] sm:$0xff] %vm1520_vm1, %v1460_v15  ;;  %v741_v7 = vmax.f32 %v356_v11, %v532_v24  ;;  %v887_v31 = vmax.f32 %v803_v12, %v532_v24  ;;  %v357_v32 = vmax.f32 %v293_v14, %v32_v6  ;;  %v130_v11 = vld [vmem:[%s3257_s1 + $0x80] sm:$0xff]  ;;  %v38_v24 = vld [vmem:[%s3254_s0 + $0xa8] sm:$0xff] }
  0x1d   :  { %v1077_v29 = vmax.f32 %v1013_v17, %v1737_v16  ;;  %v1014_v35 = vmax.f32 %v950_v22, %v127_v30  ;;  %v534_v36 = vrot.slane %v33_v20, 1  ;;  %v804_v38 = vmax.f32 %v740_v3, %v32_v6  ;;  %v204_v22 = vld [vmem:[%s3255_s2 + $0x88] sm:$0x1] }
  0x1e   :  { %v1252_v39 = vrot.slane %v1830_v21, 1  ;;  %v951_v23 = vmax.f32 %v887_v31, %v126_v9  ;;  %v1253_v16 = vrot.slane %v1836_v26, 1  ;;  %v358_v41 = vmax.f32 %v294_v28, %v33_v20 }
  0x1f   :  { %v1461_v40 = vmax.f32 %v1077_v29, %v1246_v18  ;;  %v1078_v8 = vmax.f32 %v1014_v35, %v1776_v49  ;;  %v535_v43 = vsel %vm507_vm0, %v533_v27, %v534_v36  ;;  %v536_v44 = vrot.slane %v34_v34, 1  ;;  %v1932_v35 = vld [vmem:[%s3255_s2 + $0x90] sm:$0xff] }
  0x20   :  { %v805_v45 = vmax.f32 %v741_v7, %v33_v20  ;;  %v1015_v48 = vmax.f32 %v951_v23, %v128_v42  ;;  %v1251_v49 = vsel %vm507_vm0, %v1248_v4, %v1250_v25  ;;  %v742_v50 = vmax.f32 %v357_v32, %v535_v43  ;;  %v297_v25 = vld [vmem:[%s3256_s3 + $0xa8] sm:$0xff] }
  0x21   :  { %1526 = vst.msk [vmem:[%s3258_s4 + $0x28] sm:$0xff] %vm1520_vm1, %v1461_v40  ;;  %v888_v51 = vmax.f32 %v804_v38, %v535_v43  ;;  %v1462_v53 = vmax.f32 %v1078_v8, %v1249_v19  ;;  %v1254_v54 = vsel %vm507_vm0, %v1252_v39, %v1253_v16  ;;  %v537_v55 = vsel %vm507_vm0, %v534_v36, %v536_v44  ;;  %v1937_v36 = vld [vmem:[%s3255_s2 + $0x98] sm:$0xff]  ;;  %v298_v38 = vld [vmem:[%s3256_s3 + $0xb0] sm:$0xff] }
  0x22   :  { %v1255_v56 = vrot.slane %v201_v33, 1  ;;  %v1079_v58 = vmax.f32 %v1015_v48, %v1789_v37  ;;  %v889_v60 = vmax.f32 %v805_v45, %v537_v55  ;;  %v359_v62 = vmax.f32 %v295_v47, %v35_v46  ;;  %v129_v37 = vld [vmem:[%s3257_s1 + $0x78] sm:$0xff]  ;;  %v207_v47 = vld [vmem:[%s3255_s2 + $0xa0] sm:$0x1] }
  0x23   :  { %v952_v59 = vmax.f32 %v888_v51, %v127_v30  ;;  %1527 = vst.msk [vmem:[%s3258_s4 + $0x30] sm:$0xff] %vm1520_vm1, %v1462_v53  ;;  %v743_v1 = vmax.f32 %v358_v41, %v537_v55  ;;  %v538_v2 = vrot.slane %v35_v46, 1  ;;  %v539_v3 = vrot.slane %v36_v52, 1  ;;  %v39_v30 = vld [vmem:[%s3254_s0 + $0xb0] sm:$0xff]  ;;  %v40_v33 = vld [vmem:[%s3254_s0 + $0xb8] sm:$0x1] }
  0x24   :  { %v806_v4 = vmax.f32 %v742_v50, %v35_v46  ;;  %v1463_v5 = vmax.f32 %v1079_v58, %v1251_v49  ;;  %v953_v9 = vmax.f32 %v889_v60, %v128_v42  ;;  %v1257_v10 = vrot.slane %v1881_v57, 1  ;;  %v132_v50 = vld [vmem:[%s3257_s1 + $0x98] sm:$0xff]  ;;  %v299_v55 = vld [vmem:[%s3256_s3 + $0xc0] sm:$0xff]  ;;  %v42_v60 = vld [vmem:[%s3254_s0 + $0xc8] sm:$0xff] }
  0x25   :  { %v1016_v6 = vmax.f32 %v952_v59, %v129_v37  ;;  %v540_v13 = vsel %vm507_vm0, %v538_v2, %v539_v3  ;;  %v1258_v12 = vrot.slane %v1887_v61, 1  ;;  %v360_v14 = vmax.f32 %v296_v0, %v36_v52 }
  0x26   :  { %v541_v15 = vrot.slane %v37_v63, 1  ;;  %1528 = vst.msk [vmem:[%s3258_s4 + $0x38] sm:$0xff] %vm1520_vm1, %v1463_v5  ;;  %v1017_v18 = vmax.f32 %v953_v9, %v130_v11  ;;  %v744_v19 = vmax.f32 %v359_v62, %v540_v13  ;;  %v890_v20 = vmax.f32 %v806_v4, %v540_v13  ;;  %v1987_v5 = vld [vmem:[%s3255_s2 + $0xb0] sm:$0xff] }
  0x27   :  { %v1080_v17 = vmax.f32 %v1016_v6, %v1830_v21  ;;  %v1256_v27 = vsel %vm507_vm0, %v1253_v16, %v1255_v56  ;;  %v1259_v28 = vsel %vm507_vm0, %v1257_v10, %v1258_v12  ;;  %v807_v29 = vmax.f32 %v743_v1, %v36_v52  ;;  %v1981_v1 = vld [vmem:[%s3255_s2 + $0xa8] sm:$0xff]  ;;  %v43_v9 = vld [vmem:[%s3254_s0 + $0xd0] sm:$0x1] }
  0x28   :  { %v542_v21 = vsel %vm507_vm0, %v539_v3, %v541_v15  ;;  %v1081_v31 = vmax.f32 %v1017_v18, %v1836_v26  ;;  %v954_v32 = vmax.f32 %v890_v20, %v129_v37  ;;  %v131_v26 = vld [vmem:[%s3257_s1 + $0x90] sm:$0xff]  ;;  %v1260_v40 = vrot.slane %v204_v22, 1  ;;  %v300_v10 = vld [vmem:[%s3256_s3 + $0xc8] sm:$0xff] }
  0x29   :  { %v1464_v7 = vmax.f32 %v1080_v17, %v1254_v54  ;;  %v745_v34 = vmax.f32 %v360_v14, %v542_v21  ;;  %v891_v39 = vmax.f32 %v807_v29, %v542_v21  ;;  %v361_v23 = vmax.f32 %v297_v25, %v38_v24  ;;  %v41_v54 = vld [vmem:[%s3254_s0 + $0xc0] sm:$0xff]  ;;  %v134_v20 = vld [vmem:[%s3257_s1 + $0xb0] sm:$0xff] }
  0x2a   :  { %v543_v16 = vrot.slane %v38_v24, 1  ;;  %v1465_v41 = vmax.f32 %v1081_v31, %v1256_v27  ;;  %v1018_v8 = vmax.f32 %v954_v32, %v131_v26  ;;  %v544_v42 = vrot.slane %v39_v30, 1  ;;  %v44_v31 = vld [vmem:[%s3254_s0 + $0xd8] sm:$0xff] }
  0x2b   :  { %1529 = vst.msk [vmem:[%s3258_s4 + $0x40] sm:$0xff] %vm1520_vm1, %v1464_v7  ;;  %v808_v43 = vmax.f32 %v744_v19, %v38_v24  ;;  %v955_v44 = vmax.f32 %v891_v39, %v130_v11  ;;  %v1262_v45 = vrot.slane %v1932_v35, 1  ;;  %v1263_v46 = vrot.slane %v1937_v36, 1  ;;  %v210_v7 = vld [vmem:[%s3255_s2 + $0xb8] sm:$0x1]  ;;  %v45_v39 = vld [vmem:[%s3254_s0 + $0xe0] sm:$0xff] }
  0x2c   :  { %v362_v48 = vmax.f32 %v298_v38, %v39_v30  ;;  %1530 = vst.msk [vmem:[%s3258_s4 + $0x48] sm:$0xff] %vm1520_vm1, %v1465_v41  ;;  %v1082_v49 = vmax.f32 %v1018_v8, %v1881_v57  ;;  %v545_v51 = vsel %vm507_vm0, %v543_v16, %v544_v42  ;;  %v546_v52 = vrot.slane %v40_v33, 1  ;;  %v301_v32 = vld [vmem:[%s3256_s3 + $0xd8] sm:$0xff]  ;;  %v2032_v41 = vld [vmem:[%s3255_s2 + $0xc0] sm:$0xff]  ;;  %v2037_v8 = vld [vmem:[%s3255_s2 + $0xc8] sm:$0xff] }
  0x2d   :  { %v809_v53 = vmax.f32 %v745_v34, %v39_v30  ;;  %v1019_v56 = vmax.f32 %v955_v44, %v132_v50  ;;  %v1261_v58 = vsel %vm507_vm0, %v1258_v12, %v1260_v40  ;;  %v746_v57 = vmax.f32 %v361_v23, %v545_v51 }
  0x2e   :  { %v892_v59 = vmax.f32 %v808_v43, %v545_v51  ;;  %v1466_v62 = vmax.f32 %v1082_v49, %v1259_v28  ;;  %v1264_v63 = vsel %vm507_vm0, %v1262_v45, %v1263_v46  ;;  %v547_v0 = vsel %vm507_vm0, %v544_v42, %v546_v52  ;;  %v302_v42 = vld [vmem:[%s3256_s3 + $0xe0] sm:$0xff] }
  0x2f   :  { %v1265_v37 = vrot.slane %v207_v47, 1  ;;  %v1083_v2 = vmax.f32 %v1019_v56, %v1887_v61  ;;  %v893_v4 = vmax.f32 %v809_v53, %v547_v0  ;;  %v363_v6 = vmax.f32 %v299_v55, %v41_v54  ;;  %v133_v61 = vld [vmem:[%s3257_s1 + $0xa8] sm:$0xff]  ;;  %v213_v55 = vld [vmem:[%s3255_s2 + $0xd0] sm:$0x1] }
  0x30   :  { %v956_v3 = vmax.f32 %v892_v59, %v131_v26  ;;  %1531 = vst.msk [vmem:[%s3258_s4 + $0x50] sm:$0xff] %vm1520_vm1, %v1466_v62  ;;  %v747_v11 = vmax.f32 %v362_v48, %v547_v0  ;;  %v548_v13 = vrot.slane %v41_v54, 1  ;;  %v549_v12 = vrot.slane %v42_v60, 1  ;;  %v46_v47 = vld [vmem:[%s3254_s0 + $0xe8] sm:$0x1]  ;;  %v303_v0 = vld [vmem:[%s3256_s3 + $0xf0] sm:$0xff] }
  0x31   :  { %v810_v14 = vmax.f32 %v746_v57, %v41_v54  ;;  %v1467_v15 = vmax.f32 %v1083_v2, %v1261_v58  ;;  %v957_v18 = vmax.f32 %v893_v4, %v132_v50  ;;  %v1267_v19 = vrot.slane %v1981_v1, 1  ;;  %v136_v57 = vld [vmem:[%s3257_s1 + $0xc8] sm:$0xff]  ;;  %v48_v4 = vld [vmem:[%s3254_s0 + $0xf8] sm:$0xff] }
  0x32   :  { %v1020_v17 = vmax.f32 %v956_v3, %v133_v61  ;;  %v550_v22 = vsel %vm507_vm0, %v548_v13, %v549_v12  ;;  %v1268_v24 = vrot.slane %v1987_v5, 1  ;;  %v364_v25 = vmax.f32 %v300_v10, %v42_v60 }
  0x33   :  { %v551_v27 = vrot.slane %v43_v9, 1  ;;  %1532 = vst.msk [vmem:[%s3258_s4 + $0x58] sm:$0xff] %vm1520_vm1, %v1467_v15  ;;  %v1021_v21 = vmax.f32 %v957_v18, %v134_v20  ;;  %v748_v29 = vmax.f32 %v363_v6, %v550_v22  ;;  %v894_v30 = vmax.f32 %v810_v14, %v550_v22  ;;  %v2087_v15 = vld [vmem:[%s3255_s2 + $0xe0] sm:$0xff] }
  0x34   :  { %v1084_v28 = vmax.f32 %v1020_v17, %v1932_v35  ;;  %v1266_v34 = vsel %vm507_vm0, %v1263_v46, %v1265_v37  ;;  %v1269_v38 = vsel %vm507_vm0, %v1267_v19, %v1268_v24  ;;  %v811_v26 = vmax.f32 %v747_v11, %v42_v60  ;;  %v2081_v11 = vld [vmem:[%s3255_s2 + $0xd8] sm:$0xff]  ;;  %v49_v18 = vld [vmem:[%s3254_s0 + $0x100] sm:$0x1] }
  0x35   :  { %v552_v35 = vsel %vm507_vm0, %v549_v12, %v551_v27  ;;  %v1085_v23 = vmax.f32 %v1021_v21, %v1937_v36  ;;  %v958_v16 = vmax.f32 %v894_v30, %v133_v61  ;;  %v135_v36 = vld [vmem:[%s3257_s1 + $0xc0] sm:$0xff]  ;;  %v1270_v44 = vrot.slane %v210_v7, 1  ;;  %v304_v19 = vld [vmem:[%s3256_s3 + $0xf8] sm:$0xff] }
  0x36   :  { %v1468_v40 = vmax.f32 %v1084_v28, %v1264_v63  ;;  %v749_v33 = vmax.f32 %v364_v25, %v552_v35  ;;  %v895_v43 = vmax.f32 %v811_v26, %v552_v35  ;;  %v365_v45 = vmax.f32 %v301_v32, %v44_v31  ;;  %v47_v63 = vld [vmem:[%s3254_s0 + $0xf0] sm:$0xff]  ;;  %v138_v30 = vld [vmem:[%s3257_s1 + $0xe0] sm:$0xff] }
  0x37   :  { %v553_v46 = vrot.slane %v44_v31, 1  ;;  %v1469_v48 = vmax.f32 %v1085_v23, %v1266_v34  ;;  %v1022_v49 = vmax.f32 %v958_v16, %v135_v36  ;;  %v554_v50 = vrot.slane %v45_v39, 1  ;;  %v50_v23 = vld [vmem:[%s3254_s0 + $0x108] sm:$0xff] }
  0x38   :  { %1533 = vst.msk [vmem:[%s3258_s4 + $0x60] sm:$0xff] %vm1520_vm1, %v1468_v40  ;;  %v812_v51 = vmax.f32 %v748_v29, %v44_v31  ;;  %v959_v52 = vmax.f32 %v895_v43, %v134_v20  ;;  %v1272_v53 = vrot.slane %v2032_v41, 1  ;;  %v1273_v54 = vrot.slane %v2037_v8, 1  ;;  %v216_v40 = vld [vmem:[%s3255_s2 + $0xe8] sm:$0x1]  ;;  %v51_v43 = vld [vmem:[%s3254_s0 + $0x110] sm:$0xff] }
  0x39   :  { %v366_v56 = vmax.f32 %v302_v42, %v45_v39  ;;  %1534 = vst.msk [vmem:[%s3258_s4 + $0x68] sm:$0xff] %vm1520_vm1, %v1469_v48  ;;  %v1086_v58 = vmax.f32 %v1022_v49, %v1981_v1  ;;  %v555_v59 = vsel %vm507_vm0, %v553_v46, %v554_v50  ;;  %v556_v60 = vrot.slane %v46_v47, 1  ;;  %v305_v16 = vld [vmem:[%s3256_s3 + $0x108] sm:$0xff]  ;;  %v2132_v48 = vld [vmem:[%s3255_s2 + $0xf0] sm:$0xff]  ;;  %v2137_v49 = vld [vmem:[%s3255_s2 + $0xf8] sm:$0xff] }
  0x3a   :  { %v813_v62 = vmax.f32 %v749_v33, %v45_v39  ;;  %v1023_v37 = vmax.f32 %v959_v52, %v136_v57  ;;  %v1271_v2 = vsel %vm507_vm0, %v1268_v24, %v1270_v44  ;;  %v750_v1 = vmax.f32 %v365_v45, %v555_v59 }
  0x3b   :  { %v896_v3 = vmax.f32 %v812_v51, %v555_v59  ;;  %v1470_v6 = vmax.f32 %v1086_v58, %v1269_v38  ;;  %v1274_v9 = vsel %vm507_vm0, %v1272_v53, %v1273_v54  ;;  %v557_v10 = vsel %vm507_vm0, %v554_v50, %v556_v60  ;;  %v306_v50 = vld [vmem:[%s3256_s3 + $0x110] sm:$0xff] }
  0x3c   :  { %v1275_v61 = vrot.slane %v213_v55, 1  ;;  %v1087_v13 = vmax.f32 %v1023_v37, %v1987_v5  ;;  %v897_v14 = vmax.f32 %v813_v62, %v557_v10  ;;  %v367_v17 = vmax.f32 %v303_v0, %v47_v63  ;;  %v137_v5 = vld [vmem:[%s3257_s1 + $0xd8] sm:$0xff]  ;;  %v219_v0 = vld [vmem:[%s3255_s2 + $0x100] sm:$0x1] }
  0x3d   :  { %v960_v12 = vmax.f32 %v896_v3, %v135_v36  ;;  %1535 = vst.msk [vmem:[%s3258_s4 + $0x70] sm:$0xff] %vm1520_vm1, %v1470_v6  ;;  %v751_v20 = vmax.f32 %v366_v56, %v557_v10  ;;  %v558_v22 = vrot.slane %v47_v63, 1  ;;  %v559_v24 = vrot.slane %v48_v4, 1  ;;  %v52_v55 = vld [vmem:[%s3254_s0 + $0x118] sm:$0x1]  ;;  %v307_v10 = vld [vmem:[%s3256_s3 + $0x120] sm:$0xff] }
  0x3e   :  { %v814_v25 = vmax.f32 %v750_v1, %v47_v63  ;;  %v1471_v27 = vmax.f32 %v1087_v13, %v1271_v2  ;;  %v961_v21 = vmax.f32 %v897_v14, %v136_v57  ;;  %v1277_v29 = vrot.slane %v2081_v11, 1  ;;  %v140_v1 = vld [vmem:[%s3257_s1 + $0xf8] sm:$0xff]  ;;  %v54_v14 = vld [vmem:[%s3254_s0 + $0x128] sm:$0xff] }
  0x3f   :  { %v1024_v28 = vmax.f32 %v960_v12, %v137_v5  ;;  %v560_v7 = vsel %vm507_vm0, %v558_v22, %v559_v24  ;;  %v1278_v31 = vrot.slane %v2087_v15, 1  ;;  %v368_v32 = vmax.f32 %v304_v19, %v48_v4 }
  0x40   :  { %v561_v34 = vrot.slane %v49_v18, 1  ;;  %1536 = vst.msk [vmem:[%s3258_s4 + $0x78] sm:$0xff] %vm1520_vm1, %v1471_v27  ;;  %v1025_v35 = vmax.f32 %v961_v21, %v138_v30  ;;  %v752_v26 = vmax.f32 %v367_v17, %v560_v7  ;;  %v898_v39 = vmax.f32 %v814_v25, %v560_v7  ;;  %v2187_v27 = vld [vmem:[%s3255_s2 + $0x110] sm:$0xff] }
  0x41   :  { %v1088_v38 = vmax.f32 %v1024_v28, %v2032_v41  ;;  %v1276_v33 = vsel %vm507_vm0, %v1273_v54, %v1275_v61  ;;  %v1279_v42 = vsel %vm507_vm0, %v1277_v29, %v1278_v31  ;;  %v815_v36 = vmax.f32 %v751_v20, %v48_v4  ;;  %v2181_v20 = vld [vmem:[%s3255_s2 + $0x108] sm:$0xff]  ;;  %v55_v21 = vld [vmem:[%s3254_s0 + $0x130] sm:$0x1] }
  0x42   :  { %v562_v41 = vsel %vm507_vm0, %v559_v24, %v561_v34  ;;  %v1089_v45 = vmax.f32 %v1025_v35, %v2037_v8  ;;  %v962_v46 = vmax.f32 %v898_v39, %v137_v5  ;;  %v139_v8 = vld [vmem:[%s3257_s1 + $0xf0] sm:$0xff]  ;;  %v1280_v52 = vrot.slane %v216_v40, 1  ;;  %v308_v29 = vld [vmem:[%s3256_s3 + $0x128] sm:$0xff] }
  0x43   :  { %v1472_v44 = vmax.f32 %v1088_v38, %v1274_v9  ;;  %v753_v47 = vmax.f32 %v368_v32, %v562_v41  ;;  %v899_v51 = vmax.f32 %v815_v36, %v562_v41  ;;  %v369_v53 = vmax.f32 %v305_v16, %v50_v23  ;;  %v53_v9 = vld [vmem:[%s3254_s0 + $0x120] sm:$0xff]  ;;  %v142_v39 = vld [vmem:[%s3257_s1 + $0x110] sm:$0xff] }
  0x44   :  { %v563_v54 = vrot.slane %v50_v23, 1  ;;  %v1473_v56 = vmax.f32 %v1089_v45, %v1276_v33  ;;  %v1026_v58 = vmax.f32 %v962_v46, %v139_v8  ;;  %v564_v57 = vrot.slane %v51_v43, 1  ;;  %v56_v45 = vld [vmem:[%s3254_s0 + $0x138] sm:$0xff] }
  0x45   :  { %1537 = vst.msk [vmem:[%s3258_s4 + $0x80] sm:$0xff] %vm1520_vm1, %v1472_v44  ;;  %v816_v59 = vmax.f32 %v752_v26, %v50_v23  ;;  %v963_v60 = vmax.f32 %v899_v51, %v138_v30  ;;  %v1282_v62 = vrot.slane %v2132_v48, 1  ;;  %v1283_v63 = vrot.slane %v2137_v49, 1  ;;  %v222_v44 = vld [vmem:[%s3255_s2 + $0x118] sm:$0x1]  ;;  %v57_v51 = vld [vmem:[%s3254_s0 + $0x140] sm:$0xff] }
  0x46   :  { %v370_v37 = vmax.f32 %v306_v50, %v51_v43  ;;  %1538 = vst.msk [vmem:[%s3258_s4 + $0x88] sm:$0xff] %vm1520_vm1, %v1473_v56  ;;  %v1090_v2 = vmax.f32 %v1026_v58, %v2081_v11  ;;  %v565_v3 = vsel %vm507_vm0, %v563_v54, %v564_v57  ;;  %v566_v4 = vrot.slane %v52_v55, 1  ;;  %v309_v46 = vld [vmem:[%s3256_s3 + $0x138] sm:$0xff]  ;;  %v2232_v56 = vld [vmem:[%s3255_s2 + $0x120] sm:$0xff]  ;;  %v2237_v58 = vld [vmem:[%s3255_s2 + $0x128] sm:$0xff] }
  0x47   :  { %v817_v6 = vmax.f32 %v753_v47, %v51_v43  ;;  %v1027_v61 = vmax.f32 %v963_v60, %v140_v1  ;;  %v1281_v13 = vsel %vm507_vm0, %v1278_v31, %v1280_v52  ;;  %v754_v11 = vmax.f32 %v369_v53, %v565_v3 }
  0x48   :  { %v900_v12 = vmax.f32 %v816_v59, %v565_v3  ;;  %v1474_v17 = vmax.f32 %v1090_v2, %v1279_v42  ;;  %v1284_v18 = vsel %vm507_vm0, %v1282_v62, %v1283_v63  ;;  %v567_v19 = vsel %vm507_vm0, %v564_v57, %v566_v4  ;;  %v310_v57 = vld [vmem:[%s3256_s3 + $0x140] sm:$0xff] }
  0x49   :  { %v1285_v5 = vrot.slane %v219_v0, 1  ;;  %v1091_v22 = vmax.f32 %v1027_v61, %v2087_v15  ;;  %v901_v25 = vmax.f32 %v817_v6, %v567_v19  ;;  %v371_v28 = vmax.f32 %v307_v10, %v53_v9  ;;  %v141_v15 = vld [vmem:[%s3257_s1 + $0x108] sm:$0xff]  ;;  %v225_v10 = vld [vmem:[%s3255_s2 + $0x130] sm:$0x1] }
  0x4a   :  { %v964_v24 = vmax.f32 %v900_v12, %v139_v8  ;;  %1539 = vst.msk [vmem:[%s3258_s4 + $0x90] sm:$0xff] %vm1520_vm1, %v1474_v17  ;;  %v755_v30 = vmax.f32 %v370_v37, %v567_v19  ;;  %v568_v7 = vrot.slane %v53_v9, 1  ;;  %v569_v31 = vrot.slane %v54_v14, 1  ;;  %v58_v0 = vld [vmem:[%s3254_s0 + $0x148] sm:$0x1]  ;;  %v311_v19 = vld [vmem:[%s3256_s3 + $0x150] sm:$0xff] }
  0x4b   :  { %v818_v32 = vmax.f32 %v754_v11, %v53_v9  ;;  %v1475_v34 = vmax.f32 %v1091_v22, %v1281_v13  ;;  %v965_v35 = vmax.f32 %v901_v25, %v140_v1  ;;  %v1287_v26 = vrot.slane %v2181_v20, 1  ;;  %v144_v11 = vld [vmem:[%s3257_s1 + $0x128] sm:$0xff]  ;;  %v60_v25 = vld [vmem:[%s3254_s0 + $0x158] sm:$0xff] }
  0x4c   :  { %v1028_v38 = vmax.f32 %v964_v24, %v141_v15  ;;  %v570_v40 = vsel %vm507_vm0, %v568_v7, %v569_v31  ;;  %v1288_v23 = vrot.slane %v2187_v27, 1  ;;  %v372_v16 = vmax.f32 %v308_v29, %v54_v14 }
  0x4d   :  { %v571_v33 = vrot.slane %v55_v21, 1  ;;  %1540 = vst.msk [vmem:[%s3258_s4 + $0x98] sm:$0xff] %vm1520_vm1, %v1475_v34  ;;  %v1029_v41 = vmax.f32 %v965_v35, %v142_v39  ;;  %v756_v36 = vmax.f32 %v371_v28, %v570_v40  ;;  %v902_v43 = vmax.f32 %v818_v32, %v570_v40  ;;  %v2287_v34 = vld [vmem:[%s3255_s2 + $0x140] sm:$0xff] }
  0x4e   :  { %v1092_v42 = vmax.f32 %v1028_v38, %v2132_v48  ;;  %v1286_v47 = vsel %vm507_vm0, %v1283_v63, %v1285_v5  ;;  %v1289_v50 = vsel %vm507_vm0, %v1287_v26, %v1288_v23  ;;  %v819_v8 = vmax.f32 %v755_v30, %v54_v14  ;;  %v2281_v30 = vld [vmem:[%s3255_s2 + $0x138] sm:$0xff]  ;;  %v61_v35 = vld [vmem:[%s3254_s0 + $0x160] sm:$0x1] }
  0x4f   :  { %v572_v48 = vsel %vm507_vm0, %v569_v31, %v571_v33  ;;  %v1093_v53 = vmax.f32 %v1029_v41, %v2137_v49  ;;  %v966_v54 = vmax.f32 %v902_v43, %v141_v15  ;;  %v143_v49 = vld [vmem:[%s3257_s1 + $0x120] sm:$0xff]  ;;  %v1290_v60 = vrot.slane %v222_v44, 1  ;;  %v312_v26 = vld [vmem:[%s3256_s3 + $0x158] sm:$0xff] }
  0x50   :  { %v1476_v52 = vmax.f32 %v1092_v42, %v1284_v18  ;;  %v757_v55 = vmax.f32 %v372_v16, %v572_v48  ;;  %v903_v59 = vmax.f32 %v819_v8, %v572_v48  ;;  %v373_v62 = vmax.f32 %v309_v46, %v56_v45  ;;  %v59_v18 = vld [vmem:[%s3254_s0 + $0x150] sm:$0xff]  ;;  %v146_v43 = vld [vmem:[%s3257_s1 + $0x140] sm:$0xff] }
  0x51   :  { %v573_v63 = vrot.slane %v56_v45, 1  ;;  %v1477_v37 = vmax.f32 %v1093_v53, %v1286_v47  ;;  %v1030_v2 = vmax.f32 %v966_v54, %v143_v49  ;;  %v574_v1 = vrot.slane %v57_v51, 1  ;;  %v62_v53 = vld [vmem:[%s3254_s0 + $0x168] sm:$0xff] }
  0x52   :  { %1541 = vst.msk [vmem:[%s3258_s4 + $0xa0] sm:$0xff] %vm1520_vm1, %v1476_v52  ;;  %v820_v3 = vmax.f32 %v756_v36, %v56_v45  ;;  %v967_v4 = vmax.f32 %v903_v59, %v142_v39  ;;  %v1292_v6 = vrot.slane %v2232_v56, 1  ;;  %v1293_v9 = vrot.slane %v2237_v58, 1  ;;  %v228_v52 = vld [vmem:[%s3255_s2 + $0x148] sm:$0x1]  ;;  %v63_v59 = vld [vmem:[%s3254_s0 + $0x170] sm:$0xff] }
  0x53   :  { %v374_v61 = vmax.f32 %v310_v57, %v57_v51  ;;  %1542 = vst.msk [vmem:[%s3258_s4 + $0xa8] sm:$0xff] %vm1520_vm1, %v1477_v37  ;;  %v1094_v13 = vmax.f32 %v1030_v2, %v2181_v20  ;;  %v575_v12 = vsel %vm507_vm0, %v573_v63, %v574_v1  ;;  %v576_v14 = vrot.slane %v58_v0, 1  ;;  %v313_v54 = vld [vmem:[%s3256_s3 + $0x168] sm:$0xff]  ;;  %v2332_v37 = vld [vmem:[%s3255_s2 + $0x150] sm:$0xff]  ;;  %v2337_v2 = vld [vmem:[%s3255_s2 + $0x158] sm:$0xff] }
  0x54   :  { %v821_v17 = vmax.f32 %v757_v55, %v57_v51  ;;  %v1031_v5 = vmax.f32 %v967_v4, %v144_v11  ;;  %v1291_v22 = vsel %vm507_vm0, %v1288_v23, %v1290_v60  ;;  %v758_v20 = vmax.f32 %v373_v62, %v575_v12 }
  0x55   :  { %v904_v24 = vmax.f32 %v820_v3, %v575_v12  ;;  %v1478_v28 = vmax.f32 %v1094_v13, %v1289_v50  ;;  %v1294_v21 = vsel %vm507_vm0, %v1292_v6, %v1293_v9  ;;  %v577_v29 = vsel %vm507_vm0, %v574_v1, %v576_v14  ;;  %v314_v1 = vld [vmem:[%s3256_s3 + $0x170] sm:$0xff] }
  0x56   :  { %v1295_v15 = vrot.slane %v225_v10, 1  ;;  %v1095_v7 = vmax.f32 %v1031_v5, %v2187_v27  ;;  %v905_v32 = vmax.f32 %v821_v17, %v577_v29  ;;  %v375_v38 = vmax.f32 %v311_v19, %v59_v18  ;;  %v145_v27 = vld [vmem:[%s3257_s1 + $0x138] sm:$0xff]  ;;  %v231_v19 = vld [vmem:[%s3255_s2 + $0x160] sm:$0x1] }
  0x57   :  { %v968_v31 = vmax.f32 %v904_v24, %v143_v49  ;;  %1543 = vst.msk [vmem:[%s3258_s4 + $0xb0] sm:$0xff] %vm1520_vm1, %v1478_v28  ;;  %v759_v39 = vmax.f32 %v374_v61, %v577_v29  ;;  %v578_v40 = vrot.slane %v59_v18, 1  ;;  %v579_v23 = vrot.slane %v60_v25, 1  ;;  %v64_v10 = vld [vmem:[%s3254_s0 + $0x178] sm:$0x1] }
  0x58   :  { %v822_v16 = vmax.f32 %v758_v20, %v59_v18  ;;  %v1479_v33 = vmax.f32 %v1095_v7, %v1291_v22  ;;  %v969_v41 = vmax.f32 %v905_v32, %v144_v11  ;;  %v1297_v36 = vrot.slane %v2281_v30, 1  ;;  %v65_v22 = vld [vmem:[%s3254_s0 + $0x180] sm:$0xff]  ;;  %v148_v24 = vld [vmem:[%s3257_s1 + $0x158] sm:$0xff]  ;;  %v66_v32 = vld [vmem:[%s3254_s0 + $0x188] sm:$0xff] }
  0x59   :  { %v1032_v42 = vmax.f32 %v968_v31, %v145_v27  ;;  %v580_v44 = vsel %vm507_vm0, %v578_v40, %v579_v23  ;;  %v1298_v45 = vrot.slane %v2287_v34, 1  ;;  %v376_v46 = vmax.f32 %v312_v26, %v60_v25 }
  0x5a   :  { %v581_v47 = vrot.slane %v61_v35, 1  ;;  %1544 = vst.msk [vmem:[%s3258_s4 + $0xb8] sm:$0xff] %vm1520_vm1, %v1479_v33  ;;  %v1033_v48 = vmax.f32 %v969_v41, %v146_v43  ;;  %v760_v8 = vmax.f32 %v375_v38, %v580_v44  ;;  %v906_v51 = vmax.f32 %v822_v16, %v580_v44  ;;  %v67_v41 = vld [vmem:[%s3254_s0 + $0x190] sm:$0x1] }
  0x5b   :  { %v1096_v50 = vmax.f32 %v1032_v42, %v2232_v56  ;;  %v1296_v55 = vsel %vm507_vm0, %v1293_v9, %v1295_v15  ;;  %v1299_v57 = vsel %vm507_vm0, %v1297_v36, %v1298_v45  ;;  %v823_v49 = vmax.f32 %v759_v39, %v60_v25 }
  0x5c   :  { %v582_v56 = vsel %vm507_vm0, %v579_v23, %v581_v47  ;;  %v1097_v62 = vmax.f32 %v1033_v48, %v2237_v58  ;;  %v970_v63 = vmax.f32 %v906_v51, %v145_v27  ;;  %v147_v58 = vld [vmem:[%s3257_s1 + $0x150] sm:$0xff]  ;;  %v1300_v4 = vrot.slane %v228_v52, 1  ;;  %v149_v23 = vld [vmem:[%s3257_s1 + $0x168] sm:$0xff]  ;;  %v315_v52 = vld [vmem:[%s3256_s3 + $0x198] sm:$0xff] }
  0x5d   :  { %v1480_v60 = vmax.f32 %v1096_v50, %v1294_v21  ;;  %v761_v0 = vmax.f32 %v376_v46, %v582_v56  ;;  %v907_v3 = vmax.f32 %v823_v49, %v582_v56  ;;  %v377_v6 = vmax.f32 %v313_v54, %v62_v53  ;;  %v2382_v27 = vld [vmem:[%s3255_s2 + $0x170] sm:$0xff]  ;;  %v68_v46 = vld [vmem:[%s3254_s0 + $0x198] sm:$0xff] }
  0x5e   :  { %v583_v9 = vrot.slane %v62_v53, 1  ;;  %v1481_v61 = vmax.f32 %v1097_v62, %v1296_v55  ;;  %v1034_v13 = vmax.f32 %v970_v63, %v147_v58  ;;  %v584_v11 = vrot.slane %v63_v59, 1  ;;  %v2407_v51 = vld [vmem:[%s3254_s0 + $0x1b0] sm:$0xff] }
  0x5f   :  { %1545 = vst.msk [vmem:[%s3258_s4 + $0xc0] sm:$0xff] %vm1520_vm1, %v1480_v60  ;;  %v824_v12 = vmax.f32 %v760_v8, %v62_v53  ;;  %v971_v14 = vmax.f32 %v907_v3, %v146_v43  ;;  %v1302_v17 = vrot.slane %v2332_v37, 1  ;;  %v1303_v18 = vrot.slane %v2337_v2, 1  ;;  %v317_v53 = vld [vmem:[%s3256_s3 + $0x1b0] sm:$0xff] }
  0x60   :  { %v378_v5 = vmax.f32 %v314_v1, %v63_v59  ;;  %1546 = vst.msk [vmem:[%s3258_s4 + $0xc8] sm:$0xff] %vm1520_vm1, %v1481_v61  ;;  %v1098_v20 = vmax.f32 %v1034_v13, %v2281_v30  ;;  %v585_v25 = vsel %vm507_vm0, %v583_v9, %v584_v11  ;;  %v586_v28 = vrot.slane %v64_v10, 1  ;;  %v2376_v30 = vld [vmem:[%s3255_s2 + $0x168] sm:$0xff]  ;;  %v150_v54 = vld [vmem:[%s3257_s1 + $0x170] sm:$0xff]  ;;  %v2431_v1 = vld [vmem:[%s3254_s0 + $0x1b8] sm:$0xff] }
  0x61   :  { %v825_v21 = vmax.f32 %v761_v0, %v63_v59  ;;  %v1035_v29 = vmax.f32 %v971_v14, %v148_v24  ;;  %v1301_v15 = vsel %vm507_vm0, %v1298_v45, %v1300_v4  ;;  %v762_v7 = vmax.f32 %v377_v6, %v585_v25  ;;  %v234_v45 = vld [vmem:[%s3255_s2 + $0x178] sm:$0x1]  ;;  %v69_v0 = vld [vmem:[%s3254_s0 + $0x1a0] sm:$0xff]  ;;  %v152_v14 = vld [vmem:[%s3257_s1 + $0x188] sm:$0xff] }
  0x62   :  { %v908_v31 = vmax.f32 %v824_v12, %v585_v25  ;;  %v1482_v38 = vmax.f32 %v1098_v20, %v1299_v57  ;;  %v587_v35 = vsel %vm507_vm0, %v584_v11, %v586_v28  ;;  %v1305_v26 = vrot.slane %v231_v19, 1  ;;  %v2443_v11 = vld [vmem:[%s3255_s2 + $0x198] sm:$0xff]  ;;  %v2448_v12 = vld [vmem:[%s3255_s2 + $0x1a0] sm:$0xff]  ;;  %v70_v28 = vld [vmem:[%s3254_s0 + $0x1a8] sm:$0x1] }
  0x63   :  { %v866_v39 = vrot.slane %v65_v22, 1  ;;  %v1099_v40 = vmax.f32 %v1035_v29, %v2287_v34  ;;  %v763_v33 = vmax.f32 %v378_v5, %v587_v35  ;;  %v909_v42 = vmax.f32 %v825_v21, %v587_v35  ;;  %v316_v5 = vld [vmem:[%s3256_s3 + $0x1a0] sm:$0xff]  ;;  %v318_v29 = vld [vmem:[%s3256_s3 + $0x1b8] sm:$0xff] }
  0x64   :  { %v972_v16 = vmax.f32 %v908_v31, %v147_v58  ;;  %1547 = vst.msk [vmem:[%s3258_s4 + $0xd0] sm:$0xff] %vm1520_vm1, %v1482_v38  ;;  %v1304_v36 = vsel %vm507_vm0, %v1302_v17, %v1303_v18  ;;  %v826_v43 = vmax.f32 %v762_v7, %v65_v22  ;;  %v867_v34 = vrot.slane %v66_v32, 1  ;;  %v151_v58 = vld [vmem:[%s3257_s1 + $0x180] sm:$0xff]  ;;  %v237_v38 = vld [vmem:[%s3255_s2 + $0x1a8] sm:$0x1] }
  0x65   :  { %v1307_v44 = vrot.slane %v2376_v30, 1  ;;  %v1483_v47 = vmax.f32 %v1099_v40, %v1301_v15  ;;  %v973_v48 = vmax.f32 %v909_v42, %v148_v24  ;;  %v1308_v8 = vrot.slane %v2382_v27, 1  ;;  %v73_v21 = vld [vmem:[%s3254_s0 + $0x1c0] sm:$0x1] }
  0x66   :  { %v1036_v50 = vmax.f32 %v972_v16, %v149_v23  ;;  %v1306_v55 = vsel %vm507_vm0, %v1303_v18, %v1305_v26  ;;  %v868_v57 = vsel %vm507_vm0, %v866_v39, %v867_v34  ;;  %v827_v56 = vmax.f32 %v763_v33, %v66_v32  ;;  %v319_v16 = vld [vmem:[%s3256_s3 + $0x1c8] sm:$0xff] }
  0x67   :  { %v869_v49 = vrot.slane %v67_v41, 1  ;;  %1548 = vst.msk [vmem:[%s3258_s4 + $0xd8] sm:$0xff] %vm1520_vm1, %v1483_v47  ;;  %v1037_v60 = vmax.f32 %v973_v48, %v150_v54  ;;  %v910_v62 = vmax.f32 %v826_v43, %v868_v57  ;;  %v1310_v63 = vrot.slane %v234_v45, 1  ;;  %v75_v45 = vld [vmem:[%s3254_s0 + $0x1d0] sm:$0xff]  ;;  %v153_v47 = vld [vmem:[%s3257_s1 + $0x198] sm:$0xff] }
  0x68   :  { %v1100_v59 = vmax.f32 %v1036_v50, %v2332_v37  ;;  %v1309_v3 = vsel %vm507_vm0, %v1307_v44, %v1308_v8  ;;  %v379_v4 = vmax.f32 %v315_v52, %v68_v46  ;;  %v381_v6 = vmax.f32 %v317_v53, %v2407_v51  ;;  %v2509_v48 = vld [vmem:[%s3255_s2 + $0x1b8] sm:$0xff]  ;;  %v320_v52 = vld [vmem:[%s3256_s3 + $0x1d0] sm:$0xff] }
  0x69   :  { %v870_v37 = vsel %vm507_vm0, %v867_v34, %v869_v49  ;;  %v1101_v10 = vmax.f32 %v1037_v60, %v2337_v2  ;;  %v974_v61 = vmax.f32 %v910_v62, %v149_v23  ;;  %v588_v17 = vrot.slane %v68_v46, 1  ;;  %v74_v23 = vld [vmem:[%s3254_s0 + $0x1c8] sm:$0xff]  ;;  %v2499_v46 = vld [vmem:[%s3255_s2 + $0x1b0] sm:$0xff] }
  0x6a   :  { %v1484_v9 = vmax.f32 %v1100_v59, %v1304_v36  ;;  %v911_v13 = vmax.f32 %v827_v56, %v870_v37  ;;  %v589_v18 = vrot.slane %v69_v0, 1  ;;  %v593_v2 = vrot.slane %v2407_v51, 1  ;;  %v76_v56 = vld [vmem:[%s3254_s0 + $0x1d8] sm:$0x1] }
  0x6b   :  { %v594_v19 = vrot.slane %v2431_v1, 1  ;;  %v1485_v22 = vmax.f32 %v1101_v10, %v1306_v55  ;;  %v1038_v20 = vmax.f32 %v974_v61, %v151_v58  ;;  %v1311_v25 = vsel %vm507_vm0, %v1308_v8, %v1310_v63 }
  0x6c   :  { %1549 = vst.msk [vmem:[%s3258_s4 + $0xe0] sm:$0xff] %vm1520_vm1, %v1484_v9  ;;  %v975_v24 = vmax.f32 %v911_v13, %v150_v54  ;;  %v590_v15 = vsel %vm507_vm0, %v588_v17, %v589_v18  ;;  %v1312_v31 = vrot.slane %v2443_v11, 1  ;;  %v1313_v32 = vrot.slane %v2448_v12, 1  ;;  %v155_v9 = vld [vmem:[%s3257_s1 + $0x1b0] sm:$0xff] }
  0x6d   :  { %v595_v7 = vsel %vm507_vm0, %v593_v2, %v594_v19  ;;  %1550 = vst.msk [vmem:[%s3258_s4 + $0xe8] sm:$0xff] %vm1520_vm1, %v1485_v22  ;;  %v1102_v35 = vmax.f32 %v1038_v20, %v2376_v30  ;;  %v764_v39 = vmax.f32 %v379_v4, %v590_v15  ;;  %v380_v40 = vmax.f32 %v316_v5, %v69_v0  ;;  %v77_v4 = vld [vmem:[%s3254_s0 + $0x1e0] sm:$0xff]  ;;  %v78_v5 = vld [vmem:[%s3254_s0 + $0x1e8] sm:$0xff] }
  0x6e   :  { %v1039_v26 = vmax.f32 %v975_v24, %v152_v14  ;;  %v766_v33 = vmax.f32 %v381_v6, %v595_v7  ;;  %v382_v42 = vmax.f32 %v318_v29, %v2431_v1  ;;  %v591_v41 = vrot.slane %v70_v28, 1  ;;  %v321_v6 = vld [vmem:[%s3256_s3 + $0x1e0] sm:$0xff]  ;;  %v156_v29 = vld [vmem:[%s3257_s1 + $0x1b8] sm:$0xff] }
  0x6f   :  { %v596_v36 = vrot.slane %v73_v21, 1  ;;  %v1486_v43 = vmax.f32 %v1102_v35, %v1309_v3  ;;  %v828_v30 = vmax.f32 %v764_v39, %v2407_v51  ;;  %v1315_v44 = vrot.slane %v237_v38, 1  ;;  %v240_v3 = vld [vmem:[%s3255_s2 + $0x1c0] sm:$0x1]  ;;  %v157_v38 = vld [vmem:[%s3257_s1 + $0x1c8] sm:$0xff] }
  0x70   :  { %v1103_v34 = vmax.f32 %v1039_v26, %v2382_v27  ;;  %v592_v50 = vsel %vm507_vm0, %v589_v18, %v591_v41  ;;  %v383_v8 = vmax.f32 %v319_v16, %v74_v23  ;;  %v598_v51 = vrot.slane %v74_v23, 1  ;;  %v79_v41 = vld [vmem:[%s3254_s0 + $0x1f0] sm:$0x1] }
  0x71   :  { %v597_v27 = vsel %vm507_vm0, %v594_v19, %v596_v36  ;;  %1551 = vst.msk [vmem:[%s3258_s4 + $0xf0] sm:$0xff] %vm1520_vm1, %v1486_v43  ;;  %v912_v54 = vmax.f32 %v828_v30, %v595_v7  ;;  %v765_v55 = vmax.f32 %v380_v40, %v592_v50  ;;  %v1314_v49 = vsel %vm507_vm0, %v1312_v31, %v1313_v32  ;;  %v322_v40 = vld [vmem:[%s3256_s3 + $0x1e8] sm:$0xff] }
  0x72   :  { %v1487_v53 = vmax.f32 %v1103_v34, %v1311_v25  ;;  %v767_v57 = vmax.f32 %v382_v42, %v597_v27  ;;  %v599_v59 = vrot.slane %v75_v45, 1  ;;  %v830_v60 = vmax.f32 %v766_v33, %v74_v23  ;;  %v2554_v25 = vld [vmem:[%s3255_s2 + $0x1c8] sm:$0xff] }
  0x73   :  { %v1317_v62 = vrot.slane %v2499_v46, 1  ;;  %v976_v63 = vmax.f32 %v912_v54, %v153_v47  ;;  %v829_v0 = vmax.f32 %v765_v55, %v2431_v1  ;;  %v1318_v58 = vrot.slane %v2509_v48, 1  ;;  %v154_v1 = vld [vmem:[%s3257_s1 + $0x1a0] sm:$0xff]  ;;  %v158_v47 = vld [vmem:[%s3257_s1 + $0x1d0] sm:$0xff] }
  0x74   :  { %1552 = vst.msk [vmem:[%s3258_s4 + $0xf8] sm:$0xff] %vm1520_vm1, %v1487_v53  ;;  %v384_v37 = vmax.f32 %v320_v52, %v75_v45  ;;  %v1316_v10 = vsel %vm507_vm0, %v1313_v32, %v1315_v44  ;;  %v600_v61 = vsel %vm507_vm0, %v598_v51, %v599_v59  ;;  %v601_v13 = vrot.slane %v76_v56, 1  ;;  %v2563_v32 = vld [vmem:[%s3255_s2 + $0x1d0] sm:$0xff]  ;;  %v80_v51 = vld [vmem:[%s3254_s0 + $0x1f8] sm:$0xff] }
  0x75   :  { %v831_v14 = vmax.f32 %v767_v57, %v75_v45  ;;  %v1040_v17 = vmax.f32 %v976_v63, %v155_v9  ;;  %v913_v18 = vmax.f32 %v829_v0, %v597_v27  ;;  %v768_v2 = vmax.f32 %v383_v8, %v600_v61  ;;  %v243_v27 = vld [vmem:[%s3255_s2 + $0x1d8] sm:$0x1]  ;;  %v159_v63 = vld [vmem:[%s3257_s1 + $0x1e0] sm:$0xff] }
  0x76   :  { %v914_v19 = vmax.f32 %v830_v60, %v600_v61  ;;  %v1319_v22 = vsel %vm507_vm0, %v1317_v62, %v1318_v58  ;;  %v602_v20 = vsel %vm507_vm0, %v599_v59, %v601_v13  ;;  %v1320_v24 = vrot.slane %v240_v3, 1  ;;  %v81_v59 = vld [vmem:[%s3254_s0 + $0x200] sm:$0xff]  ;;  %v2613_v3 = vld [vmem:[%s3255_s2 + $0x1e8] sm:$0xff] }
  0x77   :  { %v385_v28 = vmax.f32 %v321_v6, %v77_v4  ;;  %v1104_v21 = vmax.f32 %v1040_v17, %v2443_v11  ;;  %v977_v15 = vmax.f32 %v913_v18, %v154_v1  ;;  %v769_v31 = vmax.f32 %v384_v37, %v602_v20  ;;  %v2603_v60 = vld [vmem:[%s3255_s2 + $0x1e0] sm:$0xff] }
  0x78   :  { %v978_v7 = vmax.f32 %v914_v19, %v155_v9  ;;  %v915_v35 = vmax.f32 %v831_v14, %v602_v20  ;;  %v603_v26 = vrot.slane %v77_v4, 1  ;;  %v604_v39 = vrot.slane %v78_v5, 1  ;;  %v83_v20 = vld [vmem:[%s3254_s0 + $0x210] sm:$0xff] }
  0x79   :  { %v832_v11 = vmax.f32 %v768_v2, %v77_v4  ;;  %v1488_v23 = vmax.f32 %v1104_v21, %v1314_v49  ;;  %v1041_v16 = vmax.f32 %v977_v15, %v156_v29  ;;  %v1322_v42 = vrot.slane %v2554_v25, 1  ;;  %v324_v4 = vld [vmem:[%s3256_s3 + $0x200] sm:$0xff] }
  0x7a   :  { %v1042_v33 = vmax.f32 %v978_v7, %v157_v38  ;;  %v979_v36 = vmax.f32 %v915_v35, %v156_v29  ;;  %v1321_v43 = vsel %vm507_vm0, %v1318_v58, %v1320_v24  ;;  %v605_v34 = vsel %vm507_vm0, %v603_v26, %v604_v39  ;;  %v325_v24 = vld [vmem:[%s3256_s3 + $0x210] sm:$0xff]  ;;  %v84_v26 = vld [vmem:[%s3254_s0 + $0x218] sm:$0xff] }
  0x7b   :  { %v1323_v30 = vrot.slane %v2563_v32, 1  ;;  %1553 = vst.msk [vmem:[%s3258_s4 + $0x100] sm:$0xff] %vm1520_vm1, %v1488_v23  ;;  %v1105_v44 = vmax.f32 %v1041_v16, %v2448_v12  ;;  %v916_v50 = vmax.f32 %v832_v11, %v605_v34  ;;  %v386_v8 = vmax.f32 %v322_v40, %v78_v5  ;;  %v2663_v16 = vld [vmem:[%s3255_s2 + $0x200] sm:$0xff] }
  0x7c   :  { %v1106_v45 = vmax.f32 %v1042_v33, %v2499_v46  ;;  %v1043_v52 = vmax.f32 %v979_v36, %v158_v47  ;;  %v770_v53 = vmax.f32 %v385_v28, %v605_v34  ;;  %v606_v54 = vrot.slane %v79_v41, 1  ;;  %v323_v46 = vld [vmem:[%s3256_s3 + $0x1f8] sm:$0xff]  ;;  %v85_v34 = vld [vmem:[%s3254_s0 + $0x220] sm:$0x1] }
  0x7d   :  { %v833_v12 = vmax.f32 %v769_v31, %v78_v5  ;;  %v1489_v55 = vmax.f32 %v1105_v44, %v1316_v10  ;;  %v980_v56 = vmax.f32 %v916_v50, %v157_v38  ;;  %v1324_v49 = vsel %vm507_vm0, %v1322_v42, %v1323_v30  ;;  %v82_v10 = vld [vmem:[%s3254_s0 + $0x208] sm:$0x1]  ;;  %v246_v5 = vld [vmem:[%s3255_s2 + $0x1f0] sm:$0x1]  ;;  %v161_v44 = vld [vmem:[%s3257_s1 + $0x1f8] sm:$0xff] }
  0x7e   :  { %v1490_v57 = vmax.f32 %v1106_v45, %v1319_v22  ;;  %v1107_v62 = vmax.f32 %v1043_v52, %v2509_v48  ;;  %v607_v0 = vsel %vm507_vm0, %v604_v39, %v606_v54  ;;  %v1325_v58 = vrot.slane %v243_v27, 1  ;;  %v2656_v39 = vld [vmem:[%s3255_s2 + $0x1f8] sm:$0xff]  ;;  %v162_v54 = vld [vmem:[%s3257_s1 + $0x200] sm:$0xff] }
  0x7f   :  { %v608_v37 = vrot.slane %v80_v51, 1  ;;  %1554 = vst.msk [vmem:[%s3258_s4 + $0x108] sm:$0xff] %vm1520_vm1, %v1489_v55  ;;  %v1044_v48 = vmax.f32 %v980_v56, %v159_v63  ;;  %v771_v6 = vmax.f32 %v386_v8, %v607_v0  ;;  %v917_v9 = vmax.f32 %v833_v12, %v607_v0  ;;  %v86_v56 = vld [vmem:[%s3254_s0 + $0x228] sm:$0xff] }
  0x80   :  { %v387_v1 = vmax.f32 %v323_v46, %v80_v51  ;;  %1555 = vst.msk [vmem:[%s3258_s4 + $0x110] sm:$0xff] %vm1520_vm1, %v1490_v57  ;;  %v1491_v61 = vmax.f32 %v1107_v62, %v1321_v43  ;;  %v609_v13 = vrot.slane %v81_v59, 1  ;;  %v834_v14 = vmax.f32 %v770_v53, %v80_v51  ;;  %v249_v53 = vld [vmem:[%s3255_s2 + $0x208] sm:$0x1] }
  0x81   :  { %v1327_v17 = vrot.slane %v2603_v60, 1  ;;  %v1108_v18 = vmax.f32 %v1044_v48, %v2554_v25  ;;  %v981_v2 = vmax.f32 %v917_v9, %v158_v47  ;;  %v1328_v19 = vrot.slane %v2613_v3, 1  ;;  %v160_v25 = vld [vmem:[%s3257_s1 + $0x1e8] sm:$0xff]  ;;  %v2708_v9 = vld [vmem:[%s3255_s2 + $0x210] sm:$0xff] }
  0x82   :  { %v388_v22 = vmax.f32 %v324_v4, %v81_v59  ;;  %1556 = vst.msk [vmem:[%s3258_s4 + $0x118] sm:$0xff] %vm1520_vm1, %v1491_v61  ;;  %v1326_v28 = vsel %vm507_vm0, %v1323_v30, %v1325_v58  ;;  %v610_v21 = vsel %vm507_vm0, %v608_v37, %v609_v13  ;;  %v611_v29 = vrot.slane %v82_v10, 1  ;;  %v326_v30 = vld [vmem:[%s3256_s3 + $0x218] sm:$0xff]  ;;  %v87_v58 = vld [vmem:[%s3254_s0 + $0x230] sm:$0xff] }
  0x83   :  { %v835_v15 = vmax.f32 %v771_v6, %v81_v59  ;;  %v1492_v7 = vmax.f32 %v1108_v18, %v1324_v49  ;;  %v1045_v31 = vmax.f32 %v981_v2, %v160_v25  ;;  %v772_v38 = vmax.f32 %v387_v1, %v610_v21  ;;  %v327_v49 = vld [vmem:[%s3256_s3 + $0x228] sm:$0xff]  ;;  %v2714_v61 = vld [vmem:[%s3255_s2 + $0x218] sm:$0xff] }
  0x84   :  { %v918_v35 = vmax.f32 %v834_v14, %v610_v21  ;;  %v1329_v11 = vsel %vm507_vm0, %v1327_v17, %v1328_v19  ;;  %v612_v40 = vsel %vm507_vm0, %v609_v13, %v611_v29  ;;  %v1330_v23 = vrot.slane %v246_v5, 1  ;;  %v328_v14 = vld [vmem:[%s3256_s3 + $0x230] sm:$0xff] }
  0x85   :  { %v389_v33 = vmax.f32 %v325_v24, %v83_v20  ;;  %1557 = vst.msk [vmem:[%s3258_s4 + $0x120] sm:$0xff] %vm1520_vm1, %v1492_v7  ;;  %v1109_v42 = vmax.f32 %v1045_v31, %v2563_v32  ;;  %v773_v36 = vmax.f32 %v388_v22, %v612_v40  ;;  %v919_v43 = vmax.f32 %v835_v15, %v612_v40  ;;  %v163_v17 = vld [vmem:[%s3257_s1 + $0x210] sm:$0xff]  ;;  %v252_v15 = vld [vmem:[%s3255_s2 + $0x220] sm:$0x1] }
  0x86   :  { %v982_v41 = vmax.f32 %v918_v35, %v159_v63  ;;  %v613_v45 = vrot.slane %v83_v20, 1  ;;  %v614_v47 = vrot.slane %v84_v26, 1  ;;  %v836_v50 = vmax.f32 %v772_v38, %v83_v20  ;;  %v164_v38 = vld [vmem:[%s3257_s1 + $0x218] sm:$0xff]  ;;  %v89_v40 = vld [vmem:[%s3254_s0 + $0x240] sm:$0xff] }
  0x87   :  { %v1332_v32 = vrot.slane %v2656_v39, 1  ;;  %v1493_v27 = vmax.f32 %v1109_v42, %v1326_v28  ;;  %v983_v51 = vmax.f32 %v919_v43, %v160_v25  ;;  %v1333_v52 = vrot.slane %v2663_v16, 1 }
  0x88   :  { %v1046_v8 = vmax.f32 %v982_v41, %v161_v44  ;;  %v615_v12 = vsel %vm507_vm0, %v613_v45, %v614_v47  ;;  %v390_v46 = vmax.f32 %v326_v30, %v84_v26  ;;  %v616_v55 = vrot.slane %v85_v34, 1  ;;  %v2758_v45 = vld [vmem:[%s3255_s2 + $0x228] sm:$0xff] }
  0x89   :  { %v837_v57 = vmax.f32 %v773_v36, %v84_v26  ;;  %1558 = vst.msk [vmem:[%s3258_s4 + $0x128] sm:$0xff] %vm1520_vm1, %v1493_v27  ;;  %v1047_v62 = vmax.f32 %v983_v51, %v162_v54  ;;  %v774_v63 = vmax.f32 %v389_v33, %v615_v12  ;;  %v920_v0 = vmax.f32 %v836_v50, %v615_v12  ;;  %v90_v36 = vld [vmem:[%s3254_s0 + $0x248] sm:$0xff] }
  0x8a   :  { %v1110_v59 = vmax.f32 %v1046_v8, %v2603_v60  ;;  %v1331_v37 = vsel %vm507_vm0, %v1328_v19, %v1330_v23  ;;  %v1334_v4 = vsel %vm507_vm0, %v1332_v32, %v1333_v52  ;;  %v617_v48 = vsel %vm507_vm0, %v614_v47, %v616_v55  ;;  %v329_v23 = vld [vmem:[%s3256_s3 + $0x240] sm:$0xff]  ;;  %v2763_v47 = vld [vmem:[%s3255_s2 + $0x230] sm:$0xff]  ;;  %v165_v32 = vld [vmem:[%s3257_s1 + $0x228] sm:$0xff] }
  0x8b   :  { %v1335_v6 = vrot.slane %v249_v53, 1  ;;  %v1111_v1 = vmax.f32 %v1047_v62, %v2613_v3  ;;  %v984_v10 = vmax.f32 %v920_v0, %v161_v44  ;;  %v391_v13 = vmax.f32 %v327_v49, %v86_v56  ;;  %v88_v3 = vld [vmem:[%s3254_s0 + $0x238] sm:$0x1]  ;;  %v330_v53 = vld [vmem:[%s3256_s3 + $0x248] sm:$0xff] }
  0x8c   :  { %v1494_v60 = vmax.f32 %v1110_v59, %v1329_v11  ;;  %v775_v18 = vmax.f32 %v390_v46, %v617_v48  ;;  %v921_v2 = vmax.f32 %v837_v57, %v617_v48  ;;  %v618_v19 = vrot.slane %v86_v56, 1  ;;  %v166_v57 = vld [vmem:[%s3257_s1 + $0x230] sm:$0xff]  ;;  %v255_v0 = vld [vmem:[%s3255_s2 + $0x238] sm:$0x1] }
  0x8d   :  { %v619_v5 = vrot.slane %v87_v58, 1  ;;  %v1495_v22 = vmax.f32 %v1111_v1, %v1331_v37  ;;  %v1048_v20 = vmax.f32 %v984_v10, %v163_v17  ;;  %v838_v24 = vmax.f32 %v774_v63, %v86_v56  ;;  %v331_v48 = vld [vmem:[%s3256_s3 + $0x258] sm:$0xff]  ;;  %v93_v10 = vld [vmem:[%s3254_s0 + $0x260] sm:$0xff] }
  0x8e   :  { %1559 = vst.msk [vmem:[%s3258_s4 + $0x130] sm:$0xff] %vm1520_vm1, %v1494_v60  ;;  %v1337_v25 = vrot.slane %v2708_v9, 1  ;;  %v985_v28 = vmax.f32 %v921_v2, %v162_v54  ;;  %v1338_v29 = vrot.slane %v2714_v61, 1  ;;  %v392_v7 = vmax.f32 %v328_v14, %v87_v58  ;;  %v2808_v2 = vld [vmem:[%s3255_s2 + $0x240] sm:$0xff] }
  0x8f   :  { %v620_v21 = vsel %vm507_vm0, %v618_v19, %v619_v5  ;;  %1560 = vst.msk [vmem:[%s3258_s4 + $0x138] sm:$0xff] %vm1520_vm1, %v1495_v22  ;;  %v1112_v31 = vmax.f32 %v1048_v20, %v2656_v39  ;;  %v621_v11 = vrot.slane %v88_v3, 1  ;;  %v1336_v42 = vsel %vm507_vm0, %v1333_v52, %v1335_v6  ;;  %v91_v52 = vld [vmem:[%s3254_s0 + $0x250] sm:$0x1]  ;;  %v2814_v22 = vld [vmem:[%s3255_s2 + $0x248] sm:$0xff] }
  0x90   :  { %v776_v35 = vmax.f32 %v391_v13, %v620_v21  ;;  %v922_v26 = vmax.f32 %v838_v24, %v620_v21  ;;  %v1049_v33 = vmax.f32 %v985_v28, %v164_v38  ;;  %v1339_v39 = vsel %vm507_vm0, %v1337_v25, %v1338_v29  ;;  %v332_v24 = vld [vmem:[%s3256_s3 + $0x260] sm:$0xff] }
  0x91   :  { %v839_v41 = vmax.f32 %v775_v18, %v87_v58  ;;  %v1496_v43 = vmax.f32 %v1112_v31, %v1334_v4  ;;  %v622_v30 = vsel %vm507_vm0, %v619_v5, %v621_v11  ;;  %v1340_v44 = vrot.slane %v252_v15, 1  ;;  %v92_v4 = vld [vmem:[%s3254_s0 + $0x258] sm:$0xff]  ;;  %v94_v15 = vld [vmem:[%s3254_s0 + $0x268] sm:$0x1] }
  0x92   :  { %v986_v34 = vmax.f32 %v922_v26, %v163_v17  ;;  %v1113_v50 = vmax.f32 %v1049_v33, %v2663_v16  ;;  %v777_v27 = vmax.f32 %v392_v7, %v622_v30  ;;  %v393_v51 = vmax.f32 %v329_v23, %v89_v40  ;;  %v258_v23 = vld [vmem:[%s3255_s2 + $0x250] sm:$0x1] }
  0x93   :  { %v923_v8 = vmax.f32 %v839_v41, %v622_v30  ;;  %1561 = vst.msk [vmem:[%s3258_s4 + $0x140] sm:$0xff] %vm1520_vm1, %v1496_v43  ;;  %v623_v54 = vrot.slane %v89_v40, 1  ;;  %v624_v12 = vrot.slane %v90_v36, 1  ;;  %v840_v46 = vmax.f32 %v776_v35, %v89_v40  ;;  %v333_v30 = vld [vmem:[%s3256_s3 + $0x270] sm:$0xff] }
  0x94   :  { %v1050_v16 = vmax.f32 %v986_v34, %v165_v32  ;;  %v1497_v55 = vmax.f32 %v1113_v50, %v1336_v42  ;;  %v1342_v49 = vrot.slane %v2758_v45, 1  ;;  %v1343_v59 = vrot.slane %v2763_v47, 1  ;;  %v95_v34 = vld [vmem:[%s3254_s0 + $0x270] sm:$0xff] }
  0x95   :  { %v987_v56 = vmax.f32 %v923_v8, %v164_v38  ;;  %v625_v63 = vsel %vm507_vm0, %v623_v54, %v624_v12  ;;  %v394_v58 = vmax.f32 %v330_v53, %v90_v36  ;;  %v626_v37 = vrot.slane %v91_v52, 1  ;;  %v2863_v54 = vld [vmem:[%s3255_s2 + $0x260] sm:$0xff] }
  0x96   :  { %v1114_v62 = vmax.f32 %v1050_v16, %v2708_v9  ;;  %1562 = vst.msk [vmem:[%s3258_s4 + $0x148] sm:$0xff] %vm1520_vm1, %v1497_v55  ;;  %v1341_v9 = vsel %vm507_vm0, %v1338_v29, %v1340_v44  ;;  %v778_v60 = vmax.f32 %v393_v51, %v625_v63  ;;  %v924_v1 = vmax.f32 %v840_v46, %v625_v63  ;;  %v2858_v16 = vld [vmem:[%s3255_s2 + $0x258] sm:$0xff] }
  0x97   :  { %v1051_v6 = vmax.f32 %v987_v56, %v166_v57  ;;  %v1344_v14 = vsel %vm507_vm0, %v1342_v49, %v1343_v59  ;;  %v627_v17 = vsel %vm507_vm0, %v624_v12, %v626_v37  ;;  %v841_v18 = vmax.f32 %v777_v27, %v90_v36  ;;  %v96_v27 = vld [vmem:[%s3254_s0 + $0x278] sm:$0xff]  ;;  %v97_v49 = vld [vmem:[%s3254_s0 + $0x280] sm:$0x1] }
  0x98   :  { %v1498_v13 = vmax.f32 %v1114_v62, %v1339_v39  ;;  %v988_v5 = vmax.f32 %v924_v1, %v165_v32  ;;  %v1345_v3 = vrot.slane %v255_v0, 1  ;;  %v395_v20 = vmax.f32 %v331_v48, %v92_v4  ;;  %v168_v39 = vld [vmem:[%s3257_s1 + $0x248] sm:$0xff]  ;;  %v169_v46 = vld [vmem:[%s3257_s1 + $0x258] sm:$0xff]  ;;  %v170_v37 = vld [vmem:[%s3257_s1 + $0x260] sm:$0xff] }
  0x99   :  { %v1115_v19 = vmax.f32 %v1051_v6, %v2714_v61  ;;  %v167_v61 = vld [vmem:[%s3257_s1 + $0x240] sm:$0xff]  ;;  %v779_v25 = vmax.f32 %v394_v58, %v627_v17  ;;  %v925_v28 = vmax.f32 %v841_v18, %v627_v17  ;;  %v628_v21 = vrot.slane %v92_v4, 1  ;;  %v261_v1 = vld [vmem:[%s3255_s2 + $0x268] sm:$0x1] }
  0x9a   :  { %1563 = vst.msk [vmem:[%s3258_s4 + $0x150] sm:$0xff] %vm1520_vm1, %v1498_v13  ;;  %v629_v29 = vrot.slane %v93_v10, 1  ;;  %v1052_v31 = vmax.f32 %v988_v5, %v167_v61  ;;  %v842_v38 = vmax.f32 %v778_v60, %v92_v4  ;;  %v1347_v35 = vrot.slane %v2808_v2, 1  ;;  %v335_v17 = vld [vmem:[%s3256_s3 + $0x288] sm:$0xff] }
  0x9b   :  { %v1499_v7 = vmax.f32 %v1115_v19, %v1341_v9  ;;  %v989_v26 = vmax.f32 %v925_v28, %v166_v57  ;;  %v1348_v40 = vrot.slane %v2814_v22, 1  ;;  %v396_v33 = vmax.f32 %v332_v24, %v93_v10  ;;  %v2908_v28 = vld [vmem:[%s3255_s2 + $0x270] sm:$0xff] }
  0x9c   :  { %v630_v11 = vsel %vm507_vm0, %v628_v21, %v629_v29  ;;  %v1116_v42 = vmax.f32 %v1052_v31, %v2758_v45  ;;  %v631_v43 = vrot.slane %v94_v15, 1  ;;  %v1346_v50 = vsel %vm507_vm0, %v1343_v59, %v1345_v3  ;;  %v334_v59 = vld [vmem:[%s3256_s3 + $0x278] sm:$0xff]  ;;  %v99_v3 = vld [vmem:[%s3254_s0 + $0x290] sm:$0xff] }
  0x9d   :  { %1564 = vst.msk [vmem:[%s3258_s4 + $0x158] sm:$0xff] %vm1520_vm1, %v1499_v7  ;;  %v780_v41 = vmax.f32 %v395_v20, %v630_v11  ;;  %v926_v36 = vmax.f32 %v842_v38, %v630_v11  ;;  %v1053_v44 = vmax.f32 %v989_v26, %v168_v39  ;;  %v1349_v45 = vsel %vm507_vm0, %v1347_v35, %v1348_v40  ;;  %v2914_v7 = vld [vmem:[%s3255_s2 + $0x278] sm:$0xff]  ;;  %v336_v38 = vld [vmem:[%s3256_s3 + $0x290] sm:$0xff] }
  0x9e   :  { %v843_v32 = vmax.f32 %v779_v25, %v93_v10  ;;  %v1500_v8 = vmax.f32 %v1116_v42, %v1344_v14  ;;  %v632_v52 = vsel %vm507_vm0, %v629_v29, %v631_v43  ;;  %v1350_v53 = vrot.slane %v258_v23, 1  ;;  %v98_v14 = vld [vmem:[%s3254_s0 + $0x288] sm:$0xff]  ;;  %v100_v23 = vld [vmem:[%s3254_s0 + $0x298] sm:$0x1] }
  0x9f   :  { %v990_v51 = vmax.f32 %v926_v36, %v167_v61  ;;  %v1117_v12 = vmax.f32 %v1053_v44, %v2763_v47  ;;  %v781_v55 = vmax.f32 %v396_v33, %v632_v52  ;;  %v397_v56 = vmax.f32 %v333_v30, %v95_v34  ;;  %v264_v30 = vld [vmem:[%s3255_s2 + $0x280] sm:$0x1] }
  0xa0   :  { %v927_v57 = vmax.f32 %v843_v32, %v632_v52  ;;  %1565 = vst.msk [vmem:[%s3258_s4 + $0x160] sm:$0xff] %vm1520_vm1, %v1500_v8  ;;  %v633_v62 = vrot.slane %v95_v34, 1  ;;  %v634_v63 = vrot.slane %v96_v27, 1  ;;  %v844_v0 = vmax.f32 %v780_v41, %v95_v34  ;;  %v337_v52 = vld [vmem:[%s3256_s3 + $0x2a0] sm:$0xff] }
  0xa1   :  { %v1054_v47 = vmax.f32 %v990_v51, %v169_v46  ;;  %v1501_v58 = vmax.f32 %v1117_v12, %v1346_v50  ;;  %v1352_v48 = vrot.slane %v2858_v16, 1  ;;  %v1353_v6 = vrot.slane %v2863_v54, 1  ;;  %v101_v51 = vld [vmem:[%s3254_s0 + $0x2a0] sm:$0xff] }
  0xa2   :  { %v991_v4 = vmax.f32 %v927_v57, %v168_v39  ;;  %v635_v60 = vsel %vm507_vm0, %v633_v62, %v634_v63  ;;  %v398_v10 = vmax.f32 %v334_v59, %v96_v27  ;;  %v636_v13 = vrot.slane %v97_v49, 1  ;;  %v2963_v62 = vld [vmem:[%s3255_s2 + $0x290] sm:$0xff] }
  0xa3   :  { %v1118_v9 = vmax.f32 %v1054_v47, %v2808_v2  ;;  %1566 = vst.msk [vmem:[%s3258_s4 + $0x168] sm:$0xff] %vm1520_vm1, %v1501_v58  ;;  %v1351_v2 = vsel %vm507_vm0, %v1348_v40, %v1350_v53  ;;  %v782_v19 = vmax.f32 %v397_v56, %v635_v60  ;;  %v928_v5 = vmax.f32 %v844_v0, %v635_v60  ;;  %v2958_v47 = vld [vmem:[%s3255_s2 + $0x288] sm:$0xff] }
  0xa4   :  { %v1055_v18 = vmax.f32 %v991_v4, %v170_v37  ;;  %v1354_v24 = vsel %vm507_vm0, %v1352_v48, %v1353_v6  ;;  %v637_v61 = vsel %vm507_vm0, %v634_v63, %v636_v13  ;;  %v845_v25 = vmax.f32 %v781_v55, %v96_v27  ;;  %v102_v55 = vld [vmem:[%s3254_s0 + $0x2a8] sm:$0xff]  ;;  %v103_v48 = vld [vmem:[%s3254_s0 + $0x2b0] sm:$0x1] }
  0xa5   :  { %v1502_v20 = vmax.f32 %v1118_v9, %v1349_v45  ;;  %v992_v29 = vmax.f32 %v928_v5, %v169_v46  ;;  %v1355_v15 = vrot.slane %v261_v1, 1  ;;  %v399_v31 = vmax.f32 %v335_v17, %v98_v14  ;;  %v172_v45 = vld [vmem:[%s3257_s1 + $0x278] sm:$0xff]  ;;  %v173_v0 = vld [vmem:[%s3257_s1 + $0x288] sm:$0xff]  ;;  %v174_v13 = vld [vmem:[%s3257_s1 + $0x290] sm:$0xff] }
  0xa6   :  { %v1119_v21 = vmax.f32 %v1055_v18, %v2814_v22  ;;  %v171_v22 = vld [vmem:[%s3257_s1 + $0x270] sm:$0xff]  ;;  %v783_v35 = vmax.f32 %v398_v10, %v637_v61  ;;  %v929_v26 = vmax.f32 %v845_v25, %v637_v61  ;;  %v638_v11 = vrot.slane %v98_v14, 1  ;;  %v267_v5 = vld [vmem:[%s3255_s2 + $0x298] sm:$0x1] }
  0xa7   :  { %1567 = vst.msk [vmem:[%s3258_s4 + $0x170] sm:$0xff] %vm1520_vm1, %v1502_v20  ;;  %v639_v40 = vrot.slane %v99_v3, 1  ;;  %v1056_v42 = vmax.f32 %v992_v29, %v171_v22  ;;  %v846_v39 = vmax.f32 %v782_v19, %v98_v14  ;;  %v1357_v41 = vrot.slane %v2908_v28, 1  ;;  %v339_v61 = vld [vmem:[%s3256_s3 + $0x2b8] sm:$0xff] }
  0xa8   :  { %v1503_v33 = vmax.f32 %v1119_v21, %v1351_v2  ;;  %v993_v36 = vmax.f32 %v929_v26, %v170_v37  ;;  %v1358_v34 = vrot.slane %v2914_v7, 1  ;;  %v400_v44 = vmax.f32 %v336_v38, %v99_v3  ;;  %v3008_v26 = vld [vmem:[%s3255_s2 + $0x2a0] sm:$0xff] }
  0xa9   :  { %v640_v43 = vsel %vm507_vm0, %v638_v11, %v639_v40  ;;  %v1120_v50 = vmax.f32 %v1056_v42, %v2858_v16  ;;  %v641_v8 = vrot.slane %v100_v23, 1  ;;  %v1356_v12 = vsel %vm507_vm0, %v1353_v6, %v1355_v15  ;;  %v338_v6 = vld [vmem:[%s3256_s3 + $0x2a8] sm:$0xff]  ;;  %v105_v15 = vld [vmem:[%s3254_s0 + $0x2c0] sm:$0xff] }
  0xaa   :  { %1568 = vst.msk [vmem:[%s3258_s4 + $0x178] sm:$0xff] %vm1520_vm1, %v1503_v33  ;;  %v784_v32 = vmax.f32 %v399_v31, %v640_v43  ;;  %v930_v27 = vmax.f32 %v846_v39, %v640_v43  ;;  %v1057_v53 = vmax.f32 %v993_v36, %v172_v45  ;;  %v1359_v16 = vsel %vm507_vm0, %v1357_v41, %v1358_v34  ;;  %v3014_v33 = vld [vmem:[%s3255_s2 + $0x2a8] sm:$0xff]  ;;  %v340_v39 = vld [vmem:[%s3256_s3 + $0x2c0] sm:$0xff] }
  0xab   :  { %v847_v46 = vmax.f32 %v783_v35, %v99_v3  ;;  %v1504_v57 = vmax.f32 %v1120_v50, %v1354_v24  ;;  %v642_v49 = vsel %vm507_vm0, %v639_v40, %v641_v8  ;;  %v1360_v59 = vrot.slane %v264_v30, 1  ;;  %v104_v24 = vld [vmem:[%s3254_s0 + $0x2b8] sm:$0xff]  ;;  %v106_v30 = vld [vmem:[%s3254_s0 + $0x2c8] sm:$0x1] }
  0xac   :  { %v994_v56 = vmax.f32 %v930_v27, %v171_v22  ;;  %v1121_v63 = vmax.f32 %v1057_v53, %v2863_v54  ;;  %v785_v58 = vmax.f32 %v400_v44, %v642_v49  ;;  %v401_v4 = vmax.f32 %v337_v52, %v101_v51  ;;  %v270_v27 = vld [vmem:[%s3255_s2 + $0x2b0] sm:$0x1] }
  0xad   :  { %v931_v37 = vmax.f32 %v847_v46, %v642_v49  ;;  %1569 = vst.msk [vmem:[%s3258_s4 + $0x180] sm:$0xff] %vm1520_vm1, %v1504_v57  ;;  %v643_v9 = vrot.slane %v101_v51, 1  ;;  %v644_v60 = vrot.slane %v102_v55, 1  ;;  %v848_v1 = vmax.f32 %v784_v32, %v101_v51  ;;  %v341_v49 = vld [vmem:[%s3256_s3 + $0x2d0] sm:$0xff] }
  0xae   :  { %v1058_v54 = vmax.f32 %v994_v56, %v173_v0  ;;  %v1505_v10 = vmax.f32 %v1121_v63, %v1356_v12  ;;  %v1362_v17 = vrot.slane %v2958_v47, 1  ;;  %v1363_v18 = vrot.slane %v2963_v62, 1  ;;  %v107_v56 = vld [vmem:[%s3254_s0 + $0x2d0] sm:$0xff] }
  0xaf   :  { %v995_v14 = vmax.f32 %v931_v37, %v172_v45  ;;  %v645_v19 = vsel %vm507_vm0, %v643_v9, %v644_v60  ;;  %v402_v3 = vmax.f32 %v338_v6, %v102_v55  ;;  %v646_v20 = vrot.slane %v103_v48, 1 }
  0xb0   :  { %v1122_v2 = vmax.f32 %v1058_v54, %v2908_v28  ;;  %1570 = vst.msk [vmem:[%s3258_s4 + $0x188] sm:$0xff] %vm1520_vm1, %v1505_v10  ;;  %v1361_v28 = vsel %vm507_vm0, %v1358_v34, %v1360_v59  ;;  %v786_v21 = vmax.f32 %v401_v4, %v645_v19  ;;  %v932_v29 = vmax.f32 %v848_v1, %v645_v19  ;;  %v3058_v54 = vld [vmem:[%s3255_s2 + $0x2b8] sm:$0xff] }
  0xb1   :  { %v1059_v25 = vmax.f32 %v995_v14, %v174_v13  ;;  %v1364_v38 = vsel %vm507_vm0, %v1362_v17, %v1363_v18  ;;  %v647_v22 = vsel %vm507_vm0, %v644_v60, %v646_v20  ;;  %v849_v35 = vmax.f32 %v785_v58, %v102_v55  ;;  %v108_v58 = vld [vmem:[%s3254_s0 + $0x2d8] sm:$0xff]  ;;  %v109_v14 = vld [vmem:[%s3254_s0 + $0x2e0] sm:$0x1] }
  0xb2   :  { %v1506_v31 = vmax.f32 %v1122_v2, %v1359_v16  ;;  %v996_v40 = vmax.f32 %v932_v29, %v173_v0  ;;  %v1365_v23 = vrot.slane %v267_v5, 1  ;;  %v403_v42 = vmax.f32 %v339_v61, %v104_v24  ;;  %v176_v16 = vld [vmem:[%s3257_s1 + $0x2a8] sm:$0xff]  ;;  %v177_v60 = vld [vmem:[%s3257_s1 + $0x2b8] sm:$0xff] }
  0xb3   :  { %v1123_v11 = vmax.f32 %v1059_v25, %v2914_v7  ;;  %v175_v7 = vld [vmem:[%s3257_s1 + $0x2a0] sm:$0xff]  ;;  %v787_v41 = vmax.f32 %v402_v3, %v647_v22  ;;  %v933_v36 = vmax.f32 %v849_v35, %v647_v22  ;;  %v648_v43 = vrot.slane %v104_v24, 1  ;;  %v342_v17 = vld [vmem:[%s3256_s3 + $0x2d8] sm:$0xff]  ;;  %v273_v25 = vld [vmem:[%s3255_s2 + $0x2c8] sm:$0x1] }
  0xb4   :  { %1571 = vst.msk [vmem:[%s3258_s4 + $0x190] sm:$0xff] %vm1520_vm1, %v1506_v31  ;;  %v649_v34 = vrot.slane %v105_v15, 1  ;;  %v1060_v50 = vmax.f32 %v996_v40, %v175_v7  ;;  %v850_v45 = vmax.f32 %v786_v21, %v104_v24  ;;  %v1367_v32 = vrot.slane %v3008_v26, 1  ;;  %v178_v21 = vld [vmem:[%s3257_s1 + $0x2c0] sm:$0xff]  ;;  %v343_v22 = vld [vmem:[%s3256_s3 + $0x2e8] sm:$0xff] }
  0xb5   :  { %v1507_v44 = vmax.f32 %v1123_v11, %v1361_v28  ;;  %v997_v8 = vmax.f32 %v933_v36, %v174_v13  ;;  %v1368_v52 = vrot.slane %v3014_v33, 1  ;;  %v404_v53 = vmax.f32 %v340_v39, %v105_v15 }
  0xb6   :  { %v650_v51 = vsel %vm507_vm0, %v648_v43, %v649_v34  ;;  %v1124_v12 = vmax.f32 %v1060_v50, %v2958_v47  ;;  %v651_v57 = vrot.slane %v106_v30, 1  ;;  %v1366_v63 = vsel %vm507_vm0, %v1363_v18, %v1365_v23  ;;  %v3077_v18 = vld [vmem:[%s3255_s2 + $0x2c0] sm:$0xff]  ;;  %v111_v23 = vld [vmem:[%s3254_s0 + $0x2f0] sm:$0xff] }
  0xb7   :  { %1572 = vst.msk [vmem:[%s3258_s4 + $0x198] sm:$0xff] %vm1520_vm1, %v1507_v44  ;;  %v788_v46 = vmax.f32 %v403_v42, %v650_v51  ;;  %v934_v55 = vmax.f32 %v850_v45, %v650_v51  ;;  %v1061_v59 = vmax.f32 %v997_v8, %v176_v16  ;;  %v851_v0 = vmax.f32 %v787_v41, %v105_v15  ;;  %v344_v30 = vld [vmem:[%s3256_s3 + $0x2f0] sm:$0xff] }
  0xb8   :  { %v1370_v47 = vrot.slane %v270_v27, 1  ;;  %v1508_v37 = vmax.f32 %v1124_v12, %v1364_v38  ;;  %v1369_v48 = vsel %vm507_vm0, %v1367_v32, %v1368_v52  ;;  %v652_v6 = vsel %vm507_vm0, %v649_v34, %v651_v57  ;;  %v110_v38 = vld [vmem:[%s3254_s0 + $0x2e8] sm:$0xff]  ;;  %v179_v44 = vld [vmem:[%s3257_s1 + $0x2d0] sm:$0xff]  ;;  %v3125_v12 = vld [vmem:[%s3255_s2 + $0x2d8] sm:$0xff] }
  0xb9   :  { %v998_v4 = vmax.f32 %v934_v55, %v175_v7  ;;  %v1125_v9 = vmax.f32 %v1061_v59, %v2963_v62  ;;  %v789_v1 = vmax.f32 %v404_v53, %v652_v6  ;;  %v935_v10 = vmax.f32 %v851_v0, %v652_v6  ;;  %v274_v53 = vld [vmem:[%s3255_s2 + $0x2d0] sm:$0xff] }
  0xba   :  { %v405_v13 = vmax.f32 %v341_v49, %v107_v56  ;;  %1573 = vst.msk [vmem:[%s3258_s4 + $0x1a0] sm:$0xff] %vm1520_vm1, %v1508_v37  ;;  %v653_v2 = vrot.slane %v107_v56, 1  ;;  %v654_v19 = vrot.slane %v108_v58, 1  ;;  %v852_v5 = vmax.f32 %v788_v46, %v107_v56  ;;  %v276_v56 = vld [vmem:[%s3255_s2 + $0x2e0] sm:$0x1] }
  0xbb   :  { %v1062_v62 = vmax.f32 %v998_v4, %v177_v60  ;;  %v1509_v3 = vmax.f32 %v1125_v9, %v1366_v63  ;;  %v999_v20 = vmax.f32 %v935_v10, %v176_v16  ;;  %v1371_v24 = vsel %vm507_vm0, %v1368_v52, %v1370_v47  ;;  %v180_v63 = vld [vmem:[%s3257_s1 + $0x2d8] sm:$0xff]  ;;  %v113_v37 = vld [vmem:[%s3254_s0 + $0x300] sm:$0xff] }
  0xbc   :  { %v1372_v61 = vrot.slane %v3058_v54, 1  ;;  %v655_v29 = vsel %vm507_vm0, %v653_v2, %v654_v19  ;;  %v406_v15 = vmax.f32 %v342_v17, %v108_v58  ;;  %v656_v31 = vrot.slane %v109_v14, 1  ;;  %v345_v4 = vld [vmem:[%s3256_s3 + $0x300] sm:$0xff]  ;;  %v3154_v17 = vld [vmem:[%s3255_s2 + $0x2e8] sm:$0xff] }
  0xbd   :  { %v1126_v28 = vmax.f32 %v1062_v62, %v3008_v26  ;;  %1574 = vst.msk [vmem:[%s3258_s4 + $0x1a8] sm:$0xff] %vm1520_vm1, %v1509_v3  ;;  %v1063_v35 = vmax.f32 %v999_v20, %v178_v21  ;;  %v790_v26 = vmax.f32 %v405_v13, %v655_v29  ;;  %v936_v11 = vmax.f32 %v852_v5, %v655_v29  ;;  %v181_v2 = vld [vmem:[%s3257_s1 + $0x2e8] sm:$0xff]  ;;  %v115_v20 = vld [vmem:[%s3254_s0 + $0x310] sm:$0x1] }
  0xbe   :  { %v1373_v40 = vrot.slane %v3077_v18, 1  ;;  %v657_v39 = vsel %vm507_vm0, %v654_v19, %v656_v31  ;;  %v853_v7 = vmax.f32 %v789_v1, %v108_v58  ;;  %v1375_v41 = vrot.slane %v273_v25, 1 }
  0xbf   :  { %v1510_v42 = vmax.f32 %v1126_v28, %v1369_v48  ;;  %v1127_v36 = vmax.f32 %v1063_v35, %v3014_v33  ;;  %v1000_v43 = vmax.f32 %v936_v11, %v177_v60  ;;  %v407_v34 = vmax.f32 %v343_v22, %v110_v38  ;;  %v112_v33 = vld [vmem:[%s3254_s0 + $0x2f8] sm:$0x1]  ;;  %v114_v60 = vld [vmem:[%s3254_s0 + $0x308] sm:$0xff]  ;;  %v182_v35 = vld [vmem:[%s3257_s1 + $0x2f0] sm:$0xff] }
  0xc0   :  { %v791_v50 = vmax.f32 %v406_v15, %v657_v39  ;;  %v937_v45 = vmax.f32 %v853_v7, %v657_v39  ;;  %v658_v32 = vrot.slane %v110_v38, 1  ;;  %v659_v27 = vrot.slane %v111_v23, 1 }
  0xc1   :  { %1575 = vst.msk [vmem:[%s3258_s4 + $0x1b0] sm:$0xff] %vm1520_vm1, %v1510_v42  ;;  %v1511_v8 = vmax.f32 %v1127_v36, %v1371_v24  ;;  %v1064_v51 = vmax.f32 %v1000_v43, %v179_v44  ;;  %v1374_v52 = vsel %vm507_vm0, %v1372_v61, %v1373_v40  ;;  %v854_v16 = vmax.f32 %v790_v26, %v110_v38  ;;  %v346_v24 = vld [vmem:[%s3256_s3 + $0x308] sm:$0xff]  ;;  %v3173_v61 = vld [vmem:[%s3255_s2 + $0x2f0] sm:$0xff]  ;;  %v117_v36 = vld [vmem:[%s3254_s0 + $0x320] sm:$0xff] }
  0xc2   :  { %v1001_v46 = vmax.f32 %v937_v45, %v178_v21  ;;  %v1376_v55 = vsel %vm507_vm0, %v1373_v40, %v1375_v41  ;;  %v660_v57 = vsel %vm507_vm0, %v658_v32, %v659_v27  ;;  %v408_v49 = vmax.f32 %v344_v30, %v111_v23  ;;  %v279_v30 = vld [vmem:[%s3255_s2 + $0x2f8] sm:$0x1] }
  0xc3   :  { %1576 = vst.msk [vmem:[%s3258_s4 + $0x1b8] sm:$0xff] %vm1520_vm1, %v1511_v8  ;;  %v1128_v59 = vmax.f32 %v1064_v51, %v3058_v54  ;;  %v792_v0 = vmax.f32 %v407_v34, %v660_v57  ;;  %v938_v47 = vmax.f32 %v854_v16, %v660_v57  ;;  %v661_v58 = vrot.slane %v112_v33, 1  ;;  %v118_v8 = vld [vmem:[%s3254_s0 + $0x328] sm:$0x1]  ;;  %v183_v51 = vld [vmem:[%s3257_s1 + $0x300] sm:$0xff] }
  0xc4   :  { %v1065_v48 = vmax.f32 %v1001_v46, %v180_v63  ;;  %v1377_v6 = vrot.slane %v274_v53, 1  ;;  %v1378_v9 = vrot.slane %v3125_v12, 1  ;;  %v855_v54 = vmax.f32 %v791_v50, %v111_v23  ;;  %v116_v23 = vld [vmem:[%s3254_s0 + $0x318] sm:$0xff] }
  0xc5   :  { %v1512_v1 = vmax.f32 %v1128_v59, %v1374_v52  ;;  %v1002_v10 = vmax.f32 %v938_v47, %v179_v44  ;;  %v662_v13 = vsel %vm507_vm0, %v659_v27, %v661_v58  ;;  %v1380_v14 = vrot.slane %v276_v56, 1  ;;  %v280_v56 = vld [vmem:[%s3255_s2 + $0x300] sm:$0xff] }
  0xc6   :  { %v1129_v62 = vmax.f32 %v1065_v48, %v3077_v18  ;;  %v793_v19 = vmax.f32 %v408_v49, %v662_v13  ;;  %v939_v5 = vmax.f32 %v855_v54, %v662_v13  ;;  %v409_v3 = vmax.f32 %v345_v4, %v113_v37  ;;  %v281_v49 = vld [vmem:[%s3255_s2 + $0x308] sm:$0xff]  ;;  %v282_v48 = vld [vmem:[%s3255_s2 + $0x310] sm:$0x1] }
  0xc7   :  { %1577 = vst.msk [vmem:[%s3258_s4 + $0x1c0] sm:$0xff] %vm1520_vm1, %v1512_v1  ;;  %v1066_v18 = vmax.f32 %v1002_v10, %v181_v2  ;;  %v663_v25 = vrot.slane %v113_v37, 1  ;;  %v664_v28 = vrot.slane %v114_v60, 1  ;;  %v856_v21 = vmax.f32 %v792_v0, %v113_v37  ;;  %v184_v37 = vld [vmem:[%s3257_s1 + $0x308] sm:$0xff] }
  0xc8   :  { %v1513_v29 = vmax.f32 %v1129_v62, %v1376_v55  ;;  %v1379_v15 = vsel %vm507_vm0, %v1377_v6, %v1378_v9  ;;  %v1003_v31 = vmax.f32 %v939_v5, %v180_v63  ;;  %v1382_v38 = vrot.slane %v3154_v17, 1 }
  0xc9   :  { %v1130_v22 = vmax.f32 %v1066_v18, %v274_v53  ;;  %v665_v26 = vsel %vm507_vm0, %v663_v25, %v664_v28  ;;  %v410_v11 = vmax.f32 %v346_v24, %v114_v60  ;;  %v666_v40 = vrot.slane %v115_v20, 1 }
  0xca   :  { %1578 = vst.msk [vmem:[%s3258_s4 + $0x1c8] sm:$0xff] %vm1520_vm1, %v1513_v29  ;;  %v1067_v42 = vmax.f32 %v1003_v31, %v182_v35  ;;  %v794_v39 = vmax.f32 %v409_v3, %v665_v26  ;;  %v940_v7 = vmax.f32 %v856_v21, %v665_v26  ;;  %v1383_v41 = vrot.slane %v3173_v61, 1 }
  0xcb   :  { %v1514_v43 = vmax.f32 %v1130_v22, %v1379_v15  ;;  %v1381_v34 = vsel %vm507_vm0, %v1378_v9, %v1380_v14  ;;  %v667_v44 = vsel %vm507_vm0, %v664_v28, %v666_v40  ;;  %v857_v50 = vmax.f32 %v793_v19, %v114_v60  ;;  %v185_v9 = vld [vmem:[%s3257_s1 + $0x318] sm:$0xff] }
  0xcc   :  { %v1131_v45 = vmax.f32 %v1067_v42, %v3125_v12  ;;  %v1004_v32 = vmax.f32 %v940_v7, %v181_v2  ;;  %v795_v27 = vmax.f32 %v410_v11, %v667_v44  ;;  %v858_v33 = vmax.f32 %v794_v39, %v116_v23  ;;  %v186_v2 = vld [vmem:[%s3257_s1 + $0x320] sm:$0xff] }
  0xcd   :  { %1579 = vst.msk [vmem:[%s3258_s4 + $0x1d0] sm:$0xff] %vm1520_vm1, %v1514_v43  ;;  %v941_v52 = vmax.f32 %v857_v50, %v667_v44  ;;  %v871_v53 = vrot.slane %v116_v23, 1  ;;  %v872_v16 = vrot.slane %v117_v36, 1  ;;  %v1384_v55 = vsel %vm507_vm0, %v1382_v38, %v1383_v41 }
  0xce   :  { %v1515_v12 = vmax.f32 %v1131_v45, %v1381_v34  ;;  %v1068_v46 = vmax.f32 %v1004_v32, %v183_v51  ;;  %v1385_v57 = vrot.slane %v279_v30, 1  ;;  %v859_v0 = vmax.f32 %v795_v27, %v117_v36 }
  0xcf   :  { %v1005_v59 = vmax.f32 %v941_v52, %v182_v35  ;;  %v873_v63 = vsel %vm507_vm0, %v871_v53, %v872_v16  ;;  %v874_v47 = vrot.slane %v118_v8, 1  ;;  %v1387_v54 = vrot.slane %v280_v56, 1 }
  0xd0   :  { %1580 = vst.msk [vmem:[%s3258_s4 + $0x1d8] sm:$0xff] %vm1520_vm1, %v1515_v12  ;;  %v1132_v58 = vmax.f32 %v1068_v46, %v3154_v17  ;;  %v942_v4 = vmax.f32 %v858_v33, %v873_v63  ;;  %v1388_v60 = vrot.slane %v281_v49, 1  ;;  %v1386_v13 = vsel %vm507_vm0, %v1383_v41, %v1385_v57 }
  0xd1   :  { %v1069_v6 = vmax.f32 %v1005_v59, %v184_v37  ;;  %v875_v1 = vsel %vm507_vm0, %v872_v16, %v874_v47  ;;  %v1390_v19 = vrot.slane %v282_v48, 1 }
  0xd2   :  { %v1516_v10 = vmax.f32 %v1132_v58, %v1384_v55  ;;  %v1006_v14 = vmax.f32 %v942_v4, %v183_v51  ;;  %v943_v17 = vmax.f32 %v859_v0, %v875_v1  ;;  %v1389_v24 = vsel %vm507_vm0, %v1387_v54, %v1388_v60 }
  0xd3   :  { %v1133_v62 = vmax.f32 %v1069_v6, %v3173_v61  ;;  %v1391_v61 = vsel %vm507_vm0, %v1388_v60, %v1390_v19 }
  0xd4   :  { %1581 = vst.msk [vmem:[%s3258_s4 + $0x1e0] sm:$0xff] %vm1520_vm1, %v1516_v10  ;;  %v1070_v5 = vmax.f32 %v1006_v14, %v185_v9  ;;  %v1007_v3 = vmax.f32 %v943_v17, %v184_v37 }
  0xd5   :  { %v1517_v20 = vmax.f32 %v1133_v62, %v1386_v13 }
  0xd6   :  { %v1134_v18 = vmax.f32 %v1070_v5, %v280_v56  ;;  %v1071_v25 = vmax.f32 %v1007_v3, %v186_v2 }
  0xd7   :  { %1582 = vst.msk [vmem:[%s3258_s4 + $0x1e8] sm:$0xff] %vm1520_vm1, %v1517_v20 }
  0xd8   :  { %v1518_v28 = vmax.f32 %v1134_v18, %v1389_v24  ;;  %v1135_v21 = vmax.f32 %v1071_v25, %v281_v49 }
  0xda   :  { %1583 = vst.msk [vmem:[%s3258_s4 + $0x1f0] sm:$0xff] %vm1520_vm1, %v1518_v28  ;;  %v1519_v29 = vmax.f32 %v1135_v21, %v1391_v61 }
  0xdc   :  { %1584 = vst.msk [vmem:[%s3258_s4 + $0x1f8] sm:$0xff] %vm1520_vm1, %v1519_v29 }

// kernel: facebox_extractor_forward.26
= control target key start
LH: loop header
LB: loop body
LE: loop exit
PB: predicated region body
PF: predicated region fallthrough
CT: control target
= control target key end

     0   :  { %vm1888_vm0 = vcmask 1040384   ;;  %vm1889_vm1 = vcmask 1041408   ;;  %v5179_v2 = vmov 65535   ;;  %vm1503_vm2 = vcmask 154624   ;;  %s8532_s1 = inlined_call_operand.vmem [shape: bf16[147,48], index: 1, kind: input, shape index: {}]   ;;  %s8533_s0 = inlined_call_operand.vmem [shape: bf16[2048,147], index: 0, kind: input, shape index: {}]   ;;  %s8534_s2 = inlined_call_operand.vmem [shape: f32[1,48], index: 2, kind: input, shape index: {}]   ;;  %s8535_s3 = inlined_call_operand.vmem [shape: f32[2048,48], index: 3, kind: output, shape index: {}]  }
   0x1   :  { %v5161_v0 = vld [vmem:[%s8532_s1 + $0x38] sm:$0xff]  ;;  %v289_v1 = vld [vmem:[%s8532_s1 + $0x48] sm:$0x3]  ;;  %v1890_v3 = vsel %vm1888_vm0, 4294967295, %v5179_v2  ;;  %v5160_v5 = vld [vmem:[%s8532_s1 + $0x30] sm:$0xff]  ;;  %vm3449_vm3 = vcmask 392192  }
   0x2   :  { %v1483_v4 = vunpack.c.l.b16 %v289_v1  ;;  %1895 = vmatpush.bf16.msra.mxu0 %v5161_v0  ;;  %5163 = vmatpush.bf16.msra.mxu2 %v5161_v0  ;;  %v1891_v6 = vsel %vm1889_vm1, %v1890_v3, 0  ;;  %v5159_v9 = vld [vmem:[%s8532_s1 + $0x28] sm:$0xff]  ;;  %v5162_v10 = vld [vmem:[%s8532_s1 + $0x40] sm:$0xff]  ;;  %v5028_v13 = vld [vmem:[%s8533_s0 + $0x414] sm:$0xf] }
   0x3   :  { %v4898_v11 = vld [vmem:[%s8533_s0 + $0x4] sm:$0xf]  ;;  %v3714_v12 = vld [vmem:[%s8533_s0 + $0x8] sm:$0xf0]  ;;  %v4234_v14 = vld [vmem:[%s8533_s0 + $0x418] sm:$0xf0] }
   0x4   :  { %v1493_v7 = vpack.c.b16 %v1483_v4, %v1483_v4  ;;  %v3717_v15 = vor.u32 %v4898_v11, %v3714_v12  ;;  %v5158_v16 = vld [vmem:[%s8532_s1 + $0x20] sm:$0xff]  ;;  %v4237_v17 = vor.u32 %v5028_v13, %v4234_v14  ;;  %v5157_v18 = vld [vmem:[%s8532_s1 + $0x18] sm:$0xff]  ;;  %v5156_v19 = vld [vmem:[%s8532_s1 + $0x10] sm:$0xff] }
   0x5   :  { %v5155_v20 = vld [vmem:[%s8532_s1 + $0x8] sm:$0xff]  ;;  %v4900_v21 = vld [vmem:[%s8533_s0 + $0x14] sm:$0xf]  ;;  %v3722_v22 = vld [vmem:[%s8533_s0 + $0x18] sm:$0xf0] }
   0x6   :  { %v1893_v8 = vand.u32 %v1891_v6, %v1493_v7  ;;  %1896 = vmatpush.bf16.msra.mxu0 %v5160_v5  ;;  %5164 = vmatpush.bf16.msra.mxu2 %v5160_v5  ;;  %v5030_v23 = vld [vmem:[%s8533_s0 + $0x424] sm:$0xf]  ;;  %v4242_v24 = vld [vmem:[%s8533_s0 + $0x428] sm:$0xf0]  ;;  %v3725_v25 = vor.u32 %v4900_v21, %v3722_v22  ;;  %v3712_v27 = vld [vmem:[%s8533_s0] sm:$0xf] }
   0x7   :  { %v5154_v26 = vld [vmem:[%s8532_s1] sm:$0xff]  ;;  %v4899_v28 = vld [vmem:[%s8533_s0 + $0x4] sm:$0xf0]  ;;  %v4245_v31 = vor.u32 %v5030_v23, %v4242_v24  ;;  %v3730_v35 = vld [vmem:[%s8533_s0 + $0x28] sm:$0xf0] }
   0x8   :  { %2550 = vmatpush.bf16.msra.mxu1 %v1893_v8  ;;  %5171 = vmatpush.bf16.msra.mxu3 %v1893_v8  ;;  %v4224_v29 = vld [vmem:[%s8533_s0 + $0x400] sm:$0xf]  ;;  %v5027_v30 = vld [vmem:[%s8533_s0 + $0x404] sm:$0xf0]  ;;  %v3713_v32 = vor.u32 %v4899_v28, %v3712_v27  ;;  %v4902_v34 = vld [vmem:[%s8533_s0 + $0x24] sm:$0xf] }
   0x9   :  { %v4225_v33 = vor.u32 %v5027_v30, %v4224_v29  ;;  %v5032_v36 = vld [vmem:[%s8533_s0 + $0x434] sm:$0xf]  ;;  %v4250_v37 = vld [vmem:[%s8533_s0 + $0x438] sm:$0xf0]  ;;  %v3733_v38 = vor.u32 %v4902_v34, %v3730_v35  ;;  %v3720_v39 = vld [vmem:[%s8533_s0 + $0x10] sm:$0xf] }
   0xa   :  { %1897 = vmatpush.bf16.msra.mxu0 %v5159_v9  ;;  %5165 = vmatpush.bf16.msra.mxu2 %v5159_v9  ;;  %v4901_v40 = vld [vmem:[%s8533_s0 + $0x14] sm:$0xf0]  ;;  %v4232_v41 = vld [vmem:[%s8533_s0 + $0x410] sm:$0xf]  ;;  %v4253_v43 = vor.u32 %v5032_v36, %v4250_v37  ;;  %v4904_v46 = vld [vmem:[%s8533_s0 + $0x34] sm:$0xf] }
   0xb   :  { %v5029_v42 = vld [vmem:[%s8533_s0 + $0x414] sm:$0xf0]  ;;  %v3721_v44 = vor.u32 %v4901_v40, %v3720_v39  ;;  %v3738_v47 = vld [vmem:[%s8533_s0 + $0x38] sm:$0xf0]  ;;  %v5034_v48 = vld [vmem:[%s8533_s0 + $0x444] sm:$0xf] }
   0xc   :  { %2551 = vmatpush.bf16.msra.mxu1 %v5162_v10  ;;  %5172 = vmatpush.bf16.msra.mxu3 %v5162_v10  ;;  %v4233_v45 = vor.u32 %v5029_v42, %v4232_v41  ;;  %v4258_v49 = vld [vmem:[%s8533_s0 + $0x448] sm:$0xf0]  ;;  %v3741_v50 = vor.u32 %v4904_v46, %v3738_v47  ;;  %v3728_v51 = vld [vmem:[%s8533_s0 + $0x20] sm:$0xf]  ;;  %v4903_v52 = vld [vmem:[%s8533_s0 + $0x24] sm:$0xf0] }
   0xd   :  { %v4240_v53 = vld [vmem:[%s8533_s0 + $0x420] sm:$0xf]  ;;  %v5031_v54 = vld [vmem:[%s8533_s0 + $0x424] sm:$0xf0]  ;;  %v4261_v55 = vor.u32 %v5034_v48, %v4258_v49  ;;  %v3729_v56 = vor.u32 %v4903_v52, %v3728_v51  ;;  %v4906_v58 = vld [vmem:[%s8533_s0 + $0x44] sm:$0xf] }
   0xe   :  { %1898 = vmatpush.bf16.msra.mxu0 %v5158_v16  ;;  %5166 = vmatpush.bf16.msra.mxu2 %v5158_v16  ;;  %v4241_v57 = vor.u32 %v5031_v54, %v4240_v53  ;;  %v3746_v59 = vld [vmem:[%s8533_s0 + $0x48] sm:$0xf0]  ;;  %v5036_v60 = vld [vmem:[%s8533_s0 + $0x454] sm:$0xf]  ;;  %v4266_v61 = vld [vmem:[%s8533_s0 + $0x458] sm:$0xf0] }
   0xf   :  { %4770 = vmatmul.msk.bf16.vlgmr.msra.gmra.mxu1 %vm1503_vm2, %v3717_v15  ;;  %4835 = vmatmul.msk.bf16.vlgmr.msra.gmra.mxu3 %vm1503_vm2, %v4237_v17  ;;  %v3749_v62 = vor.u32 %v4906_v58, %v3746_v59  ;;  %v3736_v63 = vld [vmem:[%s8533_s0 + $0x30] sm:$0xf]  ;;  %v4905_v0 = vld [vmem:[%s8533_s0 + $0x34] sm:$0xf0]  ;;  %v4269_v3 = vor.u32 %v5036_v60, %v4266_v61  ;;  %v4908_v6 = vld [vmem:[%s8533_s0 + $0x54] sm:$0xf] }
  0x10   :  { %v4248_v1 = vld [vmem:[%s8533_s0 + $0x430] sm:$0xf]  ;;  %v5033_v2 = vld [vmem:[%s8533_s0 + $0x434] sm:$0xf0]  ;;  %v3737_v4 = vor.u32 %v4905_v0, %v3736_v63  ;;  %v3754_v7 = vld [vmem:[%s8533_s0 + $0x58] sm:$0xf0] }
  0x11   :  { %v4249_v5 = vor.u32 %v5033_v2, %v4248_v1  ;;  %v5038_v8 = vld [vmem:[%s8533_s0 + $0x464] sm:$0xf]  ;;  %v4274_v9 = vld [vmem:[%s8533_s0 + $0x468] sm:$0xf0]  ;;  %v3757_v10 = vor.u32 %v4908_v6, %v3754_v7  ;;  %v3744_v11 = vld [vmem:[%s8533_s0 + $0x40] sm:$0xf] }
  0x12   :  { %1899 = vmatpush.bf16.msra.mxu0 %v5157_v18  ;;  %5167 = vmatpush.bf16.msra.mxu2 %v5157_v18  ;;  %v4907_v12 = vld [vmem:[%s8533_s0 + $0x44] sm:$0xf0]  ;;  %v4256_v13 = vld [vmem:[%s8533_s0 + $0x440] sm:$0xf]  ;;  %v4277_v15 = vor.u32 %v5038_v8, %v4274_v9  ;;  %v4910_v18 = vld [vmem:[%s8533_s0 + $0x64] sm:$0xf] }
  0x13   :  { %v5035_v14 = vld [vmem:[%s8533_s0 + $0x444] sm:$0xf0]  ;;  %v3745_v16 = vor.u32 %v4907_v12, %v3744_v11  ;;  %v4282_v21 = vld [vmem:[%s8533_s0 + $0x478] sm:$0xf0]  ;;  %v3752_v23 = vld [vmem:[%s8533_s0 + $0x50] sm:$0xf] }
  0x14   :  { %v4257_v17 = vor.u32 %v5035_v14, %v4256_v13  ;;  %v4909_v24 = vld [vmem:[%s8533_s0 + $0x54] sm:$0xf0]  ;;  %v4912_v30 = vld [vmem:[%s8533_s0 + $0x74] sm:$0xf]  ;;  %v3760_v35 = vld [vmem:[%s8533_s0 + $0x60] sm:$0xf] }
  0x15   :  { %v3753_v28 = vor.u32 %v4909_v24, %v3752_v23  ;;  %v4911_v36 = vld [vmem:[%s8533_s0 + $0x64] sm:$0xf0]  ;;  %v4272_v37 = vld [vmem:[%s8533_s0 + $0x460] sm:$0xf]  ;;  %v4914_v42 = vld [vmem:[%s8533_s0 + $0x84] sm:$0xf] }
  0x16   :  { %1900 = vmatpush.bf16.msra.mxu0 %v5156_v19  ;;  %5168 = vmatpush.bf16.msra.mxu2 %v5156_v19  ;;  %v3762_v19 = vld [vmem:[%s8533_s0 + $0x68] sm:$0xf0]  ;;  %v3761_v40 = vor.u32 %v4911_v36, %v3760_v35  ;;  %v3768_v47 = vld [vmem:[%s8533_s0 + $0x70] sm:$0xf]  ;;  %v4913_v48 = vld [vmem:[%s8533_s0 + $0x74] sm:$0xf0] }
  0x17   :  { %v3765_v22 = vor.u32 %v4910_v18, %v3762_v19  ;;  %v5041_v51 = vld [vmem:[%s8533_s0 + $0x474] sm:$0xf0]  ;;  %v3769_v53 = vor.u32 %v4913_v48, %v3768_v47  ;;  %v3786_v58 = vld [vmem:[%s8533_s0 + $0x98] sm:$0xf0]  ;;  %v5046_v59 = vld [vmem:[%s8533_s0 + $0x4a4] sm:$0xf] }
  0x18   :  { %v4306_v60 = vld [vmem:[%s8533_s0 + $0x4a8] sm:$0xf0]  ;;  %v4915_v63 = vld [vmem:[%s8533_s0 + $0x84] sm:$0xf0]  ;;  %v5477_v2 = vld [vmem:[%s8534_s2] ss:$0 sm:$0xff] }
  0x19   :  { %v3794_v18 = vld [vmem:[%s8533_s0 + $0xa8] sm:$0xf0]  ;;  %v3784_v23 = vld [vmem:[%s8533_s0 + $0x90] sm:$0xf]  ;;  %v4917_v24 = vld [vmem:[%s8533_s0 + $0x94] sm:$0xf0] }
  0x1a   :  { %1901 = vmatpush.bf16.msra.mxu0 %v5155_v20  ;;  %5169 = vmatpush.bf16.msra.mxu2 %v5155_v20  ;;  %v5040_v20 = vld [vmem:[%s8533_s0 + $0x474] sm:$0xf]  ;;  %v5050_v48 = vld [vmem:[%s8533_s0 + $0x4c4] sm:$0xf] }
  0x1b   :  { %v4285_v27 = vor.u32 %v5040_v20, %v4282_v21  ;;  %v5048_v20 = vld [vmem:[%s8533_s0 + $0x4b4] sm:$0xf]  ;;  %v4314_v21 = vld [vmem:[%s8533_s0 + $0x4b8] sm:$0xf0] }
  0x1e   :  { %1902 = vmatpush.bf16.msra.mxu0 %v5154_v26  ;;  %5170 = vmatpush.bf16.msra.mxu2 %v5154_v26  ;;  %v5037_v26 = vld [vmem:[%s8533_s0 + $0x454] sm:$0xf0] }
  0x1f   :  { %4771 = vmatmul.msk.bf16.gmra.mxu1 %vm1503_vm2, %v3725_v25  ;;  %4836 = vmatmul.msk.bf16.gmra.mxu3 %vm1503_vm2, %v4245_v31  ;;  %v4264_v25 = vld [vmem:[%s8533_s0 + $0x450] sm:$0xf]  ;;  %v3770_v31 = vld [vmem:[%s8533_s0 + $0x78] sm:$0xf0] }
  0x20   :  { %v4265_v29 = vor.u32 %v5037_v26, %v4264_v25  ;;  %v3773_v34 = vor.u32 %v4912_v30, %v3770_v31  ;;  %v4317_v30 = vor.u32 %v5048_v20, %v4314_v21  ;;  %v4330_v20 = vld [vmem:[%s8533_s0 + $0x4d8] sm:$0xf0] }
  0x21   :  { %1903 = vmatmul.bf16.vlgmr.msra.gmra.mxu0 %v3713_v32  ;;  %2223 = vmatmul.bf16.vlgmr.msra.gmra.mxu2 %v4225_v33  ;;  %v5042_v32 = vld [vmem:[%s8533_s0 + $0x484] sm:$0xf]  ;;  %v4290_v33 = vld [vmem:[%s8533_s0 + $0x488] sm:$0xf0] }
  0x22   :  { %v4293_v39 = vor.u32 %v5042_v32, %v4290_v33  ;;  %v3785_v32 = vor.u32 %v4917_v24, %v3784_v23  ;;  %v3800_v23 = vld [vmem:[%s8533_s0 + $0xb0] sm:$0xf]  ;;  %v4921_v24 = vld [vmem:[%s8533_s0 + $0xb4] sm:$0xf0] }
  0x2f   :  { %4772 = vmatmul.msk.bf16.gmra.mxu1 %vm1503_vm2, %v3733_v38  ;;  %4837 = vmatmul.msk.bf16.gmra.mxu3 %vm1503_vm2, %v4253_v43  ;;  %v5039_v38 = vld [vmem:[%s8533_s0 + $0x464] sm:$0xf0]  ;;  %v3778_v43 = vld [vmem:[%s8533_s0 + $0x88] sm:$0xf0] }
  0x30   :  { %v4273_v41 = vor.u32 %v5039_v38, %v4272_v37  ;;  %v3781_v46 = vor.u32 %v4914_v42, %v3778_v43 }
  0x31   :  { %1908 = vmatmul.bf16.gmra.mxu0 %v3721_v44  ;;  %2228 = vmatmul.bf16.gmra.mxu2 %v4233_v45  ;;  %v5044_v44 = vld [vmem:[%s8533_s0 + $0x494] sm:$0xf]  ;;  %v4298_v45 = vld [vmem:[%s8533_s0 + $0x498] sm:$0xf0] }
  0x32   :  { %v4301_v52 = vor.u32 %v5044_v44, %v4298_v45  ;;  %v4920_v44 = vld [vmem:[%s8533_s0 + $0xb4] sm:$0xf]  ;;  %v3802_v45 = vld [vmem:[%s8533_s0 + $0xb8] sm:$0xf0] }
  0x3f   :  { %4773 = vmatmul.msk.bf16.gmra.mxu1 %vm1503_vm2, %v3741_v50  ;;  %4838 = vmatmul.msk.bf16.gmra.mxu3 %vm1503_vm2, %v4261_v55  ;;  %v4280_v50 = vld [vmem:[%s8533_s0 + $0x470] sm:$0xf] }
  0x40   :  { %v4281_v54 = vor.u32 %v5041_v51, %v4280_v50  ;;  %v3805_v51 = vor.u32 %v4920_v44, %v3802_v45 }
  0x41   :  { %1913 = vmatmul.bf16.gmra.mxu0 %v3729_v56  ;;  %2233 = vmatmul.bf16.gmra.mxu2 %v4241_v57  ;;  %v4916_v57 = vld [vmem:[%s8533_s0 + $0x94] sm:$0xf] }
  0x42   :  { %v3789_v61 = vor.u32 %v4916_v57, %v3786_v58  ;;  %v4304_v57 = vld [vmem:[%s8533_s0 + $0x4a0] sm:$0xf]  ;;  %v5047_v58 = vld [vmem:[%s8533_s0 + $0x4a4] sm:$0xf0] }
  0x4f   :  { %4774 = vmatmul.msk.bf16.gmra.mxu1 %vm1503_vm2, %v3749_v62  ;;  %4839 = vmatmul.msk.bf16.gmra.mxu3 %vm1503_vm2, %v4269_v3  ;;  %v3776_v62 = vld [vmem:[%s8533_s0 + $0x80] sm:$0xf] }
  0x50   :  { %v4288_v3 = vld [vmem:[%s8533_s0 + $0x480] sm:$0xf]  ;;  %v3777_v6 = vor.u32 %v4915_v63, %v3776_v62 }
  0x51   :  { %1918 = vmatmul.bf16.gmra.mxu0 %v3737_v4  ;;  %2238 = vmatmul.bf16.gmra.mxu2 %v4249_v5  ;;  %v5043_v4 = vld [vmem:[%s8533_s0 + $0x484] sm:$0xf0]  ;;  %v4309_v5 = vor.u32 %v5046_v59, %v4306_v60 }
  0x52   :  { %v4289_v8 = vor.u32 %v5043_v4, %v4288_v3 }
  0x5f   :  { %4775 = vmatmul.msk.bf16.gmra.mxu1 %vm1503_vm2, %v3757_v10  ;;  %4840 = vmatmul.msk.bf16.gmra.mxu3 %vm1503_vm2, %v4277_v15 }
  0x61   :  { %1923 = vmatmul.bf16.gmra.mxu0 %v3745_v16  ;;  %2243 = vmatmul.bf16.gmra.mxu2 %v4257_v17  ;;  %v4918_v17 = vld [vmem:[%s8533_s0 + $0xa4] sm:$0xf] }
  0x6f   :  { %4776 = vmatmul.msk.bf16.gmra.mxu1 %vm1503_vm2, %v3765_v22  ;;  %4841 = vmatmul.msk.bf16.gmra.mxu3 %vm1503_vm2, %v4285_v27  ;;  %v3797_v22 = vor.u32 %v4918_v17, %v3794_v18 }
  0x71   :  { %1928 = vmatmul.bf16.gmra.mxu0 %v3753_v28  ;;  %2248 = vmatmul.bf16.gmra.mxu2 %v4265_v29  ;;  %v4296_v28 = vld [vmem:[%s8533_s0 + $0x490] sm:$0xf]  ;;  %v5045_v29 = vld [vmem:[%s8533_s0 + $0x494] sm:$0xf0] }
  0x7f   :  { %4777 = vmatmul.msk.bf16.gmra.mxu1 %vm1503_vm2, %v3773_v34  ;;  %4842 = vmatmul.msk.bf16.gmra.mxu3 %vm1503_vm2, %v4293_v39  ;;  %v4297_v34 = vor.u32 %v5045_v29, %v4296_v28  ;;  %v4312_v28 = vld [vmem:[%s8533_s0 + $0x4b0] sm:$0xf]  ;;  %v5049_v29 = vld [vmem:[%s8533_s0 + $0x4b4] sm:$0xf0] }
  0x81   :  { %1933 = vmatmul.bf16.gmra.mxu0 %v3761_v40  ;;  %2253 = vmatmul.bf16.gmra.mxu2 %v4273_v41 }
  0x8c   :  { %v2553_v49 = vpop.f32.mrf.mxu1 }
  0x8f   :  { %4778 = vmatmul.msk.bf16.gmra.mxu1 %vm1503_vm2, %v3781_v46  ;;  %4843 = vmatmul.msk.bf16.gmra.mxu3 %vm1503_vm2, %v4301_v52  ;;  %v3792_v52 = vld [vmem:[%s8533_s0 + $0xa0] sm:$0xf] }
  0x91   :  { %1938 = vmatmul.bf16.gmra.mxu0 %v3769_v53  ;;  %2258 = vmatmul.bf16.gmra.mxu2 %v4281_v54  ;;  %v4919_v53 = vld [vmem:[%s8533_s0 + $0xa4] sm:$0xf0] }
  0x92   :  { %v5452_v55 = vpop.f32.mrf.mxu3 }
  0x94   :  { %v2555_v56 = vpop.f32.mrf.mxu1 }
  0x9a   :  { %v5472_v0 = vpop.f32.mrf.mxu3 }
  0x9c   :  { %v2558_v1 = vpop.f32.mrf.mxu1 }
  0x9e   :  { %v1904_v7 = vpop.f32.mrf.mxu0 }
  0x9f   :  { %4779 = vmatmul.msk.bf16.gmra.mxu1 %vm1503_vm2, %v3789_v61  ;;  %v1905_v9 = vadd.f32 %v5477_v2, %v1904_v7  ;;  %4844 = vmatmul.msk.bf16.gmra.mxu3 %vm1503_vm2, %v4309_v5  ;;  %v3793_v61 = vor.u32 %v4919_v53, %v3792_v52  ;;  %v5054_v52 = vld [vmem:[%s8533_s0 + $0x4e4] sm:$0xf]  ;;  %v4338_v53 = vld [vmem:[%s8533_s0 + $0x4e8] sm:$0xf0] }
  0xa1   :  { %v2554_v10 = vadd.f32 %v2553_v49, %v1905_v9  ;;  %1943 = vmatmul.bf16.gmra.mxu0 %v3777_v6  ;;  %2263 = vmatmul.bf16.gmra.mxu2 %v4289_v8  ;;  %v4322_v49 = vld [vmem:[%s8533_s0 + $0x4c8] sm:$0xf0] }
  0xa2   :  { %v5488_v11 = vpop.f32.mrf.mxu3  ;;  %v4325_v59 = vor.u32 %v5050_v48, %v4322_v49  ;;  %v4924_v48 = vld [vmem:[%s8533_s0 + $0xd4] sm:$0xf]  ;;  %v3818_v49 = vld [vmem:[%s8533_s0 + $0xd8] sm:$0xf0] }
  0xa3   :  { %v3193_v12 = vmax.f32 %v2554_v10, 0.0 }
  0xa4   :  { %v2560_v13 = vpop.f32.mrf.mxu1  ;;  %v5494_v14 = vpop.f32.mrf.mxu2 }
  0xa5   :  { %3450 = vst.msk [vmem:[%s8535_s3] sm:$0xff] %vm3449_vm3, %v3193_v12 }
  0xa6   :  { %v1906_v15 = vpop.f32.mrf.mxu0 }
  0xa7   :  { %v1907_v16 = vadd.f32 %v5477_v2, %v1906_v15  ;;  %v4922_v15 = vld [vmem:[%s8533_s0 + $0xc4] sm:$0xf] }
  0xa9   :  { %v2556_v19 = vadd.f32 %v2555_v56, %v1907_v16  ;;  %v3810_v16 = vld [vmem:[%s8533_s0 + $0xc8] sm:$0xf0] }
  0xaa   :  { %v5515_v25 = vpop.f32.mrf.mxu3 }
  0xab   :  { %v3194_v26 = vmax.f32 %v2556_v19, 0.0  ;;  %v5052_v19 = vld [vmem:[%s8533_s0 + $0x4d4] sm:$0xf] }
  0xac   :  { %v2563_v27 = vpop.f32.mrf.mxu1  ;;  %v5527_v31 = vpop.f32.mrf.mxu2 }
  0xad   :  { %3451 = vst.msk [vmem:[%s8535_s3 + $0x8] sm:$0xff] %vm3449_vm3, %v3194_v26 }
  0xae   :  { %v1909_v33 = vpop.f32.mrf.mxu0 }
  0xaf   :  { %4780 = vmatmul.msk.bf16.gmra.mxu1 %vm1503_vm2, %v3797_v22  ;;  %v1910_v35 = vadd.f32 %v5477_v2, %v1909_v33  ;;  %4845 = vmatmul.msk.bf16.gmra.mxu3 %vm1503_vm2, %v4317_v30  ;;  %v3813_v22 = vor.u32 %v4922_v15, %v3810_v16  ;;  %v4333_v30 = vor.u32 %v5052_v19, %v4330_v20  ;;  %v4926_v19 = vld [vmem:[%s8533_s0 + $0xe4] sm:$0xf]  ;;  %v3826_v20 = vld [vmem:[%s8533_s0 + $0xe8] sm:$0xf0] }
  0xb0   :  { %v3801_v33 = vor.u32 %v4921_v24, %v3800_v23  ;;  %v5056_v23 = vld [vmem:[%s8533_s0 + $0x4f4] sm:$0xf]  ;;  %v4346_v24 = vld [vmem:[%s8533_s0 + $0x4f8] sm:$0xf0] }
  0xb1   :  { %v2559_v36 = vadd.f32 %v2558_v1, %v1910_v35  ;;  %1948 = vmatmul.bf16.gmra.mxu0 %v3785_v32  ;;  %2268 = vmatmul.bf16.gmra.mxu2 %v4297_v34  ;;  %v4305_v1 = vor.u32 %v5047_v58, %v4304_v57  ;;  %v3808_v57 = vld [vmem:[%s8533_s0 + $0xc0] sm:$0xf]  ;;  %v4923_v58 = vld [vmem:[%s8533_s0 + $0xc4] sm:$0xf0] }
  0xb2   :  { %v5532_v37 = vpop.f32.mrf.mxu3 }
  0xb3   :  { %v3195_v38 = vmax.f32 %v2559_v36, 0.0  ;;  %v4313_v36 = vor.u32 %v5049_v29, %v4312_v28  ;;  %v3816_v28 = vld [vmem:[%s8533_s0 + $0xd0] sm:$0xf]  ;;  %v4925_v29 = vld [vmem:[%s8533_s0 + $0xd4] sm:$0xf0] }
  0xb4   :  { %v2565_v39 = vpop.f32.mrf.mxu1  ;;  %v2229_v40 = vpop.f32.mrf.mxu2 }
  0xb5   :  { %3452 = vst.msk [vmem:[%s8535_s3 + $0x10] sm:$0xff] %vm3449_vm3, %v3195_v38  ;;  %v2230_v41 = vadd.f32 %v5477_v2, %v2229_v40 }
  0xb6   :  { %v1911_v42 = vpop.f32.mrf.mxu0 }
  0xb7   :  { %v1912_v43 = vadd.f32 %v5477_v2, %v1911_v42  ;;  %v2879_v46 = vadd.f32 %v5452_v55, %v2230_v41 }
  0xb9   :  { %v2561_v47 = vadd.f32 %v2560_v13, %v1912_v43  ;;  %v3323_v50 = vmax.f32 %v2879_v46, 0.0 }
  0xba   :  { %v5559_v54 = vpop.f32.mrf.mxu3 }
  0xbb   :  { %v3196_v55 = vmax.f32 %v2561_v47, 0.0  ;;  %3580 = vst.msk [vmem:[%s8535_s3 + $0x410] sm:$0xff] %vm3449_vm3, %v3323_v50 }
  0xbc   :  { %v2568_v56 = vpop.f32.mrf.mxu1  ;;  %v2231_v60 = vpop.f32.mrf.mxu2 }
  0xbd   :  { %3453 = vst.msk [vmem:[%s8535_s3 + $0x18] sm:$0xff] %vm3449_vm3, %v3196_v55  ;;  %v2232_v62 = vadd.f32 %v5477_v2, %v2231_v60 }
  0xbe   :  { %v1914_v63 = vpop.f32.mrf.mxu0 }
  0xbf   :  { %4781 = vmatmul.msk.bf16.gmra.mxu1 %vm1503_vm2, %v3805_v51  ;;  %v1915_v3 = vadd.f32 %v5477_v2, %v1914_v63  ;;  %4846 = vmatmul.msk.bf16.gmra.mxu3 %vm1503_vm2, %v4325_v59  ;;  %v2881_v4 = vadd.f32 %v5472_v0, %v2232_v62  ;;  %v5051_v62 = vld [vmem:[%s8533_s0 + $0x4c4] sm:$0xf0]  ;;  %v4341_v63 = vor.u32 %v5054_v52, %v4338_v53  ;;  %v4928_v52 = vld [vmem:[%s8533_s0 + $0xf4] sm:$0xf]  ;;  %v3834_v53 = vld [vmem:[%s8533_s0 + $0xf8] sm:$0xf0] }
  0xc1   :  { %v2564_v5 = vadd.f32 %v2563_v27, %v1915_v3  ;;  %1953 = vmatmul.bf16.gmra.mxu0 %v3793_v61  ;;  %v3324_v6 = vmax.f32 %v2881_v4, 0.0  ;;  %2273 = vmatmul.bf16.gmra.mxu2 %v4305_v1  ;;  %v4320_v61 = vld [vmem:[%s8533_s0 + $0x4c0] sm:$0xf]  ;;  %v3809_v3 = vor.u32 %v4923_v58, %v3808_v57  ;;  %v5058_v57 = vld [vmem:[%s8533_s0 + $0x504] sm:$0xf] }
  0xc2   :  { %v5580_v7 = vpop.f32.mrf.mxu3  ;;  %v4354_v58 = vld [vmem:[%s8533_s0 + $0x508] sm:$0xf0] }
  0xc3   :  { %v3197_v8 = vmax.f32 %v2564_v5, 0.0  ;;  %3581 = vst.msk [vmem:[%s8535_s3 + $0x418] sm:$0xff] %vm3449_vm3, %v3324_v6  ;;  %v4321_v6 = vor.u32 %v5051_v62, %v4320_v61  ;;  %v3824_v61 = vld [vmem:[%s8533_s0 + $0xe0] sm:$0xf]  ;;  %v4927_v62 = vld [vmem:[%s8533_s0 + $0xe4] sm:$0xf0] }
  0xc4   :  { %v2570_v9 = vpop.f32.mrf.mxu1  ;;  %v2234_v10 = vpop.f32.mrf.mxu2 }
  0xc5   :  { %3454 = vst.msk [vmem:[%s8535_s3 + $0x20] sm:$0xff] %vm3449_vm3, %v3197_v8  ;;  %v2235_v0 = vadd.f32 %v5477_v2, %v2234_v10 }
  0xc6   :  { %v1916_v12 = vpop.f32.mrf.mxu0 }
  0xc7   :  { %v1917_v13 = vadd.f32 %v5477_v2, %v1916_v12  ;;  %v2884_v17 = vadd.f32 %v5488_v11, %v2235_v0 }
  0xc9   :  { %v2566_v18 = vadd.f32 %v2565_v39, %v1917_v13  ;;  %v3325_v21 = vmax.f32 %v2884_v17, 0.0 }
  0xca   :  { %v5611_v11 = vpop.f32.mrf.mxu3 }
  0xcb   :  { %v3198_v26 = vmax.f32 %v2566_v18, 0.0  ;;  %3582 = vst.msk [vmem:[%s8535_s3 + $0x420] sm:$0xff] %vm3449_vm3, %v3325_v21 }
  0xcc   :  { %v2573_v27 = vpop.f32.mrf.mxu1  ;;  %v2236_v32 = vpop.f32.mrf.mxu2 }
  0xcd   :  { %3455 = vst.msk [vmem:[%s8535_s3 + $0x28] sm:$0xff] %vm3449_vm3, %v3198_v26  ;;  %v2237_v34 = vadd.f32 %v5477_v2, %v2236_v32 }
  0xce   :  { %v1919_v35 = vpop.f32.mrf.mxu0 }
  0xcf   :  { %4782 = vmatmul.msk.bf16.gmra.mxu1 %vm1503_vm2, %v3813_v22  ;;  %v1920_v38 = vadd.f32 %v5477_v2, %v1919_v35  ;;  %4847 = vmatmul.msk.bf16.gmra.mxu3 %vm1503_vm2, %v4333_v30  ;;  %v2886_v39 = vadd.f32 %v5515_v25, %v2237_v34  ;;  %v5053_v34 = vld [vmem:[%s8533_s0 + $0x4d4] sm:$0xf0]  ;;  %v4349_v35 = vor.u32 %v5056_v23, %v4346_v24  ;;  %v4930_v23 = vld [vmem:[%s8533_s0 + $0x104] sm:$0xf]  ;;  %v3842_v24 = vld [vmem:[%s8533_s0 + $0x108] sm:$0xf0] }
  0xd1   :  { %v2569_v40 = vadd.f32 %v2568_v56, %v1920_v38  ;;  %1958 = vmatmul.bf16.gmra.mxu0 %v3801_v33  ;;  %v3326_v41 = vmax.f32 %v2886_v39, 0.0  ;;  %2278 = vmatmul.bf16.gmra.mxu2 %v4313_v36  ;;  %v3821_v56 = vor.u32 %v4924_v48, %v3818_v49  ;;  %v4328_v33 = vld [vmem:[%s8533_s0 + $0x4d0] sm:$0xf]  ;;  %v3817_v38 = vor.u32 %v4925_v29, %v3816_v28  ;;  %v5060_v28 = vld [vmem:[%s8533_s0 + $0x514] sm:$0xf] }
  0xd2   :  { %v5632_v42 = vpop.f32.mrf.mxu3  ;;  %v4362_v29 = vld [vmem:[%s8533_s0 + $0x518] sm:$0xf0] }
  0xd3   :  { %v3199_v43 = vmax.f32 %v2569_v40, 0.0  ;;  %3583 = vst.msk [vmem:[%s8535_s3 + $0x428] sm:$0xff] %vm3449_vm3, %v3326_v41  ;;  %v4329_v41 = vor.u32 %v5053_v34, %v4328_v33  ;;  %v3832_v33 = vld [vmem:[%s8533_s0 + $0xf0] sm:$0xf]  ;;  %v4929_v34 = vld [vmem:[%s8533_s0 + $0xf4] sm:$0xf0] }
  0xd4   :  { %v2575_v44 = vpop.f32.mrf.mxu1  ;;  %v2239_v45 = vpop.f32.mrf.mxu2 }
  0xd5   :  { %3456 = vst.msk [vmem:[%s8535_s3 + $0x30] sm:$0xff] %vm3449_vm3, %v3199_v43  ;;  %v2240_v25 = vadd.f32 %v5477_v2, %v2239_v45 }
  0xd6   :  { %v1921_v46 = vpop.f32.mrf.mxu0 }
  0xd7   :  { %v1922_v47 = vadd.f32 %v5477_v2, %v1921_v46  ;;  %v2889_v50 = vadd.f32 %v5532_v37, %v2240_v25 }
  0xd9   :  { %v2571_v51 = vadd.f32 %v2570_v9, %v1922_v47  ;;  %v3327_v55 = vmax.f32 %v2889_v50, 0.0 }
  0xda   :  { %v5663_v37 = vpop.f32.mrf.mxu3 }
  0xdb   :  { %v3200_v59 = vmax.f32 %v2571_v51, 0.0  ;;  %3584 = vst.msk [vmem:[%s8535_s3 + $0x430] sm:$0xff] %vm3449_vm3, %v3327_v55 }
  0xdc   :  { %v2578_v60 = vpop.f32.mrf.mxu1  ;;  %v2241_v1 = vpop.f32.mrf.mxu2 }
  0xdd   :  { %3457 = vst.msk [vmem:[%s8535_s3 + $0x38] sm:$0xff] %vm3449_vm3, %v3200_v59  ;;  %v2242_v4 = vadd.f32 %v5477_v2, %v2241_v1 }
  0xde   :  { %v1924_v5 = vpop.f32.mrf.mxu0 }
  0xdf   :  { %4783 = vmatmul.msk.bf16.gmra.mxu1 %vm1503_vm2, %v3821_v56  ;;  %v1925_v8 = vadd.f32 %v5477_v2, %v1924_v5  ;;  %4848 = vmatmul.msk.bf16.gmra.mxu3 %vm1503_vm2, %v4341_v63  ;;  %v2891_v9 = vadd.f32 %v5559_v54, %v2242_v4  ;;  %v5055_v4 = vld [vmem:[%s8533_s0 + $0x4e4] sm:$0xf0]  ;;  %v4357_v5 = vor.u32 %v5058_v57, %v4354_v58  ;;  %v4932_v57 = vld [vmem:[%s8533_s0 + $0x114] sm:$0xf]  ;;  %v3850_v58 = vld [vmem:[%s8533_s0 + $0x118] sm:$0xf0] }
  0xe1   :  { %v2574_v10 = vadd.f32 %v2573_v27, %v1925_v8  ;;  %1963 = vmatmul.bf16.gmra.mxu0 %v3809_v3  ;;  %v3328_v0 = vmax.f32 %v2891_v9, 0.0  ;;  %2283 = vmatmul.bf16.gmra.mxu2 %v4321_v6  ;;  %v3829_v27 = vor.u32 %v4926_v19, %v3826_v20  ;;  %v4336_v3 = vld [vmem:[%s8533_s0 + $0x4e0] sm:$0xf]  ;;  %v3825_v8 = vor.u32 %v4927_v62, %v3824_v61  ;;  %v5062_v61 = vld [vmem:[%s8533_s0 + $0x524] sm:$0xf] }
  0xe2   :  { %v5684_v12 = vpop.f32.mrf.mxu3  ;;  %v4370_v62 = vld [vmem:[%s8533_s0 + $0x528] sm:$0xf0] }
  0xe3   :  { %v3201_v13 = vmax.f32 %v2574_v10, 0.0  ;;  %3585 = vst.msk [vmem:[%s8535_s3 + $0x438] sm:$0xff] %vm3449_vm3, %v3328_v0  ;;  %v4337_v0 = vor.u32 %v5055_v4, %v4336_v3  ;;  %v3840_v3 = vld [vmem:[%s8533_s0 + $0x100] sm:$0xf]  ;;  %v4931_v4 = vld [vmem:[%s8533_s0 + $0x104] sm:$0xf0] }
  0xe4   :  { %v2580_v15 = vpop.f32.mrf.mxu1  ;;  %v2244_v16 = vpop.f32.mrf.mxu2 }
  0xe5   :  { %3458 = vst.msk [vmem:[%s8535_s3 + $0x40] sm:$0xff] %vm3449_vm3, %v3201_v13  ;;  %v2245_v54 = vadd.f32 %v5477_v2, %v2244_v16 }
  0xe6   :  { %v1926_v17 = vpop.f32.mrf.mxu0 }
  0xe7   :  { %v1927_v18 = vadd.f32 %v5477_v2, %v1926_v17  ;;  %v2894_v21 = vadd.f32 %v5580_v7, %v2245_v54 }
  0xe9   :  { %v2576_v22 = vadd.f32 %v2575_v44, %v1927_v18  ;;  %v3329_v26 = vmax.f32 %v2894_v21, 0.0 }
  0xea   :  { %v5715_v7 = vpop.f32.mrf.mxu3 }
  0xeb   :  { %v3202_v30 = vmax.f32 %v2576_v22, 0.0  ;;  %3586 = vst.msk [vmem:[%s8535_s3 + $0x440] sm:$0xff] %vm3449_vm3, %v3329_v26 }
  0xec   :  { %v2583_v32 = vpop.f32.mrf.mxu1  ;;  %v2246_v36 = vpop.f32.mrf.mxu2 }
  0xed   :  { %3459 = vst.msk [vmem:[%s8535_s3 + $0x48] sm:$0xff] %vm3449_vm3, %v3202_v30  ;;  %v2247_v39 = vadd.f32 %v5477_v2, %v2246_v36 }
  0xee   :  { %v1929_v40 = vpop.f32.mrf.mxu0 }
  0xef   :  { %4784 = vmatmul.msk.bf16.gmra.mxu1 %vm1503_vm2, %v3829_v27  ;;  %v1930_v43 = vadd.f32 %v5477_v2, %v1929_v40  ;;  %4849 = vmatmul.msk.bf16.gmra.mxu3 %vm1503_vm2, %v4349_v35  ;;  %v2896_v44 = vadd.f32 %v5611_v11, %v2247_v39  ;;  %v5057_v39 = vld [vmem:[%s8533_s0 + $0x4f4] sm:$0xf0]  ;;  %v4365_v40 = vor.u32 %v5060_v28, %v4362_v29  ;;  %v4934_v28 = vld [vmem:[%s8533_s0 + $0x124] sm:$0xf]  ;;  %v3858_v29 = vld [vmem:[%s8533_s0 + $0x128] sm:$0xf0] }
  0xf1   :  { %v2579_v45 = vadd.f32 %v2578_v60, %v1930_v43  ;;  %1968 = vmatmul.bf16.gmra.mxu0 %v3817_v38  ;;  %v3330_v25 = vmax.f32 %v2896_v44, 0.0  ;;  %2288 = vmatmul.bf16.gmra.mxu2 %v4329_v41  ;;  %v3837_v60 = vor.u32 %v4928_v52, %v3834_v53  ;;  %v4344_v38 = vld [vmem:[%s8533_s0 + $0x4f0] sm:$0xf]  ;;  %v3833_v43 = vor.u32 %v4929_v34, %v3832_v33  ;;  %v5064_v33 = vld [vmem:[%s8533_s0 + $0x534] sm:$0xf] }
  0xf2   :  { %v5736_v46 = vpop.f32.mrf.mxu3  ;;  %v4378_v34 = vld [vmem:[%s8533_s0 + $0x538] sm:$0xf0] }
  0xf3   :  { %v3203_v47 = vmax.f32 %v2579_v45, 0.0  ;;  %3587 = vst.msk [vmem:[%s8535_s3 + $0x448] sm:$0xff] %vm3449_vm3, %v3330_v25  ;;  %v4345_v25 = vor.u32 %v5057_v39, %v4344_v38  ;;  %v3848_v38 = vld [vmem:[%s8533_s0 + $0x110] sm:$0xf]  ;;  %v4933_v39 = vld [vmem:[%s8533_s0 + $0x114] sm:$0xf0] }
  0xf4   :  { %v2585_v48 = vpop.f32.mrf.mxu1  ;;  %v2249_v49 = vpop.f32.mrf.mxu2 }
  0xf5   :  { %3460 = vst.msk [vmem:[%s8535_s3 + $0x50] sm:$0xff] %vm3449_vm3, %v3203_v47  ;;  %v2250_v11 = vadd.f32 %v5477_v2, %v2249_v49 }
  0xf6   :  { %v1931_v50 = vpop.f32.mrf.mxu0 }
  0xf7   :  { %v1932_v51 = vadd.f32 %v5477_v2, %v1931_v50  ;;  %v2899_v55 = vadd.f32 %v5632_v42, %v2250_v11 }
  0xf9   :  { %v2581_v56 = vadd.f32 %v2580_v15, %v1932_v51  ;;  %v3331_v59 = vmax.f32 %v2899_v55, 0.0 }
  0xfa   :  { %v5767_v42 = vpop.f32.mrf.mxu3 }
  0xfb   :  { %v3204_v63 = vmax.f32 %v2581_v56, 0.0  ;;  %3588 = vst.msk [vmem:[%s8535_s3 + $0x450] sm:$0xff] %vm3449_vm3, %v3331_v59 }
  0xfc   :  { %v2588_v1 = vpop.f32.mrf.mxu1  ;;  %v2251_v6 = vpop.f32.mrf.mxu2 }
  0xfd   :  { %3461 = vst.msk [vmem:[%s8535_s3 + $0x58] sm:$0xff] %vm3449_vm3, %v3204_v63  ;;  %v2252_v9 = vadd.f32 %v5477_v2, %v2251_v6 }
  0xfe   :  { %v1934_v10 = vpop.f32.mrf.mxu0 }
  0xff   :  { %4785 = vmatmul.msk.bf16.gmra.mxu1 %vm1503_vm2, %v3837_v60  ;;  %v1935_v13 = vadd.f32 %v5477_v2, %v1934_v10  ;;  %4850 = vmatmul.msk.bf16.gmra.mxu3 %vm1503_vm2, %v4357_v5  ;;  %v2901_v15 = vadd.f32 %v5663_v37, %v2252_v9  ;;  %v5059_v9 = vld [vmem:[%s8533_s0 + $0x504] sm:$0xf0]  ;;  %v4373_v10 = vor.u32 %v5062_v61, %v4370_v62  ;;  %v4936_v61 = vld [vmem:[%s8533_s0 + $0x134] sm:$0xf]  ;;  %v3866_v62 = vld [vmem:[%s8533_s0 + $0x138] sm:$0xf0] }
 0x101   :  { %v2584_v16 = vadd.f32 %v2583_v32, %v1935_v13  ;;  %1973 = vmatmul.bf16.gmra.mxu0 %v3825_v8  ;;  %v3332_v54 = vmax.f32 %v2901_v15, 0.0  ;;  %2293 = vmatmul.bf16.gmra.mxu2 %v4337_v0  ;;  %v3845_v32 = vor.u32 %v4930_v23, %v3842_v24  ;;  %v4352_v8 = vld [vmem:[%s8533_s0 + $0x500] sm:$0xf]  ;;  %v3841_v13 = vor.u32 %v4931_v4, %v3840_v3  ;;  %v5066_v3 = vld [vmem:[%s8533_s0 + $0x544] sm:$0xf] }
 0x102   :  { %v5788_v17 = vpop.f32.mrf.mxu3  ;;  %v4386_v4 = vld [vmem:[%s8533_s0 + $0x548] sm:$0xf0] }
 0x103   :  { %v3205_v18 = vmax.f32 %v2584_v16, 0.0  ;;  %3589 = vst.msk [vmem:[%s8535_s3 + $0x458] sm:$0xff] %vm3449_vm3, %v3332_v54  ;;  %v4353_v54 = vor.u32 %v5059_v9, %v4352_v8  ;;  %v3856_v8 = vld [vmem:[%s8533_s0 + $0x120] sm:$0xf]  ;;  %v4935_v9 = vld [vmem:[%s8533_s0 + $0x124] sm:$0xf0] }
 0x104   :  { %v2590_v19 = vpop.f32.mrf.mxu1  ;;  %v2254_v20 = vpop.f32.mrf.mxu2 }
 0x105   :  { %3462 = vst.msk [vmem:[%s8535_s3 + $0x60] sm:$0xff] %vm3449_vm3, %v3205_v18  ;;  %v2255_v37 = vadd.f32 %v5477_v2, %v2254_v20 }
 0x106   :  { %v1936_v21 = vpop.f32.mrf.mxu0 }
 0x107   :  { %v1937_v22 = vadd.f32 %v5477_v2, %v1936_v21  ;;  %v2904_v26 = vadd.f32 %v5684_v12, %v2255_v37 }
 0x109   :  { %v2586_v27 = vadd.f32 %v2585_v48, %v1937_v22  ;;  %v3333_v30 = vmax.f32 %v2904_v26, 0.0 }
 0x10a   :  { %v5819_v12 = vpop.f32.mrf.mxu3 }
 0x10b   :  { %v3206_v35 = vmax.f32 %v2586_v27, 0.0  ;;  %3590 = vst.msk [vmem:[%s8535_s3 + $0x460] sm:$0xff] %vm3449_vm3, %v3333_v30 }
 0x10c   :  { %v2593_v36 = vpop.f32.mrf.mxu1  ;;  %v2256_v41 = vpop.f32.mrf.mxu2 }
 0x10d   :  { %3463 = vst.msk [vmem:[%s8535_s3 + $0x68] sm:$0xff] %vm3449_vm3, %v3206_v35  ;;  %v2257_v44 = vadd.f32 %v5477_v2, %v2256_v41 }
 0x10e   :  { %v1939_v45 = vpop.f32.mrf.mxu0 }
 0x10f   :  { %4786 = vmatmul.msk.bf16.gmra.mxu1 %vm1503_vm2, %v3845_v32  ;;  %v1940_v47 = vadd.f32 %v5477_v2, %v1939_v45  ;;  %4851 = vmatmul.msk.bf16.gmra.mxu3 %vm1503_vm2, %v4365_v40  ;;  %v2906_v48 = vadd.f32 %v5715_v7, %v2257_v44  ;;  %v5061_v44 = vld [vmem:[%s8533_s0 + $0x514] sm:$0xf0]  ;;  %v4381_v45 = vor.u32 %v5064_v33, %v4378_v34  ;;  %v4938_v33 = vld [vmem:[%s8533_s0 + $0x144] sm:$0xf]  ;;  %v3874_v34 = vld [vmem:[%s8533_s0 + $0x148] sm:$0xf0] }
 0x111   :  { %v2589_v49 = vadd.f32 %v2588_v1, %v1940_v47  ;;  %1978 = vmatmul.bf16.gmra.mxu0 %v3833_v43  ;;  %v3334_v11 = vmax.f32 %v2906_v48, 0.0  ;;  %2298 = vmatmul.bf16.gmra.mxu2 %v4345_v25  ;;  %v3853_v1 = vor.u32 %v4932_v57, %v3850_v58  ;;  %v4360_v43 = vld [vmem:[%s8533_s0 + $0x510] sm:$0xf]  ;;  %v3849_v47 = vor.u32 %v4933_v39, %v3848_v38  ;;  %v5068_v38 = vld [vmem:[%s8533_s0 + $0x554] sm:$0xf] }
 0x112   :  { %v5840_v50 = vpop.f32.mrf.mxu3  ;;  %v4394_v39 = vld [vmem:[%s8533_s0 + $0x558] sm:$0xf0] }
 0x113   :  { %v3207_v51 = vmax.f32 %v2589_v49, 0.0  ;;  %3591 = vst.msk [vmem:[%s8535_s3 + $0x468] sm:$0xff] %vm3449_vm3, %v3334_v11  ;;  %v4361_v11 = vor.u32 %v5061_v44, %v4360_v43  ;;  %v3864_v43 = vld [vmem:[%s8533_s0 + $0x130] sm:$0xf]  ;;  %v4937_v44 = vld [vmem:[%s8533_s0 + $0x134] sm:$0xf0] }
 0x114   :  { %v2595_v52 = vpop.f32.mrf.mxu1  ;;  %v2259_v53 = vpop.f32.mrf.mxu2 }
 0x115   :  { %3464 = vst.msk [vmem:[%s8535_s3 + $0x70] sm:$0xff] %vm3449_vm3, %v3207_v51  ;;  %v2260_v7 = vadd.f32 %v5477_v2, %v2259_v53 }
 0x116   :  { %v1941_v55 = vpop.f32.mrf.mxu0 }
 0x117   :  { %v1942_v56 = vadd.f32 %v5477_v2, %v1941_v55  ;;  %v2909_v59 = vadd.f32 %v5736_v46, %v2260_v7 }
 0x119   :  { %v2591_v60 = vadd.f32 %v2590_v19, %v1942_v56  ;;  %v3335_v63 = vmax.f32 %v2909_v59, 0.0 }
 0x11a   :  { %v5871_v46 = vpop.f32.mrf.mxu3 }
 0x11b   :  { %v3208_v5 = vmax.f32 %v2591_v60, 0.0  ;;  %3592 = vst.msk [vmem:[%s8535_s3 + $0x470] sm:$0xff] %vm3449_vm3, %v3335_v63 }
 0x11c   :  { %v2598_v6 = vpop.f32.mrf.mxu1  ;;  %v2261_v0 = vpop.f32.mrf.mxu2 }
 0x11d   :  { %3465 = vst.msk [vmem:[%s8535_s3 + $0x78] sm:$0xff] %vm3449_vm3, %v3208_v5  ;;  %v2262_v15 = vadd.f32 %v5477_v2, %v2261_v0 }
 0x11e   :  { %v1944_v16 = vpop.f32.mrf.mxu0 }
 0x11f   :  { %4787 = vmatmul.msk.bf16.gmra.mxu1 %vm1503_vm2, %v3853_v1  ;;  %v1945_v18 = vadd.f32 %v5477_v2, %v1944_v16  ;;  %4852 = vmatmul.msk.bf16.gmra.mxu3 %vm1503_vm2, %v4373_v10  ;;  %v2911_v19 = vadd.f32 %v5767_v42, %v2262_v15  ;;  %v5063_v15 = vld [vmem:[%s8533_s0 + $0x524] sm:$0xf0]  ;;  %v4389_v16 = vor.u32 %v5066_v3, %v4386_v4  ;;  %v4940_v3 = vld [vmem:[%s8533_s0 + $0x154] sm:$0xf]  ;;  %v3882_v4 = vld [vmem:[%s8533_s0 + $0x158] sm:$0xf0] }
 0x121   :  { %v2594_v20 = vadd.f32 %v2593_v36, %v1945_v18  ;;  %1983 = vmatmul.bf16.gmra.mxu0 %v3841_v13  ;;  %v3336_v37 = vmax.f32 %v2911_v19, 0.0  ;;  %2303 = vmatmul.bf16.gmra.mxu2 %v4353_v54  ;;  %v3861_v36 = vor.u32 %v4934_v28, %v3858_v29  ;;  %v4368_v13 = vld [vmem:[%s8533_s0 + $0x520] sm:$0xf]  ;;  %v3857_v18 = vor.u32 %v4935_v9, %v3856_v8  ;;  %v5070_v8 = vld [vmem:[%s8533_s0 + $0x564] sm:$0xf] }
 0x122   :  { %v5892_v21 = vpop.f32.mrf.mxu3  ;;  %v4402_v9 = vld [vmem:[%s8533_s0 + $0x568] sm:$0xf0] }
 0x123   :  { %v3209_v22 = vmax.f32 %v2594_v20, 0.0  ;;  %3593 = vst.msk [vmem:[%s8535_s3 + $0x478] sm:$0xff] %vm3449_vm3, %v3336_v37  ;;  %v4369_v37 = vor.u32 %v5063_v15, %v4368_v13  ;;  %v3872_v13 = vld [vmem:[%s8533_s0 + $0x140] sm:$0xf]  ;;  %v4939_v15 = vld [vmem:[%s8533_s0 + $0x144] sm:$0xf0] }
 0x124   :  { %v2600_v23 = vpop.f32.mrf.mxu1  ;;  %v2264_v24 = vpop.f32.mrf.mxu2 }
 0x125   :  { %3466 = vst.msk [vmem:[%s8535_s3 + $0x80] sm:$0xff] %vm3449_vm3, %v3209_v22  ;;  %v2265_v42 = vadd.f32 %v5477_v2, %v2264_v24 }
 0x126   :  { %v1946_v26 = vpop.f32.mrf.mxu0 }
 0x127   :  { %v1947_v27 = vadd.f32 %v5477_v2, %v1946_v26  ;;  %v2914_v30 = vadd.f32 %v5788_v17, %v2265_v42 }
 0x129   :  { %v2596_v32 = vadd.f32 %v2595_v52, %v1947_v27  ;;  %v3337_v35 = vmax.f32 %v2914_v30, 0.0 }
 0x12a   :  { %v5923_v17 = vpop.f32.mrf.mxu3 }
 0x12b   :  { %v3210_v40 = vmax.f32 %v2596_v32, 0.0  ;;  %3594 = vst.msk [vmem:[%s8535_s3 + $0x480] sm:$0xff] %vm3449_vm3, %v3337_v35 }
 0x12c   :  { %v2603_v41 = vpop.f32.mrf.mxu1  ;;  %v2266_v25 = vpop.f32.mrf.mxu2 }
 0x12d   :  { %3467 = vst.msk [vmem:[%s8535_s3 + $0x88] sm:$0xff] %vm3449_vm3, %v3210_v40  ;;  %v2267_v48 = vadd.f32 %v5477_v2, %v2266_v25 }
 0x12e   :  { %v1949_v49 = vpop.f32.mrf.mxu0 }
 0x12f   :  { %4788 = vmatmul.msk.bf16.gmra.mxu1 %vm1503_vm2, %v3861_v36  ;;  %v1950_v51 = vadd.f32 %v5477_v2, %v1949_v49  ;;  %4853 = vmatmul.msk.bf16.gmra.mxu3 %vm1503_vm2, %v4381_v45  ;;  %v2916_v52 = vadd.f32 %v5819_v12, %v2267_v48  ;;  %v5065_v48 = vld [vmem:[%s8533_s0 + $0x534] sm:$0xf0]  ;;  %v4397_v49 = vor.u32 %v5068_v38, %v4394_v39  ;;  %v4942_v38 = vld [vmem:[%s8533_s0 + $0x164] sm:$0xf]  ;;  %v3890_v39 = vld [vmem:[%s8533_s0 + $0x168] sm:$0xf0] }
 0x131   :  { %v2599_v53 = vadd.f32 %v2598_v6, %v1950_v51  ;;  %1988 = vmatmul.bf16.gmra.mxu0 %v3849_v47  ;;  %v3338_v7 = vmax.f32 %v2916_v52, 0.0  ;;  %2308 = vmatmul.bf16.gmra.mxu2 %v4361_v11  ;;  %v3869_v6 = vor.u32 %v4936_v61, %v3866_v62  ;;  %v4376_v47 = vld [vmem:[%s8533_s0 + $0x530] sm:$0xf]  ;;  %v3865_v51 = vor.u32 %v4937_v44, %v3864_v43  ;;  %v5072_v43 = vld [vmem:[%s8533_s0 + $0x574] sm:$0xf] }
 0x132   :  { %v5944_v55 = vpop.f32.mrf.mxu3  ;;  %v4410_v44 = vld [vmem:[%s8533_s0 + $0x578] sm:$0xf0] }
 0x133   :  { %v3211_v56 = vmax.f32 %v2599_v53, 0.0  ;;  %3595 = vst.msk [vmem:[%s8535_s3 + $0x488] sm:$0xff] %vm3449_vm3, %v3338_v7  ;;  %v4377_v7 = vor.u32 %v5065_v48, %v4376_v47  ;;  %v4941_v47 = vld [vmem:[%s8533_s0 + $0x154] sm:$0xf0] }
 0x134   :  { %v2605_v57 = vpop.f32.mrf.mxu1  ;;  %v2269_v58 = vpop.f32.mrf.mxu2 }
 0x135   :  { %3468 = vst.msk [vmem:[%s8535_s3 + $0x90] sm:$0xff] %vm3449_vm3, %v3211_v56  ;;  %v2270_v12 = vadd.f32 %v5477_v2, %v2269_v58 }
 0x136   :  { %v1951_v59 = vpop.f32.mrf.mxu0 }
 0x137   :  { %v1952_v60 = vadd.f32 %v5477_v2, %v1951_v59  ;;  %v2919_v63 = vadd.f32 %v5840_v50, %v2270_v12 }
 0x139   :  { %v2601_v1 = vadd.f32 %v2600_v23, %v1952_v60  ;;  %v3339_v5 = vmax.f32 %v2919_v63, 0.0 }
 0x13a   :  { %v5975_v50 = vpop.f32.mrf.mxu3 }
 0x13b   :  { %v3212_v10 = vmax.f32 %v2601_v1, 0.0  ;;  %3596 = vst.msk [vmem:[%s8535_s3 + $0x490] sm:$0xff] %vm3449_vm3, %v3339_v5 }
 0x13c   :  { %v2608_v0 = vpop.f32.mrf.mxu1  ;;  %v2271_v54 = vpop.f32.mrf.mxu2 }
 0x13d   :  { %3469 = vst.msk [vmem:[%s8535_s3 + $0x98] sm:$0xff] %vm3449_vm3, %v3212_v10  ;;  %v2272_v19 = vadd.f32 %v5477_v2, %v2271_v54 }
 0x13e   :  { %v1954_v20 = vpop.f32.mrf.mxu0 }
 0x13f   :  { %4789 = vmatmul.msk.bf16.gmra.mxu1 %vm1503_vm2, %v3869_v6  ;;  %v1955_v22 = vadd.f32 %v5477_v2, %v1954_v20  ;;  %4854 = vmatmul.msk.bf16.gmra.mxu3 %vm1503_vm2, %v4389_v16  ;;  %v2921_v23 = vadd.f32 %v5871_v46, %v2272_v19  ;;  %v5067_v19 = vld [vmem:[%s8533_s0 + $0x544] sm:$0xf0]  ;;  %v4405_v20 = vor.u32 %v5070_v8, %v4402_v9  ;;  %v4944_v8 = vld [vmem:[%s8533_s0 + $0x174] sm:$0xf]  ;;  %v3898_v9 = vld [vmem:[%s8533_s0 + $0x178] sm:$0xf0] }
 0x141   :  { %v2604_v24 = vadd.f32 %v2603_v41, %v1955_v22  ;;  %1993 = vmatmul.bf16.gmra.mxu0 %v3857_v18  ;;  %v3340_v42 = vmax.f32 %v2921_v23, 0.0  ;;  %2313 = vmatmul.bf16.gmra.mxu2 %v4369_v37  ;;  %v3877_v41 = vor.u32 %v4938_v33, %v3874_v34  ;;  %v4384_v18 = vld [vmem:[%s8533_s0 + $0x540] sm:$0xf]  ;;  %v3873_v22 = vor.u32 %v4939_v15, %v3872_v13  ;;  %v5074_v13 = vld [vmem:[%s8533_s0 + $0x584] sm:$0xf] }
 0x142   :  { %v5996_v26 = vpop.f32.mrf.mxu3  ;;  %v4418_v15 = vld [vmem:[%s8533_s0 + $0x588] sm:$0xf0] }
 0x143   :  { %v3213_v27 = vmax.f32 %v2604_v24, 0.0  ;;  %3597 = vst.msk [vmem:[%s8535_s3 + $0x498] sm:$0xff] %vm3449_vm3, %v3340_v42  ;;  %v4385_v42 = vor.u32 %v5067_v19, %v4384_v18  ;;  %v3888_v18 = vld [vmem:[%s8533_s0 + $0x160] sm:$0xf]  ;;  %v4943_v19 = vld [vmem:[%s8533_s0 + $0x164] sm:$0xf0] }
 0x144   :  { %v2610_v28 = vpop.f32.mrf.mxu1  ;;  %v2274_v29 = vpop.f32.mrf.mxu2 }
 0x145   :  { %3470 = vst.msk [vmem:[%s8535_s3 + $0xa0] sm:$0xff] %vm3449_vm3, %v3213_v27  ;;  %v2275_v46 = vadd.f32 %v5477_v2, %v2274_v29 }
 0x146   :  { %v1956_v30 = vpop.f32.mrf.mxu0 }
 0x147   :  { %v1957_v32 = vadd.f32 %v5477_v2, %v1956_v30  ;;  %v2924_v35 = vadd.f32 %v5892_v21, %v2275_v46 }
 0x149   :  { %v2606_v36 = vadd.f32 %v2605_v57, %v1957_v32  ;;  %v3341_v40 = vmax.f32 %v2924_v35, 0.0 }
 0x14a   :  { %v6027_v21 = vpop.f32.mrf.mxu3 }
 0x14b   :  { %v3214_v45 = vmax.f32 %v2606_v36, 0.0  ;;  %3598 = vst.msk [vmem:[%s8535_s3 + $0x4a0] sm:$0xff] %vm3449_vm3, %v3341_v40 }
 0x14c   :  { %v2613_v25 = vpop.f32.mrf.mxu1  ;;  %v2276_v11 = vpop.f32.mrf.mxu2 }
 0x14d   :  { %3471 = vst.msk [vmem:[%s8535_s3 + $0xa8] sm:$0xff] %vm3449_vm3, %v3214_v45  ;;  %v2277_v52 = vadd.f32 %v5477_v2, %v2276_v11  ;;  %v3893_v45 = vor.u32 %v4942_v38, %v3890_v39  ;;  %v4392_v11 = vld [vmem:[%s8533_s0 + $0x550] sm:$0xf] }
 0x14e   :  { %v1959_v53 = vpop.f32.mrf.mxu0 }
 0x14f   :  { %4790 = vmatmul.msk.bf16.gmra.mxu1 %vm1503_vm2, %v3877_v41  ;;  %v1960_v56 = vadd.f32 %v5477_v2, %v1959_v53  ;;  %4855 = vmatmul.msk.bf16.gmra.mxu3 %vm1503_vm2, %v4397_v49  ;;  %v2926_v57 = vadd.f32 %v5923_v17, %v2277_v52  ;;  %v4413_v52 = vor.u32 %v5072_v43, %v4410_v44  ;;  %v4946_v43 = vld [vmem:[%s8533_s0 + $0x184] sm:$0xf]  ;;  %v3906_v44 = vld [vmem:[%s8533_s0 + $0x188] sm:$0xf0] }
 0x151   :  { %v2609_v58 = vadd.f32 %v2608_v0, %v1960_v56  ;;  %1998 = vmatmul.bf16.gmra.mxu0 %v3865_v51  ;;  %v3342_v12 = vmax.f32 %v2926_v57, 0.0  ;;  %2318 = vmatmul.bf16.gmra.mxu2 %v4377_v7  ;;  %v3885_v0 = vor.u32 %v4940_v3, %v3882_v4  ;;  %v5069_v51 = vld [vmem:[%s8533_s0 + $0x554] sm:$0xf0]  ;;  %v6150_v56 = vld [vmem:[%s8534_s2] ss:$0 sm:$0xff] }
 0x152   :  { %v6048_v59 = vpop.f32.mrf.mxu3 }
 0x153   :  { %v3215_v60 = vmax.f32 %v2609_v58, 0.0  ;;  %3599 = vst.msk [vmem:[%s8535_s3 + $0x4a8] sm:$0xff] %vm3449_vm3, %v3342_v12  ;;  %v4393_v12 = vor.u32 %v5069_v51, %v4392_v11  ;;  %v3896_v11 = vld [vmem:[%s8533_s0 + $0x170] sm:$0xf]  ;;  %v4945_v51 = vld [vmem:[%s8533_s0 + $0x174] sm:$0xf0] }
 0x154   :  { %v2615_v61 = vpop.f32.mrf.mxu1  ;;  %v2279_v62 = vpop.f32.mrf.mxu2 }
 0x155   :  { %3472 = vst.msk [vmem:[%s8535_s3 + $0xb0] sm:$0xff] %vm3449_vm3, %v3215_v60  ;;  %v2280_v17 = vadd.f32 %v5477_v2, %v2279_v62 }
 0x156   :  { %v1961_v63 = vpop.f32.mrf.mxu0 }
 0x157   :  { %v1962_v1 = vadd.f32 %v5477_v2, %v1961_v63  ;;  %v2929_v5 = vadd.f32 %v5944_v55, %v2280_v17 }
 0x159   :  { %v2611_v6 = vadd.f32 %v2610_v28, %v1962_v1  ;;  %v3343_v10 = vmax.f32 %v2929_v5, 0.0 }
 0x15a   :  { %v6079_v55 = vpop.f32.mrf.mxu3 }
 0x15b   :  { %v3216_v16 = vmax.f32 %v2611_v6, 0.0  ;;  %3600 = vst.msk [vmem:[%s8535_s3 + $0x4b0] sm:$0xff] %vm3449_vm3, %v3343_v10 }
 0x15c   :  { %v2618_v54 = vpop.f32.mrf.mxu1  ;;  %v2281_v37 = vpop.f32.mrf.mxu2 }
 0x15d   :  { %3473 = vst.msk [vmem:[%s8535_s3 + $0xb8] sm:$0xff] %vm3449_vm3, %v3216_v16  ;;  %v2282_v23 = vadd.f32 %v5477_v2, %v2281_v37 }
 0x15e   :  { %v1964_v24 = vpop.f32.mrf.mxu0 }
 0x15f   :  { %4791 = vmatmul.msk.bf16.gmra.mxu1 %vm1503_vm2, %v3885_v0  ;;  %v1965_v27 = vadd.f32 %v5477_v2, %v1964_v24  ;;  %4856 = vmatmul.msk.bf16.gmra.mxu3 %vm1503_vm2, %v4405_v20  ;;  %v2931_v28 = vadd.f32 %v5975_v50, %v2282_v23  ;;  %v5071_v23 = vld [vmem:[%s8533_s0 + $0x564] sm:$0xf0]  ;;  %v4421_v24 = vor.u32 %v5074_v13, %v4418_v15  ;;  %v4948_v13 = vld [vmem:[%s8533_s0 + $0x194] sm:$0xf]  ;;  %v3914_v15 = vld [vmem:[%s8533_s0 + $0x198] sm:$0xf0] }
 0x161   :  { %v2614_v29 = vadd.f32 %v2613_v25, %v1965_v27  ;;  %2003 = vmatmul.bf16.gmra.mxu0 %v3873_v22  ;;  %v3344_v46 = vmax.f32 %v2931_v28, 0.0  ;;  %2323 = vmatmul.bf16.gmra.mxu2 %v4385_v42  ;;  %v3880_v25 = vld [vmem:[%s8533_s0 + $0x150] sm:$0xf]  ;;  %v4400_v22 = vld [vmem:[%s8533_s0 + $0x560] sm:$0xf]  ;;  %v3889_v27 = vor.u32 %v4943_v19, %v3888_v18 }
 0x162   :  { %v6100_v30 = vpop.f32.mrf.mxu3  ;;  %v3881_v7 = vor.u32 %v4941_v47, %v3880_v25  ;;  %v5076_v25 = vld [vmem:[%s8533_s0 + $0x594] sm:$0xf]  ;;  %v4426_v47 = vld [vmem:[%s8533_s0 + $0x598] sm:$0xf0]  ;;  %v5078_v18 = vld [vmem:[%s8533_s0 + $0x5a4] sm:$0xf] }
 0x163   :  { %v3217_v32 = vmax.f32 %v2614_v29, 0.0  ;;  %3601 = vst.msk [vmem:[%s8535_s3 + $0x4b8] sm:$0xff] %vm3449_vm3, %v3344_v46  ;;  %v4401_v46 = vor.u32 %v5071_v23, %v4400_v22  ;;  %v4434_v19 = vld [vmem:[%s8533_s0 + $0x5a8] sm:$0xf0]  ;;  %v3904_v22 = vld [vmem:[%s8533_s0 + $0x180] sm:$0xf] }
 0x164   :  { %v2620_v33 = vpop.f32.mrf.mxu1  ;;  %v2284_v34 = vpop.f32.mrf.mxu2  ;;  %v4947_v23 = vld [vmem:[%s8533_s0 + $0x184] sm:$0xf0] }
 0x165   :  { %3474 = vst.msk [vmem:[%s8535_s3 + $0xc0] sm:$0xff] %vm3449_vm3, %v3217_v32  ;;  %v2285_v50 = vadd.f32 %v5477_v2, %v2284_v34 }
 0x166   :  { %v1966_v35 = vpop.f32.mrf.mxu0 }
 0x167   :  { %v1967_v36 = vadd.f32 %v5477_v2, %v1966_v35  ;;  %v2934_v40 = vadd.f32 %v5996_v26, %v2285_v50 }
 0x169   :  { %v2616_v41 = vadd.f32 %v2615_v61, %v1967_v36  ;;  %v3345_v2 = vmax.f32 %v2934_v40, 0.0 }
 0x16a   :  { %v6131_v26 = vpop.f32.mrf.mxu3 }
 0x16b   :  { %v3218_v48 = vmax.f32 %v2616_v41, 0.0  ;;  %3602 = vst.msk [vmem:[%s8535_s3 + $0x4c0] sm:$0xff] %vm3449_vm3, %v3345_v2 }
 0x16c   :  { %v2623_v49 = vpop.f32.mrf.mxu1  ;;  %v2286_v53 = vpop.f32.mrf.mxu2 }
 0x16d   :  { %3475 = vst.msk [vmem:[%s8535_s3 + $0xc8] sm:$0xff] %vm3449_vm3, %v3218_v48  ;;  %v2287_v57 = vadd.f32 %v6150_v56, %v2286_v53 }
 0x16e   :  { %v1969_v58 = vpop.f32.mrf.mxu0 }
 0x16f   :  { %4792 = vmatmul.msk.bf16.gmra.mxu1 %vm1503_vm2, %v3893_v45  ;;  %v1970_v60 = vadd.f32 %v6150_v56, %v1969_v58  ;;  %4857 = vmatmul.msk.bf16.gmra.mxu3 %vm1503_vm2, %v4413_v52  ;;  %v2936_v61 = vadd.f32 %v6027_v21, %v2287_v57  ;;  %v5073_v57 = vld [vmem:[%s8533_s0 + $0x574] sm:$0xf0]  ;;  %v4429_v58 = vor.u32 %v5076_v25, %v4426_v47  ;;  %v4950_v25 = vld [vmem:[%s8533_s0 + $0x1a4] sm:$0xf]  ;;  %v3922_v47 = vld [vmem:[%s8533_s0 + $0x1a8] sm:$0xf0] }
 0x171   :  { %v2619_v62 = vadd.f32 %v2618_v54, %v1970_v60  ;;  %2008 = vmatmul.bf16.gmra.mxu0 %v3881_v7  ;;  %v3346_v17 = vmax.f32 %v2936_v61, 0.0  ;;  %2328 = vmatmul.bf16.gmra.mxu2 %v4393_v12  ;;  %v3901_v54 = vor.u32 %v4944_v8, %v3898_v9  ;;  %v4408_v7 = vld [vmem:[%s8533_s0 + $0x570] sm:$0xf]  ;;  %v3897_v60 = vor.u32 %v4945_v51, %v3896_v11  ;;  %v5080_v11 = vld [vmem:[%s8533_s0 + $0x5b4] sm:$0xf] }
 0x172   :  { %v6157_v63 = vpop.f32.mrf.mxu3  ;;  %v4442_v51 = vld [vmem:[%s8533_s0 + $0x5b8] sm:$0xf0] }
 0x173   :  { %v3219_v1 = vmax.f32 %v2619_v62, 0.0  ;;  %3603 = vst.msk [vmem:[%s8535_s3 + $0x4c8] sm:$0xff] %vm3449_vm3, %v3346_v17  ;;  %v4409_v17 = vor.u32 %v5073_v57, %v4408_v7  ;;  %v3912_v7 = vld [vmem:[%s8533_s0 + $0x190] sm:$0xf]  ;;  %v4949_v57 = vld [vmem:[%s8533_s0 + $0x194] sm:$0xf0] }
 0x174   :  { %v2625_v3 = vpop.f32.mrf.mxu1  ;;  %v2289_v4 = vpop.f32.mrf.mxu2 }
 0x175   :  { %3476 = vst.msk [vmem:[%s8535_s3 + $0xd0] sm:$0xff] %vm3449_vm3, %v3219_v1  ;;  %v2290_v21 = vadd.f32 %v6150_v56, %v2289_v4 }
 0x176   :  { %v1971_v5 = vpop.f32.mrf.mxu0 }
 0x177   :  { %v1972_v6 = vadd.f32 %v6150_v56, %v1971_v5  ;;  %v2939_v10 = vadd.f32 %v6048_v59, %v2290_v21 }
 0x179   :  { %v2621_v0 = vadd.f32 %v2620_v33, %v1972_v6  ;;  %v3347_v16 = vmax.f32 %v2939_v10, 0.0 }
 0x17a   :  { %v6188_v59 = vpop.f32.mrf.mxu3 }
 0x17b   :  { %v3220_v20 = vmax.f32 %v2621_v0, 0.0  ;;  %3604 = vst.msk [vmem:[%s8535_s3 + $0x4d0] sm:$0xff] %vm3449_vm3, %v3347_v16 }
 0x17c   :  { %v2628_v37 = vpop.f32.mrf.mxu1  ;;  %v2291_v42 = vpop.f32.mrf.mxu2 }
 0x17d   :  { %3477 = vst.msk [vmem:[%s8535_s3 + $0xd8] sm:$0xff] %vm3449_vm3, %v3220_v20  ;;  %v2292_v28 = vadd.f32 %v6150_v56, %v2291_v42 }
 0x17e   :  { %v1974_v29 = vpop.f32.mrf.mxu0 }
 0x17f   :  { %4793 = vmatmul.msk.bf16.gmra.mxu1 %vm1503_vm2, %v3901_v54  ;;  %v1975_v32 = vadd.f32 %v6150_v56, %v1974_v29  ;;  %4858 = vmatmul.msk.bf16.gmra.mxu3 %vm1503_vm2, %v4421_v24  ;;  %v2941_v33 = vadd.f32 %v6079_v55, %v2292_v28  ;;  %v5075_v28 = vld [vmem:[%s8533_s0 + $0x584] sm:$0xf0]  ;;  %v4437_v29 = vor.u32 %v5078_v18, %v4434_v19  ;;  %v4952_v18 = vld [vmem:[%s8533_s0 + $0x1b4] sm:$0xf]  ;;  %v3930_v19 = vld [vmem:[%s8533_s0 + $0x1b8] sm:$0xf0] }
 0x181   :  { %v2624_v34 = vadd.f32 %v2623_v49, %v1975_v32  ;;  %2013 = vmatmul.bf16.gmra.mxu0 %v3889_v27  ;;  %v3348_v50 = vmax.f32 %v2941_v33, 0.0  ;;  %2333 = vmatmul.bf16.gmra.mxu2 %v4401_v46  ;;  %v3909_v49 = vor.u32 %v4946_v43, %v3906_v44  ;;  %v4416_v27 = vld [vmem:[%s8533_s0 + $0x580] sm:$0xf]  ;;  %v3905_v32 = vor.u32 %v4947_v23, %v3904_v22  ;;  %v5082_v22 = vld [vmem:[%s8533_s0 + $0x5c4] sm:$0xf] }
 0x182   :  { %v6209_v35 = vpop.f32.mrf.mxu3  ;;  %v4450_v23 = vld [vmem:[%s8533_s0 + $0x5c8] sm:$0xf0] }
 0x183   :  { %v3221_v36 = vmax.f32 %v2624_v34, 0.0  ;;  %3605 = vst.msk [vmem:[%s8535_s3 + $0x4d8] sm:$0xff] %vm3449_vm3, %v3348_v50  ;;  %v4417_v50 = vor.u32 %v5075_v28, %v4416_v27  ;;  %v3920_v27 = vld [vmem:[%s8533_s0 + $0x1a0] sm:$0xf]  ;;  %v4951_v28 = vld [vmem:[%s8533_s0 + $0x1a4] sm:$0xf0] }
 0x184   :  { %v2630_v38 = vpop.f32.mrf.mxu1  ;;  %v2294_v39 = vpop.f32.mrf.mxu2 }
 0x185   :  { %3478 = vst.msk [vmem:[%s8535_s3 + $0xe0] sm:$0xff] %vm3449_vm3, %v3221_v36  ;;  %v2295_v55 = vadd.f32 %v6150_v56, %v2294_v39 }
 0x186   :  { %v1976_v40 = vpop.f32.mrf.mxu0 }
 0x187   :  { %v1977_v41 = vadd.f32 %v6150_v56, %v1976_v40  ;;  %v2944_v2 = vadd.f32 %v6100_v30, %v2295_v55 }
 0x189   :  { %v2626_v45 = vadd.f32 %v2625_v3, %v1977_v41  ;;  %v3349_v48 = vmax.f32 %v2944_v2, 0.0 }
 0x18a   :  { %v6240_v30 = vpop.f32.mrf.mxu3 }
 0x18b   :  { %v3222_v52 = vmax.f32 %v2626_v45, 0.0  ;;  %3606 = vst.msk [vmem:[%s8535_s3 + $0x4e0] sm:$0xff] %vm3449_vm3, %v3349_v48 }
 0x18c   :  { %v2633_v53 = vpop.f32.mrf.mxu1  ;;  %v2296_v12 = vpop.f32.mrf.mxu2 }
 0x18d   :  { %3479 = vst.msk [vmem:[%s8535_s3 + $0xe8] sm:$0xff] %vm3449_vm3, %v3222_v52  ;;  %v2297_v61 = vadd.f32 %v6150_v56, %v2296_v12 }
 0x18e   :  { %v1979_v62 = vpop.f32.mrf.mxu0 }
 0x18f   :  { %4794 = vmatmul.msk.bf16.gmra.mxu1 %vm1503_vm2, %v3909_v49  ;;  %v1980_v1 = vadd.f32 %v6150_v56, %v1979_v62  ;;  %4859 = vmatmul.msk.bf16.gmra.mxu3 %vm1503_vm2, %v4429_v58  ;;  %v2946_v3 = vadd.f32 %v6131_v26, %v2297_v61  ;;  %v5077_v61 = vld [vmem:[%s8533_s0 + $0x594] sm:$0xf0]  ;;  %v4445_v62 = vor.u32 %v5080_v11, %v4442_v51  ;;  %v4954_v11 = vld [vmem:[%s8533_s0 + $0x1c4] sm:$0xf]  ;;  %v3938_v51 = vld [vmem:[%s8533_s0 + $0x1c8] sm:$0xf0] }
 0x191   :  { %v2629_v4 = vadd.f32 %v2628_v37, %v1980_v1  ;;  %2018 = vmatmul.bf16.gmra.mxu0 %v3897_v60  ;;  %v3350_v21 = vmax.f32 %v2946_v3, 0.0  ;;  %2338 = vmatmul.bf16.gmra.mxu2 %v4409_v17  ;;  %v3917_v37 = vor.u32 %v4948_v13, %v3914_v15  ;;  %v4424_v60 = vld [vmem:[%s8533_s0 + $0x590] sm:$0xf]  ;;  %v3913_v1 = vor.u32 %v4949_v57, %v3912_v7  ;;  %v5084_v7 = vld [vmem:[%s8533_s0 + $0x5d4] sm:$0xf] }
 0x192   :  { %v6261_v5 = vpop.f32.mrf.mxu3  ;;  %v4458_v57 = vld [vmem:[%s8533_s0 + $0x5d8] sm:$0xf0] }
 0x193   :  { %v3223_v6 = vmax.f32 %v2629_v4, 0.0  ;;  %3607 = vst.msk [vmem:[%s8535_s3 + $0x4e8] sm:$0xff] %vm3449_vm3, %v3350_v21  ;;  %v4425_v21 = vor.u32 %v5077_v61, %v4424_v60  ;;  %v3928_v60 = vld [vmem:[%s8533_s0 + $0x1b0] sm:$0xf]  ;;  %v4953_v61 = vld [vmem:[%s8533_s0 + $0x1b4] sm:$0xf0] }
 0x194   :  { %v2635_v8 = vpop.f32.mrf.mxu1  ;;  %v2299_v9 = vpop.f32.mrf.mxu2 }
 0x195   :  { %3480 = vst.msk [vmem:[%s8535_s3 + $0xf0] sm:$0xff] %vm3449_vm3, %v3223_v6  ;;  %v2300_v26 = vadd.f32 %v6150_v56, %v2299_v9 }
 0x196   :  { %v1981_v10 = vpop.f32.mrf.mxu0 }
 0x197   :  { %v1982_v0 = vadd.f32 %v6150_v56, %v1981_v10  ;;  %v2949_v16 = vadd.f32 %v6157_v63, %v2300_v26 }
 0x199   :  { %v2631_v54 = vadd.f32 %v2630_v38, %v1982_v0  ;;  %v3351_v20 = vmax.f32 %v2949_v16, 0.0 }
 0x19a   :  { %v6292_v63 = vpop.f32.mrf.mxu3 }
 0x19b   :  { %v3224_v24 = vmax.f32 %v2631_v54, 0.0  ;;  %3608 = vst.msk [vmem:[%s8535_s3 + $0x4f0] sm:$0xff] %vm3449_vm3, %v3351_v20 }
 0x19c   :  { %v2638_v42 = vpop.f32.mrf.mxu1  ;;  %v2301_v46 = vpop.f32.mrf.mxu2 }
 0x19d   :  { %3481 = vst.msk [vmem:[%s8535_s3 + $0xf8] sm:$0xff] %vm3449_vm3, %v3224_v24  ;;  %v2302_v33 = vadd.f32 %v6150_v56, %v2301_v46 }
 0x19e   :  { %v1984_v34 = vpop.f32.mrf.mxu0 }
 0x19f   :  { %4795 = vmatmul.msk.bf16.gmra.mxu1 %vm1503_vm2, %v3917_v37  ;;  %v1985_v36 = vadd.f32 %v6150_v56, %v1984_v34  ;;  %4860 = vmatmul.msk.bf16.gmra.mxu3 %vm1503_vm2, %v4437_v29  ;;  %v2951_v38 = vadd.f32 %v6188_v59, %v2302_v33  ;;  %v5079_v33 = vld [vmem:[%s8533_s0 + $0x5a4] sm:$0xf0]  ;;  %v4453_v34 = vor.u32 %v5082_v22, %v4450_v23  ;;  %v4956_v22 = vld [vmem:[%s8533_s0 + $0x1d4] sm:$0xf]  ;;  %v3946_v23 = vld [vmem:[%s8533_s0 + $0x1d8] sm:$0xf0] }
 0x1a1   :  { %v2634_v39 = vadd.f32 %v2633_v53, %v1985_v36  ;;  %2023 = vmatmul.bf16.gmra.mxu0 %v3905_v32  ;;  %v3352_v55 = vmax.f32 %v2951_v38, 0.0  ;;  %2343 = vmatmul.bf16.gmra.mxu2 %v4417_v50  ;;  %v3925_v53 = vor.u32 %v4950_v25, %v3922_v47  ;;  %v4432_v32 = vld [vmem:[%s8533_s0 + $0x5a0] sm:$0xf]  ;;  %v3921_v36 = vor.u32 %v4951_v28, %v3920_v27  ;;  %v5086_v27 = vld [vmem:[%s8533_s0 + $0x5e4] sm:$0xf] }
 0x1a2   :  { %v6313_v40 = vpop.f32.mrf.mxu3  ;;  %v4466_v28 = vld [vmem:[%s8533_s0 + $0x5e8] sm:$0xf0] }
 0x1a3   :  { %v3225_v41 = vmax.f32 %v2634_v39, 0.0  ;;  %3609 = vst.msk [vmem:[%s8535_s3 + $0x4f8] sm:$0xff] %vm3449_vm3, %v3352_v55  ;;  %v4433_v55 = vor.u32 %v5079_v33, %v4432_v32  ;;  %v3936_v32 = vld [vmem:[%s8533_s0 + $0x1c0] sm:$0xf]  ;;  %v4955_v33 = vld [vmem:[%s8533_s0 + $0x1c4] sm:$0xf0] }
 0x1a4   :  { %v2640_v43 = vpop.f32.mrf.mxu1  ;;  %v2304_v44 = vpop.f32.mrf.mxu2 }
 0x1a5   :  { %3482 = vst.msk [vmem:[%s8535_s3 + $0x100] sm:$0xff] %vm3449_vm3, %v3225_v41  ;;  %v2305_v59 = vadd.f32 %v6150_v56, %v2304_v44 }
 0x1a6   :  { %v1986_v2 = vpop.f32.mrf.mxu0 }
 0x1a7   :  { %v1987_v45 = vadd.f32 %v6150_v56, %v1986_v2  ;;  %v2954_v48 = vadd.f32 %v6209_v35, %v2305_v59 }
 0x1a9   :  { %v2636_v49 = vadd.f32 %v2635_v8, %v1987_v45  ;;  %v3353_v52 = vmax.f32 %v2954_v48, 0.0 }
 0x1aa   :  { %v6344_v35 = vpop.f32.mrf.mxu3 }
 0x1ab   :  { %v3226_v58 = vmax.f32 %v2636_v49, 0.0  ;;  %3610 = vst.msk [vmem:[%s8535_s3 + $0x500] sm:$0xff] %vm3449_vm3, %v3353_v52 }
 0x1ac   :  { %v2643_v12 = vpop.f32.mrf.mxu1  ;;  %v2306_v17 = vpop.f32.mrf.mxu2 }
 0x1ad   :  { %3483 = vst.msk [vmem:[%s8535_s3 + $0x108] sm:$0xff] %vm3449_vm3, %v3226_v58  ;;  %v2307_v3 = vadd.f32 %v6150_v56, %v2306_v17 }
 0x1ae   :  { %v1989_v4 = vpop.f32.mrf.mxu0 }
 0x1af   :  { %4796 = vmatmul.msk.bf16.gmra.mxu1 %vm1503_vm2, %v3925_v53  ;;  %v1990_v6 = vadd.f32 %v6150_v56, %v1989_v4  ;;  %4861 = vmatmul.msk.bf16.gmra.mxu3 %vm1503_vm2, %v4445_v62  ;;  %v2956_v8 = vadd.f32 %v6240_v30, %v2307_v3  ;;  %v5081_v3 = vld [vmem:[%s8533_s0 + $0x5b4] sm:$0xf0]  ;;  %v4461_v4 = vor.u32 %v5084_v7, %v4458_v57  ;;  %v4958_v7 = vld [vmem:[%s8533_s0 + $0x1e4] sm:$0xf]  ;;  %v3954_v57 = vld [vmem:[%s8533_s0 + $0x1e8] sm:$0xf0] }
 0x1b1   :  { %v2639_v9 = vadd.f32 %v2638_v42, %v1990_v6  ;;  %2028 = vmatmul.bf16.gmra.mxu0 %v3913_v1  ;;  %v3354_v26 = vmax.f32 %v2956_v8, 0.0  ;;  %2348 = vmatmul.bf16.gmra.mxu2 %v4425_v21  ;;  %v3933_v42 = vor.u32 %v4952_v18, %v3930_v19  ;;  %v4440_v1 = vld [vmem:[%s8533_s0 + $0x5b0] sm:$0xf]  ;;  %v3929_v6 = vor.u32 %v4953_v61, %v3928_v60  ;;  %v5088_v60 = vld [vmem:[%s8533_s0 + $0x5f4] sm:$0xf] }
 0x1b2   :  { %v6365_v10 = vpop.f32.mrf.mxu3  ;;  %v4474_v61 = vld [vmem:[%s8533_s0 + $0x5f8] sm:$0xf0] }
 0x1b3   :  { %v3227_v0 = vmax.f32 %v2639_v9, 0.0  ;;  %3611 = vst.msk [vmem:[%s8535_s3 + $0x508] sm:$0xff] %vm3449_vm3, %v3354_v26  ;;  %v4441_v26 = vor.u32 %v5081_v3, %v4440_v1  ;;  %v3944_v1 = vld [vmem:[%s8533_s0 + $0x1d0] sm:$0xf]  ;;  %v4957_v3 = vld [vmem:[%s8533_s0 + $0x1d4] sm:$0xf0] }
 0x1b4   :  { %v2645_v13 = vpop.f32.mrf.mxu1  ;;  %v2309_v15 = vpop.f32.mrf.mxu2 }
 0x1b5   :  { %3484 = vst.msk [vmem:[%s8535_s3 + $0x110] sm:$0xff] %vm3449_vm3, %v3227_v0  ;;  %v2310_v30 = vadd.f32 %v6150_v56, %v2309_v15 }
 0x1b6   :  { %v1991_v16 = vpop.f32.mrf.mxu0 }
 0x1b7   :  { %v1992_v54 = vadd.f32 %v6150_v56, %v1991_v16  ;;  %v2959_v20 = vadd.f32 %v6261_v5, %v2310_v30 }
 0x1b9   :  { %v2641_v37 = vadd.f32 %v2640_v43, %v1992_v54  ;;  %v3355_v24 = vmax.f32 %v2959_v20, 0.0 }
 0x1ba   :  { %v6396_v5 = vpop.f32.mrf.mxu3 }
 0x1bb   :  { %v3228_v29 = vmax.f32 %v2641_v37, 0.0  ;;  %3612 = vst.msk [vmem:[%s8535_s3 + $0x510] sm:$0xff] %vm3449_vm3, %v3355_v24 }
 0x1bc   :  { %v2648_v46 = vpop.f32.mrf.mxu1  ;;  %v2311_v50 = vpop.f32.mrf.mxu2 }
 0x1bd   :  { %3485 = vst.msk [vmem:[%s8535_s3 + $0x118] sm:$0xff] %vm3449_vm3, %v3228_v29  ;;  %v2312_v38 = vadd.f32 %v6150_v56, %v2311_v50 }
 0x1be   :  { %v1994_v39 = vpop.f32.mrf.mxu0 }
 0x1bf   :  { %4797 = vmatmul.msk.bf16.gmra.mxu1 %vm1503_vm2, %v3933_v42  ;;  %v1995_v41 = vadd.f32 %v6150_v56, %v1994_v39  ;;  %4862 = vmatmul.msk.bf16.gmra.mxu3 %vm1503_vm2, %v4453_v34  ;;  %v2961_v43 = vadd.f32 %v6292_v63, %v2312_v38  ;;  %v5083_v38 = vld [vmem:[%s8533_s0 + $0x5c4] sm:$0xf0]  ;;  %v4469_v39 = vor.u32 %v5086_v27, %v4466_v28  ;;  %v4960_v27 = vld [vmem:[%s8533_s0 + $0x1f4] sm:$0xf]  ;;  %v3962_v28 = vld [vmem:[%s8533_s0 + $0x1f8] sm:$0xf0] }
 0x1c1   :  { %v2644_v44 = vadd.f32 %v2643_v12, %v1995_v41  ;;  %2033 = vmatmul.bf16.gmra.mxu0 %v3921_v36  ;;  %v3356_v59 = vmax.f32 %v2961_v43, 0.0  ;;  %2353 = vmatmul.bf16.gmra.mxu2 %v4433_v55  ;;  %v3941_v12 = vor.u32 %v4954_v11, %v3938_v51  ;;  %v4448_v36 = vld [vmem:[%s8533_s0 + $0x5c0] sm:$0xf]  ;;  %v3937_v41 = vor.u32 %v4955_v33, %v3936_v32  ;;  %v5090_v32 = vld [vmem:[%s8533_s0 + $0x604] sm:$0xf] }
 0x1c2   :  { %v6417_v2 = vpop.f32.mrf.mxu3  ;;  %v4482_v33 = vld [vmem:[%s8533_s0 + $0x608] sm:$0xf0] }
 0x1c3   :  { %v3229_v45 = vmax.f32 %v2644_v44, 0.0  ;;  %3613 = vst.msk [vmem:[%s8535_s3 + $0x518] sm:$0xff] %vm3449_vm3, %v3356_v59  ;;  %v4449_v59 = vor.u32 %v5083_v38, %v4448_v36  ;;  %v3952_v36 = vld [vmem:[%s8533_s0 + $0x1e0] sm:$0xf]  ;;  %v4959_v38 = vld [vmem:[%s8533_s0 + $0x1e4] sm:$0xf0] }
 0x1c4   :  { %v2650_v25 = vpop.f32.mrf.mxu1  ;;  %v2314_v47 = vpop.f32.mrf.mxu2 }
 0x1c5   :  { %3486 = vst.msk [vmem:[%s8535_s3 + $0x120] sm:$0xff] %vm3449_vm3, %v3229_v45  ;;  %v2315_v63 = vadd.f32 %v6150_v56, %v2314_v47 }
 0x1c6   :  { %v1996_v48 = vpop.f32.mrf.mxu0 }
 0x1c7   :  { %v1997_v49 = vadd.f32 %v6150_v56, %v1996_v48  ;;  %v2964_v52 = vadd.f32 %v6313_v40, %v2315_v63 }
 0x1c9   :  { %v2646_v53 = vadd.f32 %v2645_v13, %v1997_v49  ;;  %v3357_v58 = vmax.f32 %v2964_v52, 0.0 }
 0x1ca   :  { %v6448_v40 = vpop.f32.mrf.mxu3 }
 0x1cb   :  { %v3230_v62 = vmax.f32 %v2646_v53, 0.0  ;;  %3614 = vst.msk [vmem:[%s8535_s3 + $0x520] sm:$0xff] %vm3449_vm3, %v3357_v58 }
 0x1cc   :  { %v2653_v17 = vpop.f32.mrf.mxu1  ;;  %v2316_v21 = vpop.f32.mrf.mxu2 }
 0x1cd   :  { %3487 = vst.msk [vmem:[%s8535_s3 + $0x128] sm:$0xff] %vm3449_vm3, %v3230_v62  ;;  %v2317_v8 = vadd.f32 %v6150_v56, %v2316_v21 }
 0x1ce   :  { %v1999_v9 = vpop.f32.mrf.mxu0 }
 0x1cf   :  { %4798 = vmatmul.msk.bf16.gmra.mxu1 %vm1503_vm2, %v3941_v12  ;;  %v2000_v0 = vadd.f32 %v6150_v56, %v1999_v9  ;;  %4863 = vmatmul.msk.bf16.gmra.mxu3 %vm1503_vm2, %v4461_v4  ;;  %v2966_v13 = vadd.f32 %v6344_v35, %v2317_v8  ;;  %v5085_v8 = vld [vmem:[%s8533_s0 + $0x5d4] sm:$0xf0]  ;;  %v4477_v9 = vor.u32 %v5088_v60, %v4474_v61  ;;  %v4962_v60 = vld [vmem:[%s8533_s0 + $0x204] sm:$0xf]  ;;  %v3970_v61 = vld [vmem:[%s8533_s0 + $0x208] sm:$0xf0] }
 0x1d1   :  { %v2649_v15 = vadd.f32 %v2648_v46, %v2000_v0  ;;  %2038 = vmatmul.bf16.gmra.mxu0 %v3929_v6  ;;  %v3358_v30 = vmax.f32 %v2966_v13, 0.0  ;;  %2358 = vmatmul.bf16.gmra.mxu2 %v4441_v26  ;;  %v3949_v46 = vor.u32 %v4956_v22, %v3946_v23  ;;  %v4456_v6 = vld [vmem:[%s8533_s0 + $0x5d0] sm:$0xf]  ;;  %v3945_v0 = vor.u32 %v4957_v3, %v3944_v1  ;;  %v5092_v1 = vld [vmem:[%s8533_s0 + $0x614] sm:$0xf] }
 0x1d2   :  { %v6469_v16 = vpop.f32.mrf.mxu3  ;;  %v4490_v3 = vld [vmem:[%s8533_s0 + $0x618] sm:$0xf0] }
 0x1d3   :  { %v3231_v54 = vmax.f32 %v2649_v15, 0.0  ;;  %3615 = vst.msk [vmem:[%s8535_s3 + $0x528] sm:$0xff] %vm3449_vm3, %v3358_v30  ;;  %v4457_v30 = vor.u32 %v5085_v8, %v4456_v6  ;;  %v3960_v6 = vld [vmem:[%s8533_s0 + $0x1f0] sm:$0xf]  ;;  %v4961_v8 = vld [vmem:[%s8533_s0 + $0x1f4] sm:$0xf0] }
 0x1d4   :  { %v2655_v18 = vpop.f32.mrf.mxu1  ;;  %v2319_v19 = vpop.f32.mrf.mxu2 }
 0x1d5   :  { %3488 = vst.msk [vmem:[%s8535_s3 + $0x130] sm:$0xff] %vm3449_vm3, %v3231_v54  ;;  %v2320_v35 = vadd.f32 %v6150_v56, %v2319_v19 }
 0x1d6   :  { %v2001_v20 = vpop.f32.mrf.mxu0 }
 0x1d7   :  { %v2002_v37 = vadd.f32 %v6150_v56, %v2001_v20  ;;  %v2969_v24 = vadd.f32 %v6365_v10, %v2320_v35 }
 0x1d9   :  { %v2651_v42 = vadd.f32 %v2650_v25, %v2002_v37  ;;  %v3359_v29 = vmax.f32 %v2969_v24, 0.0 }
 0x1da   :  { %v6500_v10 = vpop.f32.mrf.mxu3 }
 0x1db   :  { %v3232_v34 = vmax.f32 %v2651_v42, 0.0  ;;  %3616 = vst.msk [vmem:[%s8535_s3 + $0x530] sm:$0xff] %vm3449_vm3, %v3359_v29 }
 0x1dc   :  { %v2658_v50 = vpop.f32.mrf.mxu1  ;;  %v2321_v55 = vpop.f32.mrf.mxu2 }
 0x1dd   :  { %3489 = vst.msk [vmem:[%s8535_s3 + $0x138] sm:$0xff] %vm3449_vm3, %v3232_v34  ;;  %v2322_v43 = vadd.f32 %v6150_v56, %v2321_v55 }
 0x1de   :  { %v2004_v44 = vpop.f32.mrf.mxu0 }
 0x1df   :  { %4799 = vmatmul.msk.bf16.gmra.mxu1 %vm1503_vm2, %v3949_v46  ;;  %v2005_v45 = vadd.f32 %v6150_v56, %v2004_v44  ;;  %4864 = vmatmul.msk.bf16.gmra.mxu3 %vm1503_vm2, %v4469_v39  ;;  %v2971_v25 = vadd.f32 %v6396_v5, %v2322_v43  ;;  %v5087_v43 = vld [vmem:[%s8533_s0 + $0x5e4] sm:$0xf0]  ;;  %v4485_v44 = vor.u32 %v5090_v32, %v4482_v33  ;;  %v4964_v32 = vld [vmem:[%s8533_s0 + $0x214] sm:$0xf]  ;;  %v3978_v33 = vld [vmem:[%s8533_s0 + $0x218] sm:$0xf0] }
 0x1e1   :  { %v2654_v47 = vadd.f32 %v2653_v17, %v2005_v45  ;;  %2043 = vmatmul.bf16.gmra.mxu0 %v3937_v41  ;;  %v3360_v63 = vmax.f32 %v2971_v25, 0.0  ;;  %2363 = vmatmul.bf16.gmra.mxu2 %v4449_v59  ;;  %v3957_v17 = vor.u32 %v4958_v7, %v3954_v57  ;;  %v4464_v41 = vld [vmem:[%s8533_s0 + $0x5e0] sm:$0xf]  ;;  %v3953_v45 = vor.u32 %v4959_v38, %v3952_v36  ;;  %v5094_v36 = vld [vmem:[%s8533_s0 + $0x624] sm:$0xf] }
 0x1e2   :  { %v6521_v48 = vpop.f32.mrf.mxu3  ;;  %v4498_v38 = vld [vmem:[%s8533_s0 + $0x628] sm:$0xf0] }
 0x1e3   :  { %v3233_v49 = vmax.f32 %v2654_v47, 0.0  ;;  %3617 = vst.msk [vmem:[%s8535_s3 + $0x538] sm:$0xff] %vm3449_vm3, %v3360_v63  ;;  %v4465_v63 = vor.u32 %v5087_v43, %v4464_v41  ;;  %v3968_v41 = vld [vmem:[%s8533_s0 + $0x200] sm:$0xf]  ;;  %v4963_v43 = vld [vmem:[%s8533_s0 + $0x204] sm:$0xf0] }
 0x1e4   :  { %v2660_v11 = vpop.f32.mrf.mxu1  ;;  %v2324_v51 = vpop.f32.mrf.mxu2 }
 0x1e5   :  { %3490 = vst.msk [vmem:[%s8535_s3 + $0x140] sm:$0xff] %vm3449_vm3, %v3233_v49  ;;  %v2325_v5 = vadd.f32 %v6150_v56, %v2324_v51 }
 0x1e6   :  { %v2006_v52 = vpop.f32.mrf.mxu0 }
 0x1e7   :  { %v2007_v53 = vadd.f32 %v6150_v56, %v2006_v52  ;;  %v2974_v58 = vadd.f32 %v6417_v2, %v2325_v5 }
 0x1e9   :  { %v2656_v12 = vadd.f32 %v2655_v18, %v2007_v53  ;;  %v3361_v62 = vmax.f32 %v2974_v58, 0.0 }
 0x1ea   :  { %v6552_v2 = vpop.f32.mrf.mxu3 }
 0x1eb   :  { %v3234_v4 = vmax.f32 %v2656_v12, 0.0  ;;  %3618 = vst.msk [vmem:[%s8535_s3 + $0x540] sm:$0xff] %vm3449_vm3, %v3361_v62 }
 0x1ec   :  { %v2663_v21 = vpop.f32.mrf.mxu1  ;;  %v2326_v26 = vpop.f32.mrf.mxu2 }
 0x1ed   :  { %3491 = vst.msk [vmem:[%s8535_s3 + $0x148] sm:$0xff] %vm3449_vm3, %v3234_v4  ;;  %v2327_v13 = vadd.f32 %v6150_v56, %v2326_v26 }
 0x1ee   :  { %v2009_v15 = vpop.f32.mrf.mxu0 }
 0x1ef   :  { %4800 = vmatmul.msk.bf16.gmra.mxu1 %vm1503_vm2, %v3957_v17  ;;  %v2010_v54 = vadd.f32 %v6150_v56, %v2009_v15  ;;  %4865 = vmatmul.msk.bf16.gmra.mxu3 %vm1503_vm2, %v4477_v9  ;;  %v2976_v18 = vadd.f32 %v6448_v40, %v2327_v13  ;;  %v5089_v13 = vld [vmem:[%s8533_s0 + $0x5f4] sm:$0xf0]  ;;  %v4493_v15 = vor.u32 %v5092_v1, %v4490_v3  ;;  %v4966_v1 = vld [vmem:[%s8533_s0 + $0x224] sm:$0xf]  ;;  %v3986_v3 = vld [vmem:[%s8533_s0 + $0x228] sm:$0xf0] }
 0x1f1   :  { %v2659_v19 = vadd.f32 %v2658_v50, %v2010_v54  ;;  %2048 = vmatmul.bf16.gmra.mxu0 %v3945_v0  ;;  %v3362_v35 = vmax.f32 %v2976_v18, 0.0  ;;  %2368 = vmatmul.bf16.gmra.mxu2 %v4457_v30  ;;  %v3965_v50 = vor.u32 %v4960_v27, %v3962_v28  ;;  %v4472_v0 = vld [vmem:[%s8533_s0 + $0x5f0] sm:$0xf]  ;;  %v3961_v54 = vor.u32 %v4961_v8, %v3960_v6  ;;  %v5096_v6 = vld [vmem:[%s8533_s0 + $0x634] sm:$0xf] }
 0x1f2   :  { %v6573_v20 = vpop.f32.mrf.mxu3  ;;  %v4506_v8 = vld [vmem:[%s8533_s0 + $0x638] sm:$0xf0] }
 0x1f3   :  { %v3235_v37 = vmax.f32 %v2659_v19, 0.0  ;;  %3619 = vst.msk [vmem:[%s8535_s3 + $0x548] sm:$0xff] %vm3449_vm3, %v3362_v35  ;;  %v4473_v35 = vor.u32 %v5089_v13, %v4472_v0  ;;  %v3976_v0 = vld [vmem:[%s8533_s0 + $0x210] sm:$0xf]  ;;  %v4965_v13 = vld [vmem:[%s8533_s0 + $0x214] sm:$0xf0] }
 0x1f4   :  { %v2665_v22 = vpop.f32.mrf.mxu1  ;;  %v2329_v23 = vpop.f32.mrf.mxu2 }
 0x1f5   :  { %3492 = vst.msk [vmem:[%s8535_s3 + $0x150] sm:$0xff] %vm3449_vm3, %v3235_v37  ;;  %v2330_v40 = vadd.f32 %v6150_v56, %v2329_v23 }
 0x1f6   :  { %v2011_v24 = vpop.f32.mrf.mxu0 }
 0x1f7   :  { %v2012_v42 = vadd.f32 %v6150_v56, %v2011_v24  ;;  %v2979_v29 = vadd.f32 %v6469_v16, %v2330_v40 }
 0x1f9   :  { %v2661_v46 = vadd.f32 %v2660_v11, %v2012_v42  ;;  %v3363_v34 = vmax.f32 %v2979_v29, 0.0 }
 0x1fa   :  { %v6604_v16 = vpop.f32.mrf.mxu3 }
 0x1fb   :  { %v3236_v39 = vmax.f32 %v2661_v46, 0.0  ;;  %3620 = vst.msk [vmem:[%s8535_s3 + $0x550] sm:$0xff] %vm3449_vm3, %v3363_v34 }
 0x1fc   :  { %v2668_v55 = vpop.f32.mrf.mxu1  ;;  %v2331_v59 = vpop.f32.mrf.mxu2 }
 0x1fd   :  { %3493 = vst.msk [vmem:[%s8535_s3 + $0x158] sm:$0xff] %vm3449_vm3, %v3236_v39  ;;  %v2332_v25 = vadd.f32 %v6150_v56, %v2331_v59 }
 0x1fe   :  { %v2014_v47 = vpop.f32.mrf.mxu0 }
 0x1ff   :  { %4801 = vmatmul.msk.bf16.gmra.mxu1 %vm1503_vm2, %v3965_v50  ;;  %v2015_v49 = vadd.f32 %v6150_v56, %v2014_v47  ;;  %4866 = vmatmul.msk.bf16.gmra.mxu3 %vm1503_vm2, %v4485_v44  ;;  %v2981_v11 = vadd.f32 %v6500_v10, %v2332_v25  ;;  %v5091_v25 = vld [vmem:[%s8533_s0 + $0x604] sm:$0xf0]  ;;  %v4501_v47 = vor.u32 %v5094_v36, %v4498_v38  ;;  %v4968_v36 = vld [vmem:[%s8533_s0 + $0x234] sm:$0xf]  ;;  %v3994_v38 = vld [vmem:[%s8533_s0 + $0x238] sm:$0xf0] }
 0x201   :  { %v2664_v51 = vadd.f32 %v2663_v21, %v2015_v49  ;;  %2053 = vmatmul.bf16.gmra.mxu0 %v3953_v45  ;;  %v3364_v5 = vmax.f32 %v2981_v11, 0.0  ;;  %2373 = vmatmul.bf16.gmra.mxu2 %v4465_v63  ;;  %v3973_v21 = vor.u32 %v4962_v60, %v3970_v61  ;;  %v4480_v45 = vld [vmem:[%s8533_s0 + $0x600] sm:$0xf]  ;;  %v3969_v49 = vor.u32 %v4963_v43, %v3968_v41  ;;  %v5098_v41 = vld [vmem:[%s8533_s0 + $0x644] sm:$0xf] }
 0x202   :  { %v6625_v52 = vpop.f32.mrf.mxu3  ;;  %v4514_v43 = vld [vmem:[%s8533_s0 + $0x648] sm:$0xf0] }
 0x203   :  { %v3237_v53 = vmax.f32 %v2664_v51, 0.0  ;;  %3621 = vst.msk [vmem:[%s8535_s3 + $0x558] sm:$0xff] %vm3449_vm3, %v3364_v5  ;;  %v4481_v5 = vor.u32 %v5091_v25, %v4480_v45  ;;  %v4967_v45 = vld [vmem:[%s8533_s0 + $0x224] sm:$0xf0] }
 0x204   :  { %v2670_v7 = vpop.f32.mrf.mxu1  ;;  %v2334_v57 = vpop.f32.mrf.mxu2 }
 0x205   :  { %3494 = vst.msk [vmem:[%s8535_s3 + $0x160] sm:$0xff] %vm3449_vm3, %v3237_v53  ;;  %v2335_v10 = vadd.f32 %v6150_v56, %v2334_v57 }
 0x206   :  { %v2016_v58 = vpop.f32.mrf.mxu0 }
 0x207   :  { %v2017_v12 = vadd.f32 %v6150_v56, %v2016_v58  ;;  %v2984_v62 = vadd.f32 %v6521_v48, %v2335_v10 }
 0x209   :  { %v2666_v17 = vadd.f32 %v2665_v22, %v2017_v12  ;;  %v3365_v4 = vmax.f32 %v2984_v62, 0.0 }
 0x20a   :  { %v6656_v48 = vpop.f32.mrf.mxu3 }
 0x20b   :  { %v3238_v9 = vmax.f32 %v2666_v17, 0.0  ;;  %3622 = vst.msk [vmem:[%s8535_s3 + $0x560] sm:$0xff] %vm3449_vm3, %v3365_v4 }
 0x20c   :  { %v2673_v26 = vpop.f32.mrf.mxu1  ;;  %v2336_v30 = vpop.f32.mrf.mxu2 }
 0x20d   :  { %3495 = vst.msk [vmem:[%s8535_s3 + $0x168] sm:$0xff] %vm3449_vm3, %v3238_v9  ;;  %v2337_v18 = vadd.f32 %v6150_v56, %v2336_v30 }
 0x20e   :  { %v2019_v19 = vpop.f32.mrf.mxu0 }
 0x20f   :  { %4802 = vmatmul.msk.bf16.gmra.mxu1 %vm1503_vm2, %v3973_v21  ;;  %v2020_v37 = vadd.f32 %v6150_v56, %v2019_v19  ;;  %4867 = vmatmul.msk.bf16.gmra.mxu3 %vm1503_vm2, %v4493_v15  ;;  %v2986_v22 = vadd.f32 %v6552_v2, %v2337_v18  ;;  %v5093_v18 = vld [vmem:[%s8533_s0 + $0x614] sm:$0xf0]  ;;  %v4509_v19 = vor.u32 %v5096_v6, %v4506_v8  ;;  %v4970_v6 = vld [vmem:[%s8533_s0 + $0x244] sm:$0xf]  ;;  %v4002_v8 = vld [vmem:[%s8533_s0 + $0x248] sm:$0xf0] }
 0x211   :  { %v2669_v23 = vadd.f32 %v2668_v55, %v2020_v37  ;;  %2058 = vmatmul.bf16.gmra.mxu0 %v3961_v54  ;;  %v3366_v40 = vmax.f32 %v2986_v22, 0.0  ;;  %2378 = vmatmul.bf16.gmra.mxu2 %v4473_v35  ;;  %v3981_v55 = vor.u32 %v4964_v32, %v3978_v33  ;;  %v4488_v54 = vld [vmem:[%s8533_s0 + $0x610] sm:$0xf]  ;;  %v3977_v37 = vor.u32 %v4965_v13, %v3976_v0  ;;  %v5100_v0 = vld [vmem:[%s8533_s0 + $0x654] sm:$0xf] }
 0x212   :  { %v6677_v24 = vpop.f32.mrf.mxu3  ;;  %v4522_v13 = vld [vmem:[%s8533_s0 + $0x658] sm:$0xf0] }
 0x213   :  { %v3239_v42 = vmax.f32 %v2669_v23, 0.0  ;;  %3623 = vst.msk [vmem:[%s8535_s3 + $0x568] sm:$0xff] %vm3449_vm3, %v3366_v40  ;;  %v4489_v40 = vor.u32 %v5093_v18, %v4488_v54  ;;  %v3992_v54 = vld [vmem:[%s8533_s0 + $0x230] sm:$0xf]  ;;  %v4969_v18 = vld [vmem:[%s8533_s0 + $0x234] sm:$0xf0] }
 0x214   :  { %v2675_v27 = vpop.f32.mrf.mxu1  ;;  %v2339_v28 = vpop.f32.mrf.mxu2 }
 0x215   :  { %3496 = vst.msk [vmem:[%s8535_s3 + $0x170] sm:$0xff] %vm3449_vm3, %v3239_v42  ;;  %v2340_v2 = vadd.f32 %v6150_v56, %v2339_v28 }
 0x216   :  { %v2021_v29 = vpop.f32.mrf.mxu0 }
 0x217   :  { %v2022_v46 = vadd.f32 %v6150_v56, %v2021_v29  ;;  %v2989_v34 = vadd.f32 %v6573_v20, %v2340_v2 }
 0x219   :  { %v2671_v50 = vadd.f32 %v2670_v7, %v2022_v46  ;;  %v3367_v39 = vmax.f32 %v2989_v34, 0.0 }
 0x21a   :  { %v6708_v20 = vpop.f32.mrf.mxu3 }
 0x21b   :  { %v3240_v44 = vmax.f32 %v2671_v50, 0.0  ;;  %3624 = vst.msk [vmem:[%s8535_s3 + $0x570] sm:$0xff] %vm3449_vm3, %v3367_v39 }
 0x21c   :  { %v2678_v59 = vpop.f32.mrf.mxu1  ;;  %v2341_v63 = vpop.f32.mrf.mxu2 }
 0x21d   :  { %3497 = vst.msk [vmem:[%s8535_s3 + $0x178] sm:$0xff] %vm3449_vm3, %v3240_v44  ;;  %v2342_v11 = vadd.f32 %v6150_v56, %v2341_v63  ;;  %v3997_v44 = vor.u32 %v4968_v36, %v3994_v38  ;;  %v4496_v63 = vld [vmem:[%s8533_s0 + $0x620] sm:$0xf] }
 0x21e   :  { %v2024_v51 = vpop.f32.mrf.mxu0 }
 0x21f   :  { %4803 = vmatmul.msk.bf16.gmra.mxu1 %vm1503_vm2, %v3981_v55  ;;  %v2025_v53 = vadd.f32 %v6150_v56, %v2024_v51  ;;  %4868 = vmatmul.msk.bf16.gmra.mxu3 %vm1503_vm2, %v4501_v47  ;;  %v2991_v7 = vadd.f32 %v6604_v16, %v2342_v11  ;;  %v4517_v11 = vor.u32 %v5098_v41, %v4514_v43  ;;  %v4972_v41 = vld [vmem:[%s8533_s0 + $0x254] sm:$0xf]  ;;  %v4010_v43 = vld [vmem:[%s8533_s0 + $0x258] sm:$0xf0] }
 0x221   :  { %v2674_v57 = vadd.f32 %v2673_v26, %v2025_v53  ;;  %2063 = vmatmul.bf16.gmra.mxu0 %v3969_v49  ;;  %v3368_v10 = vmax.f32 %v2991_v7, 0.0  ;;  %2383 = vmatmul.bf16.gmra.mxu2 %v4481_v5  ;;  %v3989_v26 = vor.u32 %v4966_v1, %v3986_v3  ;;  %v5095_v49 = vld [vmem:[%s8533_s0 + $0x624] sm:$0xf0]  ;;  %v6831_v53 = vld [vmem:[%s8534_s2] ss:$0 sm:$0xff] }
 0x222   :  { %v6729_v58 = vpop.f32.mrf.mxu3 }
 0x223   :  { %v3241_v12 = vmax.f32 %v2674_v57, 0.0  ;;  %3625 = vst.msk [vmem:[%s8535_s3 + $0x578] sm:$0xff] %vm3449_vm3, %v3368_v10  ;;  %v4497_v10 = vor.u32 %v5095_v49, %v4496_v63  ;;  %v4000_v63 = vld [vmem:[%s8533_s0 + $0x240] sm:$0xf]  ;;  %v4971_v49 = vld [vmem:[%s8533_s0 + $0x244] sm:$0xf0] }
 0x224   :  { %v2680_v60 = vpop.f32.mrf.mxu1  ;;  %v2344_v61 = vpop.f32.mrf.mxu2 }
 0x225   :  { %3498 = vst.msk [vmem:[%s8535_s3 + $0x180] sm:$0xff] %vm3449_vm3, %v3241_v12  ;;  %v2345_v16 = vadd.f32 %v6150_v56, %v2344_v61 }
 0x226   :  { %v2026_v62 = vpop.f32.mrf.mxu0 }
 0x227   :  { %v2027_v17 = vadd.f32 %v6150_v56, %v2026_v62  ;;  %v2994_v4 = vadd.f32 %v6625_v52, %v2345_v16 }
 0x229   :  { %v2676_v21 = vadd.f32 %v2675_v27, %v2027_v17  ;;  %v3369_v9 = vmax.f32 %v2994_v4, 0.0 }
 0x22a   :  { %v6760_v52 = vpop.f32.mrf.mxu3 }
 0x22b   :  { %v3242_v15 = vmax.f32 %v2676_v21, 0.0  ;;  %3626 = vst.msk [vmem:[%s8535_s3 + $0x580] sm:$0xff] %vm3449_vm3, %v3369_v9 }
 0x22c   :  { %v2683_v30 = vpop.f32.mrf.mxu1  ;;  %v2346_v35 = vpop.f32.mrf.mxu2 }
 0x22d   :  { %3499 = vst.msk [vmem:[%s8535_s3 + $0x188] sm:$0xff] %vm3449_vm3, %v3242_v15  ;;  %v2347_v22 = vadd.f32 %v6150_v56, %v2346_v35 }
 0x22e   :  { %v2029_v23 = vpop.f32.mrf.mxu0 }
 0x22f   :  { %4804 = vmatmul.msk.bf16.gmra.mxu1 %vm1503_vm2, %v3989_v26  ;;  %v2030_v42 = vadd.f32 %v6150_v56, %v2029_v23  ;;  %4869 = vmatmul.msk.bf16.gmra.mxu3 %vm1503_vm2, %v4509_v19  ;;  %v2996_v27 = vadd.f32 %v6656_v48, %v2347_v22  ;;  %v5097_v22 = vld [vmem:[%s8533_s0 + $0x634] sm:$0xf0]  ;;  %v4525_v23 = vor.u32 %v5100_v0, %v4522_v13  ;;  %v4974_v0 = vld [vmem:[%s8533_s0 + $0x264] sm:$0xf]  ;;  %v4018_v13 = vld [vmem:[%s8533_s0 + $0x268] sm:$0xf0] }
 0x231   :  { %v2679_v28 = vadd.f32 %v2678_v59, %v2030_v42  ;;  %2068 = vmatmul.bf16.gmra.mxu0 %v3977_v37  ;;  %v3370_v2 = vmax.f32 %v2996_v27, 0.0  ;;  %2388 = vmatmul.bf16.gmra.mxu2 %v4489_v40  ;;  %v3984_v59 = vld [vmem:[%s8533_s0 + $0x220] sm:$0xf]  ;;  %v4504_v37 = vld [vmem:[%s8533_s0 + $0x630] sm:$0xf]  ;;  %v3993_v42 = vor.u32 %v4969_v18, %v3992_v54 }
 0x232   :  { %v6781_v29 = vpop.f32.mrf.mxu3  ;;  %v3985_v5 = vor.u32 %v4967_v45, %v3984_v59  ;;  %v5102_v59 = vld [vmem:[%s8533_s0 + $0x664] sm:$0xf]  ;;  %v4530_v45 = vld [vmem:[%s8533_s0 + $0x668] sm:$0xf0]  ;;  %v5104_v54 = vld [vmem:[%s8533_s0 + $0x674] sm:$0xf] }
 0x233   :  { %v3243_v46 = vmax.f32 %v2679_v28, 0.0  ;;  %3627 = vst.msk [vmem:[%s8535_s3 + $0x588] sm:$0xff] %vm3449_vm3, %v3370_v2  ;;  %v4505_v2 = vor.u32 %v5097_v22, %v4504_v37  ;;  %v4538_v18 = vld [vmem:[%s8533_s0 + $0x678] sm:$0xf0]  ;;  %v4008_v37 = vld [vmem:[%s8533_s0 + $0x250] sm:$0xf] }
 0x234   :  { %v2685_v32 = vpop.f32.mrf.mxu1  ;;  %v2349_v33 = vpop.f32.mrf.mxu2  ;;  %v4973_v22 = vld [vmem:[%s8533_s0 + $0x254] sm:$0xf0] }
 0x235   :  { %3500 = vst.msk [vmem:[%s8535_s3 + $0x190] sm:$0xff] %vm3449_vm3, %v3243_v46  ;;  %v2350_v48 = vadd.f32 %v6150_v56, %v2349_v33 }
 0x236   :  { %v2031_v34 = vpop.f32.mrf.mxu0 }
 0x237   :  { %v2032_v50 = vadd.f32 %v6150_v56, %v2031_v34  ;;  %v2999_v39 = vadd.f32 %v6677_v24, %v2350_v48 }
 0x239   :  { %v2681_v55 = vadd.f32 %v2680_v60, %v2032_v50  ;;  %v3371_v56 = vmax.f32 %v2999_v39, 0.0 }
 0x23a   :  { %v6812_v24 = vpop.f32.mrf.mxu3 }
 0x23b   :  { %v3244_v25 = vmax.f32 %v2681_v55, 0.0  ;;  %3628 = vst.msk [vmem:[%s8535_s3 + $0x590] sm:$0xff] %vm3449_vm3, %v3371_v56 }
 0x23c   :  { %v2688_v47 = vpop.f32.mrf.mxu1  ;;  %v2351_v51 = vpop.f32.mrf.mxu2 }
 0x23d   :  { %3501 = vst.msk [vmem:[%s8535_s3 + $0x198] sm:$0xff] %vm3449_vm3, %v3244_v25  ;;  %v2352_v7 = vadd.f32 %v6831_v53, %v2351_v51 }
 0x23e   :  { %v2034_v57 = vpop.f32.mrf.mxu0 }
 0x23f   :  { %4805 = vmatmul.msk.bf16.gmra.mxu1 %vm1503_vm2, %v3997_v44  ;;  %v2035_v12 = vadd.f32 %v6831_v53, %v2034_v57  ;;  %4870 = vmatmul.msk.bf16.gmra.mxu3 %vm1503_vm2, %v4517_v11  ;;  %v3001_v60 = vadd.f32 %v6708_v20, %v2352_v7  ;;  %v5099_v7 = vld [vmem:[%s8533_s0 + $0x644] sm:$0xf0]  ;;  %v4533_v57 = vor.u32 %v5102_v59, %v4530_v45  ;;  %v4976_v59 = vld [vmem:[%s8533_s0 + $0x274] sm:$0xf]  ;;  %v4026_v45 = vld [vmem:[%s8533_s0 + $0x278] sm:$0xf0] }
 0x241   :  { %v2684_v61 = vadd.f32 %v2683_v30, %v2035_v12  ;;  %2073 = vmatmul.bf16.gmra.mxu0 %v3985_v5  ;;  %v3372_v16 = vmax.f32 %v3001_v60, 0.0  ;;  %2393 = vmatmul.bf16.gmra.mxu2 %v4497_v10  ;;  %v4005_v30 = vor.u32 %v4970_v6, %v4002_v8  ;;  %v4512_v5 = vld [vmem:[%s8533_s0 + $0x640] sm:$0xf]  ;;  %v4001_v12 = vor.u32 %v4971_v49, %v4000_v63  ;;  %v5106_v63 = vld [vmem:[%s8533_s0 + $0x684] sm:$0xf] }
 0x242   :  { %v6838_v62 = vpop.f32.mrf.mxu3  ;;  %v4546_v49 = vld [vmem:[%s8533_s0 + $0x688] sm:$0xf0] }
 0x243   :  { %v3245_v17 = vmax.f32 %v2684_v61, 0.0  ;;  %3629 = vst.msk [vmem:[%s8535_s3 + $0x598] sm:$0xff] %vm3449_vm3, %v3372_v16  ;;  %v4513_v16 = vor.u32 %v5099_v7, %v4512_v5  ;;  %v4016_v5 = vld [vmem:[%s8533_s0 + $0x260] sm:$0xf]  ;;  %v4975_v7 = vld [vmem:[%s8533_s0 + $0x264] sm:$0xf0] }
 0x244   :  { %v2690_v1 = vpop.f32.mrf.mxu1  ;;  %v2354_v3 = vpop.f32.mrf.mxu2 }
 0x245   :  { %3502 = vst.msk [vmem:[%s8535_s3 + $0x1a0] sm:$0xff] %vm3449_vm3, %v3245_v17  ;;  %v2355_v20 = vadd.f32 %v6831_v53, %v2354_v3 }
 0x246   :  { %v2036_v4 = vpop.f32.mrf.mxu0 }
 0x247   :  { %v2037_v21 = vadd.f32 %v6831_v53, %v2036_v4  ;;  %v3004_v9 = vadd.f32 %v6729_v58, %v2355_v20 }
 0x249   :  { %v2686_v26 = vadd.f32 %v2685_v32, %v2037_v21  ;;  %v3373_v15 = vmax.f32 %v3004_v9, 0.0 }
 0x24a   :  { %v6869_v58 = vpop.f32.mrf.mxu3 }
 0x24b   :  { %v3246_v19 = vmax.f32 %v2686_v26, 0.0  ;;  %3630 = vst.msk [vmem:[%s8535_s3 + $0x5a0] sm:$0xff] %vm3449_vm3, %v3373_v15 }
 0x24c   :  { %v2693_v35 = vpop.f32.mrf.mxu1  ;;  %v2356_v40 = vpop.f32.mrf.mxu2 }
 0x24d   :  { %3503 = vst.msk [vmem:[%s8535_s3 + $0x1a8] sm:$0xff] %vm3449_vm3, %v3246_v19  ;;  %v2357_v27 = vadd.f32 %v6831_v53, %v2356_v40 }
 0x24e   :  { %v2039_v28 = vpop.f32.mrf.mxu0 }
 0x24f   :  { %4806 = vmatmul.msk.bf16.gmra.mxu1 %vm1503_vm2, %v4005_v30  ;;  %v2040_v46 = vadd.f32 %v6831_v53, %v2039_v28  ;;  %4871 = vmatmul.msk.bf16.gmra.mxu3 %vm1503_vm2, %v4525_v23  ;;  %v3006_v32 = vadd.f32 %v6760_v52, %v2357_v27  ;;  %v5101_v27 = vld [vmem:[%s8533_s0 + $0x654] sm:$0xf0]  ;;  %v4541_v28 = vor.u32 %v5104_v54, %v4538_v18  ;;  %v4978_v54 = vld [vmem:[%s8533_s0 + $0x284] sm:$0xf]  ;;  %v4034_v18 = vld [vmem:[%s8533_s0 + $0x288] sm:$0xf0] }
 0x251   :  { %v2689_v33 = vadd.f32 %v2688_v47, %v2040_v46  ;;  %2078 = vmatmul.bf16.gmra.mxu0 %v3993_v42  ;;  %v3374_v48 = vmax.f32 %v3006_v32, 0.0  ;;  %2398 = vmatmul.bf16.gmra.mxu2 %v4505_v2  ;;  %v4013_v47 = vor.u32 %v4972_v41, %v4010_v43  ;;  %v4520_v42 = vld [vmem:[%s8533_s0 + $0x650] sm:$0xf]  ;;  %v4009_v46 = vor.u32 %v4973_v22, %v4008_v37  ;;  %v5108_v37 = vld [vmem:[%s8533_s0 + $0x694] sm:$0xf] }
 0x252   :  { %v6890_v34 = vpop.f32.mrf.mxu3  ;;  %v4554_v22 = vld [vmem:[%s8533_s0 + $0x698] sm:$0xf0] }
 0x253   :  { %v3247_v50 = vmax.f32 %v2689_v33, 0.0  ;;  %3631 = vst.msk [vmem:[%s8535_s3 + $0x5a8] sm:$0xff] %vm3449_vm3, %v3374_v48  ;;  %v4521_v48 = vor.u32 %v5101_v27, %v4520_v42  ;;  %v4024_v42 = vld [vmem:[%s8533_s0 + $0x270] sm:$0xf]  ;;  %v4977_v27 = vld [vmem:[%s8533_s0 + $0x274] sm:$0xf0] }
 0x254   :  { %v2695_v36 = vpop.f32.mrf.mxu1  ;;  %v2359_v38 = vpop.f32.mrf.mxu2 }
 0x255   :  { %3504 = vst.msk [vmem:[%s8535_s3 + $0x1b0] sm:$0xff] %vm3449_vm3, %v3247_v50  ;;  %v2360_v52 = vadd.f32 %v6831_v53, %v2359_v38 }
 0x256   :  { %v2041_v39 = vpop.f32.mrf.mxu0 }
 0x257   :  { %v2042_v55 = vadd.f32 %v6831_v53, %v2041_v39  ;;  %v3009_v56 = vadd.f32 %v6781_v29, %v2360_v52 }
 0x259   :  { %v2691_v44 = vadd.f32 %v2690_v1, %v2042_v55  ;;  %v3375_v25 = vmax.f32 %v3009_v56, 0.0 }
 0x25a   :  { %v6921_v29 = vpop.f32.mrf.mxu3 }
 0x25b   :  { %v3248_v11 = vmax.f32 %v2691_v44, 0.0  ;;  %3632 = vst.msk [vmem:[%s8535_s3 + $0x5b0] sm:$0xff] %vm3449_vm3, %v3375_v25 }
 0x25c   :  { %v2698_v51 = vpop.f32.mrf.mxu1  ;;  %v2361_v10 = vpop.f32.mrf.mxu2 }
 0x25d   :  { %3505 = vst.msk [vmem:[%s8535_s3 + $0x1b8] sm:$0xff] %vm3449_vm3, %v3248_v11  ;;  %v2362_v60 = vadd.f32 %v6831_v53, %v2361_v10 }
 0x25e   :  { %v2044_v61 = vpop.f32.mrf.mxu0 }
 0x25f   :  { %4807 = vmatmul.msk.bf16.gmra.mxu1 %vm1503_vm2, %v4013_v47  ;;  %v2045_v17 = vadd.f32 %v6831_v53, %v2044_v61  ;;  %4872 = vmatmul.msk.bf16.gmra.mxu3 %vm1503_vm2, %v4533_v57  ;;  %v3011_v1 = vadd.f32 %v6812_v24, %v2362_v60  ;;  %v5103_v60 = vld [vmem:[%s8533_s0 + $0x664] sm:$0xf0]  ;;  %v4549_v61 = vor.u32 %v5106_v63, %v4546_v49  ;;  %v4980_v63 = vld [vmem:[%s8533_s0 + $0x294] sm:$0xf]  ;;  %v4042_v49 = vld [vmem:[%s8533_s0 + $0x298] sm:$0xf0] }
 0x261   :  { %v2694_v3 = vadd.f32 %v2693_v35, %v2045_v17  ;;  %2083 = vmatmul.bf16.gmra.mxu0 %v4001_v12  ;;  %v3376_v20 = vmax.f32 %v3011_v1, 0.0  ;;  %2403 = vmatmul.bf16.gmra.mxu2 %v4513_v16  ;;  %v4021_v35 = vor.u32 %v4974_v0, %v4018_v13  ;;  %v4528_v12 = vld [vmem:[%s8533_s0 + $0x660] sm:$0xf]  ;;  %v4017_v17 = vor.u32 %v4975_v7, %v4016_v5  ;;  %v5110_v5 = vld [vmem:[%s8533_s0 + $0x6a4] sm:$0xf] }
 0x262   :  { %v6942_v4 = vpop.f32.mrf.mxu3  ;;  %v4562_v7 = vld [vmem:[%s8533_s0 + $0x6a8] sm:$0xf0] }
 0x263   :  { %v3249_v21 = vmax.f32 %v2694_v3, 0.0  ;;  %3633 = vst.msk [vmem:[%s8535_s3 + $0x5b8] sm:$0xff] %vm3449_vm3, %v3376_v20  ;;  %v4529_v20 = vor.u32 %v5103_v60, %v4528_v12  ;;  %v4032_v12 = vld [vmem:[%s8533_s0 + $0x280] sm:$0xf]  ;;  %v4979_v60 = vld [vmem:[%s8533_s0 + $0x284] sm:$0xf0] }
 0x264   :  { %v2700_v6 = vpop.f32.mrf.mxu1  ;;  %v2364_v8 = vpop.f32.mrf.mxu2 }
 0x265   :  { %3506 = vst.msk [vmem:[%s8535_s3 + $0x1c0] sm:$0xff] %vm3449_vm3, %v3249_v21  ;;  %v2365_v24 = vadd.f32 %v6831_v53, %v2364_v8 }
 0x266   :  { %v2046_v9 = vpop.f32.mrf.mxu0 }
 0x267   :  { %v2047_v26 = vadd.f32 %v6831_v53, %v2046_v9  ;;  %v3014_v15 = vadd.f32 %v6838_v62, %v2365_v24 }
 0x269   :  { %v2696_v30 = vadd.f32 %v2695_v36, %v2047_v26  ;;  %v3377_v19 = vmax.f32 %v3014_v15, 0.0 }
 0x26a   :  { %v6973_v62 = vpop.f32.mrf.mxu3 }
 0x26b   :  { %v3250_v23 = vmax.f32 %v2696_v30, 0.0  ;;  %3634 = vst.msk [vmem:[%s8535_s3 + $0x5c0] sm:$0xff] %vm3449_vm3, %v3377_v19 }
 0x26c   :  { %v2703_v40 = vpop.f32.mrf.mxu1  ;;  %v2366_v2 = vpop.f32.mrf.mxu2 }
 0x26d   :  { %3507 = vst.msk [vmem:[%s8535_s3 + $0x1c8] sm:$0xff] %vm3449_vm3, %v3250_v23  ;;  %v2367_v32 = vadd.f32 %v6831_v53, %v2366_v2 }
 0x26e   :  { %v2049_v33 = vpop.f32.mrf.mxu0 }
 0x26f   :  { %4808 = vmatmul.msk.bf16.gmra.mxu1 %vm1503_vm2, %v4021_v35  ;;  %v2050_v50 = vadd.f32 %v6831_v53, %v2049_v33  ;;  %4873 = vmatmul.msk.bf16.gmra.mxu3 %vm1503_vm2, %v4541_v28  ;;  %v3016_v36 = vadd.f32 %v6869_v58, %v2367_v32  ;;  %v5105_v32 = vld [vmem:[%s8533_s0 + $0x674] sm:$0xf0]  ;;  %v4557_v33 = vor.u32 %v5108_v37, %v4554_v22  ;;  %v4982_v37 = vld [vmem:[%s8533_s0 + $0x2a4] sm:$0xf]  ;;  %v4050_v22 = vld [vmem:[%s8533_s0 + $0x2a8] sm:$0xf0] }
 0x271   :  { %v2699_v38 = vadd.f32 %v2698_v51, %v2050_v50  ;;  %2088 = vmatmul.bf16.gmra.mxu0 %v4009_v46  ;;  %v3378_v52 = vmax.f32 %v3016_v36, 0.0  ;;  %2408 = vmatmul.bf16.gmra.mxu2 %v4521_v48  ;;  %v4029_v51 = vor.u32 %v4976_v59, %v4026_v45  ;;  %v4536_v46 = vld [vmem:[%s8533_s0 + $0x670] sm:$0xf]  ;;  %v4025_v50 = vor.u32 %v4977_v27, %v4024_v42  ;;  %v5112_v42 = vld [vmem:[%s8533_s0 + $0x6b4] sm:$0xf] }
 0x272   :  { %v6994_v39 = vpop.f32.mrf.mxu3  ;;  %v4570_v27 = vld [vmem:[%s8533_s0 + $0x6b8] sm:$0xf0] }
 0x273   :  { %v3251_v55 = vmax.f32 %v2699_v38, 0.0  ;;  %3635 = vst.msk [vmem:[%s8535_s3 + $0x5c8] sm:$0xff] %vm3449_vm3, %v3378_v52  ;;  %v4537_v52 = vor.u32 %v5105_v32, %v4536_v46  ;;  %v4040_v46 = vld [vmem:[%s8533_s0 + $0x290] sm:$0xf]  ;;  %v4981_v32 = vld [vmem:[%s8533_s0 + $0x294] sm:$0xf0] }
 0x274   :  { %v2705_v41 = vpop.f32.mrf.mxu1  ;;  %v2369_v43 = vpop.f32.mrf.mxu2 }
 0x275   :  { %3508 = vst.msk [vmem:[%s8535_s3 + $0x1d0] sm:$0xff] %vm3449_vm3, %v3251_v55  ;;  %v2370_v58 = vadd.f32 %v6831_v53, %v2369_v43 }
 0x276   :  { %v2051_v56 = vpop.f32.mrf.mxu0 }
 0x277   :  { %v2052_v44 = vadd.f32 %v6831_v53, %v2051_v56  ;;  %v3019_v25 = vadd.f32 %v6890_v34, %v2370_v58 }
 0x279   :  { %v2701_v47 = vadd.f32 %v2700_v6, %v2052_v44  ;;  %v3379_v11 = vmax.f32 %v3019_v25, 0.0 }
 0x27a   :  { %v7025_v34 = vpop.f32.mrf.mxu3 }
 0x27b   :  { %v3252_v57 = vmax.f32 %v2701_v47, 0.0  ;;  %3636 = vst.msk [vmem:[%s8535_s3 + $0x5d0] sm:$0xff] %vm3449_vm3, %v3379_v11 }
 0x27c   :  { %v2708_v10 = vpop.f32.mrf.mxu1  ;;  %v2371_v16 = vpop.f32.mrf.mxu2 }
 0x27d   :  { %3509 = vst.msk [vmem:[%s8535_s3 + $0x1d8] sm:$0xff] %vm3449_vm3, %v3252_v57  ;;  %v2372_v1 = vadd.f32 %v6831_v53, %v2371_v16 }
 0x27e   :  { %v2054_v3 = vpop.f32.mrf.mxu0 }
 0x27f   :  { %4809 = vmatmul.msk.bf16.gmra.mxu1 %vm1503_vm2, %v4029_v51  ;;  %v2055_v21 = vadd.f32 %v6831_v53, %v2054_v3  ;;  %4874 = vmatmul.msk.bf16.gmra.mxu3 %vm1503_vm2, %v4549_v61  ;;  %v3021_v6 = vadd.f32 %v6921_v29, %v2372_v1  ;;  %v5107_v1 = vld [vmem:[%s8533_s0 + $0x684] sm:$0xf0]  ;;  %v4565_v3 = vor.u32 %v5110_v5, %v4562_v7  ;;  %v4984_v5 = vld [vmem:[%s8533_s0 + $0x2b4] sm:$0xf]  ;;  %v4058_v7 = vld [vmem:[%s8533_s0 + $0x2b8] sm:$0xf0] }
 0x281   :  { %v2704_v8 = vadd.f32 %v2703_v40, %v2055_v21  ;;  %2093 = vmatmul.bf16.gmra.mxu0 %v4017_v17  ;;  %v3380_v24 = vmax.f32 %v3021_v6, 0.0  ;;  %2413 = vmatmul.bf16.gmra.mxu2 %v4529_v20  ;;  %v4037_v40 = vor.u32 %v4978_v54, %v4034_v18  ;;  %v4544_v17 = vld [vmem:[%s8533_s0 + $0x680] sm:$0xf]  ;;  %v4033_v21 = vor.u32 %v4979_v60, %v4032_v12  ;;  %v5114_v12 = vld [vmem:[%s8533_s0 + $0x6c4] sm:$0xf] }
 0x282   :  { %v7046_v9 = vpop.f32.mrf.mxu3  ;;  %v4578_v60 = vld [vmem:[%s8533_s0 + $0x6c8] sm:$0xf0] }
 0x283   :  { %v3253_v26 = vmax.f32 %v2704_v8, 0.0  ;;  %3637 = vst.msk [vmem:[%s8535_s3 + $0x5d8] sm:$0xff] %vm3449_vm3, %v3380_v24  ;;  %v4545_v24 = vor.u32 %v5107_v1, %v4544_v17  ;;  %v4048_v17 = vld [vmem:[%s8533_s0 + $0x2a0] sm:$0xf]  ;;  %v4983_v1 = vld [vmem:[%s8533_s0 + $0x2a4] sm:$0xf0] }
 0x284   :  { %v2710_v0 = vpop.f32.mrf.mxu1  ;;  %v2374_v13 = vpop.f32.mrf.mxu2 }
 0x285   :  { %3510 = vst.msk [vmem:[%s8535_s3 + $0x1e0] sm:$0xff] %vm3449_vm3, %v3253_v26  ;;  %v2375_v29 = vadd.f32 %v6831_v53, %v2374_v13 }
 0x286   :  { %v2056_v15 = vpop.f32.mrf.mxu0 }
 0x287   :  { %v2057_v30 = vadd.f32 %v6831_v53, %v2056_v15  ;;  %v3024_v19 = vadd.f32 %v6942_v4, %v2375_v29 }
 0x289   :  { %v2706_v35 = vadd.f32 %v2705_v41, %v2057_v30  ;;  %v3381_v23 = vmax.f32 %v3024_v19, 0.0 }
 0x28a   :  { %v7077_v4 = vpop.f32.mrf.mxu3 }
 0x28b   :  { %v3254_v28 = vmax.f32 %v2706_v35, 0.0  ;;  %3638 = vst.msk [vmem:[%s8535_s3 + $0x5e0] sm:$0xff] %vm3449_vm3, %v3381_v23 }
 0x28c   :  { %v2713_v2 = vpop.f32.mrf.mxu1  ;;  %v2376_v48 = vpop.f32.mrf.mxu2 }
 0x28d   :  { %3511 = vst.msk [vmem:[%s8535_s3 + $0x1e8] sm:$0xff] %vm3449_vm3, %v3254_v28  ;;  %v2377_v36 = vadd.f32 %v6831_v53, %v2376_v48 }
 0x28e   :  { %v2059_v38 = vpop.f32.mrf.mxu0 }
 0x28f   :  { %4810 = vmatmul.msk.bf16.gmra.mxu1 %vm1503_vm2, %v4037_v40  ;;  %v2060_v55 = vadd.f32 %v6831_v53, %v2059_v38  ;;  %4875 = vmatmul.msk.bf16.gmra.mxu3 %vm1503_vm2, %v4557_v33  ;;  %v3026_v41 = vadd.f32 %v6973_v62, %v2377_v36  ;;  %v5109_v36 = vld [vmem:[%s8533_s0 + $0x694] sm:$0xf0]  ;;  %v4573_v38 = vor.u32 %v5112_v42, %v4570_v27  ;;  %v4986_v42 = vld [vmem:[%s8533_s0 + $0x2c4] sm:$0xf]  ;;  %v4066_v27 = vld [vmem:[%s8533_s0 + $0x2c8] sm:$0xf0] }
 0x291   :  { %v2709_v43 = vadd.f32 %v2708_v10, %v2060_v55  ;;  %2098 = vmatmul.bf16.gmra.mxu0 %v4025_v50  ;;  %v3382_v58 = vmax.f32 %v3026_v41, 0.0  ;;  %2418 = vmatmul.bf16.gmra.mxu2 %v4537_v52  ;;  %v4045_v10 = vor.u32 %v4980_v63, %v4042_v49  ;;  %v4552_v50 = vld [vmem:[%s8533_s0 + $0x690] sm:$0xf]  ;;  %v4041_v55 = vor.u32 %v4981_v32, %v4040_v46  ;;  %v5116_v46 = vld [vmem:[%s8533_s0 + $0x6d4] sm:$0xf] }
 0x292   :  { %v7098_v56 = vpop.f32.mrf.mxu3  ;;  %v4586_v32 = vld [vmem:[%s8533_s0 + $0x6d8] sm:$0xf0] }
 0x293   :  { %v3255_v44 = vmax.f32 %v2709_v43, 0.0  ;;  %3639 = vst.msk [vmem:[%s8535_s3 + $0x5e8] sm:$0xff] %vm3449_vm3, %v3382_v58  ;;  %v4553_v58 = vor.u32 %v5109_v36, %v4552_v50  ;;  %v4056_v50 = vld [vmem:[%s8533_s0 + $0x2b0] sm:$0xf]  ;;  %v4985_v36 = vld [vmem:[%s8533_s0 + $0x2b4] sm:$0xf0] }
 0x294   :  { %v2715_v59 = vpop.f32.mrf.mxu1  ;;  %v2379_v45 = vpop.f32.mrf.mxu2 }
 0x295   :  { %3512 = vst.msk [vmem:[%s8535_s3 + $0x1f0] sm:$0xff] %vm3449_vm3, %v3255_v44  ;;  %v2380_v62 = vadd.f32 %v6831_v53, %v2379_v45 }
 0x296   :  { %v2061_v25 = vpop.f32.mrf.mxu0 }
 0x297   :  { %v2062_v47 = vadd.f32 %v6831_v53, %v2061_v25  ;;  %v3029_v11 = vadd.f32 %v6994_v39, %v2380_v62 }
 0x299   :  { %v2711_v51 = vadd.f32 %v2710_v0, %v2062_v47  ;;  %v3383_v57 = vmax.f32 %v3029_v11, 0.0 }
 0x29a   :  { %v7129_v39 = vpop.f32.mrf.mxu3 }
 0x29b   :  { %v3256_v61 = vmax.f32 %v2711_v51, 0.0  ;;  %3640 = vst.msk [vmem:[%s8535_s3 + $0x5f0] sm:$0xff] %vm3449_vm3, %v3383_v57 }
 0x29c   :  { %v2718_v16 = vpop.f32.mrf.mxu1  ;;  %v2381_v20 = vpop.f32.mrf.mxu2 }
 0x29d   :  { %3513 = vst.msk [vmem:[%s8535_s3 + $0x1f8] sm:$0xff] %vm3449_vm3, %v3256_v61  ;;  %v2382_v6 = vadd.f32 %v6831_v53, %v2381_v20 }
 0x29e   :  { %v2064_v8 = vpop.f32.mrf.mxu0 }
 0x29f   :  { %4811 = vmatmul.msk.bf16.gmra.mxu1 %vm1503_vm2, %v4045_v10  ;;  %v2065_v26 = vadd.f32 %v6831_v53, %v2064_v8  ;;  %4876 = vmatmul.msk.bf16.gmra.mxu3 %vm1503_vm2, %v4565_v3  ;;  %v3031_v0 = vadd.f32 %v7025_v34, %v2382_v6  ;;  %v5111_v6 = vld [vmem:[%s8533_s0 + $0x6a4] sm:$0xf0]  ;;  %v4581_v8 = vor.u32 %v5114_v12, %v4578_v60  ;;  %v4988_v12 = vld [vmem:[%s8533_s0 + $0x2d4] sm:$0xf]  ;;  %v4074_v60 = vld [vmem:[%s8533_s0 + $0x2d8] sm:$0xf0] }
 0x2a1   :  { %v2714_v13 = vadd.f32 %v2713_v2, %v2065_v26  ;;  %2103 = vmatmul.bf16.gmra.mxu0 %v4033_v21  ;;  %v3384_v29 = vmax.f32 %v3031_v0, 0.0  ;;  %2423 = vmatmul.bf16.gmra.mxu2 %v4545_v24  ;;  %v4053_v2 = vor.u32 %v4982_v37, %v4050_v22  ;;  %v4560_v21 = vld [vmem:[%s8533_s0 + $0x6a0] sm:$0xf]  ;;  %v4049_v26 = vor.u32 %v4983_v1, %v4048_v17  ;;  %v5118_v17 = vld [vmem:[%s8533_s0 + $0x6e4] sm:$0xf] }
 0x2a2   :  { %v7150_v15 = vpop.f32.mrf.mxu3  ;;  %v4594_v1 = vld [vmem:[%s8533_s0 + $0x6e8] sm:$0xf0] }
 0x2a3   :  { %v3257_v30 = vmax.f32 %v2714_v13, 0.0  ;;  %3641 = vst.msk [vmem:[%s8535_s3 + $0x5f8] sm:$0xff] %vm3449_vm3, %v3384_v29  ;;  %v4561_v29 = vor.u32 %v5111_v6, %v4560_v21  ;;  %v4064_v21 = vld [vmem:[%s8533_s0 + $0x2c0] sm:$0xf]  ;;  %v4987_v6 = vld [vmem:[%s8533_s0 + $0x2c4] sm:$0xf0] }
 0x2a4   :  { %v2720_v54 = vpop.f32.mrf.mxu1  ;;  %v2384_v18 = vpop.f32.mrf.mxu2 }
 0x2a5   :  { %3514 = vst.msk [vmem:[%s8535_s3 + $0x200] sm:$0xff] %vm3449_vm3, %v3257_v30  ;;  %v2385_v34 = vadd.f32 %v6831_v53, %v2384_v18 }
 0x2a6   :  { %v2066_v19 = vpop.f32.mrf.mxu0 }
 0x2a7   :  { %v2067_v35 = vadd.f32 %v6831_v53, %v2066_v19  ;;  %v3034_v23 = vadd.f32 %v7046_v9, %v2385_v34 }
 0x2a9   :  { %v2716_v40 = vadd.f32 %v2715_v59, %v2067_v35  ;;  %v3385_v28 = vmax.f32 %v3034_v23, 0.0 }
 0x2aa   :  { %v7181_v9 = vpop.f32.mrf.mxu3 }
 0x2ab   :  { %v3258_v33 = vmax.f32 %v2716_v40, 0.0  ;;  %3642 = vst.msk [vmem:[%s8535_s3 + $0x600] sm:$0xff] %vm3449_vm3, %v3385_v28 }
 0x2ac   :  { %v2723_v48 = vpop.f32.mrf.mxu1  ;;  %v2386_v52 = vpop.f32.mrf.mxu2 }
 0x2ad   :  { %3515 = vst.msk [vmem:[%s8535_s3 + $0x208] sm:$0xff] %vm3449_vm3, %v3258_v33  ;;  %v2387_v41 = vadd.f32 %v6831_v53, %v2386_v52 }
 0x2ae   :  { %v2069_v43 = vpop.f32.mrf.mxu0 }
 0x2af   :  { %4812 = vmatmul.msk.bf16.gmra.mxu1 %vm1503_vm2, %v4053_v2  ;;  %v2070_v44 = vadd.f32 %v6831_v53, %v2069_v43  ;;  %4877 = vmatmul.msk.bf16.gmra.mxu3 %vm1503_vm2, %v4573_v38  ;;  %v3036_v59 = vadd.f32 %v7077_v4, %v2387_v41  ;;  %v5113_v41 = vld [vmem:[%s8533_s0 + $0x6b4] sm:$0xf0]  ;;  %v4589_v43 = vor.u32 %v5116_v46, %v4586_v32  ;;  %v4990_v46 = vld [vmem:[%s8533_s0 + $0x2e4] sm:$0xf]  ;;  %v4082_v32 = vld [vmem:[%s8533_s0 + $0x2e8] sm:$0xf0] }
 0x2b1   :  { %v2719_v45 = vadd.f32 %v2718_v16, %v2070_v44  ;;  %2108 = vmatmul.bf16.gmra.mxu0 %v4041_v55  ;;  %v3386_v62 = vmax.f32 %v3036_v59, 0.0  ;;  %2428 = vmatmul.bf16.gmra.mxu2 %v4553_v58  ;;  %v4061_v16 = vor.u32 %v4984_v5, %v4058_v7  ;;  %v4568_v55 = vld [vmem:[%s8533_s0 + $0x6b0] sm:$0xf]  ;;  %v4057_v44 = vor.u32 %v4985_v36, %v4056_v50  ;;  %v5120_v50 = vld [vmem:[%s8533_s0 + $0x6f4] sm:$0xf] }
 0x2b2   :  { %v7202_v25 = vpop.f32.mrf.mxu3  ;;  %v4602_v36 = vld [vmem:[%s8533_s0 + $0x6f8] sm:$0xf0] }
 0x2b3   :  { %v3259_v47 = vmax.f32 %v2719_v45, 0.0  ;;  %3643 = vst.msk [vmem:[%s8535_s3 + $0x608] sm:$0xff] %vm3449_vm3, %v3386_v62  ;;  %v4569_v62 = vor.u32 %v5113_v41, %v4568_v55  ;;  %v4072_v55 = vld [vmem:[%s8533_s0 + $0x2d0] sm:$0xf]  ;;  %v4989_v41 = vld [vmem:[%s8533_s0 + $0x2d4] sm:$0xf0] }
 0x2b4   :  { %v2725_v63 = vpop.f32.mrf.mxu1  ;;  %v2389_v49 = vpop.f32.mrf.mxu2 }
 0x2b5   :  { %3516 = vst.msk [vmem:[%s8535_s3 + $0x210] sm:$0xff] %vm3449_vm3, %v3259_v47  ;;  %v2390_v4 = vadd.f32 %v6831_v53, %v2389_v49 }
 0x2b6   :  { %v2071_v11 = vpop.f32.mrf.mxu0 }
 0x2b7   :  { %v2072_v51 = vadd.f32 %v6831_v53, %v2071_v11  ;;  %v3039_v57 = vadd.f32 %v7098_v56, %v2390_v4 }
 0x2b9   :  { %v2721_v10 = vadd.f32 %v2720_v54, %v2072_v51  ;;  %v3387_v61 = vmax.f32 %v3039_v57, 0.0 }
 0x2ba   :  { %v7233_v56 = vpop.f32.mrf.mxu3 }
 0x2bb   :  { %v3260_v3 = vmax.f32 %v2721_v10, 0.0  ;;  %3644 = vst.msk [vmem:[%s8535_s3 + $0x610] sm:$0xff] %vm3449_vm3, %v3387_v61 }
 0x2bc   :  { %v2728_v20 = vpop.f32.mrf.mxu1  ;;  %v2391_v24 = vpop.f32.mrf.mxu2 }
 0x2bd   :  { %3517 = vst.msk [vmem:[%s8535_s3 + $0x218] sm:$0xff] %vm3449_vm3, %v3260_v3  ;;  %v2392_v0 = vadd.f32 %v6831_v53, %v2391_v24 }
 0x2be   :  { %v2074_v13 = vpop.f32.mrf.mxu0 }
 0x2bf   :  { %4813 = vmatmul.msk.bf16.gmra.mxu1 %vm1503_vm2, %v4061_v16  ;;  %v2075_v30 = vadd.f32 %v6831_v53, %v2074_v13  ;;  %4878 = vmatmul.msk.bf16.gmra.mxu3 %vm1503_vm2, %v4581_v8  ;;  %v3041_v54 = vadd.f32 %v7129_v39, %v2392_v0  ;;  %v5115_v0 = vld [vmem:[%s8533_s0 + $0x6c4] sm:$0xf0]  ;;  %v4597_v13 = vor.u32 %v5118_v17, %v4594_v1  ;;  %v4992_v17 = vld [vmem:[%s8533_s0 + $0x2f4] sm:$0xf]  ;;  %v4090_v1 = vld [vmem:[%s8533_s0 + $0x2f8] sm:$0xf0] }
 0x2c1   :  { %v2724_v18 = vadd.f32 %v2723_v48, %v2075_v30  ;;  %2113 = vmatmul.bf16.gmra.mxu0 %v4049_v26  ;;  %v3388_v34 = vmax.f32 %v3041_v54, 0.0  ;;  %2433 = vmatmul.bf16.gmra.mxu2 %v4561_v29  ;;  %v4069_v48 = vor.u32 %v4986_v42, %v4066_v27  ;;  %v4576_v26 = vld [vmem:[%s8533_s0 + $0x6c0] sm:$0xf]  ;;  %v4065_v30 = vor.u32 %v4987_v6, %v4064_v21  ;;  %v5122_v21 = vld [vmem:[%s8533_s0 + $0x704] sm:$0xf] }
 0x2c2   :  { %v7254_v19 = vpop.f32.mrf.mxu3  ;;  %v4610_v6 = vld [vmem:[%s8533_s0 + $0x708] sm:$0xf0] }
 0x2c3   :  { %v3261_v35 = vmax.f32 %v2724_v18, 0.0  ;;  %3645 = vst.msk [vmem:[%s8535_s3 + $0x618] sm:$0xff] %vm3449_vm3, %v3388_v34  ;;  %v4577_v34 = vor.u32 %v5115_v0, %v4576_v26  ;;  %v4080_v26 = vld [vmem:[%s8533_s0 + $0x2e0] sm:$0xf]  ;;  %v4991_v0 = vld [vmem:[%s8533_s0 + $0x2e4] sm:$0xf0] }
 0x2c4   :  { %v2730_v37 = vpop.f32.mrf.mxu1  ;;  %v2394_v22 = vpop.f32.mrf.mxu2 }
 0x2c5   :  { %3518 = vst.msk [vmem:[%s8535_s3 + $0x220] sm:$0xff] %vm3449_vm3, %v3261_v35  ;;  %v2395_v39 = vadd.f32 %v6831_v53, %v2394_v22 }
 0x2c6   :  { %v2076_v23 = vpop.f32.mrf.mxu0 }
 0x2c7   :  { %v2077_v40 = vadd.f32 %v6831_v53, %v2076_v23  ;;  %v3044_v28 = vadd.f32 %v7150_v15, %v2395_v39 }
 0x2c9   :  { %v2726_v2 = vadd.f32 %v2725_v63, %v2077_v40  ;;  %v3389_v33 = vmax.f32 %v3044_v28, 0.0 }
 0x2ca   :  { %v7285_v15 = vpop.f32.mrf.mxu3 }
 0x2cb   :  { %v3262_v38 = vmax.f32 %v2726_v2, 0.0  ;;  %3646 = vst.msk [vmem:[%s8535_s3 + $0x620] sm:$0xff] %vm3449_vm3, %v3389_v33 }
 0x2cc   :  { %v2733_v52 = vpop.f32.mrf.mxu1  ;;  %v2396_v58 = vpop.f32.mrf.mxu2 }
 0x2cd   :  { %3519 = vst.msk [vmem:[%s8535_s3 + $0x228] sm:$0xff] %vm3449_vm3, %v3262_v38  ;;  %v2397_v59 = vadd.f32 %v6831_v53, %v2396_v58 }
 0x2ce   :  { %v2079_v45 = vpop.f32.mrf.mxu0 }
 0x2cf   :  { %4814 = vmatmul.msk.bf16.gmra.mxu1 %vm1503_vm2, %v4069_v48  ;;  %v2080_v47 = vadd.f32 %v6831_v53, %v2079_v45  ;;  %4879 = vmatmul.msk.bf16.gmra.mxu3 %vm1503_vm2, %v4589_v43  ;;  %v3046_v63 = vadd.f32 %v7181_v9, %v2397_v59  ;;  %v5117_v59 = vld [vmem:[%s8533_s0 + $0x6d4] sm:$0xf0]  ;;  %v4605_v45 = vor.u32 %v5120_v50, %v4602_v36  ;;  %v4994_v50 = vld [vmem:[%s8533_s0 + $0x304] sm:$0xf]  ;;  %v4098_v36 = vld [vmem:[%s8533_s0 + $0x308] sm:$0xf0] }
 0x2d1   :  { %v2729_v49 = vadd.f32 %v2728_v20, %v2080_v47  ;;  %2118 = vmatmul.bf16.gmra.mxu0 %v4057_v44  ;;  %v3390_v4 = vmax.f32 %v3046_v63, 0.0  ;;  %2438 = vmatmul.bf16.gmra.mxu2 %v4569_v62  ;;  %v4077_v20 = vor.u32 %v4988_v12, %v4074_v60  ;;  %v4584_v44 = vld [vmem:[%s8533_s0 + $0x6d0] sm:$0xf]  ;;  %v4073_v47 = vor.u32 %v4989_v41, %v4072_v55  ;;  %v5124_v55 = vld [vmem:[%s8533_s0 + $0x714] sm:$0xf] }
 0x2d2   :  { %v7306_v11 = vpop.f32.mrf.mxu3  ;;  %v4618_v41 = vld [vmem:[%s8533_s0 + $0x718] sm:$0xf0] }
 0x2d3   :  { %v3263_v51 = vmax.f32 %v2729_v49, 0.0  ;;  %3647 = vst.msk [vmem:[%s8535_s3 + $0x628] sm:$0xff] %vm3449_vm3, %v3390_v4  ;;  %v4585_v4 = vor.u32 %v5117_v59, %v4584_v44  ;;  %v4993_v44 = vld [vmem:[%s8533_s0 + $0x2f4] sm:$0xf0] }
 0x2d4   :  { %v2735_v5 = vpop.f32.mrf.mxu1  ;;  %v2399_v7 = vpop.f32.mrf.mxu2 }
 0x2d5   :  { %3520 = vst.msk [vmem:[%s8535_s3 + $0x230] sm:$0xff] %vm3449_vm3, %v3263_v51  ;;  %v2400_v9 = vadd.f32 %v6831_v53, %v2399_v7 }
 0x2d6   :  { %v2081_v57 = vpop.f32.mrf.mxu0 }
 0x2d7   :  { %v2082_v10 = vadd.f32 %v6831_v53, %v2081_v57  ;;  %v3049_v61 = vadd.f32 %v7202_v25, %v2400_v9 }
 0x2d9   :  { %v2731_v16 = vadd.f32 %v2730_v37, %v2082_v10  ;;  %v3391_v3 = vmax.f32 %v3049_v61, 0.0 }
 0x2da   :  { %v7337_v25 = vpop.f32.mrf.mxu3 }
 0x2db   :  { %v3264_v8 = vmax.f32 %v2731_v16, 0.0  ;;  %3648 = vst.msk [vmem:[%s8535_s3 + $0x630] sm:$0xff] %vm3449_vm3, %v3391_v3 }
 0x2dc   :  { %v2738_v24 = vpop.f32.mrf.mxu1  ;;  %v2401_v29 = vpop.f32.mrf.mxu2 }
 0x2dd   :  { %3521 = vst.msk [vmem:[%s8535_s3 + $0x238] sm:$0xff] %vm3449_vm3, %v3264_v8  ;;  %v2402_v54 = vadd.f32 %v6831_v53, %v2401_v29 }
 0x2de   :  { %v2084_v18 = vpop.f32.mrf.mxu0 }
 0x2df   :  { %4815 = vmatmul.msk.bf16.gmra.mxu1 %vm1503_vm2, %v4077_v20  ;;  %v2085_v35 = vadd.f32 %v6831_v53, %v2084_v18  ;;  %4880 = vmatmul.msk.bf16.gmra.mxu3 %vm1503_vm2, %v4597_v13  ;;  %v3051_v37 = vadd.f32 %v7233_v56, %v2402_v54  ;;  %v5119_v54 = vld [vmem:[%s8533_s0 + $0x6e4] sm:$0xf0]  ;;  %v4613_v18 = vor.u32 %v5122_v21, %v4610_v6  ;;  %v4996_v21 = vld [vmem:[%s8533_s0 + $0x314] sm:$0xf]  ;;  %v4106_v6 = vld [vmem:[%s8533_s0 + $0x318] sm:$0xf0] }
 0x2e1   :  { %v2734_v22 = vadd.f32 %v2733_v52, %v2085_v35  ;;  %2123 = vmatmul.bf16.gmra.mxu0 %v4065_v30  ;;  %v3392_v39 = vmax.f32 %v3051_v37, 0.0  ;;  %2443 = vmatmul.bf16.gmra.mxu2 %v4577_v34  ;;  %v4085_v52 = vor.u32 %v4990_v46, %v4082_v32  ;;  %v4592_v30 = vld [vmem:[%s8533_s0 + $0x6e0] sm:$0xf]  ;;  %v4081_v35 = vor.u32 %v4991_v0, %v4080_v26  ;;  %v5126_v26 = vld [vmem:[%s8533_s0 + $0x724] sm:$0xf] }
 0x2e2   :  { %v7358_v23 = vpop.f32.mrf.mxu3  ;;  %v4626_v0 = vld [vmem:[%s8533_s0 + $0x728] sm:$0xf0] }
 0x2e3   :  { %v3265_v40 = vmax.f32 %v2734_v22, 0.0  ;;  %3649 = vst.msk [vmem:[%s8535_s3 + $0x638] sm:$0xff] %vm3449_vm3, %v3392_v39  ;;  %v4593_v39 = vor.u32 %v5119_v54, %v4592_v30  ;;  %v4096_v30 = vld [vmem:[%s8533_s0 + $0x300] sm:$0xf]  ;;  %v4995_v54 = vld [vmem:[%s8533_s0 + $0x304] sm:$0xf0] }
 0x2e4   :  { %v2740_v42 = vpop.f32.mrf.mxu1  ;;  %v2404_v27 = vpop.f32.mrf.mxu2 }
 0x2e5   :  { %3522 = vst.msk [vmem:[%s8535_s3 + $0x240] sm:$0xff] %vm3449_vm3, %v3265_v40  ;;  %v2405_v56 = vadd.f32 %v6831_v53, %v2404_v27 }
 0x2e6   :  { %v2086_v28 = vpop.f32.mrf.mxu0 }
 0x2e7   :  { %v2087_v2 = vadd.f32 %v6831_v53, %v2086_v28  ;;  %v3054_v33 = vadd.f32 %v7254_v19, %v2405_v56 }
 0x2e9   :  { %v2736_v48 = vadd.f32 %v2735_v5, %v2087_v2  ;;  %v3393_v38 = vmax.f32 %v3054_v33, 0.0 }
 0x2ea   :  { %v7389_v19 = vpop.f32.mrf.mxu3 }
 0x2eb   :  { %v3266_v43 = vmax.f32 %v2736_v48, 0.0  ;;  %3650 = vst.msk [vmem:[%s8535_s3 + $0x640] sm:$0xff] %vm3449_vm3, %v3393_v38 }
 0x2ec   :  { %v2743_v58 = vpop.f32.mrf.mxu1  ;;  %v2406_v62 = vpop.f32.mrf.mxu2 }
 0x2ed   :  { %3523 = vst.msk [vmem:[%s8535_s3 + $0x248] sm:$0xff] %vm3449_vm3, %v3266_v43  ;;  %v2407_v63 = vadd.f32 %v6831_v53, %v2406_v62  ;;  %v4101_v43 = vor.u32 %v4994_v50, %v4098_v36  ;;  %v4600_v62 = vld [vmem:[%s8533_s0 + $0x6f0] sm:$0xf] }
 0x2ee   :  { %v2089_v49 = vpop.f32.mrf.mxu0 }
 0x2ef   :  { %4816 = vmatmul.msk.bf16.gmra.mxu1 %vm1503_vm2, %v4085_v52  ;;  %v2090_v51 = vadd.f32 %v6831_v53, %v2089_v49  ;;  %4881 = vmatmul.msk.bf16.gmra.mxu3 %vm1503_vm2, %v4605_v45  ;;  %v3056_v5 = vadd.f32 %v7285_v15, %v2407_v63  ;;  %v4621_v63 = vor.u32 %v5124_v55, %v4618_v41  ;;  %v4998_v55 = vld [vmem:[%s8533_s0 + $0x324] sm:$0xf]  ;;  %v4114_v41 = vld [vmem:[%s8533_s0 + $0x328] sm:$0xf0] }
 0x2f1   :  { %v2739_v7 = vadd.f32 %v2738_v24, %v2090_v51  ;;  %2128 = vmatmul.bf16.gmra.mxu0 %v4073_v47  ;;  %v3394_v9 = vmax.f32 %v3056_v5, 0.0  ;;  %2448 = vmatmul.bf16.gmra.mxu2 %v4585_v4  ;;  %v4093_v24 = vor.u32 %v4992_v17, %v4090_v1  ;;  %v5121_v47 = vld [vmem:[%s8533_s0 + $0x6f4] sm:$0xf0]  ;;  %v7512_v51 = vld [vmem:[%s8534_s2] ss:$0 sm:$0xff] }
 0x2f2   :  { %v7410_v57 = vpop.f32.mrf.mxu3 }
 0x2f3   :  { %v3267_v10 = vmax.f32 %v2739_v7, 0.0  ;;  %3651 = vst.msk [vmem:[%s8535_s3 + $0x648] sm:$0xff] %vm3449_vm3, %v3394_v9  ;;  %v4601_v9 = vor.u32 %v5121_v47, %v4600_v62  ;;  %v4104_v62 = vld [vmem:[%s8533_s0 + $0x310] sm:$0xf]  ;;  %v4997_v47 = vld [vmem:[%s8533_s0 + $0x314] sm:$0xf0] }
 0x2f4   :  { %v2745_v12 = vpop.f32.mrf.mxu1  ;;  %v2409_v60 = vpop.f32.mrf.mxu2 }
 0x2f5   :  { %3524 = vst.msk [vmem:[%s8535_s3 + $0x250] sm:$0xff] %vm3449_vm3, %v3267_v10  ;;  %v2410_v15 = vadd.f32 %v6831_v53, %v2409_v60 }
 0x2f6   :  { %v2091_v61 = vpop.f32.mrf.mxu0 }
 0x2f7   :  { %v2092_v16 = vadd.f32 %v6831_v53, %v2091_v61  ;;  %v3059_v3 = vadd.f32 %v7306_v11, %v2410_v15 }
 0x2f9   :  { %v2741_v20 = vadd.f32 %v2740_v42, %v2092_v16  ;;  %v3395_v8 = vmax.f32 %v3059_v3, 0.0 }
 0x2fa   :  { %v7441_v11 = vpop.f32.mrf.mxu3 }
 0x2fb   :  { %v3268_v13 = vmax.f32 %v2741_v20, 0.0  ;;  %3652 = vst.msk [vmem:[%s8535_s3 + $0x650] sm:$0xff] %vm3449_vm3, %v3395_v8 }
 0x2fc   :  { %v2748_v29 = vpop.f32.mrf.mxu1  ;;  %v2411_v34 = vpop.f32.mrf.mxu2 }
 0x2fd   :  { %3525 = vst.msk [vmem:[%s8535_s3 + $0x258] sm:$0xff] %vm3449_vm3, %v3268_v13  ;;  %v2412_v37 = vadd.f32 %v6831_v53, %v2411_v34 }
 0x2fe   :  { %v2094_v22 = vpop.f32.mrf.mxu0 }
 0x2ff   :  { %4817 = vmatmul.msk.bf16.gmra.mxu1 %vm1503_vm2, %v4093_v24  ;;  %v2095_v40 = vadd.f32 %v6831_v53, %v2094_v22  ;;  %4882 = vmatmul.msk.bf16.gmra.mxu3 %vm1503_vm2, %v4613_v18  ;;  %v3061_v42 = vadd.f32 %v7337_v25, %v2412_v37  ;;  %v5123_v37 = vld [vmem:[%s8533_s0 + $0x704] sm:$0xf0]  ;;  %v4629_v22 = vor.u32 %v5126_v26, %v4626_v0  ;;  %v5000_v26 = vld [vmem:[%s8533_s0 + $0x334] sm:$0xf]  ;;  %v4122_v0 = vld [vmem:[%s8533_s0 + $0x338] sm:$0xf0] }
 0x301   :  { %v2744_v27 = vadd.f32 %v2743_v58, %v2095_v40  ;;  %2133 = vmatmul.bf16.gmra.mxu0 %v4081_v35  ;;  %v3396_v56 = vmax.f32 %v3061_v42, 0.0  ;;  %2453 = vmatmul.bf16.gmra.mxu2 %v4593_v39  ;;  %v4088_v58 = vld [vmem:[%s8533_s0 + $0x2f0] sm:$0xf]  ;;  %v4608_v35 = vld [vmem:[%s8533_s0 + $0x700] sm:$0xf]  ;;  %v4097_v40 = vor.u32 %v4995_v54, %v4096_v30 }
 0x302   :  { %v7462_v28 = vpop.f32.mrf.mxu3  ;;  %v4089_v4 = vor.u32 %v4993_v44, %v4088_v58  ;;  %v5128_v58 = vld [vmem:[%s8533_s0 + $0x734] sm:$0xf]  ;;  %v4634_v44 = vld [vmem:[%s8533_s0 + $0x738] sm:$0xf0]  ;;  %v5130_v30 = vld [vmem:[%s8533_s0 + $0x744] sm:$0xf] }
 0x303   :  { %v3269_v2 = vmax.f32 %v2744_v27, 0.0  ;;  %3653 = vst.msk [vmem:[%s8535_s3 + $0x658] sm:$0xff] %vm3449_vm3, %v3396_v56  ;;  %v4609_v56 = vor.u32 %v5123_v37, %v4608_v35  ;;  %v4642_v54 = vld [vmem:[%s8533_s0 + $0x748] sm:$0xf0]  ;;  %v4112_v35 = vld [vmem:[%s8533_s0 + $0x320] sm:$0xf] }
 0x304   :  { %v2750_v46 = vpop.f32.mrf.mxu1  ;;  %v2414_v32 = vpop.f32.mrf.mxu2  ;;  %v4999_v37 = vld [vmem:[%s8533_s0 + $0x324] sm:$0xf0] }
 0x305   :  { %3526 = vst.msk [vmem:[%s8535_s3 + $0x260] sm:$0xff] %vm3449_vm3, %v3269_v2  ;;  %v2415_v25 = vadd.f32 %v6831_v53, %v2414_v32 }
 0x306   :  { %v2096_v33 = vpop.f32.mrf.mxu0 }
 0x307   :  { %v2097_v48 = vadd.f32 %v6831_v53, %v2096_v33  ;;  %v3064_v38 = vadd.f32 %v7358_v23, %v2415_v25 }
 0x309   :  { %v2746_v52 = vadd.f32 %v2745_v12, %v2097_v48  ;;  %v3397_v53 = vmax.f32 %v3064_v38, 0.0 }
 0x30a   :  { %v7493_v23 = vpop.f32.mrf.mxu3 }
 0x30b   :  { %v3270_v59 = vmax.f32 %v2746_v52, 0.0  ;;  %3654 = vst.msk [vmem:[%s8535_s3 + $0x660] sm:$0xff] %vm3449_vm3, %v3397_v53 }
 0x30c   :  { %v2753_v45 = vpop.f32.mrf.mxu1  ;;  %v2416_v49 = vpop.f32.mrf.mxu2 }
 0x30d   :  { %3527 = vst.msk [vmem:[%s8535_s3 + $0x268] sm:$0xff] %vm3449_vm3, %v3270_v59  ;;  %v2417_v5 = vadd.f32 %v7512_v51, %v2416_v49 }
 0x30e   :  { %v2099_v7 = vpop.f32.mrf.mxu0 }
 0x30f   :  { %4818 = vmatmul.msk.bf16.gmra.mxu1 %vm1503_vm2, %v4101_v43  ;;  %v2100_v10 = vadd.f32 %v7512_v51, %v2099_v7  ;;  %4883 = vmatmul.msk.bf16.gmra.mxu3 %vm1503_vm2, %v4621_v63  ;;  %v3066_v12 = vadd.f32 %v7389_v19, %v2417_v5  ;;  %v5125_v5 = vld [vmem:[%s8533_s0 + $0x714] sm:$0xf0]  ;;  %v4637_v7 = vor.u32 %v5128_v58, %v4634_v44  ;;  %v5002_v58 = vld [vmem:[%s8533_s0 + $0x344] sm:$0xf]  ;;  %v4130_v44 = vld [vmem:[%s8533_s0 + $0x348] sm:$0xf0] }
 0x311   :  { %v2749_v60 = vadd.f32 %v2748_v29, %v2100_v10  ;;  %2138 = vmatmul.bf16.gmra.mxu0 %v4089_v4  ;;  %v3398_v15 = vmax.f32 %v3066_v12, 0.0  ;;  %2458 = vmatmul.bf16.gmra.mxu2 %v4601_v9  ;;  %v4109_v29 = vor.u32 %v4996_v21, %v4106_v6  ;;  %v4616_v4 = vld [vmem:[%s8533_s0 + $0x710] sm:$0xf]  ;;  %v4105_v10 = vor.u32 %v4997_v47, %v4104_v62  ;;  %v5132_v62 = vld [vmem:[%s8533_s0 + $0x754] sm:$0xf] }
 0x312   :  { %v7519_v61 = vpop.f32.mrf.mxu3  ;;  %v4650_v47 = vld [vmem:[%s8533_s0 + $0x758] sm:$0xf0] }
 0x313   :  { %v3271_v16 = vmax.f32 %v2749_v60, 0.0  ;;  %3655 = vst.msk [vmem:[%s8535_s3 + $0x668] sm:$0xff] %vm3449_vm3, %v3398_v15  ;;  %v4617_v15 = vor.u32 %v5125_v5, %v4616_v4  ;;  %v4120_v4 = vld [vmem:[%s8533_s0 + $0x330] sm:$0xf]  ;;  %v5001_v5 = vld [vmem:[%s8533_s0 + $0x334] sm:$0xf0] }
 0x314   :  { %v2755_v17 = vpop.f32.mrf.mxu1  ;;  %v2419_v1 = vpop.f32.mrf.mxu2 }
 0x315   :  { %3528 = vst.msk [vmem:[%s8535_s3 + $0x270] sm:$0xff] %vm3449_vm3, %v3271_v16  ;;  %v2420_v19 = vadd.f32 %v7512_v51, %v2419_v1 }
 0x316   :  { %v2101_v3 = vpop.f32.mrf.mxu0 }
 0x317   :  { %v2102_v20 = vadd.f32 %v7512_v51, %v2101_v3  ;;  %v3069_v8 = vadd.f32 %v7410_v57, %v2420_v19 }
 0x319   :  { %v2751_v24 = vadd.f32 %v2750_v46, %v2102_v20  ;;  %v3399_v13 = vmax.f32 %v3069_v8, 0.0 }
 0x31a   :  { %v7550_v57 = vpop.f32.mrf.mxu3 }
 0x31b   :  { %v3272_v18 = vmax.f32 %v2751_v24, 0.0  ;;  %3656 = vst.msk [vmem:[%s8535_s3 + $0x670] sm:$0xff] %vm3449_vm3, %v3399_v13 }
 0x31c   :  { %v2758_v34 = vpop.f32.mrf.mxu1  ;;  %v2421_v39 = vpop.f32.mrf.mxu2 }
 0x31d   :  { %3529 = vst.msk [vmem:[%s8535_s3 + $0x278] sm:$0xff] %vm3449_vm3, %v3272_v18  ;;  %v2422_v42 = vadd.f32 %v7512_v51, %v2421_v39 }
 0x31e   :  { %v2104_v27 = vpop.f32.mrf.mxu0 }
 0x31f   :  { %4819 = vmatmul.msk.bf16.gmra.mxu1 %vm1503_vm2, %v4109_v29  ;;  %v2105_v2 = vadd.f32 %v7512_v51, %v2104_v27  ;;  %4884 = vmatmul.msk.bf16.gmra.mxu3 %vm1503_vm2, %v4629_v22  ;;  %v3071_v46 = vadd.f32 %v7441_v11, %v2422_v42  ;;  %v5127_v42 = vld [vmem:[%s8533_s0 + $0x724] sm:$0xf0]  ;;  %v4645_v27 = vor.u32 %v5130_v30, %v4642_v54  ;;  %v5004_v30 = vld [vmem:[%s8533_s0 + $0x354] sm:$0xf]  ;;  %v4138_v54 = vld [vmem:[%s8533_s0 + $0x358] sm:$0xf0] }
 0x321   :  { %v2754_v32 = vadd.f32 %v2753_v45, %v2105_v2  ;;  %2143 = vmatmul.bf16.gmra.mxu0 %v4097_v40  ;;  %v3400_v25 = vmax.f32 %v3071_v46, 0.0  ;;  %2463 = vmatmul.bf16.gmra.mxu2 %v4609_v56  ;;  %v4117_v45 = vor.u32 %v4998_v55, %v4114_v41  ;;  %v4624_v40 = vld [vmem:[%s8533_s0 + $0x720] sm:$0xf]  ;;  %v4113_v2 = vor.u32 %v4999_v37, %v4112_v35  ;;  %v5134_v35 = vld [vmem:[%s8533_s0 + $0x764] sm:$0xf] }
 0x322   :  { %v7571_v33 = vpop.f32.mrf.mxu3  ;;  %v4658_v37 = vld [vmem:[%s8533_s0 + $0x768] sm:$0xf0] }
 0x323   :  { %v3273_v48 = vmax.f32 %v2754_v32, 0.0  ;;  %3657 = vst.msk [vmem:[%s8535_s3 + $0x678] sm:$0xff] %vm3449_vm3, %v3400_v25  ;;  %v4625_v25 = vor.u32 %v5127_v42, %v4624_v40  ;;  %v4128_v40 = vld [vmem:[%s8533_s0 + $0x340] sm:$0xf]  ;;  %v5003_v42 = vld [vmem:[%s8533_s0 + $0x344] sm:$0xf0] }
 0x324   :  { %v2760_v50 = vpop.f32.mrf.mxu1  ;;  %v2424_v36 = vpop.f32.mrf.mxu2 }
 0x325   :  { %3530 = vst.msk [vmem:[%s8535_s3 + $0x280] sm:$0xff] %vm3449_vm3, %v3273_v48  ;;  %v2425_v11 = vadd.f32 %v7512_v51, %v2424_v36 }
 0x326   :  { %v2106_v38 = vpop.f32.mrf.mxu0 }
 0x327   :  { %v2107_v52 = vadd.f32 %v7512_v51, %v2106_v38  ;;  %v3074_v53 = vadd.f32 %v7462_v28, %v2425_v11 }
 0x329   :  { %v2756_v43 = vadd.f32 %v2755_v17, %v2107_v52  ;;  %v3401_v59 = vmax.f32 %v3074_v53, 0.0 }
 0x32a   :  { %v7602_v28 = vpop.f32.mrf.mxu3 }
 0x32b   :  { %v3274_v63 = vmax.f32 %v2756_v43, 0.0  ;;  %3658 = vst.msk [vmem:[%s8535_s3 + $0x680] sm:$0xff] %vm3449_vm3, %v3401_v59 }
 0x32c   :  { %v2763_v49 = vpop.f32.mrf.mxu1  ;;  %v2426_v9 = vpop.f32.mrf.mxu2 }
 0x32d   :  { %3531 = vst.msk [vmem:[%s8535_s3 + $0x288] sm:$0xff] %vm3449_vm3, %v3274_v63  ;;  %v2427_v12 = vadd.f32 %v7512_v51, %v2426_v9 }
 0x32e   :  { %v2109_v60 = vpop.f32.mrf.mxu0 }
 0x32f   :  { %4820 = vmatmul.msk.bf16.gmra.mxu1 %vm1503_vm2, %v4117_v45  ;;  %v2110_v16 = vadd.f32 %v7512_v51, %v2109_v60  ;;  %4885 = vmatmul.msk.bf16.gmra.mxu3 %vm1503_vm2, %v4637_v7  ;;  %v3076_v17 = vadd.f32 %v7493_v23, %v2427_v12  ;;  %v5129_v12 = vld [vmem:[%s8533_s0 + $0x734] sm:$0xf0]  ;;  %v4653_v60 = vor.u32 %v5132_v62, %v4650_v47  ;;  %v5006_v62 = vld [vmem:[%s8533_s0 + $0x364] sm:$0xf]  ;;  %v4146_v47 = vld [vmem:[%s8533_s0 + $0x368] sm:$0xf0] }
 0x331   :  { %v2759_v1 = vadd.f32 %v2758_v34, %v2110_v16  ;;  %2148 = vmatmul.bf16.gmra.mxu0 %v4105_v10  ;;  %v3402_v19 = vmax.f32 %v3076_v17, 0.0  ;;  %2468 = vmatmul.bf16.gmra.mxu2 %v4617_v15  ;;  %v4125_v34 = vor.u32 %v5000_v26, %v4122_v0  ;;  %v4632_v10 = vld [vmem:[%s8533_s0 + $0x730] sm:$0xf]  ;;  %v4121_v16 = vor.u32 %v5001_v5, %v4120_v4  ;;  %v5136_v4 = vld [vmem:[%s8533_s0 + $0x774] sm:$0xf] }
 0x332   :  { %v7623_v3 = vpop.f32.mrf.mxu3  ;;  %v4666_v5 = vld [vmem:[%s8533_s0 + $0x778] sm:$0xf0] }
 0x333   :  { %v3275_v20 = vmax.f32 %v2759_v1, 0.0  ;;  %3659 = vst.msk [vmem:[%s8535_s3 + $0x688] sm:$0xff] %vm3449_vm3, %v3402_v19  ;;  %v4633_v19 = vor.u32 %v5129_v12, %v4632_v10  ;;  %v4136_v10 = vld [vmem:[%s8533_s0 + $0x350] sm:$0xf]  ;;  %v5005_v12 = vld [vmem:[%s8533_s0 + $0x354] sm:$0xf0] }
 0x334   :  { %v2765_v21 = vpop.f32.mrf.mxu1  ;;  %v2429_v6 = vpop.f32.mrf.mxu2 }
 0x335   :  { %3532 = vst.msk [vmem:[%s8535_s3 + $0x290] sm:$0xff] %vm3449_vm3, %v3275_v20  ;;  %v2430_v23 = vadd.f32 %v7512_v51, %v2429_v6 }
 0x336   :  { %v2111_v8 = vpop.f32.mrf.mxu0 }
 0x337   :  { %v2112_v24 = vadd.f32 %v7512_v51, %v2111_v8  ;;  %v3079_v13 = vadd.f32 %v7519_v61, %v2430_v23 }
 0x339   :  { %v2761_v29 = vadd.f32 %v2760_v50, %v2112_v24  ;;  %v3403_v18 = vmax.f32 %v3079_v13, 0.0 }
 0x33a   :  { %v7654_v61 = vpop.f32.mrf.mxu3 }
 0x33b   :  { %v3276_v22 = vmax.f32 %v2761_v29, 0.0  ;;  %3660 = vst.msk [vmem:[%s8535_s3 + $0x690] sm:$0xff] %vm3449_vm3, %v3403_v18 }
 0x33c   :  { %v2768_v39 = vpop.f32.mrf.mxu1  ;;  %v2431_v56 = vpop.f32.mrf.mxu2 }
 0x33d   :  { %3533 = vst.msk [vmem:[%s8535_s3 + $0x298] sm:$0xff] %vm3449_vm3, %v3276_v22  ;;  %v2432_v46 = vadd.f32 %v7512_v51, %v2431_v56 }
 0x33e   :  { %v2114_v32 = vpop.f32.mrf.mxu0 }
 0x33f   :  { %4821 = vmatmul.msk.bf16.gmra.mxu1 %vm1503_vm2, %v4125_v34  ;;  %v2115_v48 = vadd.f32 %v7512_v51, %v2114_v32  ;;  %4886 = vmatmul.msk.bf16.gmra.mxu3 %vm1503_vm2, %v4645_v27  ;;  %v3081_v50 = vadd.f32 %v7550_v57, %v2432_v46  ;;  %v5131_v46 = vld [vmem:[%s8533_s0 + $0x744] sm:$0xf0]  ;;  %v4661_v32 = vor.u32 %v5134_v35, %v4658_v37  ;;  %v5008_v35 = vld [vmem:[%s8533_s0 + $0x374] sm:$0xf]  ;;  %v4154_v37 = vld [vmem:[%s8533_s0 + $0x378] sm:$0xf0] }
 0x341   :  { %v2764_v36 = vadd.f32 %v2763_v49, %v2115_v48  ;;  %2153 = vmatmul.bf16.gmra.mxu0 %v4113_v2  ;;  %v3404_v11 = vmax.f32 %v3081_v50, 0.0  ;;  %2473 = vmatmul.bf16.gmra.mxu2 %v4625_v25  ;;  %v4133_v49 = vor.u32 %v5002_v58, %v4130_v44  ;;  %v4640_v2 = vld [vmem:[%s8533_s0 + $0x740] sm:$0xf]  ;;  %v4129_v48 = vor.u32 %v5003_v42, %v4128_v40  ;;  %v5138_v40 = vld [vmem:[%s8533_s0 + $0x784] sm:$0xf] }
 0x342   :  { %v7675_v38 = vpop.f32.mrf.mxu3  ;;  %v4674_v42 = vld [vmem:[%s8533_s0 + $0x788] sm:$0xf0] }
 0x343   :  { %v3277_v52 = vmax.f32 %v2764_v36, 0.0  ;;  %3661 = vst.msk [vmem:[%s8535_s3 + $0x698] sm:$0xff] %vm3449_vm3, %v3404_v11  ;;  %v4641_v11 = vor.u32 %v5131_v46, %v4640_v2  ;;  %v4144_v2 = vld [vmem:[%s8533_s0 + $0x360] sm:$0xf]  ;;  %v5007_v46 = vld [vmem:[%s8533_s0 + $0x364] sm:$0xf0] }
 0x344   :  { %v2770_v55 = vpop.f32.mrf.mxu1  ;;  %v2434_v41 = vpop.f32.mrf.mxu2 }
 0x345   :  { %3534 = vst.msk [vmem:[%s8535_s3 + $0x2a0] sm:$0xff] %vm3449_vm3, %v3277_v52  ;;  %v2435_v57 = vadd.f32 %v7512_v51, %v2434_v41 }
 0x346   :  { %v2116_v53 = vpop.f32.mrf.mxu0 }
 0x347   :  { %v2117_v43 = vadd.f32 %v7512_v51, %v2116_v53  ;;  %v3084_v59 = vadd.f32 %v7571_v33, %v2435_v57 }
 0x349   :  { %v2766_v45 = vadd.f32 %v2765_v21, %v2117_v43  ;;  %v3405_v63 = vmax.f32 %v3084_v59, 0.0 }
 0x34a   :  { %v7706_v33 = vpop.f32.mrf.mxu3 }
 0x34b   :  { %v3278_v7 = vmax.f32 %v2766_v45, 0.0  ;;  %3662 = vst.msk [vmem:[%s8535_s3 + $0x6a0] sm:$0xff] %vm3449_vm3, %v3405_v63 }
 0x34c   :  { %v2773_v9 = vpop.f32.mrf.mxu1  ;;  %v2436_v15 = vpop.f32.mrf.mxu2 }
 0x34d   :  { %3535 = vst.msk [vmem:[%s8535_s3 + $0x2a8] sm:$0xff] %vm3449_vm3, %v3278_v7  ;;  %v2437_v17 = vadd.f32 %v7512_v51, %v2436_v15 }
 0x34e   :  { %v2119_v1 = vpop.f32.mrf.mxu0 }
 0x34f   :  { %4822 = vmatmul.msk.bf16.gmra.mxu1 %vm1503_vm2, %v4133_v49  ;;  %v2120_v20 = vadd.f32 %v7512_v51, %v2119_v1  ;;  %4887 = vmatmul.msk.bf16.gmra.mxu3 %vm1503_vm2, %v4653_v60  ;;  %v3086_v21 = vadd.f32 %v7602_v28, %v2437_v17  ;;  %v5133_v17 = vld [vmem:[%s8533_s0 + $0x754] sm:$0xf0]  ;;  %v4669_v1 = vor.u32 %v5136_v4, %v4666_v5  ;;  %v5010_v4 = vld [vmem:[%s8533_s0 + $0x384] sm:$0xf]  ;;  %v4162_v5 = vld [vmem:[%s8533_s0 + $0x388] sm:$0xf0] }
 0x351   :  { %v2769_v6 = vadd.f32 %v2768_v39, %v2120_v20  ;;  %2158 = vmatmul.bf16.gmra.mxu0 %v4121_v16  ;;  %v3406_v23 = vmax.f32 %v3086_v21, 0.0  ;;  %2478 = vmatmul.bf16.gmra.mxu2 %v4633_v19  ;;  %v4141_v39 = vor.u32 %v5004_v30, %v4138_v54  ;;  %v4648_v16 = vld [vmem:[%s8533_s0 + $0x750] sm:$0xf]  ;;  %v4137_v20 = vor.u32 %v5005_v12, %v4136_v10  ;;  %v5140_v10 = vld [vmem:[%s8533_s0 + $0x794] sm:$0xf] }
 0x352   :  { %v7727_v8 = vpop.f32.mrf.mxu3  ;;  %v4682_v12 = vld [vmem:[%s8533_s0 + $0x798] sm:$0xf0] }
 0x353   :  { %v3279_v24 = vmax.f32 %v2769_v6, 0.0  ;;  %3663 = vst.msk [vmem:[%s8535_s3 + $0x6a8] sm:$0xff] %vm3449_vm3, %v3406_v23  ;;  %v4649_v23 = vor.u32 %v5133_v17, %v4648_v16  ;;  %v4152_v16 = vld [vmem:[%s8533_s0 + $0x370] sm:$0xf]  ;;  %v5009_v17 = vld [vmem:[%s8533_s0 + $0x374] sm:$0xf0] }
 0x354   :  { %v2775_v26 = vpop.f32.mrf.mxu1  ;;  %v2439_v0 = vpop.f32.mrf.mxu2 }
 0x355   :  { %3536 = vst.msk [vmem:[%s8535_s3 + $0x2b0] sm:$0xff] %vm3449_vm3, %v3279_v24  ;;  %v2440_v28 = vadd.f32 %v7512_v51, %v2439_v0 }
 0x356   :  { %v2121_v13 = vpop.f32.mrf.mxu0 }
 0x357   :  { %v2122_v29 = vadd.f32 %v7512_v51, %v2121_v13  ;;  %v3089_v18 = vadd.f32 %v7623_v3, %v2440_v28 }
 0x359   :  { %v2771_v34 = vadd.f32 %v2770_v55, %v2122_v29  ;;  %v3407_v22 = vmax.f32 %v3089_v18, 0.0 }
 0x35a   :  { %v7758_v3 = vpop.f32.mrf.mxu3 }
 0x35b   :  { %v3280_v27 = vmax.f32 %v2771_v34, 0.0  ;;  %3664 = vst.msk [vmem:[%s8535_s3 + $0x6b0] sm:$0xff] %vm3449_vm3, %v3407_v22 }
 0x35c   :  { %v2778_v56 = vpop.f32.mrf.mxu1  ;;  %v2441_v25 = vpop.f32.mrf.mxu2 }
 0x35d   :  { %3537 = vst.msk [vmem:[%s8535_s3 + $0x2b8] sm:$0xff] %vm3449_vm3, %v3280_v27  ;;  %v2442_v50 = vadd.f32 %v7512_v51, %v2441_v25 }
 0x35e   :  { %v2124_v36 = vpop.f32.mrf.mxu0 }
 0x35f   :  { %4823 = vmatmul.msk.bf16.gmra.mxu1 %vm1503_vm2, %v4141_v39  ;;  %v2125_v52 = vadd.f32 %v7512_v51, %v2124_v36  ;;  %4888 = vmatmul.msk.bf16.gmra.mxu3 %vm1503_vm2, %v4661_v32  ;;  %v3091_v55 = vadd.f32 %v7654_v61, %v2442_v50  ;;  %v5135_v50 = vld [vmem:[%s8533_s0 + $0x764] sm:$0xf0]  ;;  %v4677_v36 = vor.u32 %v5138_v40, %v4674_v42  ;;  %v5012_v40 = vld [vmem:[%s8533_s0 + $0x394] sm:$0xf]  ;;  %v4170_v42 = vld [vmem:[%s8533_s0 + $0x398] sm:$0xf0] }
 0x361   :  { %v2774_v41 = vadd.f32 %v2773_v9, %v2125_v52  ;;  %2163 = vmatmul.bf16.gmra.mxu0 %v4129_v48  ;;  %v3408_v57 = vmax.f32 %v3091_v55, 0.0  ;;  %2483 = vmatmul.bf16.gmra.mxu2 %v4641_v11  ;;  %v4149_v9 = vor.u32 %v5006_v62, %v4146_v47  ;;  %v4656_v48 = vld [vmem:[%s8533_s0 + $0x760] sm:$0xf]  ;;  %v4145_v52 = vor.u32 %v5007_v46, %v4144_v2  ;;  %v5142_v2 = vld [vmem:[%s8533_s0 + $0x7a4] sm:$0xf] }
 0x362   :  { %v7779_v53 = vpop.f32.mrf.mxu3  ;;  %v4690_v46 = vld [vmem:[%s8533_s0 + $0x7a8] sm:$0xf0] }
 0x363   :  { %v3281_v43 = vmax.f32 %v2774_v41, 0.0  ;;  %3665 = vst.msk [vmem:[%s8535_s3 + $0x6b8] sm:$0xff] %vm3449_vm3, %v3408_v57  ;;  %v4657_v57 = vor.u32 %v5135_v50, %v4656_v48  ;;  %v4160_v48 = vld [vmem:[%s8533_s0 + $0x380] sm:$0xf]  ;;  %v5011_v50 = vld [vmem:[%s8533_s0 + $0x384] sm:$0xf0] }
 0x364   :  { %v2780_v58 = vpop.f32.mrf.mxu1  ;;  %v2444_v44 = vpop.f32.mrf.mxu2 }
 0x365   :  { %3538 = vst.msk [vmem:[%s8535_s3 + $0x2c0] sm:$0xff] %vm3449_vm3, %v3281_v43  ;;  %v2445_v61 = vadd.f32 %v7512_v51, %v2444_v44 }
 0x366   :  { %v2126_v59 = vpop.f32.mrf.mxu0 }
 0x367   :  { %v2127_v45 = vadd.f32 %v7512_v51, %v2126_v59  ;;  %v3094_v63 = vadd.f32 %v7675_v38, %v2445_v61 }
 0x369   :  { %v2776_v49 = vadd.f32 %v2775_v26, %v2127_v45  ;;  %v3409_v7 = vmax.f32 %v3094_v63, 0.0 }
 0x36a   :  { %v7810_v38 = vpop.f32.mrf.mxu3 }
 0x36b   :  { %v3282_v60 = vmax.f32 %v2776_v49, 0.0  ;;  %3666 = vst.msk [vmem:[%s8535_s3 + $0x6c0] sm:$0xff] %vm3449_vm3, %v3409_v7 }
 0x36c   :  { %v2783_v15 = vpop.f32.mrf.mxu1  ;;  %v2446_v19 = vpop.f32.mrf.mxu2 }
 0x36d   :  { %3539 = vst.msk [vmem:[%s8535_s3 + $0x2c8] sm:$0xff] %vm3449_vm3, %v3282_v60  ;;  %v2447_v21 = vadd.f32 %v7512_v51, %v2446_v19 }
 0x36e   :  { %v2129_v6 = vpop.f32.mrf.mxu0 }
 0x36f   :  { %4824 = vmatmul.msk.bf16.gmra.mxu1 %vm1503_vm2, %v4149_v9  ;;  %v2130_v24 = vadd.f32 %v7512_v51, %v2129_v6  ;;  %4889 = vmatmul.msk.bf16.gmra.mxu3 %vm1503_vm2, %v4669_v1  ;;  %v3096_v26 = vadd.f32 %v7706_v33, %v2447_v21  ;;  %v5137_v21 = vld [vmem:[%s8533_s0 + $0x774] sm:$0xf0]  ;;  %v4685_v6 = vor.u32 %v5140_v10, %v4682_v12  ;;  %v5014_v10 = vld [vmem:[%s8533_s0 + $0x3a4] sm:$0xf]  ;;  %v4178_v12 = vld [vmem:[%s8533_s0 + $0x3a8] sm:$0xf0] }
 0x371   :  { %v2779_v0 = vadd.f32 %v2778_v56, %v2130_v24  ;;  %2168 = vmatmul.bf16.gmra.mxu0 %v4137_v20  ;;  %v3410_v28 = vmax.f32 %v3096_v26, 0.0  ;;  %2488 = vmatmul.bf16.gmra.mxu2 %v4649_v23  ;;  %v4157_v56 = vor.u32 %v5008_v35, %v4154_v37  ;;  %v4664_v20 = vld [vmem:[%s8533_s0 + $0x770] sm:$0xf]  ;;  %v4153_v24 = vor.u32 %v5009_v17, %v4152_v16  ;;  %v5144_v16 = vld [vmem:[%s8533_s0 + $0x7b4] sm:$0xf] }
 0x372   :  { %v7831_v13 = vpop.f32.mrf.mxu3  ;;  %v4698_v17 = vld [vmem:[%s8533_s0 + $0x7b8] sm:$0xf0] }
 0x373   :  { %v3283_v29 = vmax.f32 %v2779_v0, 0.0  ;;  %3667 = vst.msk [vmem:[%s8535_s3 + $0x6c8] sm:$0xff] %vm3449_vm3, %v3410_v28  ;;  %v4665_v28 = vor.u32 %v5137_v21, %v4664_v20  ;;  %v4168_v20 = vld [vmem:[%s8533_s0 + $0x390] sm:$0xf]  ;;  %v5013_v21 = vld [vmem:[%s8533_s0 + $0x394] sm:$0xf0] }
 0x374   :  { %v2785_v30 = vpop.f32.mrf.mxu1  ;;  %v2449_v54 = vpop.f32.mrf.mxu2 }
 0x375   :  { %3540 = vst.msk [vmem:[%s8535_s3 + $0x2d0] sm:$0xff] %vm3449_vm3, %v3283_v29  ;;  %v2450_v33 = vadd.f32 %v7512_v51, %v2449_v54 }
 0x376   :  { %v2131_v18 = vpop.f32.mrf.mxu0 }
 0x377   :  { %v2132_v34 = vadd.f32 %v7512_v51, %v2131_v18  ;;  %v3099_v22 = vadd.f32 %v7727_v8, %v2450_v33 }
 0x379   :  { %v2781_v39 = vadd.f32 %v2780_v58, %v2132_v34  ;;  %v3411_v27 = vmax.f32 %v3099_v22, 0.0 }
 0x37a   :  { %v7862_v8 = vpop.f32.mrf.mxu3 }
 0x37b   :  { %v3284_v32 = vmax.f32 %v2781_v39, 0.0  ;;  %3668 = vst.msk [vmem:[%s8535_s3 + $0x6d0] sm:$0xff] %vm3449_vm3, %v3411_v27 }
 0x37c   :  { %v2788_v25 = vpop.f32.mrf.mxu1  ;;  %v2451_v11 = vpop.f32.mrf.mxu2 }
 0x37d   :  { %3541 = vst.msk [vmem:[%s8535_s3 + $0x2d8] sm:$0xff] %vm3449_vm3, %v3284_v32  ;;  %v2452_v55 = vadd.f32 %v7512_v51, %v2451_v11 }
 0x37e   :  { %v2134_v41 = vpop.f32.mrf.mxu0 }
 0x37f   :  { %4825 = vmatmul.msk.bf16.gmra.mxu1 %vm1503_vm2, %v4157_v56  ;;  %v2135_v43 = vadd.f32 %v7512_v51, %v2134_v41  ;;  %4890 = vmatmul.msk.bf16.gmra.mxu3 %vm1503_vm2, %v4677_v36  ;;  %v3101_v58 = vadd.f32 %v7758_v3, %v2452_v55  ;;  %v5139_v55 = vld [vmem:[%s8533_s0 + $0x784] sm:$0xf0]  ;;  %v4693_v41 = vor.u32 %v5142_v2, %v4690_v46  ;;  %v5016_v2 = vld [vmem:[%s8533_s0 + $0x3b4] sm:$0xf]  ;;  %v4186_v46 = vld [vmem:[%s8533_s0 + $0x3b8] sm:$0xf0] }
 0x381   :  { %v2784_v44 = vadd.f32 %v2783_v15, %v2135_v43  ;;  %2173 = vmatmul.bf16.gmra.mxu0 %v4145_v52  ;;  %v3412_v61 = vmax.f32 %v3101_v58, 0.0  ;;  %2493 = vmatmul.bf16.gmra.mxu2 %v4657_v57  ;;  %v4165_v15 = vor.u32 %v5010_v4, %v4162_v5  ;;  %v4672_v52 = vld [vmem:[%s8533_s0 + $0x780] sm:$0xf]  ;;  %v4161_v43 = vor.u32 %v5011_v50, %v4160_v48  ;;  %v5146_v48 = vld [vmem:[%s8533_s0 + $0x7c4] sm:$0xf] }
 0x382   :  { %v7883_v59 = vpop.f32.mrf.mxu3  ;;  %v4706_v50 = vld [vmem:[%s8533_s0 + $0x7c8] sm:$0xf0] }
 0x383   :  { %v3285_v45 = vmax.f32 %v2784_v44, 0.0  ;;  %3669 = vst.msk [vmem:[%s8535_s3 + $0x6d8] sm:$0xff] %vm3449_vm3, %v3412_v61  ;;  %v4673_v61 = vor.u32 %v5139_v55, %v4672_v52  ;;  %v4176_v52 = vld [vmem:[%s8533_s0 + $0x3a0] sm:$0xf]  ;;  %v5015_v55 = vld [vmem:[%s8533_s0 + $0x3a4] sm:$0xf0] }
 0x384   :  { %v2790_v62 = vpop.f32.mrf.mxu1  ;;  %v2454_v47 = vpop.f32.mrf.mxu2 }
 0x385   :  { %3542 = vst.msk [vmem:[%s8535_s3 + $0x2e0] sm:$0xff] %vm3449_vm3, %v3285_v45  ;;  %v2455_v3 = vadd.f32 %v7512_v51, %v2454_v47 }
 0x386   :  { %v2136_v63 = vpop.f32.mrf.mxu0 }
 0x387   :  { %v2137_v49 = vadd.f32 %v7512_v51, %v2136_v63  ;;  %v3104_v7 = vadd.f32 %v7779_v53, %v2455_v3 }
 0x389   :  { %v2786_v9 = vadd.f32 %v2785_v30, %v2137_v49  ;;  %v3413_v60 = vmax.f32 %v3104_v7, 0.0 }
 0x38a   :  { %v7914_v53 = vpop.f32.mrf.mxu3 }
 0x38b   :  { %v3286_v1 = vmax.f32 %v2786_v9, 0.0  ;;  %3670 = vst.msk [vmem:[%s8535_s3 + $0x6e0] sm:$0xff] %vm3449_vm3, %v3413_v60 }
 0x38c   :  { %v2793_v19 = vpop.f32.mrf.mxu1  ;;  %v2456_v23 = vpop.f32.mrf.mxu2 }
 0x38d   :  { %3543 = vst.msk [vmem:[%s8535_s3 + $0x2e8] sm:$0xff] %vm3449_vm3, %v3286_v1  ;;  %v2457_v26 = vadd.f32 %v7512_v51, %v2456_v23 }
 0x38e   :  { %v2139_v0 = vpop.f32.mrf.mxu0 }
 0x38f   :  { %4826 = vmatmul.msk.bf16.gmra.mxu1 %vm1503_vm2, %v4165_v15  ;;  %v2140_v29 = vadd.f32 %v7512_v51, %v2139_v0  ;;  %4891 = vmatmul.msk.bf16.gmra.mxu3 %vm1503_vm2, %v4685_v6  ;;  %v3106_v30 = vadd.f32 %v7810_v38, %v2457_v26  ;;  %v5141_v26 = vld [vmem:[%s8533_s0 + $0x794] sm:$0xf0]  ;;  %v4701_v0 = vor.u32 %v5144_v16, %v4698_v17  ;;  %v5018_v16 = vld [vmem:[%s8533_s0 + $0x3c4] sm:$0xf]  ;;  %v4194_v17 = vld [vmem:[%s8533_s0 + $0x3c8] sm:$0xf0] }
 0x391   :  { %v2789_v54 = vadd.f32 %v2788_v25, %v2140_v29  ;;  %2178 = vmatmul.bf16.gmra.mxu0 %v4153_v24  ;;  %v3414_v33 = vmax.f32 %v3106_v30, 0.0  ;;  %2498 = vmatmul.bf16.gmra.mxu2 %v4665_v28  ;;  %v4173_v25 = vor.u32 %v5012_v40, %v4170_v42  ;;  %v4680_v24 = vld [vmem:[%s8533_s0 + $0x790] sm:$0xf]  ;;  %v4169_v29 = vor.u32 %v5013_v21, %v4168_v20  ;;  %v5148_v20 = vld [vmem:[%s8533_s0 + $0x7d4] sm:$0xf] }
 0x392   :  { %v7935_v18 = vpop.f32.mrf.mxu3  ;;  %v4714_v21 = vld [vmem:[%s8533_s0 + $0x7d8] sm:$0xf0] }
 0x393   :  { %v3287_v34 = vmax.f32 %v2789_v54, 0.0  ;;  %3671 = vst.msk [vmem:[%s8535_s3 + $0x6e8] sm:$0xff] %vm3449_vm3, %v3414_v33  ;;  %v4681_v33 = vor.u32 %v5141_v26, %v4680_v24  ;;  %v4184_v24 = vld [vmem:[%s8533_s0 + $0x3b0] sm:$0xf]  ;;  %v5017_v26 = vld [vmem:[%s8533_s0 + $0x3b4] sm:$0xf0] }
 0x394   :  { %v2795_v35 = vpop.f32.mrf.mxu1  ;;  %v2459_v37 = vpop.f32.mrf.mxu2 }
 0x395   :  { %3544 = vst.msk [vmem:[%s8535_s3 + $0x2f0] sm:$0xff] %vm3449_vm3, %v3287_v34  ;;  %v2460_v38 = vadd.f32 %v7512_v51, %v2459_v37 }
 0x396   :  { %v2141_v22 = vpop.f32.mrf.mxu0 }
 0x397   :  { %v2142_v39 = vadd.f32 %v7512_v51, %v2141_v22  ;;  %v3109_v27 = vadd.f32 %v7831_v13, %v2460_v38 }
 0x399   :  { %v2791_v56 = vadd.f32 %v2790_v62, %v2142_v39  ;;  %v3415_v32 = vmax.f32 %v3109_v27, 0.0 }
 0x39a   :  { %v7966_v13 = vpop.f32.mrf.mxu3 }
 0x39b   :  { %v3288_v36 = vmax.f32 %v2791_v56, 0.0  ;;  %3672 = vst.msk [vmem:[%s8535_s3 + $0x6f0] sm:$0xff] %vm3449_vm3, %v3415_v32 }
 0x39c   :  { %v2798_v11 = vpop.f32.mrf.mxu1  ;;  %v2461_v57 = vpop.f32.mrf.mxu2 }
 0x39d   :  { %3545 = vst.msk [vmem:[%s8535_s3 + $0x2f8] sm:$0xff] %vm3449_vm3, %v3288_v36  ;;  %v2462_v58 = vadd.f32 %v7512_v51, %v2461_v57 }
 0x39e   :  { %v2144_v44 = vpop.f32.mrf.mxu0 }
 0x39f   :  { %4827 = vmatmul.msk.bf16.gmra.mxu1 %vm1503_vm2, %v4173_v25  ;;  %v2145_v45 = vadd.f32 %v7512_v51, %v2144_v44  ;;  %4892 = vmatmul.msk.bf16.gmra.mxu3 %vm1503_vm2, %v4693_v41  ;;  %v3111_v62 = vadd.f32 %v7862_v8, %v2462_v58  ;;  %v5143_v58 = vld [vmem:[%s8533_s0 + $0x7a4] sm:$0xf0]  ;;  %v4709_v44 = vor.u32 %v5146_v48, %v4706_v50  ;;  %v5020_v48 = vld [vmem:[%s8533_s0 + $0x3d4] sm:$0xf]  ;;  %v4202_v50 = vld [vmem:[%s8533_s0 + $0x3d8] sm:$0xf0] }
 0x3a1   :  { %v2794_v47 = vadd.f32 %v2793_v19, %v2145_v45  ;;  %2183 = vmatmul.bf16.gmra.mxu0 %v4161_v43  ;;  %v3416_v3 = vmax.f32 %v3111_v62, 0.0  ;;  %2503 = vmatmul.bf16.gmra.mxu2 %v4673_v61  ;;  %v4181_v19 = vor.u32 %v5014_v10, %v4178_v12  ;;  %v4688_v43 = vld [vmem:[%s8533_s0 + $0x7a0] sm:$0xf]  ;;  %v4177_v45 = vor.u32 %v5015_v55, %v4176_v52  ;;  %v5150_v52 = vld [vmem:[%s8533_s0 + $0x7e4] sm:$0xf] }
 0x3a2   :  { %v7987_v63 = vpop.f32.mrf.mxu3  ;;  %v4722_v55 = vld [vmem:[%s8533_s0 + $0x7e8] sm:$0xf0] }
 0x3a3   :  { %v3289_v49 = vmax.f32 %v2794_v47, 0.0  ;;  %3673 = vst.msk [vmem:[%s8535_s3 + $0x6f8] sm:$0xff] %vm3449_vm3, %v3416_v3  ;;  %v4689_v3 = vor.u32 %v5143_v58, %v4688_v43  ;;  %v5019_v43 = vld [vmem:[%s8533_s0 + $0x3c4] sm:$0xf0] }
 0x3a4   :  { %v2800_v4 = vpop.f32.mrf.mxu1  ;;  %v2464_v5 = vpop.f32.mrf.mxu2 }
 0x3a5   :  { %3546 = vst.msk [vmem:[%s8535_s3 + $0x300] sm:$0xff] %vm3449_vm3, %v3289_v49  ;;  %v2465_v8 = vadd.f32 %v7512_v51, %v2464_v5 }
 0x3a6   :  { %v2146_v7 = vpop.f32.mrf.mxu0 }
 0x3a7   :  { %v2147_v9 = vadd.f32 %v7512_v51, %v2146_v7  ;;  %v3114_v60 = vadd.f32 %v7883_v59, %v2465_v8 }
 0x3a9   :  { %v2796_v15 = vadd.f32 %v2795_v35, %v2147_v9  ;;  %v3417_v1 = vmax.f32 %v3114_v60, 0.0 }
 0x3aa   :  { %v8018_v59 = vpop.f32.mrf.mxu3 }
 0x3ab   :  { %v3290_v6 = vmax.f32 %v2796_v15, 0.0  ;;  %3674 = vst.msk [vmem:[%s8535_s3 + $0x700] sm:$0xff] %vm3449_vm3, %v3417_v1 }
 0x3ac   :  { %v2803_v23 = vpop.f32.mrf.mxu1  ;;  %v2466_v28 = vpop.f32.mrf.mxu2 }
 0x3ad   :  { %3547 = vst.msk [vmem:[%s8535_s3 + $0x308] sm:$0xff] %vm3449_vm3, %v3290_v6  ;;  %v2467_v30 = vadd.f32 %v7512_v51, %v2466_v28 }
 0x3ae   :  { %v2149_v54 = vpop.f32.mrf.mxu0 }
 0x3af   :  { %4828 = vmatmul.msk.bf16.gmra.mxu1 %vm1503_vm2, %v4181_v19  ;;  %v2150_v34 = vadd.f32 %v7512_v51, %v2149_v54  ;;  %4893 = vmatmul.msk.bf16.gmra.mxu3 %vm1503_vm2, %v4701_v0  ;;  %v3116_v35 = vadd.f32 %v7914_v53, %v2467_v30  ;;  %v5145_v30 = vld [vmem:[%s8533_s0 + $0x7b4] sm:$0xf0]  ;;  %v4717_v54 = vor.u32 %v5148_v20, %v4714_v21  ;;  %v5022_v20 = vld [vmem:[%s8533_s0 + $0x3e4] sm:$0xf]  ;;  %v4210_v21 = vld [vmem:[%s8533_s0 + $0x3e8] sm:$0xf0] }
 0x3b1   :  { %v2799_v37 = vadd.f32 %v2798_v11, %v2150_v34  ;;  %2188 = vmatmul.bf16.gmra.mxu0 %v4169_v29  ;;  %v3418_v38 = vmax.f32 %v3116_v35, 0.0  ;;  %2508 = vmatmul.bf16.gmra.mxu2 %v4681_v33  ;;  %v4189_v11 = vor.u32 %v5016_v2, %v4186_v46  ;;  %v4696_v29 = vld [vmem:[%s8533_s0 + $0x7b0] sm:$0xf]  ;;  %v4185_v34 = vor.u32 %v5017_v26, %v4184_v24  ;;  %v5152_v24 = vld [vmem:[%s8533_s0 + $0x7f4] sm:$0xf] }
 0x3b2   :  { %v8039_v22 = vpop.f32.mrf.mxu3  ;;  %v4730_v26 = vld [vmem:[%s8533_s0 + $0x7f8] sm:$0xf0] }
 0x3b3   :  { %v3291_v39 = vmax.f32 %v2799_v37, 0.0  ;;  %3675 = vst.msk [vmem:[%s8535_s3 + $0x708] sm:$0xff] %vm3449_vm3, %v3418_v38  ;;  %v4697_v38 = vor.u32 %v5145_v30, %v4696_v29  ;;  %v4200_v29 = vld [vmem:[%s8533_s0 + $0x3d0] sm:$0xf]  ;;  %v5021_v30 = vld [vmem:[%s8533_s0 + $0x3d4] sm:$0xf0] }
 0x3b4   :  { %v2805_v40 = vpop.f32.mrf.mxu1  ;;  %v2469_v42 = vpop.f32.mrf.mxu2 }
 0x3b5   :  { %3548 = vst.msk [vmem:[%s8535_s3 + $0x310] sm:$0xff] %vm3449_vm3, %v3291_v39  ;;  %v2470_v53 = vadd.f32 %v7512_v51, %v2469_v42 }
 0x3b6   :  { %v2151_v27 = vpop.f32.mrf.mxu0 }
 0x3b7   :  { %v2152_v56 = vadd.f32 %v7512_v51, %v2151_v27  ;;  %v3119_v32 = vadd.f32 %v7935_v18, %v2470_v53 }
 0x3b9   :  { %v2801_v25 = vadd.f32 %v2800_v4, %v2152_v56  ;;  %v3419_v36 = vmax.f32 %v3119_v32, 0.0 }
 0x3ba   :  { %v8070_v18 = vpop.f32.mrf.mxu3 }
 0x3bb   :  { %v3292_v41 = vmax.f32 %v2801_v25, 0.0  ;;  %3676 = vst.msk [vmem:[%s8535_s3 + $0x710] sm:$0xff] %vm3449_vm3, %v3419_v36 }
 0x3bc   :  { %v2808_v57 = vpop.f32.mrf.mxu1  ;;  %v2471_v61 = vpop.f32.mrf.mxu2 }
 0x3bd   :  { %3549 = vst.msk [vmem:[%s8535_s3 + $0x318] sm:$0xff] %vm3449_vm3, %v3292_v41  ;;  %v2472_v62 = vadd.f32 %v7512_v51, %v2471_v61  ;;  %v4205_v41 = vor.u32 %v5020_v48, %v4202_v50  ;;  %v4704_v61 = vld [vmem:[%s8533_s0 + $0x7c0] sm:$0xf] }
 0x3be   :  { %v2154_v47 = vpop.f32.mrf.mxu0 }
 0x3bf   :  { %4829 = vmatmul.msk.bf16.gmra.mxu1 %vm1503_vm2, %v4189_v11  ;;  %v2155_v49 = vadd.f32 %v7512_v51, %v2154_v47  ;;  %4894 = vmatmul.msk.bf16.gmra.mxu3 %vm1503_vm2, %v4709_v44  ;;  %v3121_v4 = vadd.f32 %v7966_v13, %v2472_v62  ;;  %v4725_v62 = vor.u32 %v5150_v52, %v4722_v55  ;;  %v5024_v52 = vld [vmem:[%s8533_s0 + $0x3f4] sm:$0xf]  ;;  %v4218_v55 = vld [vmem:[%s8533_s0 + $0x3f8] sm:$0xf0] }
 0x3c1   :  { %v2804_v5 = vadd.f32 %v2803_v23, %v2155_v49  ;;  %2193 = vmatmul.bf16.gmra.mxu0 %v4177_v45  ;;  %v3420_v8 = vmax.f32 %v3121_v4, 0.0  ;;  %2513 = vmatmul.bf16.gmra.mxu2 %v4689_v3  ;;  %v4197_v23 = vor.u32 %v5018_v16, %v4194_v17  ;;  %v5147_v45 = vld [vmem:[%s8533_s0 + $0x7c4] sm:$0xf0]  ;;  %v8193_v49 = vld [vmem:[%s8534_s2] ss:$0 sm:$0xff] }
 0x3c2   :  { %v8091_v7 = vpop.f32.mrf.mxu3 }
 0x3c3   :  { %v3293_v9 = vmax.f32 %v2804_v5, 0.0  ;;  %3677 = vst.msk [vmem:[%s8535_s3 + $0x718] sm:$0xff] %vm3449_vm3, %v3420_v8  ;;  %v4705_v8 = vor.u32 %v5147_v45, %v4704_v61 }
 0x3c4   :  { %v2810_v10 = vpop.f32.mrf.mxu1  ;;  %v2474_v12 = vpop.f32.mrf.mxu2 }
 0x3c5   :  { %3550 = vst.msk [vmem:[%s8535_s3 + $0x320] sm:$0xff] %vm3449_vm3, %v3293_v9  ;;  %v2475_v13 = vadd.f32 %v7512_v51, %v2474_v12 }
 0x3c6   :  { %v2156_v60 = vpop.f32.mrf.mxu0 }
 0x3c7   :  { %v2157_v15 = vadd.f32 %v7512_v51, %v2156_v60  ;;  %v3124_v1 = vadd.f32 %v7987_v63, %v2475_v13 }
 0x3c9   :  { %v2806_v19 = vadd.f32 %v2805_v40, %v2157_v15  ;;  %v3421_v6 = vmax.f32 %v3124_v1, 0.0 }
 0x3ca   :  { %v8122_v63 = vpop.f32.mrf.mxu3 }
 0x3cb   :  { %v3294_v0 = vmax.f32 %v2806_v19, 0.0  ;;  %3678 = vst.msk [vmem:[%s8535_s3 + $0x720] sm:$0xff] %vm3449_vm3, %v3421_v6 }
 0x3cc   :  { %v2813_v28 = vpop.f32.mrf.mxu1  ;;  %v2476_v33 = vpop.f32.mrf.mxu2 }
 0x3cd   :  { %3551 = vst.msk [vmem:[%s8535_s3 + $0x328] sm:$0xff] %vm3449_vm3, %v3294_v0  ;;  %v2477_v35 = vadd.f32 %v7512_v51, %v2476_v33  ;;  %v4712_v33 = vld [vmem:[%s8533_s0 + $0x7d0] sm:$0xf] }
 0x3ce   :  { %v2159_v37 = vpop.f32.mrf.mxu0 }
 0x3cf   :  { %4830 = vmatmul.msk.bf16.gmra.mxu1 %vm1503_vm2, %v4197_v23  ;;  %v2160_v39 = vadd.f32 %v7512_v51, %v2159_v37  ;;  %4895 = vmatmul.msk.bf16.gmra.mxu3 %vm1503_vm2, %v4717_v54  ;;  %v3126_v40 = vadd.f32 %v8018_v59, %v2477_v35  ;;  %v4733_v37 = vor.u32 %v5152_v24, %v4730_v26 }
 0x3d1   :  { %v2809_v42 = vadd.f32 %v2808_v57, %v2160_v39  ;;  %2198 = vmatmul.bf16.gmra.mxu0 %v4185_v34  ;;  %v3422_v53 = vmax.f32 %v3126_v40, 0.0  ;;  %2518 = vmatmul.bf16.gmra.mxu2 %v4697_v38  ;;  %v4192_v57 = vld [vmem:[%s8533_s0 + $0x3c0] sm:$0xf]  ;;  %v5149_v34 = vld [vmem:[%s8533_s0 + $0x7d4] sm:$0xf0]  ;;  %v4201_v39 = vor.u32 %v5021_v30, %v4200_v29 }
 0x3d2   :  { %v8143_v27 = vpop.f32.mrf.mxu3  ;;  %v4193_v3 = vor.u32 %v5019_v43, %v4192_v57  ;;  %v4221_v43 = vor.u32 %v5024_v52, %v4218_v55  ;;  %v5025_v29 = vld [vmem:[%s8533_s0 + $0x3f4] sm:$0xf0] }
 0x3d3   :  { %v3295_v56 = vmax.f32 %v2809_v42, 0.0  ;;  %3679 = vst.msk [vmem:[%s8535_s3 + $0x728] sm:$0xff] %vm3449_vm3, %v3422_v53  ;;  %v4713_v53 = vor.u32 %v5149_v34, %v4712_v33 }
 0x3d4   :  { %v2815_v2 = vpop.f32.mrf.mxu1  ;;  %v2479_v46 = vpop.f32.mrf.mxu2 }
 0x3d5   :  { %3552 = vst.msk [vmem:[%s8535_s3 + $0x330] sm:$0xff] %vm3449_vm3, %v3295_v56  ;;  %v2480_v59 = vadd.f32 %v7512_v51, %v2479_v46 }
 0x3d6   :  { %v2161_v32 = vpop.f32.mrf.mxu0 }
 0x3d7   :  { %v2162_v25 = vadd.f32 %v7512_v51, %v2161_v32  ;;  %v3129_v36 = vadd.f32 %v8039_v22, %v2480_v59 }
 0x3d9   :  { %v2811_v11 = vadd.f32 %v2810_v10, %v2162_v25  ;;  %v3423_v51 = vmax.f32 %v3129_v36, 0.0 }
 0x3da   :  { %v8174_v22 = vpop.f32.mrf.mxu3 }
 0x3db   :  { %v3296_v58 = vmax.f32 %v2811_v11, 0.0  ;;  %3680 = vst.msk [vmem:[%s8535_s3 + $0x730] sm:$0xff] %vm3449_vm3, %v3423_v51 }
 0x3dc   :  { %v2818_v44 = vpop.f32.mrf.mxu1  ;;  %v2481_v47 = vpop.f32.mrf.mxu2 }
 0x3dd   :  { %3553 = vst.msk [vmem:[%s8535_s3 + $0x338] sm:$0xff] %vm3449_vm3, %v3296_v58  ;;  %v2482_v4 = vadd.f32 %v8193_v49, %v2481_v47  ;;  %v4208_v58 = vld [vmem:[%s8533_s0 + $0x3e0] sm:$0xf] }
 0x3de   :  { %v2164_v5 = vpop.f32.mrf.mxu0 }
 0x3df   :  { %4831 = vmatmul.msk.bf16.gmra.mxu1 %vm1503_vm2, %v4205_v41  ;;  %v2165_v9 = vadd.f32 %v8193_v49, %v2164_v5  ;;  %4896 = vmatmul.msk.bf16.gmra.mxu3 %vm1503_vm2, %v4725_v62  ;;  %v3131_v10 = vadd.f32 %v8070_v18, %v2482_v4  ;;  %v4720_v62 = vld [vmem:[%s8533_s0 + $0x7e0] sm:$0xf] }
 0x3e1   :  { %v2814_v12 = vadd.f32 %v2813_v28, %v2165_v9  ;;  %2203 = vmatmul.bf16.gmra.mxu0 %v4193_v3  ;;  %v3424_v13 = vmax.f32 %v3131_v10, 0.0  ;;  %2523 = vmatmul.bf16.gmra.mxu2 %v4705_v8  ;;  %v4213_v28 = vor.u32 %v5022_v20, %v4210_v21  ;;  %v5026_v20 = vld [vmem:[%s8533_s0 + $0x404] sm:$0xf]  ;;  %v4226_v21 = vld [vmem:[%s8533_s0 + $0x408] sm:$0xf0] }
 0x3e2   :  { %v8200_v60 = vpop.f32.mrf.mxu3 }
 0x3e3   :  { %v3297_v15 = vmax.f32 %v2814_v12, 0.0  ;;  %3681 = vst.msk [vmem:[%s8535_s3 + $0x738] sm:$0xff] %vm3449_vm3, %v3424_v13 }
 0x3e4   :  { %v2820_v16 = vpop.f32.mrf.mxu1  ;;  %v2484_v17 = vpop.f32.mrf.mxu2 }
 0x3e5   :  { %3554 = vst.msk [vmem:[%s8535_s3 + $0x340] sm:$0xff] %vm3449_vm3, %v3297_v15  ;;  %v2485_v18 = vadd.f32 %v8193_v49, %v2484_v17 }
 0x3e6   :  { %v2166_v1 = vpop.f32.mrf.mxu0 }
 0x3e7   :  { %v2167_v19 = vadd.f32 %v8193_v49, %v2166_v1  ;;  %v3134_v6 = vadd.f32 %v8091_v7, %v2485_v18 }
 0x3e9   :  { %v2816_v23 = vadd.f32 %v2815_v2, %v2167_v19  ;;  %v3425_v0 = vmax.f32 %v3134_v6, 0.0 }
 0x3ea   :  { %v8237_v35 = vpop.f32.mrf.mxu3 }
 0x3eb   :  { %v3298_v7 = vmax.f32 %v2816_v23, 0.0  ;;  %3682 = vst.msk [vmem:[%s8535_s3 + $0x740] sm:$0xff] %vm3449_vm3, %v3425_v0  ;;  %v4229_v0 = vor.u32 %v5026_v20, %v4226_v21 }
 0x3ec   :  { %v2823_v54 = vpop.f32.mrf.mxu1  ;;  %v2486_v38 = vpop.f32.mrf.mxu2 }
 0x3ed   :  { %3555 = vst.msk [vmem:[%s8535_s3 + $0x348] sm:$0xff] %vm3449_vm3, %v3298_v7  ;;  %v2487_v40 = vadd.f32 %v8193_v49, %v2486_v38 }
 0x3ee   :  { %v2169_v42 = vpop.f32.mrf.mxu0 }
 0x3ef   :  { %4832 = vmatmul.msk.bf16.gmra.mxu1 %vm1503_vm2, %v4213_v28  ;;  %v2170_v56 = vadd.f32 %v8193_v49, %v2169_v42  ;;  %4897 = vmatmul.msk.bf16.gmra.mxu3 %vm1503_vm2, %v4733_v37  ;;  %v3136_v2 = vadd.f32 %v8122_v63, %v2487_v40  ;;  %v4216_v28 = vld [vmem:[%s8533_s0 + $0x3f0] sm:$0xf] }
 0x3f0   :  { %v4217_v34 = vor.u32 %v5025_v29, %v4216_v28 }
 0x3f1   :  { %v2819_v46 = vadd.f32 %v2818_v44, %v2170_v56  ;;  %2208 = vmatmul.bf16.gmra.mxu0 %v4201_v39  ;;  %v3426_v59 = vmax.f32 %v3136_v2, 0.0  ;;  %2528 = vmatmul.bf16.gmra.mxu2 %v4713_v53  ;;  %v5023_v44 = vld [vmem:[%s8533_s0 + $0x3e4] sm:$0xf0] }
 0x3f2   :  { %v8260_v50 = vpop.f32.mrf.mxu3  ;;  %v4209_v3 = vor.u32 %v5023_v44, %v4208_v58 }
 0x3f3   :  { %v3299_v32 = vmax.f32 %v2819_v46, 0.0  ;;  %3683 = vst.msk [vmem:[%s8535_s3 + $0x748] sm:$0xff] %vm3449_vm3, %v3426_v59 }
 0x3f4   :  { %v2825_v25 = vpop.f32.mrf.mxu1  ;;  %v2489_v48 = vpop.f32.mrf.mxu2 }
 0x3f5   :  { %3556 = vst.msk [vmem:[%s8535_s3 + $0x350] sm:$0xff] %vm3449_vm3, %v3299_v32  ;;  %v2490_v63 = vadd.f32 %v8193_v49, %v2489_v48 }
 0x3f6   :  { %v2171_v36 = vpop.f32.mrf.mxu0 }
 0x3f7   :  { %v2172_v11 = vadd.f32 %v8193_v49, %v2171_v36  ;;  %v3139_v51 = vadd.f32 %v8143_v27, %v2490_v63  ;;  %v5151_v27 = vld [vmem:[%s8533_s0 + $0x7e4] sm:$0xf0] }
 0x3f8   :  { %v4721_v8 = vor.u32 %v5151_v27, %v4720_v62 }
 0x3f9   :  { %v2821_v41 = vadd.f32 %v2820_v16, %v2172_v11  ;;  %v3427_v57 = vmax.f32 %v3139_v51, 0.0 }
 0x3fa   :  { %v3150_v10 = vpop.f32.mrf.mxu3 }
 0x3fb   :  { %v3300_v61 = vmax.f32 %v2821_v41, 0.0  ;;  %3684 = vst.msk [vmem:[%s8535_s3 + $0x750] sm:$0xff] %vm3449_vm3, %v3427_v57 }
 0x3fc   :  { %v2828_v45 = vpop.f32.mrf.mxu1  ;;  %v2491_v47 = vpop.f32.mrf.mxu2 }
 0x3fd   :  { %3557 = vst.msk [vmem:[%s8535_s3 + $0x358] sm:$0xff] %vm3449_vm3, %v3300_v61  ;;  %v2492_v4 = vadd.f32 %v8193_v49, %v2491_v47 }
 0x3fe   :  { %v2174_v5 = vpop.f32.mrf.mxu0 }
 0x3ff   :  { %4833 = vmatmul.msk.bf16.gmra.mxu1 %vm1503_vm2, %v4221_v43  ;;  %v2175_v9 = vadd.f32 %v8193_v49, %v2174_v5  ;;  %v3141_v12 = vadd.f32 %v8174_v22, %v2492_v4 }
 0x401   :  { %v2824_v13 = vadd.f32 %v2823_v54, %v2175_v9  ;;  %2213 = vmatmul.bf16.gmra.mxu0 %v4209_v3  ;;  %v3428_v15 = vmax.f32 %v3141_v12, 0.0  ;;  %2533 = vmatmul.bf16.gmra.mxu2 %v4721_v8  ;;  %v4728_v54 = vld [vmem:[%s8533_s0 + $0x7f0] sm:$0xf] }
 0x402   :  { %v3153_v24 = vpop.f32.mrf.mxu3 }
 0x403   :  { %v3301_v16 = vmax.f32 %v2824_v13, 0.0  ;;  %3685 = vst.msk [vmem:[%s8535_s3 + $0x758] sm:$0xff] %vm3449_vm3, %v3428_v15 }
 0x404   :  { %v2830_v17 = vpop.f32.mrf.mxu1  ;;  %v2494_v18 = vpop.f32.mrf.mxu2 }
 0x405   :  { %3558 = vst.msk [vmem:[%s8535_s3 + $0x360] sm:$0xff] %vm3449_vm3, %v3301_v16  ;;  %v2495_v1 = vadd.f32 %v8193_v49, %v2494_v18 }
 0x406   :  { %v2176_v22 = vpop.f32.mrf.mxu0 }
 0x407   :  { %v2177_v19 = vadd.f32 %v8193_v49, %v2176_v22  ;;  %v3144_v6 = vadd.f32 %v8200_v60, %v2495_v1  ;;  %v5153_v60 = vld [vmem:[%s8533_s0 + $0x7f4] sm:$0xf0] }
 0x408   :  { %v4729_v39 = vor.u32 %v5153_v60, %v4728_v54 }
 0x409   :  { %v2826_v23 = vadd.f32 %v2825_v25, %v2177_v19  ;;  %v3429_v26 = vmax.f32 %v3144_v6, 0.0 }
 0x40a   :  { %v3155_v59 = vpop.f32.mrf.mxu3 }
 0x40b   :  { %v3302_v30 = vmax.f32 %v2826_v23, 0.0  ;;  %3686 = vst.msk [vmem:[%s8535_s3 + $0x760] sm:$0xff] %vm3449_vm3, %v3429_v26 }
 0x40c   :  { %v2833_v7 = vpop.f32.mrf.mxu1  ;;  %v2496_v33 = vpop.f32.mrf.mxu2 }
 0x40d   :  { %3559 = vst.msk [vmem:[%s8535_s3 + $0x368] sm:$0xff] %vm3449_vm3, %v3302_v30  ;;  %v2497_v37 = vadd.f32 %v8193_v49, %v2496_v33 }
 0x40e   :  { %v2179_v38 = vpop.f32.mrf.mxu0 }
 0x40f   :  { %4834 = vmatmul.msk.bf16.gmra.mxu1 %vm1503_vm2, %v4229_v0  ;;  %v2180_v40 = vadd.f32 %v8193_v49, %v2179_v38  ;;  %v3146_v42 = vadd.f32 %v8237_v35, %v2497_v37 }
 0x411   :  { %v2829_v53 = vadd.f32 %v2828_v45, %v2180_v40  ;;  %2218 = vmatmul.bf16.gmra.mxu0 %v4217_v34  ;;  %v3430_v56 = vmax.f32 %v3146_v42, 0.0  ;;  %2538 = vmatmul.bf16.gmra.mxu2 %v4729_v39 }
 0x412   :  { %v3158_v41 = vpop.f32.mrf.mxu3 }
 0x413   :  { %v3303_v2 = vmax.f32 %v2829_v53, 0.0  ;;  %3687 = vst.msk [vmem:[%s8535_s3 + $0x768] sm:$0xff] %vm3449_vm3, %v3430_v56 }
 0x414   :  { %v2835_v46 = vpop.f32.mrf.mxu1  ;;  %v2499_v32 = vpop.f32.mrf.mxu2 }
 0x415   :  { %3560 = vst.msk [vmem:[%s8535_s3 + $0x370] sm:$0xff] %vm3449_vm3, %v3303_v2  ;;  %v2500_v35 = vadd.f32 %v8193_v49, %v2499_v32 }
 0x416   :  { %v2181_v25 = vpop.f32.mrf.mxu0 }
 0x417   :  { %v2182_v48 = vadd.f32 %v8193_v49, %v2181_v25  ;;  %v3149_v63 = vadd.f32 %v8260_v50, %v2500_v35 }
 0x419   :  { %v2831_v36 = vadd.f32 %v2830_v17, %v2182_v48  ;;  %v3431_v11 = vmax.f32 %v3149_v63, 0.0 }
 0x41a   :  { %v3160_v5 = vpop.f32.mrf.mxu3 }
 0x41b   :  { %v3304_v52 = vmax.f32 %v2831_v36, 0.0  ;;  %3688 = vst.msk [vmem:[%s8535_s3 + $0x770] sm:$0xff] %vm3449_vm3, %v3431_v11 }
 0x41c   :  { %v2838_v55 = vpop.f32.mrf.mxu1  ;;  %v2501_v51 = vpop.f32.mrf.mxu2 }
 0x41d   :  { %3561 = vst.msk [vmem:[%s8535_s3 + $0x378] sm:$0xff] %vm3449_vm3, %v3304_v52  ;;  %v2502_v57 = vadd.f32 %v8193_v49, %v2501_v51 }
 0x41e   :  { %v2184_v43 = vpop.f32.mrf.mxu0 }
 0x41f   :  { %v2185_v50 = vadd.f32 %v8193_v49, %v2184_v43  ;;  %v3151_v58 = vadd.f32 %v3150_v10, %v2502_v57 }
 0x421   :  { %v2834_v44 = vadd.f32 %v2833_v7, %v2185_v50  ;;  %v3432_v61 = vmax.f32 %v3151_v58, 0.0 }
 0x422   :  { %v3163_v19 = vpop.f32.mrf.mxu3 }
 0x423   :  { %v3305_v45 = vmax.f32 %v2834_v44, 0.0  ;;  %3689 = vst.msk [vmem:[%s8535_s3 + $0x778] sm:$0xff] %vm3449_vm3, %v3432_v61 }
 0x424   :  { %v2840_v62 = vpop.f32.mrf.mxu1  ;;  %v2504_v27 = vpop.f32.mrf.mxu2 }
 0x425   :  { %3562 = vst.msk [vmem:[%s8535_s3 + $0x380] sm:$0xff] %vm3449_vm3, %v3305_v45  ;;  %v2505_v47 = vadd.f32 %v8193_v49, %v2504_v27 }
 0x426   :  { %v2186_v3 = vpop.f32.mrf.mxu0 }
 0x427   :  { %v2187_v4 = vadd.f32 %v8193_v49, %v2186_v3  ;;  %v3154_v8 = vadd.f32 %v3153_v24, %v2505_v47 }
 0x429   :  { %v2836_v9 = vadd.f32 %v2835_v46, %v2187_v4  ;;  %v3433_v10 = vmax.f32 %v3154_v8, 0.0 }
 0x42a   :  { %v3165_v60 = vpop.f32.mrf.mxu3 }
 0x42b   :  { %v3306_v12 = vmax.f32 %v2836_v9, 0.0  ;;  %3690 = vst.msk [vmem:[%s8535_s3 + $0x780] sm:$0xff] %vm3449_vm3, %v3433_v10 }
 0x42c   :  { %v2843_v13 = vpop.f32.mrf.mxu1  ;;  %v2506_v15 = vpop.f32.mrf.mxu2 }
 0x42d   :  { %3563 = vst.msk [vmem:[%s8535_s3 + $0x388] sm:$0xff] %vm3449_vm3, %v3306_v12  ;;  %v2507_v16 = vadd.f32 %v8193_v49, %v2506_v15 }
 0x42e   :  { %v2189_v17 = vpop.f32.mrf.mxu0 }
 0x42f   :  { %v2190_v18 = vadd.f32 %v8193_v49, %v2189_v17  ;;  %v3156_v1 = vadd.f32 %v3155_v59, %v2507_v16 }
 0x431   :  { %v2839_v22 = vadd.f32 %v2838_v55, %v2190_v18  ;;  %v3434_v20 = vmax.f32 %v3156_v1, 0.0 }
 0x432   :  { %v3168_v46 = vpop.f32.mrf.mxu3 }
 0x433   :  { %v3307_v21 = vmax.f32 %v2839_v22, 0.0  ;;  %3691 = vst.msk [vmem:[%s8535_s3 + $0x788] sm:$0xff] %vm3449_vm3, %v3434_v20 }
 0x434   :  { %v2845_v6 = vpop.f32.mrf.mxu1  ;;  %v2509_v23 = vpop.f32.mrf.mxu2 }
 0x435   :  { %3564 = vst.msk [vmem:[%s8535_s3 + $0x390] sm:$0xff] %vm3449_vm3, %v3307_v21  ;;  %v2510_v24 = vadd.f32 %v8193_v49, %v2509_v23 }
 0x436   :  { %v2191_v26 = vpop.f32.mrf.mxu0 }
 0x437   :  { %v2192_v0 = vadd.f32 %v8193_v49, %v2191_v26  ;;  %v3159_v28 = vadd.f32 %v3158_v41, %v2510_v24 }
 0x439   :  { %v2841_v29 = vadd.f32 %v2840_v62, %v2192_v0  ;;  %v3435_v30 = vmax.f32 %v3159_v28, 0.0 }
 0x43a   :  { %v3170_v57 = vpop.f32.mrf.mxu3 }
 0x43b   :  { %v3308_v7 = vmax.f32 %v2841_v29, 0.0  ;;  %3692 = vst.msk [vmem:[%s8535_s3 + $0x790] sm:$0xff] %vm3449_vm3, %v3435_v30 }
 0x43c   :  { %v2848_v54 = vpop.f32.mrf.mxu1  ;;  %v2511_v33 = vpop.f32.mrf.mxu2 }
 0x43d   :  { %3565 = vst.msk [vmem:[%s8535_s3 + $0x398] sm:$0xff] %vm3449_vm3, %v3308_v7  ;;  %v2512_v34 = vadd.f32 %v8193_v49, %v2511_v33 }
 0x43e   :  { %v2194_v37 = vpop.f32.mrf.mxu0 }
 0x43f   :  { %v2195_v38 = vadd.f32 %v8193_v49, %v2194_v37  ;;  %v3161_v39 = vadd.f32 %v3160_v5, %v2512_v34 }
 0x441   :  { %v2844_v40 = vadd.f32 %v2843_v13, %v2195_v38  ;;  %v3436_v42 = vmax.f32 %v3161_v39, 0.0 }
 0x442   :  { %v3173_v5 = vpop.f32.mrf.mxu3 }
 0x443   :  { %v3309_v53 = vmax.f32 %v2844_v40, 0.0  ;;  %3693 = vst.msk [vmem:[%s8535_s3 + $0x798] sm:$0xff] %vm3449_vm3, %v3436_v42 }
 0x444   :  { %v2850_v56 = vpop.f32.mrf.mxu1  ;;  %v2514_v2 = vpop.f32.mrf.mxu2 }
 0x445   :  { %3566 = vst.msk [vmem:[%s8535_s3 + $0x3a0] sm:$0xff] %vm3449_vm3, %v3309_v53  ;;  %v2515_v59 = vadd.f32 %v8193_v49, %v2514_v2 }
 0x446   :  { %v2196_v32 = vpop.f32.mrf.mxu0 }
 0x447   :  { %v2197_v35 = vadd.f32 %v8193_v49, %v2196_v32  ;;  %v3164_v25 = vadd.f32 %v3163_v19, %v2515_v59 }
 0x449   :  { %v2846_v48 = vadd.f32 %v2845_v6, %v2197_v35  ;;  %v3437_v63 = vmax.f32 %v3164_v25, 0.0 }
 0x44a   :  { %v3175_v20 = vpop.f32.mrf.mxu3 }
 0x44b   :  { %v3310_v36 = vmax.f32 %v2846_v48, 0.0  ;;  %3694 = vst.msk [vmem:[%s8535_s3 + $0x7a0] sm:$0xff] %vm3449_vm3, %v3437_v63 }
 0x44c   :  { %v2853_v11 = vpop.f32.mrf.mxu1  ;;  %v2516_v52 = vpop.f32.mrf.mxu2 }
 0x44d   :  { %3567 = vst.msk [vmem:[%s8535_s3 + $0x3a8] sm:$0xff] %vm3449_vm3, %v3310_v36  ;;  %v2517_v55 = vadd.f32 %v8193_v49, %v2516_v52 }
 0x44e   :  { %v2199_v51 = vpop.f32.mrf.mxu0 }
 0x44f   :  { %v2200_v41 = vadd.f32 %v8193_v49, %v2199_v51  ;;  %v3166_v43 = vadd.f32 %v3165_v60, %v2517_v55 }
 0x451   :  { %v2849_v50 = vadd.f32 %v2848_v54, %v2200_v41  ;;  %v3438_v58 = vmax.f32 %v3166_v43, 0.0 }
 0x452   :  { %v3178_v54 = vpop.f32.mrf.mxu3 }
 0x453   :  { %v3311_v44 = vmax.f32 %v2849_v50, 0.0  ;;  %3695 = vst.msk [vmem:[%s8535_s3 + $0x7a8] sm:$0xff] %vm3449_vm3, %v3438_v58 }
 0x454   :  { %v2855_v61 = vpop.f32.mrf.mxu1  ;;  %v2519_v45 = vpop.f32.mrf.mxu2 }
 0x455   :  { %3568 = vst.msk [vmem:[%s8535_s3 + $0x3b0] sm:$0xff] %vm3449_vm3, %v3311_v44  ;;  %v2520_v62 = vadd.f32 %v8193_v49, %v2519_v45 }
 0x456   :  { %v2201_v27 = vpop.f32.mrf.mxu0 }
 0x457   :  { %v2202_v47 = vadd.f32 %v8193_v49, %v2201_v27  ;;  %v3169_v3 = vadd.f32 %v3168_v46, %v2520_v62 }
 0x459   :  { %v2851_v4 = vadd.f32 %v2850_v56, %v2202_v47  ;;  %v3439_v8 = vmax.f32 %v3169_v3, 0.0  ;;  %v2225_v3 = vadd.f32 %v8193_v49, %v5494_v14 }
 0x45a   :  { %v3180_v59 = vpop.f32.mrf.mxu3 }
 0x45b   :  { %v3312_v9 = vmax.f32 %v2851_v4, 0.0  ;;  %3696 = vst.msk [vmem:[%s8535_s3 + $0x7b0] sm:$0xff] %vm3449_vm3, %v3439_v8 }
 0x45c   :  { %v2858_v10 = vpop.f32.mrf.mxu1  ;;  %v2521_v12 = vpop.f32.mrf.mxu2 }
 0x45d   :  { %3569 = vst.msk [vmem:[%s8535_s3 + $0x3b8] sm:$0xff] %vm3449_vm3, %v3312_v9  ;;  %v2522_v13 = vadd.f32 %v8193_v49, %v2521_v12 }
 0x45e   :  { %v2204_v15 = vpop.f32.mrf.mxu0 }
 0x45f   :  { %v2205_v16 = vadd.f32 %v8193_v49, %v2204_v15  ;;  %v3171_v17 = vadd.f32 %v3170_v57, %v2522_v13 }
 0x461   :  { %v2854_v18 = vadd.f32 %v2853_v11, %v2205_v16  ;;  %v3440_v1 = vmax.f32 %v3171_v17, 0.0 }
 0x462   :  { %v3183_v57 = vpop.f32.mrf.mxu3 }
 0x463   :  { %v3313_v22 = vmax.f32 %v2854_v18, 0.0  ;;  %3697 = vst.msk [vmem:[%s8535_s3 + $0x7b8] sm:$0xff] %vm3449_vm3, %v3440_v1  ;;  %v2227_v1 = vadd.f32 %v8193_v49, %v5527_v31 }
 0x464   :  { %v2860_v19 = vpop.f32.mrf.mxu1  ;;  %v2524_v21 = vpop.f32.mrf.mxu2 }
 0x465   :  { %3570 = vst.msk [vmem:[%s8535_s3 + $0x3c0] sm:$0xff] %vm3449_vm3, %v3313_v22  ;;  %v2525_v6 = vadd.f32 %v8193_v49, %v2524_v21 }
 0x466   :  { %v2206_v23 = vpop.f32.mrf.mxu0 }
 0x467   :  { %v2207_v24 = vadd.f32 %v8193_v49, %v2206_v23  ;;  %v3174_v26 = vadd.f32 %v3173_v5, %v2525_v6 }
 0x469   :  { %v2856_v0 = vadd.f32 %v2855_v61, %v2207_v24  ;;  %v3441_v28 = vmax.f32 %v3174_v26, 0.0 }
 0x46a   :  { %v3185_v8 = vpop.f32.mrf.mxu3 }
 0x46b   :  { %v3314_v29 = vmax.f32 %v2856_v0, 0.0  ;;  %3698 = vst.msk [vmem:[%s8535_s3 + $0x7c0] sm:$0xff] %vm3449_vm3, %v3441_v28 }
 0x46c   :  { %v2863_v30 = vpop.f32.mrf.mxu1  ;;  %v2526_v7 = vpop.f32.mrf.mxu2 }
 0x46d   :  { %3571 = vst.msk [vmem:[%s8535_s3 + $0x3c8] sm:$0xff] %vm3449_vm3, %v3314_v29  ;;  %v2527_v60 = vadd.f32 %v8193_v49, %v2526_v7 }
 0x46e   :  { %v2209_v33 = vpop.f32.mrf.mxu0 }
 0x46f   :  { %v2210_v34 = vadd.f32 %v8193_v49, %v2209_v33  ;;  %v3176_v37 = vadd.f32 %v3175_v20, %v2527_v60 }
 0x471   :  { %v2859_v38 = vadd.f32 %v2858_v10, %v2210_v34  ;;  %v3442_v39 = vmax.f32 %v3176_v37, 0.0 }
 0x472   :  { %v3188_v6 = vpop.f32.mrf.mxu3 }
 0x473   :  { %v3315_v40 = vmax.f32 %v2859_v38, 0.0  ;;  %3699 = vst.msk [vmem:[%s8535_s3 + $0x7c8] sm:$0xff] %vm3449_vm3, %v3442_v39 }
 0x474   :  { %v2865_v42 = vpop.f32.mrf.mxu1  ;;  %v2529_v53 = vpop.f32.mrf.mxu2 }
 0x475   :  { %3572 = vst.msk [vmem:[%s8535_s3 + $0x3d0] sm:$0xff] %vm3449_vm3, %v3315_v40  ;;  %v2530_v56 = vadd.f32 %v8193_v49, %v2529_v53 }
 0x476   :  { %v2211_v2 = vpop.f32.mrf.mxu0 }
 0x477   :  { %v2212_v46 = vadd.f32 %v8193_v49, %v2211_v2  ;;  %v3179_v32 = vadd.f32 %v3178_v54, %v2530_v56 }
 0x479   :  { %v2861_v35 = vadd.f32 %v2860_v19, %v2212_v46  ;;  %v3443_v25 = vmax.f32 %v3179_v32, 0.0 }
 0x47a   :  { %v3190_v33 = vpop.f32.mrf.mxu3 }
 0x47b   :  { %v3316_v48 = vmax.f32 %v2861_v35, 0.0  ;;  %3700 = vst.msk [vmem:[%s8535_s3 + $0x7d0] sm:$0xff] %vm3449_vm3, %v3443_v25 }
 0x47c   :  { %v2868_v63 = vpop.f32.mrf.mxu1  ;;  %v2531_v36 = vpop.f32.mrf.mxu2 }
 0x47d   :  { %3573 = vst.msk [vmem:[%s8535_s3 + $0x3d8] sm:$0xff] %vm3449_vm3, %v3316_v48  ;;  %v2532_v11 = vadd.f32 %v8193_v49, %v2531_v36 }
 0x47e   :  { %v2214_v52 = vpop.f32.mrf.mxu0 }
 0x47f   :  { %v2215_v55 = vadd.f32 %v8193_v49, %v2214_v52  ;;  %v3181_v51 = vadd.f32 %v3180_v59, %v2532_v11 }
 0x481   :  { %v2864_v41 = vadd.f32 %v2863_v30, %v2215_v55  ;;  %v3444_v43 = vmax.f32 %v3181_v51, 0.0 }
 0x483   :  { %v3317_v50 = vmax.f32 %v2864_v41, 0.0  ;;  %3701 = vst.msk [vmem:[%s8535_s3 + $0x7d8] sm:$0xff] %vm3449_vm3, %v3444_v43 }
 0x484   :  { %v2870_v58 = vpop.f32.mrf.mxu1  ;;  %v2534_v44 = vpop.f32.mrf.mxu2 }
 0x485   :  { %3574 = vst.msk [vmem:[%s8535_s3 + $0x3e0] sm:$0xff] %vm3449_vm3, %v3317_v50  ;;  %v2535_v61 = vadd.f32 %v8193_v49, %v2534_v44 }
 0x486   :  { %v2216_v45 = vpop.f32.mrf.mxu0 }
 0x487   :  { %v2217_v62 = vadd.f32 %v8193_v49, %v2216_v45  ;;  %v3184_v27 = vadd.f32 %v3183_v57, %v2535_v61 }
 0x489   :  { %v2866_v47 = vadd.f32 %v2865_v42, %v2217_v62  ;;  %v3445_v4 = vmax.f32 %v3184_v27, 0.0 }
 0x48b   :  { %v3318_v5 = vmax.f32 %v2866_v47, 0.0  ;;  %3702 = vst.msk [vmem:[%s8535_s3 + $0x7e0] sm:$0xff] %vm3449_vm3, %v3445_v4 }
 0x48c   :  { %v2873_v9 = vpop.f32.mrf.mxu1  ;;  %v2536_v12 = vpop.f32.mrf.mxu2 }
 0x48d   :  { %v2874_v10 = vadd.f32 %v2873_v9, %v2225_v3  ;;  %3575 = vst.msk [vmem:[%s8535_s3 + $0x3e8] sm:$0xff] %vm3449_vm3, %v3318_v5  ;;  %v2537_v15 = vadd.f32 %v8193_v49, %v2536_v12 }
 0x48e   :  { %v2219_v14 = vpop.f32.mrf.mxu0 }
 0x48f   :  { %v3321_v13 = vmax.f32 %v2874_v10, 0.0  ;;  %v2220_v16 = vadd.f32 %v8193_v49, %v2219_v14  ;;  %v3186_v17 = vadd.f32 %v3185_v8, %v2537_v15 }
 0x491   :  { %3578 = vst.msk [vmem:[%s8535_s3 + $0x400] sm:$0xff] %vm3449_vm3, %v3321_v13  ;;  %v2869_v18 = vadd.f32 %v2868_v63, %v2220_v16  ;;  %v3446_v22 = vmax.f32 %v3186_v17, 0.0 }
 0x493   :  { %v3319_v19 = vmax.f32 %v2869_v18, 0.0  ;;  %3703 = vst.msk [vmem:[%s8535_s3 + $0x7e8] sm:$0xff] %vm3449_vm3, %v3446_v22 }
 0x494   :  { %v2875_v20 = vpop.f32.mrf.mxu1  ;;  %v2539_v23 = vpop.f32.mrf.mxu2 }
 0x495   :  { %v2876_v21 = vadd.f32 %v2875_v20, %v2227_v1  ;;  %3576 = vst.msk [vmem:[%s8535_s3 + $0x3f0] sm:$0xff] %vm3449_vm3, %v3319_v19  ;;  %v2540_v26 = vadd.f32 %v8193_v49, %v2539_v23 }
 0x496   :  { %v2221_v31 = vpop.f32.mrf.mxu0 }
 0x497   :  { %v3322_v24 = vmax.f32 %v2876_v21, 0.0  ;;  %v2222_v0 = vadd.f32 %v8193_v49, %v2221_v31  ;;  %v3189_v28 = vadd.f32 %v3188_v6, %v2540_v26 }
 0x499   :  { %3579 = vst.msk [vmem:[%s8535_s3 + $0x408] sm:$0xff] %vm3449_vm3, %v3322_v24  ;;  %v2871_v29 = vadd.f32 %v2870_v58, %v2222_v0  ;;  %v3447_v30 = vmax.f32 %v3189_v28, 0.0 }
 0x49b   :  { %v3320_v7 = vmax.f32 %v2871_v29, 0.0  ;;  %3704 = vst.msk [vmem:[%s8535_s3 + $0x7f0] sm:$0xff] %vm3449_vm3, %v3447_v30 }
 0x49c   :  { %v2541_v54 = vpop.f32.mrf.mxu2 }
 0x49d   :  { %3577 = vst.msk [vmem:[%s8535_s3 + $0x3f8] sm:$0xff] %vm3449_vm3, %v3320_v7  ;;  %v2542_v60 = vadd.f32 %v8193_v49, %v2541_v54 }
 0x49f   :  { %v3191_v34 = vadd.f32 %v3190_v33, %v2542_v60 }
 0x4a1   :  { %v3448_v37 = vmax.f32 %v3191_v34, 0.0 }
 0x4a3   :  { %3705 = vst.msk [vmem:[%s8535_s3 + $0x7f8] sm:$0xff] %vm3449_vm3, %v3448_v37 }

// kernel: neg.7
= control target key start
LH: loop header
LB: loop body
LE: loop exit
PB: predicated region body
PF: predicated region fallthrough
CT: control target
= control target key end

     0   :  { %s24_s0 = inlined_call_operand.vmem [shape: f32[64], index: 0, kind: input, shape index: {}]   ;;  %s25_s1 = inlined_call_operand.vmem [shape: f32[64], index: 1, kind: output, shape index: {}]  }
   0x1   :  { %v2_v0 = vld [vmem:[%s24_s0] sm:$0x1] }
   0x2   :  { %v5_v1 = vxor.u32 2147483648, %v2_v0 }
   0x4   :  { %7 = vst [vmem:[%s25_s1] sm:$0x1] %v5_v1 }

// kernel: facebox_extractor_forward.28
= control target key start
LH: loop header
LB: loop body
LE: loop exit
PB: predicated region body
PF: predicated region fallthrough
CT: control target
= control target key end

     0   :  { %vm1091_vm0 = vcmask 392192   ;;  %s3340_s1 = inlined_call_operand.vmem [shape: bf16[1200,128], index: 1, kind: input, shape index: {}]   ;;  %s3341_s2 = inlined_call_operand.vmem [shape: f32[1,128], index: 2, kind: input, shape index: {}]   ;;  %s3342_s0 = inlined_call_operand.vmem [shape: bf16[128,1200], index: 0, kind: input, shape index: {}]   ;;  %s3343_s3 = inlined_call_operand.vmem [shape: f32[128,128], index: 3, kind: output, shape index: {}]  }
   0x1   :  { %v2357_v0 = vld [vmem:[%s3340_s1 + $0x38] sm:$0xff]  ;;  %v2356_v2 = vld [vmem:[%s3340_s1 + $0x30] sm:$0xff]  ;;  %v2355_v4 = vld [vmem:[%s3340_s1 + $0x28] sm:$0xff] }
   0x2   :  { %v2365_v1 = vld [vmem:[%s3340_s1 + $0x78] sm:$0xff]  ;;  %2425 = vmatpush.bf16.msra.mxu2 %v2357_v0  ;;  %v2364_v3 = vld [vmem:[%s3340_s1 + $0x70] sm:$0xff]  ;;  %1116 = vmatpush.bf16.msra.mxu0 %v2357_v0  ;;  %v2363_v5 = vld [vmem:[%s3340_s1 + $0x68] sm:$0xff] }
   0x3   :  { %2433 = vmatpush.bf16.msra.mxu3 %v2365_v1  ;;  %1165 = vmatpush.bf16.msra.mxu1 %v2365_v1  ;;  %v2354_v6 = vld [vmem:[%s3340_s1 + $0x20] sm:$0xff]  ;;  %v2353_v8 = vld [vmem:[%s3340_s1 + $0x18] sm:$0xff]  ;;  %v2352_v10 = vld [vmem:[%s3340_s1 + $0x10] sm:$0xff] }
   0x4   :  { %v2362_v7 = vld [vmem:[%s3340_s1 + $0x60] sm:$0xff]  ;;  %v2361_v9 = vld [vmem:[%s3340_s1 + $0x58] sm:$0xff]  ;;  %v2360_v11 = vld [vmem:[%s3340_s1 + $0x50] sm:$0xff] }
   0x5   :  { %v2351_v12 = vld [vmem:[%s3340_s1 + $0x8] sm:$0xff]  ;;  %v2350_v14 = vld [vmem:[%s3340_s1] sm:$0xff]  ;;  %v2373_v20 = vld [vmem:[%s3340_s1 + $0xb8] sm:$0xff] }
   0x6   :  { %2426 = vmatpush.bf16.msra.mxu2 %v2356_v2  ;;  %1117 = vmatpush.bf16.msra.mxu0 %v2356_v2  ;;  %v2359_v13 = vld [vmem:[%s3340_s1 + $0x48] sm:$0xff]  ;;  %v2358_v15 = vld [vmem:[%s3340_s1 + $0x40] sm:$0xff]  ;;  %v2381_v23 = vld [vmem:[%s3340_s1 + $0xf8] sm:$0xff] }
   0x7   :  { %2434 = vmatpush.bf16.msra.mxu3 %v2364_v3  ;;  %1166 = vmatpush.bf16.msra.mxu1 %v2364_v3  ;;  %v1804_v16 = vld [vmem:[%s3342_s0 + $0x140] sm:$0xf]  ;;  %v2315_v17 = vld [vmem:[%s3342_s0 + $0x164] sm:$0xf0]  ;;  %v2310_v18 = vld [vmem:[%s3342_s0 + $0x144] sm:$0xf] }
   0x8   :  { %v1806_v19 = vld [vmem:[%s3342_s0 + $0x168] sm:$0xf0]  ;;  %v1644_v21 = vld [vmem:[%s3342_s0] sm:$0xf]  ;;  %v2275_v22 = vld [vmem:[%s3342_s0 + $0x24] sm:$0xf0]  ;;  %v1805_v26 = vor.u32 %v2315_v17, %v1804_v16 }
   0x9   :  { %v2270_v24 = vld [vmem:[%s3342_s0 + $0x4] sm:$0xf]  ;;  %v1646_v25 = vld [vmem:[%s3342_s0 + $0x28] sm:$0xf0]  ;;  %v1809_v27 = vor.u32 %v2310_v18, %v1806_v19  ;;  %v1645_v28 = vor.u32 %v2275_v22, %v1644_v21  ;;  %v2397_v29 = vld [vmem:[%s3340_s1 + $0x178] sm:$0xff] }
   0xa   :  { %2427 = vmatpush.bf16.msra.mxu2 %v2355_v4  ;;  %1118 = vmatpush.bf16.msra.mxu0 %v2355_v4  ;;  %v1649_v30 = vor.u32 %v2270_v24, %v1646_v25  ;;  %v2372_v31 = vld [vmem:[%s3340_s1 + $0xb0] sm:$0xff]  ;;  %v2389_v33 = vld [vmem:[%s3340_s1 + $0x138] sm:$0xff]  ;;  %v2371_v35 = vld [vmem:[%s3340_s1 + $0xa8] sm:$0xff] }
   0xb   :  { %2435 = vmatpush.bf16.msra.mxu3 %v2363_v5  ;;  %1167 = vmatpush.bf16.msra.mxu1 %v2363_v5  ;;  %v2380_v32 = vld [vmem:[%s3340_s1 + $0xf0] sm:$0xff]  ;;  %v2379_v36 = vld [vmem:[%s3340_s1 + $0xe8] sm:$0xff]  ;;  %v2370_v39 = vld [vmem:[%s3340_s1 + $0xa0] sm:$0xff] }
   0xc   :  { %v2396_v34 = vld [vmem:[%s3340_s1 + $0x170] sm:$0xff]  ;;  %v2395_v38 = vld [vmem:[%s3340_s1 + $0x168] sm:$0xff]  ;;  %v2378_v40 = vld [vmem:[%s3340_s1 + $0xe0] sm:$0xff] }
   0xd   :  { %v2388_v37 = vld [vmem:[%s3340_s1 + $0x130] sm:$0xff]  ;;  %v2387_v41 = vld [vmem:[%s3340_s1 + $0x128] sm:$0xff]  ;;  %v2325_v43 = vld [vmem:[%s3342_s0 + $0x1b4] sm:$0xf0] }
   0xe   :  { %2428 = vmatpush.bf16.msra.mxu2 %v2354_v6  ;;  %1119 = vmatpush.bf16.msra.mxu0 %v2354_v6  ;;  %v1844_v42 = vld [vmem:[%s3342_s0 + $0x190] sm:$0xf]  ;;  %v2320_v44 = vld [vmem:[%s3342_s0 + $0x194] sm:$0xf]  ;;  %v1846_v45 = vld [vmem:[%s3342_s0 + $0x1b8] sm:$0xf0] }
   0xf   :  { %2436 = vmatpush.bf16.msra.mxu3 %v2362_v7  ;;  %1168 = vmatpush.bf16.msra.mxu1 %v2362_v7  ;;  %v1684_v46 = vld [vmem:[%s3342_s0 + $0x50] sm:$0xf]  ;;  %v2394_v47 = vld [vmem:[%s3340_s1 + $0x160] sm:$0xff]  ;;  %v2285_v48 = vld [vmem:[%s3342_s0 + $0x74] sm:$0xf0]  ;;  %v1845_v54 = vor.u32 %v2325_v43, %v1844_v42  ;;  %v1849_v55 = vor.u32 %v2320_v44, %v1846_v45 }
  0x10   :  { %v2280_v49 = vld [vmem:[%s3342_s0 + $0x54] sm:$0xf]  ;;  %v2369_v50 = vld [vmem:[%s3340_s1 + $0x98] sm:$0xff]  ;;  %v2386_v53 = vld [vmem:[%s3340_s1 + $0x120] sm:$0xff]  ;;  %v1685_v56 = vor.u32 %v2285_v48, %v1684_v46 }
  0x11   :  { %v1686_v51 = vld [vmem:[%s3342_s0 + $0x78] sm:$0xf0]  ;;  %v2368_v59 = vld [vmem:[%s3340_s1 + $0x90] sm:$0xff]  ;;  %v2367_v62 = vld [vmem:[%s3340_s1 + $0x88] sm:$0xff] }
  0x12   :  { %2429 = vmatpush.bf16.msra.mxu2 %v2353_v8  ;;  %1120 = vmatpush.bf16.msra.mxu0 %v2353_v8  ;;  %v2377_v52 = vld [vmem:[%s3340_s1 + $0xd8] sm:$0xff]  ;;  %v1689_v58 = vor.u32 %v2280_v49, %v1686_v51  ;;  %v2376_v60 = vld [vmem:[%s3340_s1 + $0xd0] sm:$0xff]  ;;  %v2375_v0 = vld [vmem:[%s3340_s1 + $0xc8] sm:$0xff] }
  0x13   :  { %2437 = vmatpush.bf16.msra.mxu3 %v2361_v9  ;;  %1169 = vmatpush.bf16.msra.mxu1 %v2361_v9  ;;  %v2393_v57 = vld [vmem:[%s3340_s1 + $0x158] sm:$0xff]  ;;  %v2392_v63 = vld [vmem:[%s3340_s1 + $0x150] sm:$0xff]  ;;  %v2391_v2 = vld [vmem:[%s3340_s1 + $0x148] sm:$0xff] }
  0x14   :  { %v2385_v61 = vld [vmem:[%s3340_s1 + $0x118] sm:$0xff]  ;;  %v2384_v1 = vld [vmem:[%s3340_s1 + $0x110] sm:$0xff]  ;;  %v2366_v3 = vld [vmem:[%s3340_s1 + $0x80] sm:$0xff] }
  0x15   :  { %v2374_v4 = vld [vmem:[%s3340_s1 + $0xc0] sm:$0xff]  ;;  %v2383_v5 = vld [vmem:[%s3340_s1 + $0x108] sm:$0xff]  ;;  %v2413_v21 = vld [vmem:[%s3340_s1 + $0x1f8] sm:$0xff] }
  0x16   :  { %2430 = vmatpush.bf16.msra.mxu2 %v2352_v10  ;;  %1121 = vmatpush.bf16.msra.mxu0 %v2352_v10  ;;  %v1884_v6 = vld [vmem:[%s3342_s0 + $0x1e0] sm:$0xf]  ;;  %v2335_v7 = vld [vmem:[%s3342_s0 + $0x204] sm:$0xf0]  ;;  %v2330_v8 = vld [vmem:[%s3342_s0 + $0x1e4] sm:$0xf] }
  0x17   :  { %2438 = vmatpush.bf16.msra.mxu3 %v2360_v11  ;;  %1170 = vmatpush.bf16.msra.mxu1 %v2360_v11  ;;  %v1886_v9 = vld [vmem:[%s3342_s0 + $0x208] sm:$0xf0]  ;;  %v1724_v10 = vld [vmem:[%s3342_s0 + $0xa0] sm:$0xf]  ;;  %v2295_v11 = vld [vmem:[%s3342_s0 + $0xc4] sm:$0xf0] }
  0x18   :  { %v1889_v16 = vor.u32 %v2330_v8, %v1886_v9  ;;  %v1725_v17 = vor.u32 %v2295_v11, %v1724_v10  ;;  %v2390_v19 = vld [vmem:[%s3340_s1 + $0x140] sm:$0xff]  ;;  %v2421_v22 = vld [vmem:[%s3340_s1 + $0x238] sm:$0xff]  ;;  %v1924_v24 = vld [vmem:[%s3342_s0 + $0x230] sm:$0xf] }
  0x19   :  { %v2345_v25 = vld [vmem:[%s3342_s0 + $0x254] sm:$0xf0]  ;;  %v1654_v42 = vld [vmem:[%s3342_s0 + $0x30] sm:$0xf0]  ;;  %v1660_v43 = vld [vmem:[%s3342_s0 + $0x10] sm:$0xf] }
  0x1a   :  { %2431 = vmatpush.bf16.msra.mxu2 %v2351_v12  ;;  %1122 = vmatpush.bf16.msra.mxu0 %v2351_v12  ;;  %v2290_v12 = vld [vmem:[%s3342_s0 + $0xa4] sm:$0xf]  ;;  %v2277_v44 = vld [vmem:[%s3342_s0 + $0x34] sm:$0xf0]  ;;  %v2272_v45 = vld [vmem:[%s3342_s0 + $0x14] sm:$0xf] }
  0x1b   :  { %2439 = vmatpush.bf16.msra.mxu3 %v2359_v13  ;;  %1171 = vmatpush.bf16.msra.mxu1 %v2359_v13  ;;  %v1726_v13 = vld [vmem:[%s3342_s0 + $0xc8] sm:$0xf0]  ;;  %v1662_v46 = vld [vmem:[%s3342_s0 + $0x38] sm:$0xf0]  ;;  %v1661_v49 = vor.u32 %v2277_v44, %v1660_v43  ;;  %v1734_v9 = vld [vmem:[%s3342_s0 + $0xd0] sm:$0xf0] }
  0x1c   :  { %v1729_v18 = vor.u32 %v2290_v12, %v1726_v13  ;;  %v2403_v51 = vld [vmem:[%s3340_s1 + $0x1a8] sm:$0xff]  ;;  %v1740_v10 = vld [vmem:[%s3342_s0 + $0xb0] sm:$0xf]  ;;  %v2297_v11 = vld [vmem:[%s3342_s0 + $0xd4] sm:$0xf0] }
  0x1d   :  { %v2291_v8 = vld [vmem:[%s3342_s0 + $0xac] sm:$0xf]  ;;  %v2292_v12 = vld [vmem:[%s3342_s0 + $0xb4] sm:$0xf]  ;;  %v1742_v13 = vld [vmem:[%s3342_s0 + $0xd8] sm:$0xf0] }
  0x1e   :  { %2432 = vmatpush.bf16.msra.mxu2 %v2350_v14  ;;  %1123 = vmatpush.bf16.msra.mxu0 %v2350_v14  ;;  %v2382_v14 = vld [vmem:[%s3340_s1 + $0x100] sm:$0xff]  ;;  %v1822_v43 = vld [vmem:[%s3342_s0 + $0x178] sm:$0xf0] }
  0x1f   :  { %2440 = vmatpush.bf16.msra.mxu3 %v2358_v15  ;;  %1172 = vmatpush.bf16.msra.mxu1 %v2358_v15  ;;  %v1885_v15 = vor.u32 %v2335_v7, %v1884_v6  ;;  %v1732_v6 = vld [vmem:[%s3342_s0 + $0xa8] sm:$0xf]  ;;  %v2296_v7 = vld [vmem:[%s3342_s0 + $0xcc] sm:$0xf0] }
  0x21   :  { %1144 = vmatmul.bf16.vlgmr.msra.gmra.mxu2 %v1805_v26  ;;  %1124 = vmatmul.bf16.vlgmr.msra.gmra.mxu0 %v1645_v28  ;;  %v2340_v26 = vld [vmem:[%s3342_s0 + $0x234] sm:$0xf]  ;;  %v1764_v28 = vld [vmem:[%s3342_s0 + $0xf0] sm:$0xf] }
  0x22   :  { %1214 = vmatpush.bf16.msrb.mxu2 %v2373_v20  ;;  %1193 = vmatmul.bf16.vlgmr.msra.gmra.mxu3 %v1809_v27  ;;  %v2405_v20 = vld [vmem:[%s3340_s1 + $0x1b8] sm:$0xff] }
  0x23   :  { %1263 = vmatpush.bf16.msrb.mxu3 %v2381_v23  ;;  %1361 = vmatpush.bf16.msrb.mxu1 %v2397_v29  ;;  %v2424_v23 = vld [vmem:[%s3340_s1 + $0x250] sm:$0xff]  ;;  %v1926_v27 = vld [vmem:[%s3342_s0 + $0x258] sm:$0xf0]  ;;  %v2305_v29 = vld [vmem:[%s3342_s0 + $0x114] sm:$0xf0] }
  0x24   :  { %1173 = vmatmul.bf16.vlgmr.msra.gmra.mxu1 %v1649_v30  ;;  %1312 = vmatpush.bf16.msrb.mxu0 %v2389_v33  ;;  %v2300_v30 = vld [vmem:[%s3342_s0 + $0xf4] sm:$0xf]  ;;  %v1929_v33 = vor.u32 %v2340_v26, %v1926_v27  ;;  %v2307_v26 = vld [vmem:[%s3342_s0 + $0x124] sm:$0xf0]  ;;  %v2302_v27 = vld [vmem:[%s3342_s0 + $0x104] sm:$0xf] }
  0x26   :  { %1215 = vmatpush.bf16.msrb.mxu2 %v2372_v31  ;;  %v1766_v31 = vld [vmem:[%s3342_s0 + $0x118] sm:$0xf0] }
  0x27   :  { %1264 = vmatpush.bf16.msrb.mxu3 %v2380_v32  ;;  %1362 = vmatpush.bf16.msrb.mxu1 %v2396_v34  ;;  %v1925_v32 = vor.u32 %v2345_v25, %v1924_v24  ;;  %v1765_v34 = vor.u32 %v2305_v29, %v1764_v28  ;;  %v2417_v24 = vld [vmem:[%s3340_s1 + $0x218] sm:$0xff]  ;;  %v1780_v25 = vld [vmem:[%s3342_s0 + $0x100] sm:$0xf]  ;;  %v1782_v28 = vld [vmem:[%s3342_s0 + $0x128] sm:$0xf0] }
  0x28   :  { %1313 = vmatpush.bf16.msrb.mxu0 %v2388_v37  ;;  %v2412_v37 = vld [vmem:[%s3340_s1 + $0x1f0] sm:$0xff] }
  0x2a   :  { %1216 = vmatpush.bf16.msrb.mxu2 %v2371_v35  ;;  %v1769_v35 = vor.u32 %v2300_v30, %v1766_v31  ;;  %v1781_v31 = vor.u32 %v2307_v26, %v1780_v25 }
  0x2b   :  { %1265 = vmatpush.bf16.msrb.mxu3 %v2379_v36  ;;  %1363 = vmatpush.bf16.msrb.mxu1 %v2395_v38  ;;  %v2404_v36 = vld [vmem:[%s3340_s1 + $0x1b0] sm:$0xff] }
  0x2c   :  { %1314 = vmatpush.bf16.msrb.mxu0 %v2387_v41  ;;  %v2420_v38 = vld [vmem:[%s3340_s1 + $0x230] sm:$0xff]  ;;  %v2271_v41 = vld [vmem:[%s3342_s0 + $0xc] sm:$0xf] }
  0x2d   :  { %v1657_v48 = vor.u32 %v2271_v41, %v1654_v42  ;;  %v2317_v41 = vld [vmem:[%s3342_s0 + $0x174] sm:$0xf0]  ;;  %v2312_v42 = vld [vmem:[%s3342_s0 + $0x154] sm:$0xf] }
  0x2e   :  { %1217 = vmatpush.bf16.msrb.mxu2 %v2370_v39  ;;  %v1652_v39 = vld [vmem:[%s3342_s0 + $0x8] sm:$0xf] }
  0x2f   :  { %1266 = vmatpush.bf16.msrb.mxu3 %v2378_v40  ;;  %1364 = vmatpush.bf16.msrb.mxu1 %v2394_v47  ;;  %v2276_v40 = vld [vmem:[%s3342_s0 + $0x2c] sm:$0xf0] }
  0x30   :  { %1315 = vmatpush.bf16.msrb.mxu0 %v2386_v53  ;;  %v1653_v47 = vor.u32 %v2276_v40, %v1652_v39  ;;  %v2419_v53 = vld [vmem:[%s3340_s1 + $0x228] sm:$0xff]  ;;  %v2416_v39 = vld [vmem:[%s3340_s1 + $0x210] sm:$0xff] }
  0x31   :  { %1149 = vmatmul.bf16.gmra.mxu2 %v1845_v54  ;;  %1129 = vmatmul.bf16.gmra.mxu0 %v1685_v56  ;;  %v1692_v54 = vld [vmem:[%s3342_s0 + $0x58] sm:$0xf]  ;;  %v2281_v56 = vld [vmem:[%s3342_s0 + $0x5c] sm:$0xf]  ;;  %v1820_v40 = vld [vmem:[%s3342_s0 + $0x150] sm:$0xf] }
  0x32   :  { %1218 = vmatpush.bf16.msrb.mxu2 %v2369_v50  ;;  %1198 = vmatmul.bf16.gmra.mxu3 %v1849_v55  ;;  %v1665_v50 = vor.u32 %v2272_v45, %v1662_v46  ;;  %v2286_v55 = vld [vmem:[%s3342_s0 + $0x7c] sm:$0xf0] }
  0x33   :  { %1267 = vmatpush.bf16.msrb.mxu3 %v2377_v52  ;;  %1365 = vmatpush.bf16.msrb.mxu1 %v2393_v57  ;;  %v2411_v52 = vld [vmem:[%s3340_s1 + $0x1e8] sm:$0xff]  ;;  %v1694_v57 = vld [vmem:[%s3342_s0 + $0x80] sm:$0xf0]  ;;  %v2885_v46 = vld [vmem:[%s3341_s2] ss:$0 sm:$0xff] }
  0x34   :  { %1178 = vmatmul.bf16.gmra.mxu1 %v1689_v58  ;;  %1316 = vmatpush.bf16.msrb.mxu0 %v2385_v61  ;;  %v1700_v58 = vld [vmem:[%s3342_s0 + $0x60] sm:$0xf]  ;;  %v1702_v61 = vld [vmem:[%s3342_s0 + $0x88] sm:$0xf0] }
  0x36   :  { %1219 = vmatpush.bf16.msrb.mxu2 %v2368_v59  ;;  %v2287_v59 = vld [vmem:[%s3342_s0 + $0x84] sm:$0xf0] }
  0x37   :  { %1268 = vmatpush.bf16.msrb.mxu3 %v2376_v60  ;;  %1366 = vmatpush.bf16.msrb.mxu1 %v2392_v63  ;;  %v2282_v60 = vld [vmem:[%s3342_s0 + $0x64] sm:$0xf]  ;;  %v1697_v63 = vor.u32 %v2281_v56, %v1694_v57 }
  0x38   :  { %1317 = vmatpush.bf16.msrb.mxu0 %v2384_v1  ;;  %v1705_v1 = vor.u32 %v2282_v60, %v1702_v61 }
  0x3a   :  { %1220 = vmatpush.bf16.msrb.mxu2 %v2367_v62  ;;  %v1693_v62 = vor.u32 %v2286_v55, %v1692_v54  ;;  %v2407_v54 = vld [vmem:[%s3340_s1 + $0x1c8] sm:$0xff]  ;;  %v2422_v55 = vld [vmem:[%s3340_s1 + $0x240] sm:$0xff] }
  0x3b   :  { %1269 = vmatpush.bf16.msrb.mxu3 %v2375_v0  ;;  %1367 = vmatpush.bf16.msrb.mxu1 %v2391_v2  ;;  %v1701_v0 = vor.u32 %v2287_v59, %v1700_v58  ;;  %v2402_v2 = vld [vmem:[%s3340_s1 + $0x1a0] sm:$0xff] }
  0x3c   :  { %1318 = vmatpush.bf16.msrb.mxu0 %v2383_v5  ;;  %v2418_v5 = vld [vmem:[%s3340_s1 + $0x220] sm:$0xff] }
  0x3e   :  { %1221 = vmatpush.bf16.msrb.mxu2 %v2366_v3  ;;  %v2410_v3 = vld [vmem:[%s3340_s1 + $0x1e0] sm:$0xff] }
  0x3f   :  { %1270 = vmatpush.bf16.msrb.mxu3 %v2374_v4  ;;  %1368 = vmatpush.bf16.msrb.mxu1 %v2390_v19  ;;  %v2423_v4 = vld [vmem:[%s3340_s1 + $0x248] sm:$0xff]  ;;  %v2409_v19 = vld [vmem:[%s3340_s1 + $0x1d8] sm:$0xff] }
  0x40   :  { %1319 = vmatpush.bf16.msrb.mxu0 %v2382_v14  ;;  %v1733_v14 = vor.u32 %v2296_v7, %v1732_v6  ;;  %v2327_v6 = vld [vmem:[%s3342_s0 + $0x1c4] sm:$0xf0] }
  0x41   :  { %1154 = vmatmul.bf16.gmra.mxu2 %v1885_v15  ;;  %1134 = vmatmul.bf16.gmra.mxu0 %v1725_v17  ;;  %v1737_v15 = vor.u32 %v2291_v8, %v1734_v9  ;;  %v1745_v17 = vor.u32 %v2292_v12, %v1742_v13  ;;  %v2322_v9 = vld [vmem:[%s3342_s0 + $0x1a4] sm:$0xf] }
  0x42   :  { %1203 = vmatmul.bf16.gmra.mxu3 %v1889_v16  ;;  %1410 = vmatpush.bf16.msra.mxu2 %v2405_v20  ;;  %v1741_v16 = vor.u32 %v2297_v11, %v1740_v10  ;;  %v1772_v20 = vld [vmem:[%s3342_s0 + $0xf8] sm:$0xf]  ;;  %v1862_v10 = vld [vmem:[%s3342_s0 + $0x1c8] sm:$0xf0] }
  0x43   :  { %1459 = vmatpush.bf16.msra.mxu3 %v2413_v21  ;;  %1562 = vmatpush.bf16.msra.mxu1 %v2424_v23  ;;  %v2306_v21 = vld [vmem:[%s3342_s0 + $0x11c] sm:$0xf0]  ;;  %v1774_v23 = vld [vmem:[%s3342_s0 + $0x120] sm:$0xf0] }
  0x44   :  { %1183 = vmatmul.bf16.gmra.mxu1 %v1729_v18  ;;  %1508 = vmatpush.bf16.msra.mxu0 %v2421_v22  ;;  %v2401_v18 = vld [vmem:[%s3340_s1 + $0x198] sm:$0xff]  ;;  %v1773_v29 = vor.u32 %v2306_v21, %v1772_v20  ;;  %v2398_v20 = vld [vmem:[%s3340_s1 + $0x180] sm:$0xff] }
  0x45   :  { %v2301_v22 = vld [vmem:[%s3342_s0 + $0xfc] sm:$0xf] }
  0x46   :  { %1411 = vmatpush.bf16.msra.mxu2 %v2404_v36  ;;  %v1777_v30 = vor.u32 %v2301_v22, %v1774_v23  ;;  %v2316_v36 = vld [vmem:[%s3342_s0 + $0x16c] sm:$0xf0]  ;;  %v2406_v22 = vld [vmem:[%s3340_s1 + $0x1c0] sm:$0xff] }
  0x47   :  { %1460 = vmatpush.bf16.msra.mxu3 %v2412_v37  ;;  %1563 = vmatpush.bf16.msra.mxu1 %v2423_v4  ;;  %v2311_v37 = vld [vmem:[%s3342_s0 + $0x14c] sm:$0xf] }
  0x48   :  { %1509 = vmatpush.bf16.msra.mxu0 %v2420_v38  ;;  %v1814_v38 = vld [vmem:[%s3342_s0 + $0x170] sm:$0xf0]  ;;  %v2415_v4 = vld [vmem:[%s3340_s1 + $0x208] sm:$0xff] }
  0x49   :  { %v1817_v45 = vor.u32 %v2311_v37, %v1814_v38  ;;  %v2337_v37 = vld [vmem:[%s3342_s0 + $0x214] sm:$0xf0] }
  0x4a   :  { %1412 = vmatpush.bf16.msra.mxu2 %v2403_v51 }
  0x4b   :  { %1461 = vmatpush.bf16.msra.mxu3 %v2411_v52  ;;  %v2399_v52 = vld [vmem:[%s3340_s1 + $0x188] sm:$0xff]  ;;  %1564 = vmatpush.bf16.msra.mxu1 %v2422_v55 }
  0x4c   :  { %1510 = vmatpush.bf16.msra.mxu0 %v2419_v53 }
  0x4e   :  { %1413 = vmatpush.bf16.msra.mxu2 %v2402_v2  ;;  %v2321_v2 = vld [vmem:[%s3342_s0 + $0x19c] sm:$0xf] }
  0x4f   :  { %1462 = vmatpush.bf16.msra.mxu3 %v2410_v3  ;;  %v1854_v3 = vld [vmem:[%s3342_s0 + $0x1c0] sm:$0xf0] }
  0x50   :  { %1511 = vmatpush.bf16.msra.mxu0 %v2418_v5  ;;  %v1860_v5 = vld [vmem:[%s3342_s0 + $0x1a0] sm:$0xf]  ;;  %v1857_v13 = vor.u32 %v2321_v2, %v1854_v3  ;;  %v2341_v2 = vld [vmem:[%s3342_s0 + $0x23c] sm:$0xf]  ;;  %v1934_v3 = vld [vmem:[%s3342_s0 + $0x260] sm:$0xf0] }
  0x51   :  { %1159 = vmatmul.bf16.gmra.mxu2 %v1925_v32  ;;  %1139 = vmatmul.bf16.gmra.mxu0 %v1765_v34  ;;  %v1785_v32 = vor.u32 %v2302_v27, %v1782_v28  ;;  %v2408_v34 = vld [vmem:[%s3340_s1 + $0x1d0] sm:$0xff] }
  0x52   :  { %1208 = vmatmul.bf16.gmra.mxu3 %v1929_v33  ;;  %1414 = vmatpush.bf16.msra.mxu2 %v2401_v18  ;;  %v2400_v33 = vld [vmem:[%s3340_s1 + $0x190] sm:$0xff] }
  0x53   :  { %1463 = vmatpush.bf16.msra.mxu3 %v2409_v19 }
  0x54   :  { %1188 = vmatmul.bf16.gmra.mxu1 %v1769_v35  ;;  %1512 = vmatpush.bf16.msra.mxu0 %v2417_v24  ;;  %v1812_v35 = vld [vmem:[%s3342_s0 + $0x148] sm:$0xf] }
  0x55   :  { %v1813_v44 = vor.u32 %v2316_v36, %v1812_v35  ;;  %v2414_v35 = vld [vmem:[%s3340_s1 + $0x200] sm:$0xff]  ;;  %v1900_v36 = vld [vmem:[%s3342_s0 + $0x1f0] sm:$0xf] }
  0x56   :  { %1415 = vmatpush.bf16.msra.mxu2 %v2400_v33  ;;  %v2331_v33 = vld [vmem:[%s3342_s0 + $0x1ec] sm:$0xf] }
  0x57   :  { %1464 = vmatpush.bf16.msra.mxu3 %v2408_v34  ;;  %v1894_v34 = vld [vmem:[%s3342_s0 + $0x210] sm:$0xf0] }
  0x58   :  { %1513 = vmatpush.bf16.msra.mxu0 %v2416_v39 }
  0x5a   :  { %1416 = vmatpush.bf16.msra.mxu2 %v2399_v52 }
  0x5b   :  { %1465 = vmatpush.bf16.msra.mxu3 %v2407_v54 }
  0x5c   :  { %1514 = vmatpush.bf16.msra.mxu0 %v2415_v4  ;;  %v1940_v4 = vld [vmem:[%s3342_s0 + $0x240] sm:$0xf] }
  0x5e   :  { %1417 = vmatpush.bf16.msra.mxu2 %v2398_v20 }
  0x5f   :  { %1466 = vmatpush.bf16.msra.mxu3 %v2406_v22 }
  0x60   :  { %1515 = vmatpush.bf16.msra.mxu0 %v2414_v35  ;;  %v1670_v35 = vld [vmem:[%s3342_s0 + $0x40] sm:$0xf0] }
  0x61   :  { %1222 = vmatmul.bf16.vlgmr.msrb.gmra.mxu2 %v1653_v47  ;;  %1320 = vmatmul.bf16.vlgmr.msrb.gmra.mxu0 %v1661_v49  ;;  %v1821_v47 = vor.u32 %v2317_v41, %v1820_v40  ;;  %v1825_v49 = vor.u32 %v2312_v42, %v1822_v43  ;;  %v2332_v40 = vld [vmem:[%s3342_s0 + $0x1f4] sm:$0xf]  ;;  %v1902_v41 = vld [vmem:[%s3342_s0 + $0x218] sm:$0xf0] }
  0x62   :  { %1271 = vmatmul.bf16.vlgmr.msrb.gmra.mxu3 %v1657_v48 }
  0x64   :  { %1369 = vmatmul.bf16.vlgmr.msrb.gmra.mxu1 %v1665_v50 }
  0x71   :  { %1227 = vmatmul.bf16.gmra.mxu2 %v1693_v62  ;;  %1325 = vmatmul.bf16.gmra.mxu0 %v1701_v0  ;;  %v2326_v0 = vld [vmem:[%s3342_s0 + $0x1bc] sm:$0xf0] }
  0x72   :  { %1276 = vmatmul.bf16.gmra.mxu3 %v1697_v63  ;;  %v1852_v63 = vld [vmem:[%s3342_s0 + $0x198] sm:$0xf] }
  0x73   :  { %v1853_v12 = vor.u32 %v2326_v0, %v1852_v63  ;;  %v2346_v0 = vld [vmem:[%s3342_s0 + $0x25c] sm:$0xf0] }
  0x74   :  { %1374 = vmatmul.bf16.gmra.mxu1 %v1705_v1 }
  0x81   :  { %1232 = vmatmul.bf16.gmra.mxu2 %v1733_v14  ;;  %1330 = vmatmul.bf16.gmra.mxu0 %v1741_v16  ;;  %v1861_v14 = vor.u32 %v2327_v6, %v1860_v5  ;;  %v2347_v5 = vld [vmem:[%s3342_s0 + $0x264] sm:$0xf0] }
  0x82   :  { %1281 = vmatmul.bf16.gmra.mxu3 %v1737_v15 }
  0x84   :  { %1379 = vmatmul.bf16.gmra.mxu1 %v1745_v17  ;;  %v1865_v17 = vor.u32 %v2322_v9, %v1862_v10  ;;  %v1942_v9 = vld [vmem:[%s3342_s0 + $0x268] sm:$0xf0] }
  0x91   :  { %1237 = vmatmul.bf16.gmra.mxu2 %v1773_v29  ;;  %1335 = vmatmul.bf16.gmra.mxu0 %v1781_v31  ;;  %v2336_v31 = vld [vmem:[%s3342_s0 + $0x20c] sm:$0xf0] }
  0x92   :  { %1286 = vmatmul.bf16.gmra.mxu3 %v1777_v30  ;;  %v1892_v30 = vld [vmem:[%s3342_s0 + $0x1e8] sm:$0xf] }
  0x93   :  { %v1893_v43 = vor.u32 %v2336_v31, %v1892_v30  ;;  %v1668_v30 = vld [vmem:[%s3342_s0 + $0x18] sm:$0xf] }
  0x94   :  { %1384 = vmatmul.bf16.gmra.mxu1 %v1785_v32 }
  0x9e   :  { %v1125_v48 = vpop.f32.mrf.mxu0 }
  0x9f   :  { %v1126_v50 = vadd.f32 %v2885_v46, %v1125_v48 }
  0xa1   :  { %v1174_v51 = vpop.f32.mrf.mxu1  ;;  %1242 = vmatmul.bf16.gmra.mxu2 %v1813_v44  ;;  %1340 = vmatmul.bf16.gmra.mxu0 %v1821_v47  ;;  %v1897_v44 = vor.u32 %v2331_v33, %v1894_v34  ;;  %v2278_v33 = vld [vmem:[%s3342_s0 + $0x3c] sm:$0xf0]  ;;  %v2273_v34 = vld [vmem:[%s3342_s0 + $0x1c] sm:$0xf] }
  0xa2   :  { %1291 = vmatmul.bf16.gmra.mxu3 %v1817_v45  ;;  %v2891_v53 = vadd.f32 %v1174_v51, %v1126_v50  ;;  %v1901_v45 = vor.u32 %v2337_v37, %v1900_v36  ;;  %v1676_v36 = vld [vmem:[%s3342_s0 + $0x20] sm:$0xf]  ;;  %v2279_v37 = vld [vmem:[%s3342_s0 + $0x44] sm:$0xf0] }
  0xa4   :  { %1389 = vmatmul.bf16.gmra.mxu1 %v1825_v49  ;;  %v1145_v56 = vpop.f32.mrf.mxu2  ;;  %v1905_v49 = vor.u32 %v2332_v40, %v1902_v41  ;;  %v2274_v40 = vld [vmem:[%s3342_s0 + $0x24] sm:$0xf]  ;;  %v1678_v41 = vld [vmem:[%s3342_s0 + $0x48] sm:$0xf0] }
  0xa5   :  { %v1194_v57 = vpop.f32.mrf.mxu3  ;;  %v1146_v58 = vadd.f32 %v2885_v46, %v1145_v56 }
  0xa6   :  { %v1127_v60 = vpop.f32.mrf.mxu0 }
  0xa7   :  { %v2900_v59 = vadd.f32 %v1194_v57, %v1146_v58  ;;  %v1128_v61 = vadd.f32 %v2885_v46, %v1127_v60 }
  0xa9   :  { %v1176_v62 = vpop.f32.mrf.mxu1 }
  0xaa   :  { %v2909_v1 = vadd.f32 %v1176_v62, %v1128_v61  ;;  %v1932_v62 = vld [vmem:[%s3342_s0 + $0x238] sm:$0xf] }
  0xac   :  { %v1147_v7 = vpop.f32.mrf.mxu2 }
  0xad   :  { %v1196_v8 = vpop.f32.mrf.mxu3  ;;  %v1148_v11 = vadd.f32 %v2885_v46, %v1147_v7 }
  0xae   :  { %v1130_v16 = vpop.f32.mrf.mxu0 }
  0xaf   :  { %v2933_v15 = vadd.f32 %v1196_v8, %v1148_v11  ;;  %v1131_v18 = vadd.f32 %v2885_v46, %v1130_v16  ;;  %v2342_v8 = vld [vmem:[%s3342_s0 + $0x244] sm:$0xf]  ;;  %v1933_v11 = vor.u32 %v2346_v0, %v1932_v62  ;;  %v1708_v62 = vld [vmem:[%s3342_s0 + $0x68] sm:$0xf]  ;;  %v2288_v0 = vld [vmem:[%s3342_s0 + $0x8c] sm:$0xf0] }
  0xb1   :  { %v1179_v19 = vpop.f32.mrf.mxu1  ;;  %1247 = vmatmul.bf16.gmra.mxu2 %v1853_v12  ;;  %1345 = vmatmul.bf16.gmra.mxu0 %v1861_v14  ;;  %v1937_v12 = vor.u32 %v2341_v2, %v1934_v3  ;;  %v2283_v2 = vld [vmem:[%s3342_s0 + $0x6c] sm:$0xf]  ;;  %v1716_v3 = vld [vmem:[%s3342_s0 + $0x70] sm:$0xf] }
  0xb2   :  { %1296 = vmatmul.bf16.gmra.mxu3 %v1857_v13  ;;  %v2939_v21 = vadd.f32 %v1179_v19, %v1131_v18  ;;  %v1941_v13 = vor.u32 %v2347_v5, %v1940_v4  ;;  %v2289_v4 = vld [vmem:[%s3342_s0 + $0x94] sm:$0xf0] }
  0xb4   :  { %1394 = vmatmul.bf16.gmra.mxu1 %v1865_v17  ;;  %v1150_v23 = vpop.f32.mrf.mxu2  ;;  %v1945_v17 = vor.u32 %v2342_v8, %v1942_v9  ;;  %v2284_v8 = vld [vmem:[%s3342_s0 + $0x74] sm:$0xf]  ;;  %v1718_v9 = vld [vmem:[%s3342_s0 + $0x98] sm:$0xf0] }
  0xb5   :  { %v1199_v24 = vpop.f32.mrf.mxu3  ;;  %v1151_v25 = vadd.f32 %v2885_v46, %v1150_v23 }
  0xb6   :  { %v1132_v27 = vpop.f32.mrf.mxu0 }
  0xb7   :  { %v2945_v26 = vadd.f32 %v1199_v24, %v1151_v25  ;;  %v1133_v28 = vadd.f32 %v2885_v46, %v1132_v27 }
  0xb9   :  { %v1181_v29 = vpop.f32.mrf.mxu1 }
  0xba   :  { %v2954_v32 = vadd.f32 %v1181_v29, %v1133_v28 }
  0xbc   :  { %v1152_v38 = vpop.f32.mrf.mxu2 }
  0xbd   :  { %v1201_v39 = vpop.f32.mrf.mxu3  ;;  %v1153_v42 = vadd.f32 %v2885_v46, %v1152_v38 }
  0xbe   :  { %v1135_v48 = vpop.f32.mrf.mxu0 }
  0xbf   :  { %v2978_v47 = vadd.f32 %v1201_v39, %v1153_v42  ;;  %v1136_v50 = vadd.f32 %v2885_v46, %v1135_v48 }
  0xc1   :  { %v1184_v51 = vpop.f32.mrf.mxu1  ;;  %1252 = vmatmul.bf16.gmra.mxu2 %v1893_v43  ;;  %1350 = vmatmul.bf16.gmra.mxu0 %v1901_v45  ;;  %v1669_v43 = vor.u32 %v2278_v33, %v1668_v30  ;;  %v1677_v45 = vor.u32 %v2279_v37, %v1676_v36  ;;  %v2293_v36 = vld [vmem:[%s3342_s0 + $0xbc] sm:$0xf]  ;;  %v1756_v37 = vld [vmem:[%s3342_s0 + $0xc0] sm:$0xf] }
  0xc2   :  { %1301 = vmatmul.bf16.gmra.mxu3 %v1897_v44  ;;  %v2981_v52 = vadd.f32 %v1184_v51, %v1136_v50  ;;  %v1673_v44 = vor.u32 %v2273_v34, %v1670_v35  ;;  %v1681_v50 = vor.u32 %v2274_v40, %v1678_v41  ;;  %v1748_v34 = vld [vmem:[%s3342_s0 + $0xb8] sm:$0xf]  ;;  %v2298_v35 = vld [vmem:[%s3342_s0 + $0xdc] sm:$0xf0] }
  0xc4   :  { %1399 = vmatmul.bf16.gmra.mxu1 %v1905_v49  ;;  %v1155_v54 = vpop.f32.mrf.mxu2 }
  0xc5   :  { %v1204_v55 = vpop.f32.mrf.mxu3  ;;  %v1156_v56 = vadd.f32 %v2885_v46, %v1155_v54 }
  0xc6   :  { %v1137_v58 = vpop.f32.mrf.mxu0 }
  0xc7   :  { %v2984_v57 = vadd.f32 %v1204_v55, %v1156_v56  ;;  %v1138_v60 = vadd.f32 %v2885_v46, %v1137_v58 }
  0xc9   :  { %v1186_v61 = vpop.f32.mrf.mxu1 }
  0xca   :  { %v2990_v63 = vadd.f32 %v1186_v61, %v1138_v60 }
  0xcc   :  { %v1157_v6 = vpop.f32.mrf.mxu2 }
  0xcd   :  { %v1206_v7 = vpop.f32.mrf.mxu3  ;;  %v1158_v10 = vadd.f32 %v2885_v46, %v1157_v6 }
  0xce   :  { %v1140_v16 = vpop.f32.mrf.mxu0 }
  0xcf   :  { %v3014_v14 = vadd.f32 %v1206_v7, %v1158_v10  ;;  %v1141_v18 = vadd.f32 %v2885_v46, %v1140_v16 }
  0xd1   :  { %v1189_v19 = vpop.f32.mrf.mxu1  ;;  %1257 = vmatmul.bf16.gmra.mxu2 %v1933_v11  ;;  %1355 = vmatmul.bf16.gmra.mxu0 %v1941_v13  ;;  %v1709_v11 = vor.u32 %v2288_v0, %v1708_v62  ;;  %v1717_v13 = vor.u32 %v2289_v4, %v1716_v3  ;;  %v1788_v3 = vld [vmem:[%s3342_s0 + $0x108] sm:$0xf]  ;;  %v2308_v4 = vld [vmem:[%s3342_s0 + $0x12c] sm:$0xf0] }
  0xd2   :  { %1306 = vmatmul.bf16.gmra.mxu3 %v1937_v12  ;;  %v3017_v20 = vadd.f32 %v1189_v19, %v1141_v18  ;;  %v1721_v18 = vor.u32 %v2284_v8, %v1718_v9  ;;  %v2309_v8 = vld [vmem:[%s3342_s0 + $0x134] sm:$0xf0] }
  0xd4   :  { %1404 = vmatmul.bf16.gmra.mxu1 %v1945_v17  ;;  %v1160_v22 = vpop.f32.mrf.mxu2 }
  0xd5   :  { %v1209_v23 = vpop.f32.mrf.mxu3  ;;  %v1161_v24 = vadd.f32 %v2885_v46, %v1160_v22 }
  0xd6   :  { %v1142_v27 = vpop.f32.mrf.mxu0 }
  0xd7   :  { %v3020_v25 = vadd.f32 %v1209_v23, %v1161_v24  ;;  %v1143_v28 = vadd.f32 %v2885_v46, %v1142_v27 }
  0xd9   :  { %v1191_v29 = vpop.f32.mrf.mxu1 }
  0xda   :  { %v3026_v31 = vadd.f32 %v1191_v29, %v1143_v28 }
  0xdc   :  { %v1162_v38 = vpop.f32.mrf.mxu2 }
  0xdd   :  { %v1211_v39 = vpop.f32.mrf.mxu3  ;;  %v1163_v42 = vadd.f32 %v2885_v46, %v1162_v38  ;;  %v2299_v38 = vld [vmem:[%s3342_s0 + $0xe4] sm:$0xf0] }
  0xde   :  { %v1321_v49 = vpop.f32.mrf.mxu0 }
  0xdf   :  { %v3050_v48 = vadd.f32 %v1211_v39, %v1163_v42  ;;  %v2294_v42 = vld [vmem:[%s3342_s0 + $0xc4] sm:$0xf] }
  0xe1   :  { %v1370_v51 = vpop.f32.mrf.mxu1  ;;  %1418 = vmatmul.bf16.vlgmr.msra.gmra.mxu2 %v1669_v43  ;;  %1516 = vmatmul.bf16.vlgmr.msra.gmra.mxu0 %v1677_v45  ;;  %v1758_v43 = vld [vmem:[%s3342_s0 + $0xe8] sm:$0xf0]  ;;  %v1749_v45 = vor.u32 %v2298_v35, %v1748_v34 }
  0xe2   :  { %1467 = vmatmul.bf16.vlgmr.msra.gmra.mxu3 %v1673_v44 }
  0xe4   :  { %2262 = vmatmul.msk.bf16.vlgmr.msra.gmra.mxu1 %vm1091_vm0, %v1681_v50  ;;  %v1223_v54 = vpop.f32.mrf.mxu2  ;;  %v1757_v50 = vor.u32 %v2299_v38, %v1756_v37  ;;  %v1828_v37 = vld [vmem:[%s3342_s0 + $0x158] sm:$0xf]  ;;  %v2318_v38 = vld [vmem:[%s3342_s0 + $0x17c] sm:$0xf0] }
  0xe5   :  { %v1272_v55 = vpop.f32.mrf.mxu3  ;;  %v1224_v56 = vadd.f32 %v1223_v54, %v2891_v53  ;;  %v1710_v53 = vld [vmem:[%s3342_s0 + $0x90] sm:$0xf0] }
  0xe6   :  { %v1323_v46 = vpop.f32.mrf.mxu0  ;;  %v1713_v12 = vor.u32 %v2283_v2, %v1710_v53 }
  0xe7   :  { %v1273_v58 = vadd.f32 %v1272_v55, %v1224_v56  ;;  %v1761_v55 = vor.u32 %v2294_v42, %v1758_v43  ;;  %v2319_v42 = vld [vmem:[%s3342_s0 + $0x184] sm:$0xf0] }
  0xe9   :  { %v1372_v60 = vpop.f32.mrf.mxu1  ;;  %v1322_v61 = vadd.f32 %v1321_v49, %v1273_v58 }
  0xeb   :  { %v3072_v5 = vadd.f32 %v1370_v51, %v1322_v61 }
  0xec   :  { %v1225_v6 = vpop.f32.mrf.mxu2 }
  0xed   :  { %v1274_v7 = vpop.f32.mrf.mxu3  ;;  %v1226_v10 = vadd.f32 %v1225_v6, %v2909_v1  ;;  %v2303_v6 = vld [vmem:[%s3342_s0 + $0x10c] sm:$0xf] }
  0xee   :  { %v1326_v17 = vpop.f32.mrf.mxu0 }
  0xef   :  { %v1275_v16 = vadd.f32 %v1274_v7, %v1226_v10  ;;  %v1796_v7 = vld [vmem:[%s3342_s0 + $0x110] sm:$0xf] }
  0xf1   :  { %v1375_v19 = vpop.f32.mrf.mxu1  ;;  %v1324_v22 = vadd.f32 %v1323_v46, %v1275_v16  ;;  %1423 = vmatmul.bf16.gmra.mxu2 %v1709_v11  ;;  %1521 = vmatmul.bf16.gmra.mxu0 %v1717_v13  ;;  %v1798_v13 = vld [vmem:[%s3342_s0 + $0x138] sm:$0xf0] }
  0xf2   :  { %1472 = vmatmul.bf16.gmra.mxu3 %v1713_v12  ;;  %v2304_v12 = vld [vmem:[%s3342_s0 + $0x114] sm:$0xf] }
  0xf3   :  { %v3082_v23 = vadd.f32 %v1372_v60, %v1324_v22 }
  0xf4   :  { %2263 = vmatmul.msk.bf16.gmra.mxu1 %vm1091_vm0, %v1721_v18  ;;  %v1228_v24 = vpop.f32.mrf.mxu2 }
  0xf5   :  { %v1277_v27 = vpop.f32.mrf.mxu3  ;;  %v1229_v28 = vadd.f32 %v1228_v24, %v2939_v21  ;;  %v1750_v21 = vld [vmem:[%s3342_s0 + $0xe0] sm:$0xf0] }
  0xf6   :  { %v1328_v29 = vpop.f32.mrf.mxu0  ;;  %v1753_v49 = vor.u32 %v2293_v36, %v1750_v21 }
  0xf7   :  { %v1278_v1 = vadd.f32 %v1277_v27, %v1229_v28  ;;  %v1801_v27 = vor.u32 %v2304_v12, %v1798_v13  ;;  %v2329_v12 = vld [vmem:[%s3342_s0 + $0x1d4] sm:$0xf0] }
  0xf9   :  { %v1377_v30 = vpop.f32.mrf.mxu1  ;;  %v1327_v33 = vadd.f32 %v1326_v17, %v1278_v1  ;;  %v1789_v17 = vor.u32 %v2308_v4, %v1788_v3 }
  0xfb   :  { %v3103_v39 = vadd.f32 %v1375_v19, %v1327_v33  ;;  %v1797_v19 = vor.u32 %v2309_v8, %v1796_v7  ;;  %v1868_v7 = vld [vmem:[%s3342_s0 + $0x1a8] sm:$0xf]  ;;  %v2328_v8 = vld [vmem:[%s3342_s0 + $0x1cc] sm:$0xf0] }
  0xfc   :  { %v1230_v40 = vpop.f32.mrf.mxu2 }
  0xfd   :  { %v1279_v41 = vpop.f32.mrf.mxu3  ;;  %v1231_v44 = vadd.f32 %v1230_v40, %v2954_v32  ;;  %v2313_v40 = vld [vmem:[%s3342_s0 + $0x15c] sm:$0xf] }
  0xfe   :  { %v1331_v54 = vpop.f32.mrf.mxu0 }
  0xff   :  { %v1280_v51 = vadd.f32 %v1279_v41, %v1231_v44  ;;  %v1836_v41 = vld [vmem:[%s3342_s0 + $0x160] sm:$0xf] }
 0x101   :  { %v1380_v56 = vpop.f32.mrf.mxu1  ;;  %v1329_v58 = vadd.f32 %v1328_v29, %v1280_v51  ;;  %1428 = vmatmul.bf16.gmra.mxu2 %v1749_v45  ;;  %1526 = vmatmul.bf16.gmra.mxu0 %v1757_v50  ;;  %v1838_v50 = vld [vmem:[%s3342_s0 + $0x188] sm:$0xf0] }
 0x102   :  { %1477 = vmatmul.bf16.gmra.mxu3 %v1753_v49  ;;  %v2314_v49 = vld [vmem:[%s3342_s0 + $0x164] sm:$0xf] }
 0x103   :  { %v3113_v46 = vadd.f32 %v1377_v30, %v1329_v58 }
 0x104   :  { %2264 = vmatmul.msk.bf16.gmra.mxu1 %vm1091_vm0, %v1761_v55  ;;  %v1233_v60 = vpop.f32.mrf.mxu2 }
 0x105   :  { %v1282_v61 = vpop.f32.mrf.mxu3  ;;  %v1234_v62 = vadd.f32 %v1233_v60, %v2981_v52  ;;  %v1790_v52 = vld [vmem:[%s3342_s0 + $0x130] sm:$0xf0] }
 0x106   :  { %v1333_v0 = vpop.f32.mrf.mxu0  ;;  %v1793_v18 = vor.u32 %v2303_v6, %v1790_v52 }
 0x107   :  { %v1283_v32 = vadd.f32 %v1282_v61, %v1234_v62  ;;  %v1841_v61 = vor.u32 %v2314_v49, %v1838_v50  ;;  %v2339_v49 = vld [vmem:[%s3342_s0 + $0x224] sm:$0xf0] }
 0x109   :  { %v1382_v2 = vpop.f32.mrf.mxu1  ;;  %v1332_v53 = vadd.f32 %v1331_v54, %v1283_v32  ;;  %v1829_v54 = vor.u32 %v2318_v38, %v1828_v37 }
 0x10b   :  { %v3134_v9 = vadd.f32 %v1380_v56, %v1332_v53  ;;  %v1837_v56 = vor.u32 %v2319_v42, %v1836_v41  ;;  %v1908_v41 = vld [vmem:[%s3342_s0 + $0x1f8] sm:$0xf]  ;;  %v2338_v42 = vld [vmem:[%s3342_s0 + $0x21c] sm:$0xf0] }
 0x10c   :  { %v1235_v10 = vpop.f32.mrf.mxu2 }
 0x10d   :  { %v1284_v11 = vpop.f32.mrf.mxu3  ;;  %v1236_v16 = vadd.f32 %v1235_v10, %v2990_v63  ;;  %v2323_v10 = vld [vmem:[%s3342_s0 + $0x1ac] sm:$0xf] }
 0x10e   :  { %v1336_v24 = vpop.f32.mrf.mxu0 }
 0x10f   :  { %v1285_v22 = vadd.f32 %v1284_v11, %v1236_v16  ;;  %v1876_v11 = vld [vmem:[%s3342_s0 + $0x1b0] sm:$0xf] }
 0x111   :  { %v1385_v28 = vpop.f32.mrf.mxu1  ;;  %v1334_v1 = vadd.f32 %v1333_v0, %v1285_v22  ;;  %1433 = vmatmul.bf16.gmra.mxu2 %v1789_v17  ;;  %1531 = vmatmul.bf16.gmra.mxu0 %v1797_v19  ;;  %v1878_v19 = vld [vmem:[%s3342_s0 + $0x1d8] sm:$0xf0] }
 0x112   :  { %1482 = vmatmul.bf16.gmra.mxu3 %v1793_v18  ;;  %v2324_v18 = vld [vmem:[%s3342_s0 + $0x1b4] sm:$0xf] }
 0x113   :  { %v3144_v29 = vadd.f32 %v1382_v2, %v1334_v1 }
 0x114   :  { %2265 = vmatmul.msk.bf16.gmra.mxu1 %vm1091_vm0, %v1801_v27  ;;  %v1238_v30 = vpop.f32.mrf.mxu2 }
 0x115   :  { %v1287_v33 = vpop.f32.mrf.mxu3  ;;  %v1239_v34 = vadd.f32 %v1238_v30, %v3017_v20  ;;  %v1830_v20 = vld [vmem:[%s3342_s0 + $0x180] sm:$0xf0] }
 0x116   :  { %v1338_v35 = vpop.f32.mrf.mxu0  ;;  %v1833_v55 = vor.u32 %v2313_v40, %v1830_v20 }
 0x117   :  { %v1288_v63 = vadd.f32 %v1287_v33, %v1239_v34  ;;  %v1881_v33 = vor.u32 %v2324_v18, %v1878_v19  ;;  %v2349_v18 = vld [vmem:[%s3342_s0 + $0x274] sm:$0xf0] }
 0x119   :  { %v1387_v36 = vpop.f32.mrf.mxu1  ;;  %v1337_v21 = vadd.f32 %v1336_v24, %v1288_v63  ;;  %v1869_v24 = vor.u32 %v2328_v8, %v1868_v7 }
 0x11b   :  { %v3165_v43 = vadd.f32 %v1385_v28, %v1337_v21  ;;  %v1877_v28 = vor.u32 %v2329_v12, %v1876_v11  ;;  %v1948_v11 = vld [vmem:[%s3342_s0 + $0x248] sm:$0xf]  ;;  %v2348_v12 = vld [vmem:[%s3342_s0 + $0x26c] sm:$0xf0] }
 0x11c   :  { %v1240_v44 = vpop.f32.mrf.mxu2 }
 0x11d   :  { %v1289_v45 = vpop.f32.mrf.mxu3  ;;  %v1241_v51 = vadd.f32 %v1240_v44, %v3026_v31  ;;  %v2333_v44 = vld [vmem:[%s3342_s0 + $0x1fc] sm:$0xf] }
 0x11e   :  { %v1341_v60 = vpop.f32.mrf.mxu0 }
 0x11f   :  { %v1290_v58 = vadd.f32 %v1289_v45, %v1241_v51  ;;  %v1916_v45 = vld [vmem:[%s3342_s0 + $0x200] sm:$0xf] }
 0x121   :  { %v1390_v62 = vpop.f32.mrf.mxu1  ;;  %v1339_v32 = vadd.f32 %v1338_v35, %v1290_v58  ;;  %1438 = vmatmul.bf16.gmra.mxu2 %v1829_v54  ;;  %1536 = vmatmul.bf16.gmra.mxu0 %v1837_v56  ;;  %v1918_v56 = vld [vmem:[%s3342_s0 + $0x228] sm:$0xf0] }
 0x122   :  { %1487 = vmatmul.bf16.gmra.mxu3 %v1833_v55  ;;  %v2334_v55 = vld [vmem:[%s3342_s0 + $0x204] sm:$0xf] }
 0x123   :  { %v3175_v0 = vadd.f32 %v1387_v36, %v1339_v32 }
 0x124   :  { %2266 = vmatmul.msk.bf16.gmra.mxu1 %vm1091_vm0, %v1841_v61  ;;  %v1243_v2 = vpop.f32.mrf.mxu2 }
 0x125   :  { %v1292_v53 = vpop.f32.mrf.mxu3  ;;  %v1244_v3 = vadd.f32 %v1243_v2, %v2900_v59  ;;  %v1870_v59 = vld [vmem:[%s3342_s0 + $0x1d0] sm:$0xf0] }
 0x126   :  { %v1343_v4 = vpop.f32.mrf.mxu0  ;;  %v1873_v27 = vor.u32 %v2323_v10, %v1870_v59 }
 0x127   :  { %v1293_v31 = vadd.f32 %v1292_v53, %v1244_v3  ;;  %v1921_v53 = vor.u32 %v2334_v55, %v1918_v56 }
 0x129   :  { %v1392_v6 = vpop.f32.mrf.mxu1  ;;  %v1342_v52 = vadd.f32 %v1341_v60, %v1293_v31  ;;  %v1909_v60 = vor.u32 %v2338_v42, %v1908_v41 }
 0x12b   :  { %v3196_v13 = vadd.f32 %v1390_v62, %v1342_v52  ;;  %v1917_v62 = vor.u32 %v2339_v49, %v1916_v45 }
 0x12c   :  { %v1245_v16 = vpop.f32.mrf.mxu2 }
 0x12d   :  { %v1294_v17 = vpop.f32.mrf.mxu3  ;;  %v1246_v22 = vadd.f32 %v1245_v16, %v2933_v15  ;;  %v2343_v16 = vld [vmem:[%s3342_s0 + $0x24c] sm:$0xf] }
 0x12e   :  { %v1346_v30 = vpop.f32.mrf.mxu0 }
 0x12f   :  { %v1295_v1 = vadd.f32 %v1294_v17, %v1246_v22  ;;  %v1956_v17 = vld [vmem:[%s3342_s0 + $0x250] sm:$0xf] }
 0x131   :  { %v1395_v34 = vpop.f32.mrf.mxu1  ;;  %v1344_v63 = vadd.f32 %v1343_v4, %v1295_v1  ;;  %1443 = vmatmul.bf16.gmra.mxu2 %v1869_v24  ;;  %1541 = vmatmul.bf16.gmra.mxu0 %v1877_v28  ;;  %v1958_v28 = vld [vmem:[%s3342_s0 + $0x278] sm:$0xf0] }
 0x132   :  { %1492 = vmatmul.bf16.gmra.mxu3 %v1873_v27  ;;  %v2344_v27 = vld [vmem:[%s3342_s0 + $0x254] sm:$0xf] }
 0x133   :  { %v3206_v35 = vadd.f32 %v1392_v6, %v1344_v63 }
 0x134   :  { %2267 = vmatmul.msk.bf16.gmra.mxu1 %vm1091_vm0, %v1881_v33  ;;  %v1248_v36 = vpop.f32.mrf.mxu2 }
 0x135   :  { %v1297_v21 = vpop.f32.mrf.mxu3  ;;  %v1249_v37 = vadd.f32 %v1248_v36, %v2945_v26  ;;  %v1910_v26 = vld [vmem:[%s3342_s0 + $0x220] sm:$0xf0] }
 0x136   :  { %v1348_v38 = vpop.f32.mrf.mxu0  ;;  %v1913_v61 = vor.u32 %v2333_v44, %v1910_v26 }
 0x137   :  { %v1298_v15 = vadd.f32 %v1297_v21, %v1249_v37  ;;  %v1961_v21 = vor.u32 %v2344_v27, %v1958_v28 }
 0x139   :  { %v1397_v40 = vpop.f32.mrf.mxu1  ;;  %v1347_v20 = vadd.f32 %v1346_v30, %v1298_v15  ;;  %v1949_v30 = vor.u32 %v2348_v12, %v1948_v11 }
 0x13b   :  { %v3227_v50 = vadd.f32 %v1395_v34, %v1347_v20  ;;  %v1957_v34 = vor.u32 %v2349_v18, %v1956_v17 }
 0x13c   :  { %v1250_v51 = vpop.f32.mrf.mxu2 }
 0x13d   :  { %v1299_v54 = vpop.f32.mrf.mxu3  ;;  %v1251_v58 = vadd.f32 %v1250_v51, %v2978_v47 }
 0x13e   :  { %v1351_v2 = vpop.f32.mrf.mxu0 }
 0x13f   :  { %v1300_v32 = vadd.f32 %v1299_v54, %v1251_v58 }
 0x141   :  { %v1400_v3 = vpop.f32.mrf.mxu1  ;;  %v1349_v31 = vadd.f32 %v1348_v38, %v1300_v32  ;;  %1448 = vmatmul.bf16.gmra.mxu2 %v1909_v60  ;;  %1546 = vmatmul.bf16.gmra.mxu0 %v1917_v62 }
 0x142   :  { %1497 = vmatmul.bf16.gmra.mxu3 %v1913_v61 }
 0x143   :  { %v3237_v4 = vadd.f32 %v1397_v40, %v1349_v31 }
 0x144   :  { %2268 = vmatmul.msk.bf16.gmra.mxu1 %vm1091_vm0, %v1921_v53  ;;  %v1253_v6 = vpop.f32.mrf.mxu2 }
 0x145   :  { %v1302_v52 = vpop.f32.mrf.mxu3  ;;  %v1254_v7 = vadd.f32 %v1253_v6, %v2984_v57  ;;  %v1950_v57 = vld [vmem:[%s3342_s0 + $0x270] sm:$0xf0] }
 0x146   :  { %v1353_v8 = vpop.f32.mrf.mxu0  ;;  %v1953_v33 = vor.u32 %v2343_v16, %v1950_v57 }
 0x147   :  { %v1303_v47 = vadd.f32 %v1302_v52, %v1254_v7 }
 0x149   :  { %v1402_v10 = vpop.f32.mrf.mxu1  ;;  %v1352_v59 = vadd.f32 %v1351_v2, %v1303_v47 }
 0x14b   :  { %v3258_v19 = vadd.f32 %v1400_v3, %v1352_v59 }
 0x14c   :  { %v1255_v22 = vpop.f32.mrf.mxu2 }
 0x14d   :  { %v1304_v24 = vpop.f32.mrf.mxu3  ;;  %v1256_v1 = vadd.f32 %v1255_v22, %v3014_v14 }
 0x14e   :  { %v1356_v36 = vpop.f32.mrf.mxu0 }
 0x14f   :  { %v1305_v63 = vadd.f32 %v1304_v24, %v1256_v1 }
 0x151   :  { %v1405_v37 = vpop.f32.mrf.mxu1  ;;  %v1354_v15 = vadd.f32 %v1353_v8, %v1305_v63  ;;  %1453 = vmatmul.bf16.gmra.mxu2 %v1949_v30  ;;  %1551 = vmatmul.bf16.gmra.mxu0 %v1957_v34 }
 0x152   :  { %1502 = vmatmul.bf16.gmra.mxu3 %v1953_v33 }
 0x153   :  { %v3268_v38 = vadd.f32 %v1402_v10, %v1354_v15 }
 0x154   :  { %2269 = vmatmul.msk.bf16.gmra.mxu1 %vm1091_vm0, %v1961_v21  ;;  %v1258_v40 = vpop.f32.mrf.mxu2 }
 0x155   :  { %v1307_v20 = vpop.f32.mrf.mxu3  ;;  %v1259_v41 = vadd.f32 %v1258_v40, %v3020_v25 }
 0x156   :  { %v1358_v42 = vpop.f32.mrf.mxu0 }
 0x157   :  { %v1308_v14 = vadd.f32 %v1307_v20, %v1259_v41 }
 0x159   :  { %v1407_v44 = vpop.f32.mrf.mxu1  ;;  %v1357_v26 = vadd.f32 %v1356_v36, %v1308_v14 }
 0x15b   :  { %v3271_v45 = vadd.f32 %v1405_v37, %v1357_v26 }
 0x15c   :  { %v1260_v49 = vpop.f32.mrf.mxu2 }
 0x15d   :  { %v1309_v51 = vpop.f32.mrf.mxu3  ;;  %v1261_v54 = vadd.f32 %v1260_v49, %v3050_v48 }
 0x15e   :  { %v1517_v56 = vpop.f32.mrf.mxu0 }
 0x15f   :  { %v1310_v55 = vadd.f32 %v1309_v51, %v1261_v54 }
 0x161   :  { %v1566_v58 = vpop.f32.mrf.mxu1  ;;  %v1359_v60 = vadd.f32 %v1358_v42, %v1310_v55 }
 0x163   :  { %v3274_v61 = vadd.f32 %v1407_v44, %v1359_v60 }
 0x164   :  { %v1419_v62 = vpop.f32.mrf.mxu2 }
 0x165   :  { %v1468_v32 = vpop.f32.mrf.mxu3  ;;  %v1420_v25 = vadd.f32 %v1419_v62, %v3072_v5 }
 0x166   :  { %v1519_v53 = vpop.f32.mrf.mxu0 }
 0x167   :  { %v1469_v2 = vadd.f32 %v1468_v32, %v1420_v25 }
 0x169   :  { %v1568_v3 = vpop.f32.mrf.mxu1  ;;  %v1518_v31 = vadd.f32 %v1517_v56, %v1469_v2 }
 0x16b   :  { %v1567_v6 = vadd.f32 %v1566_v58, %v1518_v31 }
 0x16c   :  { %v1421_v52 = vpop.f32.mrf.mxu2 }
 0x16d   :  { %v1470_v7 = vpop.f32.mrf.mxu3  ;;  %v1606_v47 = vmax.f32 %v1567_v6, 0.0  ;;  %v1422_v48 = vadd.f32 %v1421_v52, %v3082_v23 }
 0x16e   :  { %v1522_v10 = vpop.f32.mrf.mxu0 }
 0x16f   :  { %1622 = vst [vmem:[%s3343_s3] sm:$0xff] %v1606_v47  ;;  %v1471_v8 = vadd.f32 %v1470_v7, %v1422_v48 }
 0x171   :  { %v1571_v59 = vpop.f32.mrf.mxu1  ;;  %v1520_v11 = vadd.f32 %v1519_v53, %v1471_v8 }
 0x173   :  { %v1569_v12 = vadd.f32 %v1568_v3, %v1520_v11 }
 0x174   :  { %v1424_v5 = vpop.f32.mrf.mxu2 }
 0x175   :  { %v1473_v16 = vpop.f32.mrf.mxu3  ;;  %v1607_v57 = vmax.f32 %v1569_v12, 0.0  ;;  %v1425_v17 = vadd.f32 %v1424_v5, %v3103_v39 }
 0x176   :  { %v1524_v23 = vpop.f32.mrf.mxu0 }
 0x177   :  { %1623 = vst [vmem:[%s3343_s3 + $0x8] sm:$0xff] %v1607_v57  ;;  %v1474_v18 = vadd.f32 %v1473_v16, %v1425_v17 }
 0x179   :  { %v1573_v22 = vpop.f32.mrf.mxu1  ;;  %v1523_v24 = vadd.f32 %v1522_v10, %v1474_v18 }
 0x17b   :  { %v1572_v27 = vadd.f32 %v1571_v59, %v1523_v24 }
 0x17c   :  { %v1426_v28 = vpop.f32.mrf.mxu2 }
 0x17d   :  { %v1475_v1 = vpop.f32.mrf.mxu3  ;;  %v1608_v30 = vmax.f32 %v1572_v27, 0.0  ;;  %v1427_v33 = vadd.f32 %v1426_v28, %v3113_v46 }
 0x17e   :  { %v1527_v39 = vpop.f32.mrf.mxu0 }
 0x17f   :  { %1624 = vst [vmem:[%s3343_s3 + $0x10] sm:$0xff] %v1608_v30  ;;  %v1476_v34 = vadd.f32 %v1475_v1, %v1427_v33 }
 0x181   :  { %v1576_v63 = vpop.f32.mrf.mxu1  ;;  %v1525_v36 = vadd.f32 %v1524_v23, %v1476_v34 }
 0x183   :  { %v1574_v21 = vadd.f32 %v1573_v22, %v1525_v36 }
 0x184   :  { %v1429_v37 = vpop.f32.mrf.mxu2 }
 0x185   :  { %v1478_v15 = vpop.f32.mrf.mxu3  ;;  %v1609_v40 = vmax.f32 %v1574_v21, 0.0  ;;  %v1430_v20 = vadd.f32 %v1429_v37, %v3134_v9 }
 0x186   :  { %v1529_v46 = vpop.f32.mrf.mxu0 }
 0x187   :  { %1625 = vst [vmem:[%s3343_s3 + $0x18] sm:$0xff] %v1609_v40  ;;  %v1479_v41 = vadd.f32 %v1478_v15, %v1430_v20 }
 0x189   :  { %v1578_v14 = vpop.f32.mrf.mxu1  ;;  %v1528_v42 = vadd.f32 %v1527_v39, %v1479_v41 }
 0x18b   :  { %v1577_v44 = vadd.f32 %v1576_v63, %v1528_v42 }
 0x18c   :  { %v1431_v26 = vpop.f32.mrf.mxu2 }
 0x18d   :  { %v1480_v49 = vpop.f32.mrf.mxu3  ;;  %v1610_v51 = vmax.f32 %v1577_v44, 0.0  ;;  %v1432_v54 = vadd.f32 %v1431_v26, %v3144_v29 }
 0x18e   :  { %v1532_v9 = vpop.f32.mrf.mxu0 }
 0x18f   :  { %1626 = vst [vmem:[%s3343_s3 + $0x20] sm:$0xff] %v1610_v51  ;;  %v1481_v55 = vadd.f32 %v1480_v49, %v1432_v54 }
 0x191   :  { %v1581_v56 = vpop.f32.mrf.mxu1  ;;  %v1530_v58 = vadd.f32 %v1529_v46, %v1481_v55 }
 0x193   :  { %v1579_v60 = vadd.f32 %v1578_v14, %v1530_v58 }
 0x194   :  { %v1434_v62 = vpop.f32.mrf.mxu2 }
 0x195   :  { %v1483_v32 = vpop.f32.mrf.mxu3  ;;  %v1611_v25 = vmax.f32 %v1579_v60, 0.0  ;;  %v1435_v2 = vadd.f32 %v1434_v62, %v3165_v43 }
 0x196   :  { %v1534_v29 = vpop.f32.mrf.mxu0 }
 0x197   :  { %1627 = vst [vmem:[%s3343_s3 + $0x28] sm:$0xff] %v1611_v25  ;;  %v1484_v53 = vadd.f32 %v1483_v32, %v1435_v2 }
 0x199   :  { %v1583_v3 = vpop.f32.mrf.mxu1  ;;  %v1533_v31 = vadd.f32 %v1532_v9, %v1484_v53 }
 0x19b   :  { %v1582_v6 = vadd.f32 %v1581_v56, %v1533_v31 }
 0x19c   :  { %v1436_v52 = vpop.f32.mrf.mxu2 }
 0x19d   :  { %v1485_v7 = vpop.f32.mrf.mxu3  ;;  %v1612_v47 = vmax.f32 %v1582_v6, 0.0  ;;  %v1437_v48 = vadd.f32 %v1436_v52, %v3175_v0 }
 0x19e   :  { %v1537_v43 = vpop.f32.mrf.mxu0 }
 0x19f   :  { %1628 = vst [vmem:[%s3343_s3 + $0x30] sm:$0xff] %v1612_v47  ;;  %v1486_v8 = vadd.f32 %v1485_v7, %v1437_v48 }
 0x1a1   :  { %v1586_v10 = vpop.f32.mrf.mxu1  ;;  %v1535_v59 = vadd.f32 %v1534_v29, %v1486_v8 }
 0x1a3   :  { %v1584_v11 = vadd.f32 %v1583_v3, %v1535_v59 }
 0x1a4   :  { %v1439_v12 = vpop.f32.mrf.mxu2 }
 0x1a5   :  { %v1488_v5 = vpop.f32.mrf.mxu3  ;;  %v1613_v16 = vmax.f32 %v1584_v11, 0.0  ;;  %v1440_v57 = vadd.f32 %v1439_v12, %v3196_v13 }
 0x1a6   :  { %v1539_v0 = vpop.f32.mrf.mxu0 }
 0x1a7   :  { %1629 = vst [vmem:[%s3343_s3 + $0x38] sm:$0xff] %v1613_v16  ;;  %v1489_v17 = vadd.f32 %v1488_v5, %v1440_v57 }
 0x1a9   :  { %v1588_v18 = vpop.f32.mrf.mxu1  ;;  %v1538_v23 = vadd.f32 %v1537_v43, %v1489_v17 }
 0x1ab   :  { %v1587_v22 = vadd.f32 %v1586_v10, %v1538_v23 }
 0x1ac   :  { %v1441_v24 = vpop.f32.mrf.mxu2 }
 0x1ad   :  { %v1490_v27 = vpop.f32.mrf.mxu3  ;;  %v1614_v28 = vmax.f32 %v1587_v22, 0.0  ;;  %v1442_v1 = vadd.f32 %v1441_v24, %v3206_v35 }
 0x1ae   :  { %v1542_v13 = vpop.f32.mrf.mxu0 }
 0x1af   :  { %1630 = vst [vmem:[%s3343_s3 + $0x40] sm:$0xff] %v1614_v28  ;;  %v1491_v30 = vadd.f32 %v1490_v27, %v1442_v1 }
 0x1b1   :  { %v1591_v33 = vpop.f32.mrf.mxu1  ;;  %v1540_v34 = vadd.f32 %v1539_v0, %v1491_v30 }
 0x1b3   :  { %v1589_v39 = vadd.f32 %v1588_v18, %v1540_v34 }
 0x1b4   :  { %v1444_v63 = vpop.f32.mrf.mxu2 }
 0x1b5   :  { %v1493_v36 = vpop.f32.mrf.mxu3  ;;  %v1615_v21 = vmax.f32 %v1589_v39, 0.0  ;;  %v1445_v37 = vadd.f32 %v1444_v63, %v3227_v50 }
 0x1b6   :  { %v1544_v35 = vpop.f32.mrf.mxu0 }
 0x1b7   :  { %1631 = vst [vmem:[%s3343_s3 + $0x48] sm:$0xff] %v1615_v21  ;;  %v1494_v15 = vadd.f32 %v1493_v36, %v1445_v37 }
 0x1b9   :  { %v1543_v40 = vadd.f32 %v1542_v13, %v1494_v15  ;;  %v1593_v20 = vpop.f32.mrf.mxu1 }
 0x1bb   :  { %v1592_v41 = vadd.f32 %v1591_v33, %v1543_v40 }
 0x1bc   :  { %v1446_v46 = vpop.f32.mrf.mxu2 }
 0x1bd   :  { %v1495_v14 = vpop.f32.mrf.mxu3  ;;  %v1616_v42 = vmax.f32 %v1592_v41, 0.0  ;;  %v1447_v44 = vadd.f32 %v1446_v46, %v3237_v4 }
 0x1be   :  { %v1547_v49 = vpop.f32.mrf.mxu0 }
 0x1bf   :  { %1632 = vst [vmem:[%s3343_s3 + $0x50] sm:$0xff] %v1616_v42  ;;  %v1496_v26 = vadd.f32 %v1495_v14, %v1447_v44 }
 0x1c1   :  { %v1545_v50 = vadd.f32 %v1544_v35, %v1496_v26  ;;  %v1596_v54 = vpop.f32.mrf.mxu1 }
 0x1c3   :  { %v1594_v51 = vadd.f32 %v1593_v20, %v1545_v50 }
 0x1c4   :  { %v1449_v55 = vpop.f32.mrf.mxu2 }
 0x1c5   :  { %v1498_v9 = vpop.f32.mrf.mxu3  ;;  %v1617_v56 = vmax.f32 %v1594_v51, 0.0  ;;  %v1450_v58 = vadd.f32 %v1449_v55, %v3258_v19 }
 0x1c6   :  { %v1549_v32 = vpop.f32.mrf.mxu0 }
 0x1c7   :  { %1633 = vst [vmem:[%s3343_s3 + $0x58] sm:$0xff] %v1617_v56  ;;  %v1499_v60 = vadd.f32 %v1498_v9, %v1450_v58 }
 0x1c9   :  { %v1548_v4 = vadd.f32 %v1547_v49, %v1499_v60  ;;  %v1598_v3 = vpop.f32.mrf.mxu1 }
 0x1cb   :  { %v1597_v62 = vadd.f32 %v1596_v54, %v1548_v4 }
 0x1cc   :  { %v1451_v25 = vpop.f32.mrf.mxu2 }
 0x1cd   :  { %v1500_v2 = vpop.f32.mrf.mxu3  ;;  %v1618_v53 = vmax.f32 %v1597_v62, 0.0  ;;  %v1452_v29 = vadd.f32 %v1451_v25, %v3268_v38 }
 0x1ce   :  { %v1552_v8 = vpop.f32.mrf.mxu0 }
 0x1cf   :  { %1634 = vst [vmem:[%s3343_s3 + $0x60] sm:$0xff] %v1618_v53  ;;  %v1501_v31 = vadd.f32 %v1500_v2, %v1452_v29 }
 0x1d1   :  { %v1550_v19 = vadd.f32 %v1549_v32, %v1501_v31  ;;  %v1601_v38 = vpop.f32.mrf.mxu1 }
 0x1d3   :  { %v1599_v6 = vadd.f32 %v1598_v3, %v1550_v19 }
 0x1d4   :  { %v1454_v52 = vpop.f32.mrf.mxu2 }
 0x1d5   :  { %v1503_v7 = vpop.f32.mrf.mxu3  ;;  %v1619_v47 = vmax.f32 %v1599_v6, 0.0  ;;  %v1455_v48 = vadd.f32 %v1454_v52, %v3271_v45 }
 0x1d6   :  { %v1554_v45 = vpop.f32.mrf.mxu0 }
 0x1d7   :  { %1635 = vst [vmem:[%s3343_s3 + $0x68] sm:$0xff] %v1619_v47  ;;  %v1504_v43 = vadd.f32 %v1503_v7, %v1455_v48 }
 0x1d9   :  { %v1553_v10 = vadd.f32 %v1552_v8, %v1504_v43  ;;  %v1603_v0 = vpop.f32.mrf.mxu1 }
 0x1db   :  { %v1602_v59 = vadd.f32 %v1601_v38, %v1553_v10 }
 0x1dc   :  { %v1456_v11 = vpop.f32.mrf.mxu2 }
 0x1dd   :  { %v1620_v12 = vmax.f32 %v1602_v59, 0.0  ;;  %v1457_v5 = vadd.f32 %v1456_v11, %v3274_v61  ;;  %v1505_v16 = vpop.f32.mrf.mxu3 }
 0x1df   :  { %1636 = vst [vmem:[%s3343_s3 + $0x70] sm:$0xff] %v1620_v12  ;;  %v1506_v57 = vadd.f32 %v1505_v16, %v1457_v5 }
 0x1e1   :  { %v1555_v17 = vadd.f32 %v1554_v45, %v1506_v57 }
 0x1e3   :  { %v1604_v18 = vadd.f32 %v1603_v0, %v1555_v17 }
 0x1e5   :  { %v1621_v23 = vmax.f32 %v1604_v18, 0.0 }
 0x1e7   :  { %1637 = vst [vmem:[%s3343_s3 + $0x78] sm:$0xff] %v1621_v23 }

// kernel: facebox_extractor_forward.29
= control target key start
LH: loop header
LB: loop body
LE: loop exit
PB: predicated region body
PF: predicated region fallthrough
CT: control target
= control target key end

     0   :  { %s340_s0 = inlined_call_operand.vmem [shape: f32[2,5,5,128], index: 0, kind: input, shape index: {}]   ;;  %s341_s3 = inlined_call_operand.vmem [shape: f32[2,5,5,128], index: 3, kind: input, shape index: {}]   ;;  %s342_s2 = inlined_call_operand.vmem [shape: f32[2,5,5,128], index: 2, kind: input, shape index: {}]   ;;  %s343_s1 = inlined_call_operand.vmem [shape: f32[2,5,5,128], index: 1, kind: input, shape index: {}]   ;;  %s344_s4 = inlined_call_operand.vmem [shape: f32[2,4,4,128], index: 4, kind: output, shape index: {}]  }
   0x1   :  { %v17_v0 = vld [vmem:[%s340_s0] sm:$0x1f]  ;;  %v18_v1 = vld [vmem:[%s340_s0 + $0x8] sm:$0x1f]  ;;  %v19_v6 = vld [vmem:[%s340_s0 + $0x10] sm:$0x1f] }
   0x2   :  { %v45_v2 = vld [vmem:[%s341_s3] sm:$0x1f]  ;;  %v69_v4 = vrot.slane %v17_v0, 1  ;;  %v70_v5 = vrot.slane %v18_v1, 1  ;;  %v46_v7 = vld [vmem:[%s341_s3 + $0x8] sm:$0x1f] }
   0x3   :  { %v53_v3 = vmax.f32 %v45_v2, %v17_v0  ;;  %v54_v9 = vmax.f32 %v46_v7, %v18_v1  ;;  %v71_v10 = vrot.slane %v19_v6, 1  ;;  %v20_v11 = vld [vmem:[%s340_s0 + $0x18] sm:$0x1f]  ;;  %v47_v12 = vld [vmem:[%s341_s3 + $0x10] sm:$0x1f] }
   0x4   :  { %v37_v13 = vld [vmem:[%s342_s2] sm:$0x1f]  ;;  %v55_v16 = vmax.f32 %v47_v12, %v19_v6  ;;  %v72_v17 = vrot.slane %v20_v11, 1  ;;  %v48_v20 = vld [vmem:[%s341_s3 + $0x18] sm:$0x1f] }
   0x5   :  { %v85_v8 = vmax.f32 %v53_v3, %v69_v4  ;;  %v86_v15 = vmax.f32 %v54_v9, %v70_v5  ;;  %v21_v18 = vld [vmem:[%s340_s0 + $0x20] sm:$0x1f]  ;;  %v38_v22 = vld [vmem:[%s342_s2 + $0x8] sm:$0x1f]  ;;  %v56_v25 = vmax.f32 %v48_v20, %v20_v11  ;;  %v23_v27 = vld [vmem:[%s340_s0 + $0x30] sm:$0x1f] }
   0x6   :  { %v27_v19 = vld [vmem:[%s343_s1] sm:$0x1f]  ;;  %v87_v24 = vmax.f32 %v55_v16, %v71_v10  ;;  %v22_v26 = vld [vmem:[%s340_s0 + $0x28] sm:$0x1f]  ;;  %v147_v29 = vrot.slane %v37_v13, 1  ;;  %v103_v30 = vrot.slane %v21_v18, 1 }
   0x7   :  { %v93_v14 = vmax.f32 %v85_v8, %v18_v1  ;;  %v94_v23 = vmax.f32 %v86_v15, %v19_v6  ;;  %v28_v28 = vld [vmem:[%s343_s1 + $0x8] sm:$0x1f]  ;;  %v73_v31 = vrot.slane %v22_v26, 1  ;;  %v39_v34 = vld [vmem:[%s342_s2 + $0x10] sm:$0x1f]  ;;  %v88_v36 = vmax.f32 %v56_v25, %v72_v17 }
   0x8   :  { %v95_v35 = vmax.f32 %v87_v24, %v20_v11  ;;  %v49_v37 = vld [vmem:[%s341_s3 + $0x28] sm:$0x1f]  ;;  %v24_v38 = vld [vmem:[%s340_s0 + $0x38] sm:$0x1f]  ;;  %v29_v39 = vld [vmem:[%s343_s1 + $0x10] sm:$0x1f] }
   0x9   :  { %v107_v21 = vmax.f32 %v93_v14, %v70_v5  ;;  %v108_v33 = vmax.f32 %v94_v23, %v71_v10  ;;  %v148_v40 = vrot.slane %v38_v22, 1  ;;  %v57_v41 = vmax.f32 %v49_v37, %v22_v26  ;;  %v50_v43 = vld [vmem:[%s341_s3 + $0x30] sm:$0x1f]  ;;  %v25_v48 = vld [vmem:[%s340_s0 + $0x40] sm:$0x1f] }
   0xa   :  { %v74_v42 = vrot.slane %v23_v27, 1  ;;  %v109_v46 = vmax.f32 %v95_v35, %v72_v17  ;;  %v96_v47 = vmax.f32 %v88_v36, %v21_v18  ;;  %v30_v49 = vld [vmem:[%s343_s1 + $0x18] sm:$0x1f]  ;;  %v149_v50 = vrot.slane %v39_v34, 1  ;;  %v31_v60 = vld [vmem:[%s343_s1 + $0x20] sm:$0x1f] }
   0xb   :  { %v115_v32 = vmax.f32 %v107_v21, %v27_v19  ;;  %v116_v45 = vmax.f32 %v108_v33, %v28_v28  ;;  %v89_v51 = vmax.f32 %v57_v41, %v73_v31  ;;  %v58_v52 = vmax.f32 %v50_v43, %v23_v27  ;;  %v51_v54 = vld [vmem:[%s341_s3 + $0x38] sm:$0x1f]  ;;  %v52_v1 = vld [vmem:[%s341_s3 + $0x40] sm:$0x1f]  ;;  %v32_v6 = vld [vmem:[%s343_s1 + $0x28] sm:$0x1f] }
   0xc   :  { %v75_v53 = vrot.slane %v24_v38, 1  ;;  %v117_v57 = vmax.f32 %v109_v46, %v29_v39  ;;  %v40_v58 = vld [vmem:[%s342_s2 + $0x18] sm:$0x1f]  ;;  %v110_v59 = vmax.f32 %v96_v47, %v103_v30  ;;  %v59_v63 = vmax.f32 %v51_v54, %v24_v38  ;;  %v26_v11 = vld [vmem:[%s340_s0 + $0x48] sm:$0x1f] }
   0xd   :  { %v123_v44 = vmax.f32 %v115_v32, %v28_v28  ;;  %v124_v56 = vmax.f32 %v116_v45, %v29_v39  ;;  %v97_v61 = vmax.f32 %v89_v51, %v23_v27  ;;  %v90_v62 = vmax.f32 %v58_v52, %v74_v42  ;;  %v33_v15 = vld [vmem:[%s343_s1 + $0x30] sm:$0x1f]  ;;  %v41_v16 = vld [vmem:[%s342_s2 + $0x28] sm:$0x1f]  ;;  %v34_v19 = vld [vmem:[%s343_s1 + $0x38] sm:$0x1f] }
   0xe   :  { %v76_v0 = vrot.slane %v25_v48, 1  ;;  %v125_v4 = vmax.f32 %v117_v57, %v30_v49  ;;  %v118_v5 = vmax.f32 %v110_v59, %v30_v49  ;;  %v150_v7 = vrot.slane %v40_v58, 1  ;;  %v42_v24 = vld [vmem:[%s342_s2 + $0x30] sm:$0x1f]  ;;  %v43_v32 = vld [vmem:[%s342_s2 + $0x38] sm:$0x1f] }
   0xf   :  { %v131_v55 = vmax.f32 %v123_v44, %v37_v13  ;;  %v132_v3 = vmax.f32 %v124_v56, %v38_v22  ;;  %v111_v8 = vmax.f32 %v97_v61, %v74_v42  ;;  %v98_v9 = vmax.f32 %v90_v62, %v24_v38  ;;  %v35_v37 = vld [vmem:[%s343_s1 + $0x40] sm:$0x1f]  ;;  %v36_v44 = vld [vmem:[%s343_s1 + $0x48] sm:$0x1f] }
  0x10   :  { %v91_v10 = vmax.f32 %v59_v63, %v75_v53  ;;  %v133_v13 = vmax.f32 %v125_v4, %v39_v34  ;;  %v126_v14 = vmax.f32 %v118_v5, %v31_v60  ;;  %v60_v17 = vmax.f32 %v52_v1, %v25_v48  ;;  %v44_v45 = vld [vmem:[%s342_s2 + $0x40] sm:$0x1f] }
  0x11   :  { %v163_v2 = vmax.f32 %v131_v55, %v147_v29  ;;  %v164_v12 = vmax.f32 %v132_v3, %v148_v40  ;;  %v119_v18 = vmax.f32 %v111_v8, %v32_v6  ;;  %v112_v20 = vmax.f32 %v98_v9, %v75_v53 }
  0x12   :  { %v99_v21 = vmax.f32 %v91_v10, %v25_v48  ;;  %v165_v22 = vmax.f32 %v133_v13, %v149_v50  ;;  %v134_v23 = vmax.f32 %v126_v14, %v40_v58  ;;  %v92_v25 = vmax.f32 %v60_v17, %v76_v0 }
  0x13   :  { %171 = vst [vmem:[%s344_s4] sm:$0xf] %v163_v2  ;;  %v104_v26 = vrot.slane %v26_v11, 1  ;;  %v127_v27 = vmax.f32 %v119_v18, %v33_v15  ;;  %v151_v28 = vrot.slane %v41_v16, 1  ;;  %v120_v29 = vmax.f32 %v112_v20, %v33_v15 }
  0x14   :  { %172 = vst [vmem:[%s344_s4 + $0x4] sm:$0xf] %v164_v12  ;;  %v113_v30 = vmax.f32 %v99_v21, %v76_v0  ;;  %v166_v31 = vmax.f32 %v134_v23, %v150_v7  ;;  %v100_v33 = vmax.f32 %v92_v25, %v26_v11  ;;  %v152_v36 = vrot.slane %v42_v24, 1 }
  0x15   :  { %173 = vst [vmem:[%s344_s4 + $0x8] sm:$0xf] %v165_v22  ;;  %v135_v34 = vmax.f32 %v127_v27, %v41_v16  ;;  %v128_v35 = vmax.f32 %v120_v29, %v34_v19  ;;  %v153_v43 = vrot.slane %v43_v32, 1  ;;  %v154_v50 = vrot.slane %v44_v45, 1 }
  0x16   :  { %v121_v38 = vmax.f32 %v113_v30, %v34_v19  ;;  %174 = vst [vmem:[%s344_s4 + $0xc] sm:$0xf] %v166_v31  ;;  %v114_v39 = vmax.f32 %v100_v33, %v104_v26 }
  0x17   :  { %v167_v40 = vmax.f32 %v135_v34, %v151_v28  ;;  %v136_v41 = vmax.f32 %v128_v35, %v42_v24 }
  0x18   :  { %v129_v42 = vmax.f32 %v121_v38, %v35_v37  ;;  %v122_v46 = vmax.f32 %v114_v39, %v35_v37 }
  0x19   :  { %175 = vst [vmem:[%s344_s4 + $0x10] sm:$0xf] %v167_v40  ;;  %v168_v47 = vmax.f32 %v136_v41, %v152_v36 }
  0x1a   :  { %v137_v48 = vmax.f32 %v129_v42, %v43_v32  ;;  %v130_v49 = vmax.f32 %v122_v46, %v36_v44 }
  0x1b   :  { %176 = vst [vmem:[%s344_s4 + $0x14] sm:$0xf] %v168_v47 }
  0x1c   :  { %v169_v51 = vmax.f32 %v137_v48, %v153_v43  ;;  %v138_v52 = vmax.f32 %v130_v49, %v44_v45 }
  0x1e   :  { %177 = vst [vmem:[%s344_s4 + $0x18] sm:$0xf] %v169_v51  ;;  %v170_v53 = vmax.f32 %v138_v52, %v154_v50 }
  0x20   :  { %178 = vst [vmem:[%s344_s4 + $0x1c] sm:$0xf] %v170_v53 }

// kernel: facebox_extractor_forward.30
= control target key start
LH: loop header
LB: loop body
LE: loop exit
PB: predicated region body
PF: predicated region fallthrough
CT: control target
= control target key end

     0   :  { %vm117_vm0 = vcmask 654336   ;;  %s250_s1 = inlined_call_operand.vmem [shape: bf16[128,80], index: 1, kind: input, shape index: {}]   ;;  %s251_s2 = inlined_call_operand.vmem [shape: f32[1,80], index: 2, kind: input, shape index: {}]   ;;  %s252_s0 = inlined_call_operand.vmem [shape: bf16[32,128], index: 0, kind: input, shape index: {}]   ;;  %s253_s3 = inlined_call_operand.vmem [shape: f32[32,80], index: 3, kind: output, shape index: {}]  }
   0x1   :  { %v175_v0 = vld [vmem:[%s250_s1 + $0x38] sm:$0xff]  ;;  %v174_v1 = vld [vmem:[%s250_s1 + $0x30] sm:$0xff]  ;;  %v173_v2 = vld [vmem:[%s250_s1 + $0x28] sm:$0xff] }
   0x2   :  { %98 = vmatpush.bf16.msra.mxu0 %v175_v0  ;;  %176 = vmatpush.bf16.msra.mxu1 %v175_v0  ;;  %v172_v3 = vld [vmem:[%s250_s1 + $0x20] sm:$0xff]  ;;  %v171_v4 = vld [vmem:[%s250_s1 + $0x18] sm:$0xff]  ;;  %v170_v5 = vld [vmem:[%s250_s1 + $0x10] sm:$0xff] }
   0x3   :  { %v169_v6 = vld [vmem:[%s250_s1 + $0x8] sm:$0xff]  ;;  %v168_v7 = vld [vmem:[%s250_s1] sm:$0xff] }
   0x4   :  { %v166_v8 = vld [vmem:[%s252_s0] sm:$0xff]  ;;  %v167_v9 = vld [vmem:[%s252_s0 + $0x8] sm:$0xff] }
   0x5   :  { %v184_v10 = vld [vmem:[%s251_s2] ss:$0 sm:$0xff] }
   0x6   :  { %99 = vmatpush.bf16.msra.mxu0 %v174_v1  ;;  %177 = vmatpush.bf16.msra.mxu1 %v174_v1 }
   0xa   :  { %100 = vmatpush.bf16.msra.mxu0 %v173_v2  ;;  %178 = vmatpush.bf16.msra.mxu1 %v173_v2 }
   0xe   :  { %101 = vmatpush.bf16.msra.mxu0 %v172_v3  ;;  %179 = vmatpush.bf16.msra.mxu1 %v172_v3 }
  0x12   :  { %102 = vmatpush.bf16.msra.mxu0 %v171_v4  ;;  %180 = vmatpush.bf16.msra.mxu1 %v171_v4 }
  0x16   :  { %103 = vmatpush.bf16.msra.mxu0 %v170_v5  ;;  %181 = vmatpush.bf16.msra.mxu1 %v170_v5 }
  0x1a   :  { %104 = vmatpush.bf16.msra.mxu0 %v169_v6  ;;  %182 = vmatpush.bf16.msra.mxu1 %v169_v6 }
  0x1e   :  { %105 = vmatpush.bf16.msra.mxu0 %v168_v7  ;;  %183 = vmatpush.bf16.msra.mxu1 %v168_v7 }
  0x21   :  { %106 = vmatmul.bf16.vlgmr.msra.gmra.mxu0 %v166_v8  ;;  %111 = vmatmul.bf16.vlgmr.msra.gmra.mxu1 %v167_v9 }
  0x9e   :  { %v107_v11 = vpop.f32.mrf.mxu0  ;;  %v112_v12 = vpop.f32.mrf.mxu1 }
  0x9f   :  { %v108_v13 = vadd.f32 %v184_v10, %v107_v11  ;;  %v113_v14 = vadd.f32 %v184_v10, %v112_v12 }
  0xa1   :  { %118 = vst.msk [vmem:[%s253_s3] sm:$0xff] %vm117_vm0, %v108_v13 }
  0xa2   :  { %120 = vst.msk [vmem:[%s253_s3 + $0x10] sm:$0xff] %vm117_vm0, %v113_v14 }
  0xa6   :  { %v109_v15 = vpop.f32.mrf.mxu0  ;;  %v114_v16 = vpop.f32.mrf.mxu1 }
  0xa7   :  { %v110_v17 = vadd.f32 %v184_v10, %v109_v15  ;;  %v115_v18 = vadd.f32 %v184_v10, %v114_v16 }
  0xa9   :  { %119 = vst.msk [vmem:[%s253_s3 + $0x8] sm:$0xff] %vm117_vm0, %v110_v17 }
  0xaa   :  { %121 = vst.msk [vmem:[%s253_s3 + $0x18] sm:$0xff] %vm117_vm0, %v115_v18 }

// kernel: facebox_extractor_forward.33
= control target key start
LH: loop header
LB: loop body
LE: loop exit
PB: predicated region body
PF: predicated region fallthrough
CT: control target
= control target key end

     0   :  { %vm156_vm0 = vcmask 1043456   ;;  %vm149_vm1 = vcmask 719872   ;;  %vm198_vm2 = vcmask 261120   ;;  %s414_s1 = inlined_call_operand.vmem [shape: bf16[216,32], index: 1, kind: input, shape index: {}]   ;;  %s415_s2 = inlined_call_operand.vmem [shape: f32[1,32], index: 2, kind: input, shape index: {}]   ;;  %s416_s0 = inlined_call_operand.vmem [shape: bf16[32,216], index: 0, kind: input, shape index: {}]   ;;  %s417_s3 = inlined_call_operand.vmem [shape: f32[32,32], index: 3, kind: output, shape index: {}]  }
   0x1   :  { %v288_v0 = vld [vmem:[%s414_s1 + $0x38] sm:$0xff]  ;;  %v45_v1 = vld [vmem:[%s414_s1 + $0x68] sm:$0xf]  ;;  %v287_v3 = vld [vmem:[%s414_s1 + $0x30] sm:$0xff] }
   0x2   :  { %v121_v2 = vunpack.c.l.b16 %v45_v1  ;;  %160 = vmatpush.bf16.msra.mxu0 %v288_v0  ;;  %294 = vmatpush.bf16.msra.mxu2 %v288_v0  ;;  %v293_v6 = vld [vmem:[%s414_s1 + $0x60] sm:$0xff]  ;;  %v286_v7 = vld [vmem:[%s414_s1 + $0x28] sm:$0xff]  ;;  %v292_v8 = vld [vmem:[%s414_s1 + $0x58] sm:$0xff] }
   0x3   :  { %v285_v9 = vld [vmem:[%s414_s1 + $0x20] sm:$0xff]  ;;  %v291_v10 = vld [vmem:[%s414_s1 + $0x50] sm:$0xff]  ;;  %v284_v11 = vld [vmem:[%s414_s1 + $0x18] sm:$0xff] }
   0x4   :  { %v135_v4 = vpack.c.b16 %v121_v2, %v121_v2  ;;  %v290_v12 = vld [vmem:[%s414_s1 + $0x48] sm:$0xff]  ;;  %v283_v13 = vld [vmem:[%s414_s1 + $0x10] sm:$0xff]  ;;  %v289_v14 = vld [vmem:[%s414_s1 + $0x40] sm:$0xff] }
   0x5   :  { %v282_v15 = vld [vmem:[%s414_s1 + $0x8] sm:$0xff]  ;;  %v279_v16 = vld [vmem:[%s416_s0 + $0x14] sm:$0xf]  ;;  %v219_v17 = vld [vmem:[%s416_s0 + $0x18] sm:$0xf0] }
   0x6   :  { %v158_v5 = vsel %vm156_vm0, %v135_v4, 0  ;;  %161 = vmatpush.bf16.msra.mxu0 %v287_v3  ;;  %295 = vmatpush.bf16.msra.mxu2 %v287_v3  ;;  %v277_v18 = vld [vmem:[%s416_s0 + $0x4] sm:$0xf]  ;;  %v211_v19 = vld [vmem:[%s416_s0 + $0x8] sm:$0xf0]  ;;  %v222_v20 = vor.u32 %v279_v16, %v219_v17 }
   0x7   :  { %302 = vmatpush.bf16.msra.mxu3 %v158_v5  ;;  %181 = vmatpush.bf16.msra.mxu1 %v158_v5  ;;  %v281_v21 = vld [vmem:[%s414_s1] sm:$0xff]  ;;  %v278_v23 = vld [vmem:[%s416_s0 + $0x4] sm:$0xf0]  ;;  %v214_v24 = vor.u32 %v277_v18, %v211_v19  ;;  %v217_v25 = vld [vmem:[%s416_s0 + $0x10] sm:$0xf] }
   0x8   :  { %v209_v22 = vld [vmem:[%s416_s0] sm:$0xf]  ;;  %v280_v26 = vld [vmem:[%s416_s0 + $0x14] sm:$0xf0] }
   0x9   :  { %v210_v27 = vor.u32 %v278_v23, %v209_v22  ;;  %v218_v28 = vor.u32 %v280_v26, %v217_v25  ;;  %v308_v29 = vld [vmem:[%s415_s2] ss:$0 sm:$0xff] }
   0xa   :  { %162 = vmatpush.bf16.msra.mxu0 %v286_v7  ;;  %296 = vmatpush.bf16.msra.mxu2 %v286_v7 }
   0xb   :  { %303 = vmatpush.bf16.msra.mxu3 %v293_v6  ;;  %182 = vmatpush.bf16.msra.mxu1 %v293_v6 }
   0xe   :  { %163 = vmatpush.bf16.msra.mxu0 %v285_v9  ;;  %297 = vmatpush.bf16.msra.mxu2 %v285_v9 }
   0xf   :  { %304 = vmatpush.bf16.msra.mxu3 %v292_v8  ;;  %183 = vmatpush.bf16.msra.mxu1 %v292_v8 }
  0x12   :  { %164 = vmatpush.bf16.msra.mxu0 %v284_v11  ;;  %298 = vmatpush.bf16.msra.mxu2 %v284_v11 }
  0x13   :  { %305 = vmatpush.bf16.msra.mxu3 %v291_v10  ;;  %184 = vmatpush.bf16.msra.mxu1 %v291_v10 }
  0x16   :  { %165 = vmatpush.bf16.msra.mxu0 %v283_v13  ;;  %299 = vmatpush.bf16.msra.mxu2 %v283_v13 }
  0x17   :  { %306 = vmatpush.bf16.msra.mxu3 %v290_v12  ;;  %185 = vmatpush.bf16.msra.mxu1 %v290_v12 }
  0x1a   :  { %166 = vmatpush.bf16.msra.mxu0 %v282_v15  ;;  %300 = vmatpush.bf16.msra.mxu2 %v282_v15 }
  0x1b   :  { %307 = vmatpush.bf16.msra.mxu3 %v289_v14  ;;  %186 = vmatpush.bf16.msra.mxu1 %v289_v14 }
  0x1e   :  { %276 = vmatmul.msk.bf16.vlgmr.msra.gmra.mxu3 %vm149_vm1, %v222_v20  ;;  %167 = vmatpush.bf16.msra.mxu0 %v281_v21 }
  0x1f   :  { %275 = vmatmul.msk.bf16.vlgmr.msra.gmra.mxu1 %vm149_vm1, %v214_v24  ;;  %301 = vmatpush.bf16.msra.mxu2 %v281_v21 }
  0x21   :  { %168 = vmatmul.bf16.vlgmr.msra.gmra.mxu0 %v210_v27 }
  0x22   :  { %173 = vmatmul.bf16.vlgmr.msra.gmra.mxu2 %v218_v28 }
  0x9c   :  { %v188_v31 = vpop.f32.mrf.mxu1 }
  0x9e   :  { %v169_v30 = vpop.f32.mrf.mxu0 }
  0x9f   :  { %v170_v32 = vadd.f32 %v308_v29, %v169_v30 }
  0xa1   :  { %v189_v33 = vadd.f32 %v188_v31, %v170_v32  ;;  %v193_v34 = vpop.f32.mrf.mxu3 }
  0xa3   :  { %199 = vst.msk [vmem:[%s417_s3] sm:$0xff] %vm198_vm2, %v189_v33 }
  0xa4   :  { %v190_v40 = vpop.f32.mrf.mxu1 }
  0xa5   :  { %v174_v35 = vpop.f32.mrf.mxu2 }
  0xa6   :  { %v175_v36 = vadd.f32 %v308_v29, %v174_v35  ;;  %v171_v37 = vpop.f32.mrf.mxu0 }
  0xa7   :  { %v172_v38 = vadd.f32 %v308_v29, %v171_v37 }
  0xa8   :  { %v194_v39 = vadd.f32 %v193_v34, %v175_v36 }
  0xa9   :  { %v191_v41 = vadd.f32 %v190_v40, %v172_v38  ;;  %v195_v44 = vpop.f32.mrf.mxu3 }
  0xaa   :  { %201 = vst.msk [vmem:[%s417_s3 + $0x10] sm:$0xff] %vm198_vm2, %v194_v39 }
  0xab   :  { %200 = vst.msk [vmem:[%s417_s3 + $0x8] sm:$0xff] %vm198_vm2, %v191_v41 }
  0xad   :  { %v176_v42 = vpop.f32.mrf.mxu2 }
  0xae   :  { %v177_v43 = vadd.f32 %v308_v29, %v176_v42 }
  0xb0   :  { %v196_v45 = vadd.f32 %v195_v44, %v177_v43 }
  0xb2   :  { %202 = vst.msk [vmem:[%s417_s3 + $0x18] sm:$0xff] %vm198_vm2, %v196_v45 }

// kernel: facebox_extractor_forward.31
= control target key start
LH: loop header
LB: loop body
LE: loop exit
PB: predicated region body
PF: predicated region fallthrough
CT: control target
= control target key end

     0   :  { %s266_s0 = inlined_call_operand.vmem [shape: f32[2,6,6,128], index: 0, kind: input, shape index: {}]   ;;  %s267_s1 = inlined_call_operand.vmem [shape: f32[2,4,4,128], index: 1, kind: output, shape index: {}]  }
   0x1   :  { %v8_v0 = vld [vmem:[%s266_s0] sm:$0x3f]  ;;  %v9_v1 = vld [vmem:[%s266_s0 + $0x8] sm:$0x3f]  ;;  %v175_v2 = vld [vmem:[%s266_s0 + $0x10] sm:$0x3f] }
   0x2   :  { %v28_v3 = vrot.slane %v8_v0, 1  ;;  %v29_v4 = vrot.slane %v9_v1, 1  ;;  %v30_v5 = vrot.slane %v175_v2, 1  ;;  %v52_v6 = vrot.slane %v8_v0, 2  ;;  %v11_v7 = vld [vmem:[%s266_s0 + $0x18] sm:$0x3f] }
   0x3   :  { %v53_v8 = vrot.slane %v9_v1, 2  ;;  %v182_v9 = vrot.slane %v175_v2, 2  ;;  %v184_v10 = vrot.slane %v11_v7, 1  ;;  %v186_v11 = vrot.slane %v11_v7, 2  ;;  %v191_v12 = vld [vmem:[%s266_s0 + $0x20] sm:$0x3f] }
   0x4   :  { %v44_v13 = vmax.f32 %v8_v0, %v28_v3  ;;  %v45_v14 = vmax.f32 %v9_v1, %v29_v4  ;;  %v46_v15 = vmax.f32 %v175_v2, %v30_v5  ;;  %v86_v16 = vrot.slane %v191_v12, 1  ;;  %v198_v17 = vld [vmem:[%s266_s0 + $0x28] sm:$0x3f]  ;;  %v14_v18 = vld [vmem:[%s266_s0 + $0x30] sm:$0x3f] }
   0x5   :  { %v47_v19 = vmax.f32 %v11_v7, %v184_v10  ;;  %v98_v20 = vrot.slane %v191_v12, 2  ;;  %v120_v21 = vrot.slane %v198_v17, 1  ;;  %v132_v22 = vrot.slane %v198_v17, 2  ;;  %v15_v23 = vld [vmem:[%s266_s0 + $0x38] sm:$0x3f] }
   0x6   :  { %v68_v24 = vmax.f32 %v44_v13, %v52_v6  ;;  %v69_v25 = vmax.f32 %v45_v14, %v53_v8  ;;  %v70_v26 = vmax.f32 %v46_v15, %v182_v9  ;;  %v214_v27 = vld [vmem:[%s266_s0 + $0x40] sm:$0x3f]  ;;  %v32_v28 = vrot.slane %v14_v18, 1  ;;  %v17_v37 = vld [vmem:[%s266_s0 + $0x48] sm:$0x3f] }
   0x7   :  { %v71_v29 = vmax.f32 %v47_v19, %v186_v11  ;;  %v33_v30 = vrot.slane %v15_v23, 1  ;;  %v34_v31 = vrot.slane %v214_v27, 1  ;;  %v56_v32 = vrot.slane %v14_v18, 2  ;;  %v18_v62 = vld [vmem:[%s266_s0 + $0x50] sm:$0x3f] }
   0x8   :  { %v76_v33 = vmax.f32 %v68_v24, %v9_v1  ;;  %v77_v34 = vmax.f32 %v69_v25, %v175_v2  ;;  %v78_v35 = vmax.f32 %v70_v26, %v11_v7  ;;  %v48_v36 = vmax.f32 %v14_v18, %v32_v28 }
   0x9   :  { %v79_v38 = vmax.f32 %v71_v29, %v191_v12  ;;  %v49_v39 = vmax.f32 %v15_v23, %v33_v30  ;;  %v50_v40 = vmax.f32 %v214_v27, %v34_v31  ;;  %v57_v41 = vrot.slane %v15_v23, 2 }
   0xa   :  { %v90_v42 = vmax.f32 %v76_v33, %v29_v4  ;;  %v91_v43 = vmax.f32 %v77_v34, %v30_v5  ;;  %v92_v44 = vmax.f32 %v78_v35, %v184_v10  ;;  %v58_v45 = vrot.slane %v214_v27, 2 }
   0xb   :  { %v93_v46 = vmax.f32 %v79_v38, %v86_v16  ;;  %v72_v47 = vmax.f32 %v48_v36, %v56_v32  ;;  %v73_v48 = vmax.f32 %v49_v39, %v57_v41  ;;  %v35_v49 = vrot.slane %v17_v37, 1 }
   0xc   :  { %v102_v50 = vmax.f32 %v90_v42, %v53_v8  ;;  %v103_v51 = vmax.f32 %v91_v43, %v182_v9  ;;  %v104_v52 = vmax.f32 %v92_v44, %v186_v11  ;;  %v74_v53 = vmax.f32 %v50_v40, %v58_v45 }
   0xd   :  { %v105_v54 = vmax.f32 %v93_v46, %v98_v20  ;;  %v80_v55 = vmax.f32 %v72_v47, %v15_v23  ;;  %v51_v56 = vmax.f32 %v17_v37, %v35_v49  ;;  %v59_v57 = vrot.slane %v17_v37, 2 }
   0xe   :  { %v110_v58 = vmax.f32 %v102_v50, %v175_v2  ;;  %v111_v59 = vmax.f32 %v103_v51, %v11_v7  ;;  %v112_v60 = vmax.f32 %v104_v52, %v191_v12  ;;  %v81_v61 = vmax.f32 %v73_v48, %v214_v27 }
   0xf   :  { %v113_v63 = vmax.f32 %v105_v54, %v198_v17  ;;  %v94_v0 = vmax.f32 %v80_v55, %v33_v30  ;;  %v75_v1 = vmax.f32 %v51_v56, %v59_v57  ;;  %v82_v3 = vmax.f32 %v74_v53, %v17_v37 }
  0x10   :  { %v124_v4 = vmax.f32 %v110_v58, %v30_v5  ;;  %v125_v6 = vmax.f32 %v111_v59, %v184_v10  ;;  %v126_v8 = vmax.f32 %v112_v60, %v86_v16  ;;  %v95_v13 = vmax.f32 %v81_v61, %v34_v31  ;;  %v19_v5 = vld [vmem:[%s266_s0 + $0x58] sm:$0x3f] }
  0x11   :  { %v127_v2 = vmax.f32 %v113_v63, %v120_v21  ;;  %v106_v7 = vmax.f32 %v94_v0, %v57_v41  ;;  %v83_v14 = vmax.f32 %v75_v1, %v18_v62  ;;  %v87_v12 = vrot.slane %v18_v62, 1 }
  0x12   :  { %v136_v15 = vmax.f32 %v124_v4, %v182_v9  ;;  %v137_v18 = vmax.f32 %v125_v6, %v186_v11  ;;  %v138_v19 = vmax.f32 %v126_v8, %v98_v20  ;;  %v107_v23 = vmax.f32 %v95_v13, %v58_v45 }
  0x13   :  { %v139_v24 = vmax.f32 %v127_v2, %v132_v22  ;;  %v114_v17 = vmax.f32 %v106_v7, %v214_v27  ;;  %v96_v25 = vmax.f32 %v82_v3, %v35_v49  ;;  %v97_v26 = vmax.f32 %v83_v14, %v87_v12 }
  0x14   :  { %144 = vst [vmem:[%s267_s1] sm:$0xf] %v136_v15  ;;  %v115_v10 = vmax.f32 %v107_v23, %v17_v37  ;;  %v99_v16 = vrot.slane %v18_v62, 2  ;;  %v121_v22 = vrot.slane %v19_v5, 1  ;;  %v133_v32 = vrot.slane %v19_v5, 2 }
  0x15   :  { %145 = vst [vmem:[%s267_s1 + $0x4] sm:$0xf] %v137_v18  ;;  %v128_v9 = vmax.f32 %v114_v17, %v34_v31  ;;  %v108_v11 = vmax.f32 %v96_v25, %v59_v57 }
  0x16   :  { %146 = vst [vmem:[%s267_s1 + $0x8] sm:$0xf] %v138_v19  ;;  %v129_v20 = vmax.f32 %v115_v10, %v35_v49  ;;  %v109_v21 = vmax.f32 %v97_v26, %v99_v16 }
  0x17   :  { %147 = vst [vmem:[%s267_s1 + $0xc] sm:$0xf] %v139_v24  ;;  %v140_v27 = vmax.f32 %v128_v9, %v58_v45  ;;  %v116_v28 = vmax.f32 %v108_v11, %v18_v62 }
  0x18   :  { %v141_v29 = vmax.f32 %v129_v20, %v59_v57  ;;  %v117_v30 = vmax.f32 %v109_v21, %v19_v5 }
  0x19   :  { %148 = vst [vmem:[%s267_s1 + $0x10] sm:$0xf] %v140_v27  ;;  %v130_v31 = vmax.f32 %v116_v28, %v87_v12 }
  0x1a   :  { %149 = vst [vmem:[%s267_s1 + $0x14] sm:$0xf] %v141_v29  ;;  %v131_v33 = vmax.f32 %v117_v30, %v121_v22 }
  0x1b   :  { %v142_v34 = vmax.f32 %v130_v31, %v99_v16 }
  0x1c   :  { %v143_v35 = vmax.f32 %v131_v33, %v133_v32 }
  0x1d   :  { %150 = vst [vmem:[%s267_s1 + $0x18] sm:$0xf] %v142_v34 }
  0x1e   :  { %151 = vst [vmem:[%s267_s1 + $0x1c] sm:$0xf] %v143_v35 }

// kernel: facebox_extractor_forward.35
= control target key start
LH: loop header
LB: loop body
LE: loop exit
PB: predicated region body
PF: predicated region fallthrough
CT: control target
= control target key end

     0   :  { %vm201_vm0 = vcmask 261120   ;;  %s535_s1 = inlined_call_operand.vmem [shape: bf16[288,32], index: 1, kind: input, shape index: {}]   ;;  %s536_s0 = inlined_call_operand.vmem [shape: bf16[32,288], index: 0, kind: input, shape index: {}]   ;;  %s537_s2 = inlined_call_operand.vmem [shape: f32[1,32], index: 2, kind: input, shape index: {}]   ;;  %s538_s3 = inlined_call_operand.vmem [shape: f32[32,32], index: 3, kind: output, shape index: {}]  }
   0x1   :  { %v384_v0 = vld [vmem:[%s535_s1 + $0x38] sm:$0xff]  ;;  %v383_v2 = vld [vmem:[%s535_s1 + $0x30] sm:$0xff]  ;;  %v394_v3 = vld [vmem:[%s535_s1 + $0x88] sm:$0xff] }
   0x2   :  { %v392_v1 = vld [vmem:[%s535_s1 + $0x78] sm:$0xff]  ;;  %208 = vmatpush.bf16.msra.mxu0 %v384_v0  ;;  %395 = vmatpush.bf16.msra.mxu3 %v384_v0  ;;  %v391_v4 = vld [vmem:[%s535_s1 + $0x70] sm:$0xff]  ;;  %v393_v5 = vld [vmem:[%s535_s1 + $0x80] sm:$0xff] }
   0x3   :  { %227 = vmatpush.bf16.msra.mxu1 %v392_v1  ;;  %252 = vmatpush.bf16.msra.mxu2 %v394_v3  ;;  %v283_v6 = vld [vmem:[%s536_s0 + $0x8] sm:$0xf]  ;;  %v373_v7 = vld [vmem:[%s536_s0 + $0x10] sm:$0xf0]  ;;  %v381_v11 = vld [vmem:[%s535_s1 + $0x20] sm:$0xff] }
   0x4   :  { %v382_v8 = vld [vmem:[%s535_s1 + $0x28] sm:$0xff]  ;;  %v284_v10 = vor.u32 %v373_v7, %v283_v6  ;;  %v389_v12 = vld [vmem:[%s535_s1 + $0x60] sm:$0xff]  ;;  %v380_v13 = vld [vmem:[%s535_s1 + $0x18] sm:$0xff] }
   0x5   :  { %v390_v9 = vld [vmem:[%s535_s1 + $0x68] sm:$0xff]  ;;  %v388_v14 = vld [vmem:[%s535_s1 + $0x58] sm:$0xff]  ;;  %v379_v15 = vld [vmem:[%s535_s1 + $0x10] sm:$0xff] }
   0x6   :  { %209 = vmatpush.bf16.msra.mxu0 %v383_v2  ;;  %396 = vmatpush.bf16.msra.mxu3 %v383_v2  ;;  %v387_v16 = vld [vmem:[%s535_s1 + $0x50] sm:$0xff]  ;;  %v295_v17 = vld [vmem:[%s536_s0 + $0x20] sm:$0xf]  ;;  %v376_v18 = vld [vmem:[%s536_s0 + $0x28] sm:$0xf0] }
   0x7   :  { %228 = vmatpush.bf16.msra.mxu1 %v391_v4  ;;  %253 = vmatpush.bf16.msra.mxu2 %v393_v5  ;;  %v378_v19 = vld [vmem:[%s535_s1 + $0x8] sm:$0xff]  ;;  %v296_v21 = vor.u32 %v376_v18, %v295_v17  ;;  %v377_v22 = vld [vmem:[%s535_s1] sm:$0xff]  ;;  %v287_v25 = vld [vmem:[%s536_s0 + $0x18] sm:$0xf] }
   0x8   :  { %v386_v20 = vld [vmem:[%s535_s1 + $0x48] sm:$0xff]  ;;  %v275_v23 = vld [vmem:[%s536_s0] sm:$0xf]  ;;  %v375_v26 = vld [vmem:[%s536_s0 + $0x20] sm:$0xf0] }
   0x9   :  { %v372_v24 = vld [vmem:[%s536_s0 + $0x8] sm:$0xf0]  ;;  %v385_v27 = vld [vmem:[%s535_s1 + $0x40] sm:$0xff]  ;;  %v277_v29 = vld [vmem:[%s536_s0 + $0xc] sm:$0xf0]  ;;  %v288_v31 = vor.u32 %v375_v26, %v287_v25 }
   0xa   :  { %210 = vmatpush.bf16.msra.mxu0 %v382_v8  ;;  %397 = vmatpush.bf16.msra.mxu3 %v382_v8  ;;  %v371_v28 = vld [vmem:[%s536_s0 + $0x4] sm:$0xf]  ;;  %v276_v30 = vor.u32 %v372_v24, %v275_v23  ;;  %v374_v33 = vld [vmem:[%s536_s0 + $0x1c] sm:$0xf]  ;;  %v289_v34 = vld [vmem:[%s536_s0 + $0x24] sm:$0xf0] }
   0xb   :  { %229 = vmatpush.bf16.msra.mxu1 %v390_v9  ;;  %369 = vmatmul.msk.bf16.vlgmr.msra.gmra.mxu2 %vm201_vm0, %v284_v10  ;;  %v280_v32 = vor.u32 %v371_v28, %v277_v29  ;;  %v292_v35 = vor.u32 %v374_v33, %v289_v34  ;;  %v403_v37 = vld [vmem:[%s537_s2] ss:$0 sm:$0xff] }
   0xe   :  { %211 = vmatpush.bf16.msra.mxu0 %v381_v11  ;;  %398 = vmatpush.bf16.msra.mxu3 %v381_v11 }
   0xf   :  { %230 = vmatpush.bf16.msra.mxu1 %v389_v12 }
  0x12   :  { %212 = vmatpush.bf16.msra.mxu0 %v380_v13  ;;  %399 = vmatpush.bf16.msra.mxu3 %v380_v13 }
  0x13   :  { %231 = vmatpush.bf16.msra.mxu1 %v388_v14 }
  0x16   :  { %213 = vmatpush.bf16.msra.mxu0 %v379_v15  ;;  %400 = vmatpush.bf16.msra.mxu3 %v379_v15 }
  0x17   :  { %232 = vmatpush.bf16.msra.mxu1 %v387_v16 }
  0x1a   :  { %214 = vmatpush.bf16.msra.mxu0 %v378_v19  ;;  %401 = vmatpush.bf16.msra.mxu3 %v378_v19 }
  0x1b   :  { %233 = vmatpush.bf16.msra.mxu1 %v386_v20  ;;  %370 = vmatmul.msk.bf16.gmra.mxu2 %vm201_vm0, %v296_v21 }
  0x1e   :  { %215 = vmatpush.bf16.msra.mxu0 %v377_v22  ;;  %402 = vmatpush.bf16.msra.mxu3 %v377_v22 }
  0x1f   :  { %234 = vmatpush.bf16.msra.mxu1 %v385_v27 }
  0x21   :  { %216 = vmatmul.bf16.vlgmr.msra.gmra.mxu0 %v276_v30  ;;  %221 = vmatmul.bf16.vlgmr.msra.gmra.mxu3 %v288_v31 }
  0x22   :  { %235 = vmatmul.bf16.vlgmr.msra.gmra.mxu1 %v280_v32 }
  0x32   :  { %240 = vmatmul.bf16.gmra.mxu1 %v292_v35 }
  0x8e   :  { %v255_v36 = vpop.f32.mrf.mxu2 }
  0x96   :  { %v257_v43 = vpop.f32.mrf.mxu2 }
  0x9e   :  { %v217_v38 = vpop.f32.mrf.mxu0  ;;  %v260_v51 = vpop.f32.mrf.mxu2 }
  0x9f   :  { %v218_v39 = vadd.f32 %v403_v37, %v217_v38  ;;  %v236_v40 = vpop.f32.mrf.mxu1 }
  0xa1   :  { %v237_v41 = vadd.f32 %v236_v40, %v218_v39 }
  0xa3   :  { %v256_v42 = vadd.f32 %v255_v36, %v237_v41 }
  0xa4   :  { %v222_v47 = vpop.f32.mrf.mxu3 }
  0xa5   :  { %265 = vst.msk [vmem:[%s538_s3] sm:$0xff] %vm201_vm0, %v256_v42  ;;  %v223_v50 = vadd.f32 %v403_v37, %v222_v47 }
  0xa6   :  { %v219_v44 = vpop.f32.mrf.mxu0  ;;  %v262_v59 = vpop.f32.mrf.mxu2 }
  0xa7   :  { %v220_v45 = vadd.f32 %v403_v37, %v219_v44  ;;  %v238_v46 = vpop.f32.mrf.mxu1 }
  0xa9   :  { %v239_v48 = vadd.f32 %v238_v46, %v220_v45 }
  0xab   :  { %v258_v49 = vadd.f32 %v257_v43, %v239_v48 }
  0xac   :  { %v224_v55 = vpop.f32.mrf.mxu3 }
  0xad   :  { %266 = vst.msk [vmem:[%s538_s3 + $0x8] sm:$0xff] %vm201_vm0, %v258_v49  ;;  %v225_v56 = vadd.f32 %v403_v37, %v224_v55 }
  0xaf   :  { %v241_v52 = vpop.f32.mrf.mxu1 }
  0xb0   :  { %v242_v53 = vadd.f32 %v241_v52, %v223_v50 }
  0xb2   :  { %v261_v54 = vadd.f32 %v260_v51, %v242_v53 }
  0xb4   :  { %267 = vst.msk [vmem:[%s538_s3 + $0x10] sm:$0xff] %vm201_vm0, %v261_v54 }
  0xb7   :  { %v243_v57 = vpop.f32.mrf.mxu1 }
  0xb8   :  { %v244_v58 = vadd.f32 %v243_v57, %v225_v56 }
  0xba   :  { %v263_v60 = vadd.f32 %v262_v59, %v244_v58 }
  0xbc   :  { %268 = vst.msk [vmem:[%s538_s3 + $0x18] sm:$0xff] %vm201_vm0, %v263_v60 }

// kernel: facebox_extractor_forward.32
= control target key start
LH: loop header
LB: loop body
LE: loop exit
PB: predicated region body
PF: predicated region fallthrough
CT: control target
= control target key end

     0   :  { %vm117_vm0 = vcmask 261120   ;;  %s250_s1 = inlined_call_operand.vmem [shape: bf16[128,32], index: 1, kind: input, shape index: {}]   ;;  %s251_s2 = inlined_call_operand.vmem [shape: f32[1,32], index: 2, kind: input, shape index: {}]   ;;  %s252_s0 = inlined_call_operand.vmem [shape: bf16[32,128], index: 0, kind: input, shape index: {}]   ;;  %s253_s3 = inlined_call_operand.vmem [shape: f32[32,32], index: 3, kind: output, shape index: {}]  }
   0x1   :  { %v175_v0 = vld [vmem:[%s250_s1 + $0x38] sm:$0xff]  ;;  %v174_v1 = vld [vmem:[%s250_s1 + $0x30] sm:$0xff]  ;;  %v173_v2 = vld [vmem:[%s250_s1 + $0x28] sm:$0xff] }
   0x2   :  { %98 = vmatpush.bf16.msra.mxu0 %v175_v0  ;;  %176 = vmatpush.bf16.msra.mxu1 %v175_v0  ;;  %v172_v3 = vld [vmem:[%s250_s1 + $0x20] sm:$0xff]  ;;  %v171_v4 = vld [vmem:[%s250_s1 + $0x18] sm:$0xff]  ;;  %v170_v5 = vld [vmem:[%s250_s1 + $0x10] sm:$0xff] }
   0x3   :  { %v169_v6 = vld [vmem:[%s250_s1 + $0x8] sm:$0xff]  ;;  %v168_v7 = vld [vmem:[%s250_s1] sm:$0xff] }
   0x4   :  { %v166_v8 = vld [vmem:[%s252_s0] sm:$0xff]  ;;  %v167_v9 = vld [vmem:[%s252_s0 + $0x8] sm:$0xff] }
   0x5   :  { %v184_v10 = vld [vmem:[%s251_s2] ss:$0 sm:$0xff] }
   0x6   :  { %99 = vmatpush.bf16.msra.mxu0 %v174_v1  ;;  %177 = vmatpush.bf16.msra.mxu1 %v174_v1 }
   0xa   :  { %100 = vmatpush.bf16.msra.mxu0 %v173_v2  ;;  %178 = vmatpush.bf16.msra.mxu1 %v173_v2 }
   0xe   :  { %101 = vmatpush.bf16.msra.mxu0 %v172_v3  ;;  %179 = vmatpush.bf16.msra.mxu1 %v172_v3 }
  0x12   :  { %102 = vmatpush.bf16.msra.mxu0 %v171_v4  ;;  %180 = vmatpush.bf16.msra.mxu1 %v171_v4 }
  0x16   :  { %103 = vmatpush.bf16.msra.mxu0 %v170_v5  ;;  %181 = vmatpush.bf16.msra.mxu1 %v170_v5 }
  0x1a   :  { %104 = vmatpush.bf16.msra.mxu0 %v169_v6  ;;  %182 = vmatpush.bf16.msra.mxu1 %v169_v6 }
  0x1e   :  { %105 = vmatpush.bf16.msra.mxu0 %v168_v7  ;;  %183 = vmatpush.bf16.msra.mxu1 %v168_v7 }
  0x21   :  { %106 = vmatmul.bf16.vlgmr.msra.gmra.mxu0 %v166_v8  ;;  %111 = vmatmul.bf16.vlgmr.msra.gmra.mxu1 %v167_v9 }
  0x9e   :  { %v107_v11 = vpop.f32.mrf.mxu0  ;;  %v112_v12 = vpop.f32.mrf.mxu1 }
  0x9f   :  { %v108_v13 = vadd.f32 %v184_v10, %v107_v11  ;;  %v113_v14 = vadd.f32 %v184_v10, %v112_v12 }
  0xa1   :  { %118 = vst.msk [vmem:[%s253_s3] sm:$0xff] %vm117_vm0, %v108_v13 }
  0xa2   :  { %120 = vst.msk [vmem:[%s253_s3 + $0x10] sm:$0xff] %vm117_vm0, %v113_v14 }
  0xa6   :  { %v109_v15 = vpop.f32.mrf.mxu0  ;;  %v114_v16 = vpop.f32.mrf.mxu1 }
  0xa7   :  { %v110_v17 = vadd.f32 %v184_v10, %v109_v15  ;;  %v115_v18 = vadd.f32 %v184_v10, %v114_v16 }
  0xa9   :  { %119 = vst.msk [vmem:[%s253_s3 + $0x8] sm:$0xff] %vm117_vm0, %v110_v17 }
  0xaa   :  { %121 = vst.msk [vmem:[%s253_s3 + $0x18] sm:$0xff] %vm117_vm0, %v115_v18 }

// kernel: facebox_extractor_forward.48
= control target key start
LH: loop header
LB: loop body
LE: loop exit
PB: predicated region body
PF: predicated region fallthrough
CT: control target
= control target key end

     0   :  { %s249_s1 = inlined_call_operand.vmem [shape: bf16[128,128], index: 1, kind: input, shape index: {}]   ;;  %s250_s2 = inlined_call_operand.vmem [shape: f32[1,128], index: 2, kind: input, shape index: {}]   ;;  %s251_s0 = inlined_call_operand.vmem [shape: bf16[32,128], index: 0, kind: input, shape index: {}]   ;;  %s252_s3 = inlined_call_operand.vmem [shape: f32[32,128], index: 3, kind: output, shape index: {}]  }
   0x1   :  { %v174_v0 = vld [vmem:[%s249_s1 + $0x38] sm:$0xff]  ;;  %v173_v1 = vld [vmem:[%s249_s1 + $0x30] sm:$0xff]  ;;  %v172_v2 = vld [vmem:[%s249_s1 + $0x28] sm:$0xff] }
   0x2   :  { %98 = vmatpush.bf16.msra.mxu0 %v174_v0  ;;  %175 = vmatpush.bf16.msra.mxu1 %v174_v0  ;;  %v171_v3 = vld [vmem:[%s249_s1 + $0x20] sm:$0xff]  ;;  %v170_v4 = vld [vmem:[%s249_s1 + $0x18] sm:$0xff]  ;;  %v169_v5 = vld [vmem:[%s249_s1 + $0x10] sm:$0xff] }
   0x3   :  { %v168_v6 = vld [vmem:[%s249_s1 + $0x8] sm:$0xff]  ;;  %v167_v7 = vld [vmem:[%s249_s1] sm:$0xff] }
   0x4   :  { %v165_v8 = vld [vmem:[%s251_s0] sm:$0xff]  ;;  %v166_v9 = vld [vmem:[%s251_s0 + $0x8] sm:$0xff] }
   0x5   :  { %v183_v10 = vld [vmem:[%s250_s2] ss:$0 sm:$0xff] }
   0x6   :  { %99 = vmatpush.bf16.msra.mxu0 %v173_v1  ;;  %176 = vmatpush.bf16.msra.mxu1 %v173_v1 }
   0xa   :  { %100 = vmatpush.bf16.msra.mxu0 %v172_v2  ;;  %177 = vmatpush.bf16.msra.mxu1 %v172_v2 }
   0xe   :  { %101 = vmatpush.bf16.msra.mxu0 %v171_v3  ;;  %178 = vmatpush.bf16.msra.mxu1 %v171_v3 }
  0x12   :  { %102 = vmatpush.bf16.msra.mxu0 %v170_v4  ;;  %179 = vmatpush.bf16.msra.mxu1 %v170_v4 }
  0x16   :  { %103 = vmatpush.bf16.msra.mxu0 %v169_v5  ;;  %180 = vmatpush.bf16.msra.mxu1 %v169_v5 }
  0x1a   :  { %104 = vmatpush.bf16.msra.mxu0 %v168_v6  ;;  %181 = vmatpush.bf16.msra.mxu1 %v168_v6 }
  0x1e   :  { %105 = vmatpush.bf16.msra.mxu0 %v167_v7  ;;  %182 = vmatpush.bf16.msra.mxu1 %v167_v7 }
  0x21   :  { %106 = vmatmul.bf16.vlgmr.msra.gmra.mxu0 %v165_v8  ;;  %111 = vmatmul.bf16.vlgmr.msra.gmra.mxu1 %v166_v9 }
  0x9e   :  { %v107_v11 = vpop.f32.mrf.mxu0  ;;  %v112_v12 = vpop.f32.mrf.mxu1 }
  0x9f   :  { %v108_v13 = vadd.f32 %v183_v10, %v107_v11  ;;  %v113_v14 = vadd.f32 %v183_v10, %v112_v12 }
  0xa1   :  { %117 = vst [vmem:[%s252_s3] sm:$0xff] %v108_v13 }
  0xa2   :  { %119 = vst [vmem:[%s252_s3 + $0x10] sm:$0xff] %v113_v14 }
  0xa6   :  { %v109_v15 = vpop.f32.mrf.mxu0  ;;  %v114_v16 = vpop.f32.mrf.mxu1 }
  0xa7   :  { %v110_v17 = vadd.f32 %v183_v10, %v109_v15  ;;  %v115_v18 = vadd.f32 %v183_v10, %v114_v16 }
  0xa9   :  { %118 = vst [vmem:[%s252_s3 + $0x8] sm:$0xff] %v110_v17 }
  0xaa   :  { %120 = vst [vmem:[%s252_s3 + $0x18] sm:$0xff] %v115_v18 }

// kernel: facebox_extractor_forward.49
= control target key start
LH: loop header
LB: loop body
LE: loop exit
PB: predicated region body
PF: predicated region fallthrough
CT: control target
= control target key end

     0   :  { %s2825_s1 = inlined_call_operand.vmem [shape: bf16[1152,256], index: 1, kind: input, shape index: {}]   ;;  %s2826_s0 = inlined_call_operand.vmem [shape: bf16[8,1152], index: 0, kind: input, shape index: {}]   ;;  %s2827_s2 = inlined_call_operand.vmem [shape: f32[1,256], index: 2, kind: input, shape index: {}]   ;;  %s2828_s3 = inlined_call_operand.vmem [shape: f32[8,256], index: 3, kind: output, shape index: {}]  }
   0x1   :  { %v1219_v0 = vld [vmem:[%s2825_s1 + $0x70] sm:$0xf]  ;;  %v1752_v1 = vld [vmem:[%s2825_s1 + $0x74] sm:$0xf0]  ;;  %v1211_v11 = vld [vmem:[%s2825_s1 + $0x60] sm:$0xf] }
   0x2   :  { %v1283_v2 = vld [vmem:[%s2825_s1 + $0xf0] sm:$0xf]  ;;  %v1220_v3 = vor.u32 %v1752_v1, %v1219_v0  ;;  %v1768_v4 = vld [vmem:[%s2825_s1 + $0xf4] sm:$0xf0]  ;;  %v1750_v13 = vld [vmem:[%s2825_s1 + $0x64] sm:$0xf0] }
   0x3   :  { %v1347_v5 = vld [vmem:[%s2825_s1 + $0x170] sm:$0xf]  ;;  %v1784_v6 = vld [vmem:[%s2825_s1 + $0x174] sm:$0xf0]  ;;  %v1284_v7 = vor.u32 %v1768_v4, %v1283_v2  ;;  %v1275_v14 = vld [vmem:[%s2825_s1 + $0xe0] sm:$0xf]  ;;  %v1212_v16 = vor.u32 %v1750_v13, %v1211_v11 }
   0x4   :  { %v1348_v8 = vor.u32 %v1784_v6, %v1347_v5  ;;  %v1411_v9 = vld [vmem:[%s2825_s1 + $0x1f0] sm:$0xf]  ;;  %v1800_v10 = vld [vmem:[%s2825_s1 + $0x1f4] sm:$0xf0]  ;;  %921 = vmatpush.bf16.msra.mxu0 %v1220_v3  ;;  %v1766_v15 = vld [vmem:[%s2825_s1 + $0xe4] sm:$0xf0] }
   0x5   :  { %v1412_v12 = vor.u32 %v1800_v10, %v1411_v9  ;;  %934 = vmatpush.bf16.msra.mxu1 %v1284_v7  ;;  %v1276_v17 = vor.u32 %v1766_v15, %v1275_v14  ;;  %v1339_v18 = vld [vmem:[%s2825_s1 + $0x160] sm:$0xf]  ;;  %v1782_v19 = vld [vmem:[%s2825_s1 + $0x164] sm:$0xf0]  ;;  %v1203_v23 = vld [vmem:[%s2825_s1 + $0x50] sm:$0xf] }
   0x6   :  { %947 = vmatpush.bf16.msra.mxu2 %v1348_v8  ;;  %v1403_v20 = vld [vmem:[%s2825_s1 + $0x1e0] sm:$0xf]  ;;  %v1340_v21 = vor.u32 %v1782_v19, %v1339_v18  ;;  %v1798_v22 = vld [vmem:[%s2825_s1 + $0x1e4] sm:$0xf0]  ;;  %v1748_v24 = vld [vmem:[%s2825_s1 + $0x54] sm:$0xf0] }
   0x7   :  { %960 = vmatpush.bf16.msra.mxu3 %v1412_v12  ;;  %v1404_v25 = vor.u32 %v1798_v22, %v1403_v20  ;;  %v1267_v26 = vld [vmem:[%s2825_s1 + $0xd0] sm:$0xf]  ;;  %v1764_v27 = vld [vmem:[%s2825_s1 + $0xd4] sm:$0xf0]  ;;  %v1204_v29 = vor.u32 %v1748_v24, %v1203_v23  ;;  %v1195_v35 = vld [vmem:[%s2825_s1 + $0x40] sm:$0xf] }
   0x8   :  { %v1331_v28 = vld [vmem:[%s2825_s1 + $0x150] sm:$0xf]  ;;  %922 = vmatpush.bf16.msra.mxu0 %v1212_v16  ;;  %v1780_v30 = vld [vmem:[%s2825_s1 + $0x154] sm:$0xf0]  ;;  %v1268_v33 = vor.u32 %v1764_v27, %v1267_v26  ;;  %v1746_v36 = vld [vmem:[%s2825_s1 + $0x44] sm:$0xf0] }
   0x9   :  { %v1395_v31 = vld [vmem:[%s2825_s1 + $0x1d0] sm:$0xf]  ;;  %v1796_v32 = vld [vmem:[%s2825_s1 + $0x1d4] sm:$0xf0]  ;;  %935 = vmatpush.bf16.msra.mxu1 %v1276_v17  ;;  %v1332_v34 = vor.u32 %v1780_v30, %v1331_v28  ;;  %v1259_v37 = vld [vmem:[%s2825_s1 + $0xc0] sm:$0xf]  ;;  %v1196_v44 = vor.u32 %v1746_v36, %v1195_v35 }
   0xa   :  { %948 = vmatpush.bf16.msra.mxu2 %v1340_v21  ;;  %v1396_v38 = vor.u32 %v1796_v32, %v1395_v31  ;;  %v1762_v39 = vld [vmem:[%s2825_s1 + $0xc4] sm:$0xf0]  ;;  %v1323_v40 = vld [vmem:[%s2825_s1 + $0x140] sm:$0xf]  ;;  %v1187_v47 = vld [vmem:[%s2825_s1 + $0x30] sm:$0xf] }
   0xb   :  { %961 = vmatpush.bf16.msra.mxu3 %v1404_v25  ;;  %v1778_v41 = vld [vmem:[%s2825_s1 + $0x144] sm:$0xf0]  ;;  %v1387_v42 = vld [vmem:[%s2825_s1 + $0x1c0] sm:$0xf]  ;;  %v1260_v45 = vor.u32 %v1762_v39, %v1259_v37  ;;  %v1744_v48 = vld [vmem:[%s2825_s1 + $0x34] sm:$0xf0] }
   0xc   :  { %v1794_v43 = vld [vmem:[%s2825_s1 + $0x1c4] sm:$0xf0]  ;;  %923 = vmatpush.bf16.msra.mxu0 %v1204_v29  ;;  %v1324_v46 = vor.u32 %v1778_v41, %v1323_v40  ;;  %v1251_v49 = vld [vmem:[%s2825_s1 + $0xb0] sm:$0xf]  ;;  %v1760_v51 = vld [vmem:[%s2825_s1 + $0xb4] sm:$0xf0]  ;;  %v1188_v56 = vor.u32 %v1744_v48, %v1187_v47 }
   0xd   :  { %936 = vmatpush.bf16.msra.mxu1 %v1268_v33  ;;  %v1388_v50 = vor.u32 %v1794_v43, %v1387_v42  ;;  %v1315_v52 = vld [vmem:[%s2825_s1 + $0x130] sm:$0xf]  ;;  %v1776_v53 = vld [vmem:[%s2825_s1 + $0x134] sm:$0xf0]  ;;  %v1252_v57 = vor.u32 %v1760_v51, %v1251_v49  ;;  %v1179_v59 = vld [vmem:[%s2825_s1 + $0x20] sm:$0xf] }
   0xe   :  { %949 = vmatpush.bf16.msra.mxu2 %v1332_v34  ;;  %v1379_v54 = vld [vmem:[%s2825_s1 + $0x1b0] sm:$0xf]  ;;  %v1792_v55 = vld [vmem:[%s2825_s1 + $0x1b4] sm:$0xf0]  ;;  %v1316_v58 = vor.u32 %v1776_v53, %v1315_v52  ;;  %v1742_v60 = vld [vmem:[%s2825_s1 + $0x24] sm:$0xf0] }
   0xf   :  { %962 = vmatpush.bf16.msra.mxu3 %v1396_v38  ;;  %v1243_v61 = vld [vmem:[%s2825_s1 + $0xa0] sm:$0xf]  ;;  %v1380_v62 = vor.u32 %v1792_v55, %v1379_v54  ;;  %v1758_v63 = vld [vmem:[%s2825_s1 + $0xa4] sm:$0xf0]  ;;  %v1180_v4 = vor.u32 %v1742_v60, %v1179_v59  ;;  %v1171_v7 = vld [vmem:[%s2825_s1 + $0x10] sm:$0xf] }
  0x10   :  { %924 = vmatpush.bf16.msra.mxu0 %v1196_v44  ;;  %v1307_v0 = vld [vmem:[%s2825_s1 + $0x120] sm:$0xf]  ;;  %v1774_v1 = vld [vmem:[%s2825_s1 + $0x124] sm:$0xf0]  ;;  %v1244_v5 = vor.u32 %v1758_v63, %v1243_v61  ;;  %v1740_v8 = vld [vmem:[%s2825_s1 + $0x14] sm:$0xf0] }
  0x11   :  { %937 = vmatpush.bf16.msra.mxu1 %v1260_v45  ;;  %v1371_v2 = vld [vmem:[%s2825_s1 + $0x1a0] sm:$0xf]  ;;  %v1790_v3 = vld [vmem:[%s2825_s1 + $0x1a4] sm:$0xf0]  ;;  %v1308_v6 = vor.u32 %v1774_v1, %v1307_v0  ;;  %v1235_v9 = vld [vmem:[%s2825_s1 + $0x90] sm:$0xf]  ;;  %v1172_v16 = vor.u32 %v1740_v8, %v1171_v7 }
  0x12   :  { %950 = vmatpush.bf16.msra.mxu2 %v1324_v46  ;;  %v1372_v10 = vor.u32 %v1790_v3, %v1371_v2  ;;  %v1756_v11 = vld [vmem:[%s2825_s1 + $0x94] sm:$0xf0]  ;;  %v1299_v12 = vld [vmem:[%s2825_s1 + $0x110] sm:$0xf]  ;;  %v1163_v17 = vld [vmem:[%s2825_s1] sm:$0xf] }
  0x13   :  { %963 = vmatpush.bf16.msra.mxu3 %v1388_v50  ;;  %v1772_v13 = vld [vmem:[%s2825_s1 + $0x114] sm:$0xf0]  ;;  %v1363_v14 = vld [vmem:[%s2825_s1 + $0x190] sm:$0xf]  ;;  %v1738_v18 = vld [vmem:[%s2825_s1 + $0x4] sm:$0xf0]  ;;  %v1236_v19 = vor.u32 %v1756_v11, %v1235_v9 }
  0x14   :  { %925 = vmatpush.bf16.msra.mxu0 %v1188_v56  ;;  %v1788_v15 = vld [vmem:[%s2825_s1 + $0x194] sm:$0xf0]  ;;  %v1300_v20 = vor.u32 %v1772_v13, %v1299_v12  ;;  %v1227_v21 = vld [vmem:[%s2825_s1 + $0x80] sm:$0xf]  ;;  %v1754_v22 = vld [vmem:[%s2825_s1 + $0x84] sm:$0xf0]  ;;  %v1164_v31 = vor.u32 %v1738_v18, %v1163_v17 }
  0x15   :  { %938 = vmatpush.bf16.msra.mxu1 %v1252_v57  ;;  %v1291_v23 = vld [vmem:[%s2825_s1 + $0x100] sm:$0xf]  ;;  %v1364_v24 = vor.u32 %v1788_v15, %v1363_v14  ;;  %v1770_v25 = vld [vmem:[%s2825_s1 + $0x104] sm:$0xf0]  ;;  %v1475_v26 = vld [vmem:[%s2825_s1 + $0x270] sm:$0xf]  ;;  %v1228_v35 = vor.u32 %v1754_v22, %v1227_v21 }
  0x16   :  { %951 = vmatpush.bf16.msra.mxu2 %v1316_v58  ;;  %v1816_v27 = vld [vmem:[%s2825_s1 + $0x274] sm:$0xf0]  ;;  %v1539_v28 = vld [vmem:[%s2825_s1 + $0x2f0] sm:$0xf]  ;;  %v1355_v33 = vld [vmem:[%s2825_s1 + $0x180] sm:$0xf]  ;;  %v1292_v36 = vor.u32 %v1770_v25, %v1291_v23 }
  0x17   :  { %964 = vmatpush.bf16.msra.mxu3 %v1380_v62  ;;  %v1832_v29 = vld [vmem:[%s2825_s1 + $0x2f4] sm:$0xf0]  ;;  %v1603_v30 = vld [vmem:[%s2825_s1 + $0x370] sm:$0xf]  ;;  %v1786_v34 = vld [vmem:[%s2825_s1 + $0x184] sm:$0xf0]  ;;  %v1476_v39 = vor.u32 %v1816_v27, %v1475_v26 }
  0x18   :  { %926 = vmatpush.bf16.msra.mxu0 %v1180_v4  ;;  %v1848_v32 = vld [vmem:[%s2825_s1 + $0x374] sm:$0xf0]  ;;  %v1667_v37 = vld [vmem:[%s2825_s1 + $0x3f0] sm:$0xf]  ;;  %v1540_v40 = vor.u32 %v1832_v29, %v1539_v28  ;;  %v1467_v41 = vld [vmem:[%s2825_s1 + $0x260] sm:$0xf]  ;;  %v1356_v43 = vor.u32 %v1786_v34, %v1355_v33 }
  0x19   :  { %939 = vmatpush.bf16.msra.mxu1 %v1244_v5  ;;  %v1864_v38 = vld [vmem:[%s2825_s1 + $0x3f4] sm:$0xf0]  ;;  %v1604_v42 = vor.u32 %v1848_v32, %v1603_v30  ;;  %v1814_v44 = vld [vmem:[%s2825_s1 + $0x264] sm:$0xf0]  ;;  %v1531_v45 = vld [vmem:[%s2825_s1 + $0x2e0] sm:$0xf] }
  0x1a   :  { %952 = vmatpush.bf16.msra.mxu2 %v1308_v6  ;;  %v1830_v46 = vld [vmem:[%s2825_s1 + $0x2e4] sm:$0xf0]  ;;  %v1668_v47 = vor.u32 %v1864_v38, %v1667_v37  ;;  %v1595_v48 = vld [vmem:[%s2825_s1 + $0x360] sm:$0xf]  ;;  %v1468_v52 = vor.u32 %v1814_v44, %v1467_v41  ;;  %v1459_v54 = vld [vmem:[%s2825_s1 + $0x250] sm:$0xf] }
  0x1b   :  { %965 = vmatpush.bf16.msra.mxu3 %v1372_v10  ;;  %v1846_v49 = vld [vmem:[%s2825_s1 + $0x364] sm:$0xf0]  ;;  %v1659_v50 = vld [vmem:[%s2825_s1 + $0x3e0] sm:$0xf]  ;;  %v1532_v53 = vor.u32 %v1830_v46, %v1531_v45  ;;  %v1812_v55 = vld [vmem:[%s2825_s1 + $0x254] sm:$0xf0] }
  0x1c   :  { %927 = vmatpush.bf16.msra.mxu0 %v1172_v16  ;;  %v1862_v51 = vld [vmem:[%s2825_s1 + $0x3e4] sm:$0xf0]  ;;  %v1596_v57 = vor.u32 %v1846_v49, %v1595_v48  ;;  %v1523_v58 = vld [vmem:[%s2825_s1 + $0x2d0] sm:$0xf]  ;;  %v1828_v59 = vld [vmem:[%s2825_s1 + $0x2d4] sm:$0xf0]  ;;  %v1460_v4 = vor.u32 %v1812_v55, %v1459_v54 }
  0x1d   :  { %940 = vmatpush.bf16.msra.mxu1 %v1236_v19  ;;  %v15_v56 = vld [vmem:[%s2826_s0 + $0x8] sm:$0xff]  ;;  %v14_v61 = vld [vmem:[%s2826_s0] sm:$0xff]  ;;  %v1660_v63 = vor.u32 %v1862_v51, %v1659_v50  ;;  %v1587_v0 = vld [vmem:[%s2825_s1 + $0x350] sm:$0xf]  ;;  %v1524_v9 = vor.u32 %v1828_v59, %v1523_v58 }
  0x1e   :  { %953 = vmatpush.bf16.msra.mxu2 %v1300_v20  ;;  %v176_v60 = vunpack.c.l.b16 %v15_v56  ;;  %v177_v62 = vunpack.c.h.b16 %v15_v56  ;;  %v1844_v1 = vld [vmem:[%s2825_s1 + $0x354] sm:$0xf0]  ;;  %v174_v2 = vunpack.c.l.b16 %v14_v61  ;;  %v175_v3 = vunpack.c.h.b16 %v14_v61  ;;  %v1651_v5 = vld [vmem:[%s2825_s1 + $0x3d0] sm:$0xf]  ;;  %v1451_v10 = vld [vmem:[%s2825_s1 + $0x240] sm:$0xf] }
  0x1f   :  { %966 = vmatpush.bf16.msra.mxu3 %v1364_v24  ;;  %v1860_v6 = vld [vmem:[%s2825_s1 + $0x3d4] sm:$0xf0]  ;;  %v1588_v13 = vor.u32 %v1844_v1, %v1587_v0  ;;  %v1810_v14 = vld [vmem:[%s2825_s1 + $0x244] sm:$0xf0]  ;;  %v1515_v15 = vld [vmem:[%s2825_s1 + $0x2c0] sm:$0xf] }
  0x20   :  { %928 = vmatpush.bf16.msra.mxu0 %v1164_v31  ;;  %v2171_v7 = vpack.c.b16 %v176_v60, %v176_v60  ;;  %v2173_v8 = vpack.c.b16 %v177_v62, %v177_v62  ;;  %v2178_v11 = vpack.c.b16 %v174_v2, %v174_v2  ;;  %v2180_v12 = vpack.c.b16 %v175_v3, %v175_v3  ;;  %v1826_v16 = vld [vmem:[%s2825_s1 + $0x2c4] sm:$0xf0]  ;;  %v1579_v18 = vld [vmem:[%s2825_s1 + $0x340] sm:$0xf]  ;;  %v1443_v24 = vld [vmem:[%s2825_s1 + $0x230] sm:$0xf] }
  0x21   :  { %941 = vmatpush.bf16.msra.mxu1 %v1228_v35  ;;  %v1652_v17 = vor.u32 %v1860_v6, %v1651_v5  ;;  %v1842_v19 = vld [vmem:[%s2825_s1 + $0x344] sm:$0xf0]  ;;  %v1643_v20 = vld [vmem:[%s2825_s1 + $0x3c0] sm:$0xf]  ;;  %v1452_v22 = vor.u32 %v1810_v14, %v1451_v10  ;;  %v1516_v23 = vor.u32 %v1826_v16, %v1515_v15  ;;  %v1808_v26 = vld [vmem:[%s2825_s1 + $0x234] sm:$0xf0] }
  0x22   :  { %954 = vmatpush.bf16.msra.mxu2 %v1292_v36  ;;  %v1858_v21 = vld [vmem:[%s2825_s1 + $0x3c4] sm:$0xf0]  ;;  %v1580_v25 = vor.u32 %v1842_v19, %v1579_v18  ;;  %v1507_v27 = vld [vmem:[%s2825_s1 + $0x2b0] sm:$0xf]  ;;  %v1824_v28 = vld [vmem:[%s2825_s1 + $0x2b4] sm:$0xf0]  ;;  %v1444_v34 = vor.u32 %v1808_v26, %v1443_v24 }
  0x23   :  { %967 = vmatpush.bf16.msra.mxu3 %v1356_v43  ;;  %929 = vmatmul.bf16.vlgmr.msra.gmra.mxu0 %v2178_v11  ;;  %v1644_v29 = vor.u32 %v1858_v21, %v1643_v20  ;;  %v1571_v30 = vld [vmem:[%s2825_s1 + $0x330] sm:$0xf]  ;;  %v1840_v31 = vld [vmem:[%s2825_s1 + $0x334] sm:$0xf0]  ;;  %v1508_v35 = vor.u32 %v1824_v28, %v1507_v27  ;;  %v1435_v36 = vld [vmem:[%s2825_s1 + $0x220] sm:$0xf] }
  0x24   :  { %973 = vmatpush.bf16.msrb.mxu0 %v1476_v39  ;;  %942 = vmatmul.bf16.vlgmr.msra.gmra.mxu1 %v2180_v12  ;;  %v1635_v32 = vld [vmem:[%s2825_s1 + $0x3b0] sm:$0xf]  ;;  %v1856_v33 = vld [vmem:[%s2825_s1 + $0x3b4] sm:$0xf0]  ;;  %v1572_v37 = vor.u32 %v1840_v31, %v1571_v30  ;;  %v1806_v38 = vld [vmem:[%s2825_s1 + $0x224] sm:$0xf0] }
  0x25   :  { %986 = vmatpush.bf16.msrb.mxu1 %v1540_v40  ;;  %955 = vmatmul.bf16.vlgmr.msra.gmra.mxu2 %v2171_v7  ;;  %v1499_v39 = vld [vmem:[%s2825_s1 + $0x2a0] sm:$0xf]  ;;  %v1822_v40 = vld [vmem:[%s2825_s1 + $0x2a4] sm:$0xf0]  ;;  %v1636_v41 = vor.u32 %v1856_v33, %v1635_v32  ;;  %v1436_v46 = vor.u32 %v1806_v38, %v1435_v36  ;;  %v1427_v48 = vld [vmem:[%s2825_s1 + $0x210] sm:$0xf] }
  0x26   :  { %999 = vmatpush.bf16.msrb.mxu2 %v1604_v42  ;;  %968 = vmatmul.bf16.vlgmr.msra.gmra.mxu3 %v2173_v8  ;;  %v1563_v42 = vld [vmem:[%s2825_s1 + $0x320] sm:$0xf]  ;;  %v1838_v43 = vld [vmem:[%s2825_s1 + $0x324] sm:$0xf0]  ;;  %v1804_v50 = vld [vmem:[%s2825_s1 + $0x214] sm:$0xf0] }
  0x27   :  { %1012 = vmatpush.bf16.msrb.mxu3 %v1668_v47  ;;  %v1627_v44 = vld [vmem:[%s2825_s1 + $0x3a0] sm:$0xf]  ;;  %v1854_v45 = vld [vmem:[%s2825_s1 + $0x3a4] sm:$0xf0]  ;;  %v1500_v47 = vor.u32 %v1822_v40, %v1499_v39  ;;  %v1564_v49 = vor.u32 %v1838_v43, %v1563_v42  ;;  %v1491_v51 = vld [vmem:[%s2825_s1 + $0x290] sm:$0xf]  ;;  %v1428_v60 = vor.u32 %v1804_v50, %v1427_v48 }
  0x28   :  { %974 = vmatpush.bf16.msrb.mxu0 %v1468_v52  ;;  %v1820_v52 = vld [vmem:[%s2825_s1 + $0x294] sm:$0xf0]  ;;  %v1555_v54 = vld [vmem:[%s2825_s1 + $0x310] sm:$0xf]  ;;  %v1419_v58 = vld [vmem:[%s2825_s1 + $0x200] sm:$0xf] }
  0x29   :  { %987 = vmatpush.bf16.msrb.mxu1 %v1532_v53  ;;  %v1628_v53 = vor.u32 %v1854_v45, %v1627_v44  ;;  %v1836_v55 = vld [vmem:[%s2825_s1 + $0x314] sm:$0xf0]  ;;  %v1619_v56 = vld [vmem:[%s2825_s1 + $0x390] sm:$0xf]  ;;  %v1802_v59 = vld [vmem:[%s2825_s1 + $0x204] sm:$0xf0]  ;;  %v1492_v61 = vor.u32 %v1820_v52, %v1491_v51 }
  0x2a   :  { %1000 = vmatpush.bf16.msrb.mxu2 %v1596_v57  ;;  %v1852_v57 = vld [vmem:[%s2825_s1 + $0x394] sm:$0xf0]  ;;  %v1483_v62 = vld [vmem:[%s2825_s1 + $0x280] sm:$0xf]  ;;  %v16_v0 = vld [vmem:[%s2826_s0 + $0x10] sm:$0xff]  ;;  %v1556_v1 = vor.u32 %v1836_v55, %v1555_v54 }
  0x2b   :  { %1013 = vmatpush.bf16.msrb.mxu3 %v1660_v63  ;;  %v1818_v63 = vld [vmem:[%s2825_s1 + $0x284] sm:$0xf0]  ;;  %v1547_v2 = vld [vmem:[%s2825_s1 + $0x300] sm:$0xf]  ;;  %v1620_v5 = vor.u32 %v1852_v57, %v1619_v56  ;;  %v1731_v6 = vld [vmem:[%s2825_s1 + $0x470] sm:$0xf]  ;;  %v178_v16 = vunpack.c.l.b16 %v16_v0  ;;  %v179_v26 = vunpack.c.h.b16 %v16_v0 }
  0x2c   :  { %975 = vmatpush.bf16.msrb.mxu0 %v1460_v4  ;;  %v1834_v3 = vld [vmem:[%s2825_s1 + $0x304] sm:$0xf0]  ;;  %v17_v4 = vld [vmem:[%s2826_s0 + $0x18] sm:$0xff]  ;;  %v1751_v10 = vld [vmem:[%s2825_s1 + $0x74] sm:$0xf]  ;;  %v1484_v18 = vor.u32 %v1818_v63, %v1483_v62 }
  0x2d   :  { %988 = vmatpush.bf16.msrb.mxu1 %v1524_v9  ;;  %v1880_v9 = vld [vmem:[%s2825_s1 + $0x474] sm:$0xf0]  ;;  %v1767_v14 = vld [vmem:[%s2825_s1 + $0xf4] sm:$0xf]  ;;  %v1285_v15 = vld [vmem:[%s2825_s1 + $0xf8] sm:$0xf0]  ;;  %v180_v21 = vunpack.c.l.b16 %v17_v4  ;;  %v2351_v36 = vpack.c.b16 %v178_v16, %v178_v16  ;;  %v2361_v43 = vpack.c.b16 %v179_v26, %v179_v26 }
  0x2e   :  { %1001 = vmatpush.bf16.msrb.mxu2 %v1588_v13  ;;  %v1221_v13 = vld [vmem:[%s2825_s1 + $0x78] sm:$0xf0]  ;;  %v1611_v19 = vld [vmem:[%s2825_s1 + $0x380] sm:$0xf]  ;;  %v1850_v20 = vld [vmem:[%s2825_s1 + $0x384] sm:$0xf0]  ;;  %v1288_v28 = vor.u32 %v1767_v14, %v1285_v15 }
  0x2f   :  { %1014 = vmatpush.bf16.msrb.mxu3 %v1652_v17  ;;  %v1420_v17 = vor.u32 %v1802_v59, %v1419_v58  ;;  %v1783_v24 = vld [vmem:[%s2825_s1 + $0x174] sm:$0xf]  ;;  %v1224_v27 = vor.u32 %v1751_v10, %v1221_v13  ;;  %v1878_v30 = vld [vmem:[%s2825_s1 + $0x464] sm:$0xf0]  ;;  %v1749_v31 = vld [vmem:[%s2825_s1 + $0x64] sm:$0xf]  ;;  %v1612_v32 = vor.u32 %v1850_v20, %v1611_v19  ;;  %v2353_v39 = vpack.c.b16 %v180_v21, %v180_v21 }
  0x30   :  { %976 = vmatpush.bf16.msrb.mxu0 %v1452_v22  ;;  %v1548_v22 = vor.u32 %v1834_v3, %v1547_v2  ;;  %v1213_v33 = vld [vmem:[%s2825_s1 + $0x68] sm:$0xf0]  ;;  %v1747_v48 = vld [vmem:[%s2825_s1 + $0x54] sm:$0xf]  ;;  %v1205_v50 = vld [vmem:[%s2825_s1 + $0x58] sm:$0xf0] }
  0x31   :  { %989 = vmatpush.bf16.msrb.mxu1 %v1516_v23  ;;  %v1732_v23 = vor.u32 %v1880_v9, %v1731_v6  ;;  %v1341_v42 = vld [vmem:[%s2825_s1 + $0x168] sm:$0xf0]  ;;  %v1216_v44 = vor.u32 %v1749_v31, %v1213_v33  ;;  %v1763_v51 = vld [vmem:[%s2825_s1 + $0xd4] sm:$0xf]  ;;  %v1269_v52 = vld [vmem:[%s2825_s1 + $0xd8] sm:$0xf0]  ;;  %v1208_v57 = vor.u32 %v1747_v48, %v1205_v50 }
  0x32   :  { %1002 = vmatpush.bf16.msrb.mxu2 %v1580_v25  ;;  %v1349_v25 = vld [vmem:[%s2825_s1 + $0x178] sm:$0xf0]  ;;  %v1779_v55 = vld [vmem:[%s2825_s1 + $0x154] sm:$0xf]  ;;  %v1272_v58 = vor.u32 %v1763_v51, %v1269_v52  ;;  %v1707_v59 = vld [vmem:[%s2825_s1 + $0x440] sm:$0xf] }
  0x33   :  { %1015 = vmatpush.bf16.msrb.mxu3 %v1644_v29  ;;  %v1723_v29 = vld [vmem:[%s2825_s1 + $0x460] sm:$0xf]  ;;  %v1352_v38 = vor.u32 %v1783_v24, %v1349_v25  ;;  %v1333_v56 = vld [vmem:[%s2825_s1 + $0x158] sm:$0xf0]  ;;  %v1197_v62 = vld [vmem:[%s2825_s1 + $0x48] sm:$0xf0] }
  0x34   :  { %977 = vmatpush.bf16.msrb.mxu0 %v1444_v34  ;;  %v1765_v34 = vld [vmem:[%s2825_s1 + $0xe4] sm:$0xf]  ;;  %v1724_v40 = vor.u32 %v1878_v30, %v1723_v29  ;;  %v1261_v0 = vld [vmem:[%s2825_s1 + $0xc8] sm:$0xf0]  ;;  %v1699_v9 = vld [vmem:[%s2825_s1 + $0x430] sm:$0xf] }
  0x35   :  { %990 = vmatpush.bf16.msrb.mxu1 %v1508_v35  ;;  %v1277_v35 = vld [vmem:[%s2825_s1 + $0xe8] sm:$0xf0]  ;;  %v1761_v63 = vld [vmem:[%s2825_s1 + $0xc4] sm:$0xf]  ;;  %v1872_v10 = vld [vmem:[%s2825_s1 + $0x434] sm:$0xf0] }
  0x36   :  { %1003 = vmatpush.bf16.msrb.mxu2 %v1572_v37  ;;  %v181_v37 = vunpack.c.h.b16 %v17_v4  ;;  %v1280_v45 = vor.u32 %v1765_v34, %v1277_v35  ;;  %v1777_v3 = vld [vmem:[%s2825_s1 + $0x144] sm:$0xf]  ;;  %v1325_v4 = vld [vmem:[%s2825_s1 + $0x148] sm:$0xf0]  ;;  %v1264_v6 = vor.u32 %v1761_v63, %v1261_v0  ;;  %v1743_v13 = vld [vmem:[%s2825_s1 + $0x34] sm:$0xf] }
  0x37   :  { %1016 = vmatpush.bf16.msrb.mxu3 %v1636_v41  ;;  %v1781_v41 = vld [vmem:[%s2825_s1 + $0x164] sm:$0xf]  ;;  %v1189_v14 = vld [vmem:[%s2825_s1 + $0x38] sm:$0xf0]  ;;  %v1759_v15 = vld [vmem:[%s2825_s1 + $0xb4] sm:$0xf] }
  0x38   :  { %978 = vmatpush.bf16.msrb.mxu0 %v1436_v46  ;;  %v1715_v46 = vld [vmem:[%s2825_s1 + $0x450] sm:$0xf]  ;;  %v1253_v16 = vld [vmem:[%s2825_s1 + $0xb8] sm:$0xf0]  ;;  %v1775_v19 = vld [vmem:[%s2825_s1 + $0x134] sm:$0xf]  ;;  %v1192_v21 = vor.u32 %v1743_v13, %v1189_v14 }
  0x39   :  { %991 = vmatpush.bf16.msrb.mxu1 %v1500_v47  ;;  %v1876_v47 = vld [vmem:[%s2825_s1 + $0x454] sm:$0xf0]  ;;  %v1317_v20 = vld [vmem:[%s2825_s1 + $0x138] sm:$0xf0]  ;;  %v1870_v24 = vld [vmem:[%s2825_s1 + $0x424] sm:$0xf0] }
  0x3a   :  { %1004 = vmatpush.bf16.msrb.mxu2 %v1564_v49  ;;  %v2373_v49 = vpack.c.b16 %v181_v37, %v181_v37  ;;  %v1716_v54 = vor.u32 %v1876_v47, %v1715_v46  ;;  %v1741_v25 = vld [vmem:[%s2825_s1 + $0x24] sm:$0xf]  ;;  %v1181_v26 = vld [vmem:[%s2825_s1 + $0x28] sm:$0xf0]  ;;  %v1320_v29 = vor.u32 %v1775_v19, %v1317_v20  ;;  %v1683_v35 = vld [vmem:[%s2825_s1 + $0x410] sm:$0xf] }
  0x3b   :  { %1017 = vmatpush.bf16.msrb.mxu3 %v1628_v53  ;;  %v1344_v53 = vor.u32 %v1781_v41, %v1341_v42  ;;  %v1773_v31 = vld [vmem:[%s2825_s1 + $0x124] sm:$0xf]  ;;  %v1184_v33 = vor.u32 %v1741_v25, %v1181_v26  ;;  %v1868_v37 = vld [vmem:[%s2825_s1 + $0x414] sm:$0xf0]  ;;  %v1755_v41 = vld [vmem:[%s2825_s1 + $0x94] sm:$0xf] }
  0x3c   :  { %979 = vmatpush.bf16.msrb.mxu0 %v1428_v60  ;;  %v1874_v60 = vld [vmem:[%s2825_s1 + $0x444] sm:$0xf0]  ;;  %v1237_v42 = vld [vmem:[%s2825_s1 + $0x98] sm:$0xf0]  ;;  %v1684_v46 = vor.u32 %v1868_v37, %v1683_v35  ;;  %v1675_v48 = vld [vmem:[%s2825_s1 + $0x400] sm:$0xf] }
  0x3d   :  { %992 = vmatpush.bf16.msrb.mxu1 %v1492_v61  ;;  %v1745_v61 = vld [vmem:[%s2825_s1 + $0x44] sm:$0xf]  ;;  %v1708_v2 = vor.u32 %v1874_v60, %v1707_v59  ;;  %v1301_v47 = vld [vmem:[%s2825_s1 + $0x118] sm:$0xf0]  ;;  %v18_v50 = vld [vmem:[%s2826_s0 + $0x20] sm:$0xf]  ;;  %v1240_v52 = vor.u32 %v1755_v41, %v1237_v42 }
  0x3e   :  { %1005 = vmatpush.bf16.msrb.mxu2 %v1556_v1  ;;  %v1336_v1 = vor.u32 %v1779_v55, %v1333_v56  ;;  %v1165_v55 = vld [vmem:[%s2825_s1 + $0x8] sm:$0xf0]  ;;  %v1753_v56 = vld [vmem:[%s2825_s1 + $0x84] sm:$0xf]  ;;  %v1413_v60 = vld [vmem:[%s2825_s1 + $0x1f8] sm:$0xf0]  ;;  %v182_v63 = vunpack.c.l.b16 %v18_v50 }
  0x3f   :  { %1018 = vmatpush.bf16.msrb.mxu3 %v1620_v5  ;;  %v1200_v5 = vor.u32 %v1745_v61, %v1197_v62  ;;  %v1815_v61 = vld [vmem:[%s2825_s1 + $0x274] sm:$0xf]  ;;  %v1477_v62 = vld [vmem:[%s2825_s1 + $0x278] sm:$0xf0]  ;;  %v1813_v19 = vld [vmem:[%s2825_s1 + $0x264] sm:$0xf] }
  0x40   :  { %980 = vmatpush.bf16.msrb.mxu0 %v1420_v17  ;;  %v1328_v17 = vor.u32 %v1777_v3, %v1325_v4  ;;  %v1847_v13 = vld [vmem:[%s2825_s1 + $0x374] sm:$0xf]  ;;  %v1605_v14 = vld [vmem:[%s2825_s1 + $0x378] sm:$0xf0]  ;;  %v1469_v20 = vld [vmem:[%s2825_s1 + $0x268] sm:$0xf0] }
  0x41   :  { %993 = vmatpush.bf16.msrb.mxu1 %v1484_v18  ;;  %v1700_v18 = vor.u32 %v1872_v10, %v1699_v9  ;;  %v1480_v10 = vor.u32 %v1815_v61, %v1477_v62  ;;  %v1472_v26 = vor.u32 %v1813_v19, %v1469_v20  ;;  %v1525_v35 = vld [vmem:[%s2825_s1 + $0x2d8] sm:$0xf0]  ;;  %v1843_v41 = vld [vmem:[%s2825_s1 + $0x354] sm:$0xf] }
  0x42   :  { %1006 = vmatpush.bf16.msrb.mxu2 %v1548_v22  ;;  %v1256_v22 = vor.u32 %v1759_v15, %v1253_v16  ;;  %v1797_v15 = vld [vmem:[%s2825_s1 + $0x1e4] sm:$0xf]  ;;  %v1589_v42 = vld [vmem:[%s2825_s1 + $0x358] sm:$0xf0]  ;;  %v1787_v19 = vld [vmem:[%s2825_s1 + $0x194] sm:$0xf] }
  0x43   :  { %1019 = vmatpush.bf16.msrb.mxu3 %v1612_v32  ;;  %981 = vmatmul.bf16.vlgmr.msrb.gmra.mxu0 %v2351_v36  ;;  %v1309_v32 = vld [vmem:[%s2825_s1 + $0x128] sm:$0xf0]  ;;  %v1592_v50 = vor.u32 %v1843_v41, %v1589_v42  ;;  %v1669_v41 = vld [vmem:[%s2825_s1 + $0x3f8] sm:$0xf0] }
  0x44   :  { %1025 = vmatpush.bf16.msra.mxu0 %v1732_v23  ;;  %994 = vmatmul.bf16.vlgmr.msrb.gmra.mxu1 %v2361_v43  ;;  %v1691_v23 = vld [vmem:[%s2825_s1 + $0x420] sm:$0xf] }
  0x45   :  { %1038 = vmatpush.bf16.msra.mxu1 %v1224_v27  ;;  %1007 = vmatmul.bf16.vlgmr.msrb.gmra.mxu2 %v2353_v39  ;;  %v1757_v27 = vld [vmem:[%s2825_s1 + $0xa4] sm:$0xf]  ;;  %v1692_v30 = vor.u32 %v1870_v24, %v1691_v23  ;;  %v1533_v23 = vld [vmem:[%s2825_s1 + $0x2e8] sm:$0xf0]  ;;  %v1608_v24 = vor.u32 %v1847_v13, %v1605_v14 }
  0x46   :  { %1051 = vmatpush.bf16.msra.mxu2 %v1288_v28  ;;  %1020 = vmatmul.bf16.vlgmr.msrb.gmra.mxu3 %v2373_v49  ;;  %v1245_v28 = vld [vmem:[%s2825_s1 + $0xa8] sm:$0xf0] }
  0x47   :  { %1064 = vmatpush.bf16.msra.mxu3 %v1352_v38  ;;  %v1248_v34 = vor.u32 %v1757_v27, %v1245_v28  ;;  %v1739_v38 = vld [vmem:[%s2825_s1 + $0x14] sm:$0xf]  ;;  %v1845_v27 = vld [vmem:[%s2825_s1 + $0x364] sm:$0xf]  ;;  %v1597_v28 = vld [vmem:[%s2825_s1 + $0x368] sm:$0xf0] }
  0x48   :  { %1026 = vmatpush.bf16.msra.mxu0 %v1724_v40  ;;  %v1173_v40 = vld [vmem:[%s2825_s1 + $0x18] sm:$0xf0]  ;;  %v1600_v37 = vor.u32 %v1845_v27, %v1597_v28  ;;  %v1835_v27 = vld [vmem:[%s2825_s1 + $0x314] sm:$0xf] }
  0x49   :  { %1039 = vmatpush.bf16.msra.mxu1 %v1216_v44  ;;  %v1312_v44 = vor.u32 %v1773_v31, %v1309_v32  ;;  %v1176_v51 = vor.u32 %v1739_v38, %v1173_v40  ;;  %v1397_v31 = vld [vmem:[%s2825_s1 + $0x1d8] sm:$0xf0]  ;;  %v1811_v32 = vld [vmem:[%s2825_s1 + $0x254] sm:$0xf] }
  0x4a   :  { %1052 = vmatpush.bf16.msra.mxu2 %v1280_v45  ;;  %v1771_v45 = vld [vmem:[%s2825_s1 + $0x114] sm:$0xf] }
  0x4b   :  { %1065 = vmatpush.bf16.msra.mxu3 %v1344_v53  ;;  %v1866_v53 = vld [vmem:[%s2825_s1 + $0x404] sm:$0xf0]  ;;  %v1304_v59 = vor.u32 %v1771_v45, %v1301_v47  ;;  %v1809_v45 = vld [vmem:[%s2825_s1 + $0x244] sm:$0xf] }
  0x4c   :  { %1027 = vmatpush.bf16.msra.mxu0 %v1716_v54  ;;  %v1737_v54 = vld [vmem:[%s2825_s1 + $0x4] sm:$0xf]  ;;  %v1676_v0 = vor.u32 %v1866_v53, %v1675_v48  ;;  %v1517_v48 = vld [vmem:[%s2825_s1 + $0x2c8] sm:$0xf0] }
  0x4d   :  { %1040 = vmatpush.bf16.msra.mxu1 %v1208_v57  ;;  %v1229_v57 = vld [vmem:[%s2825_s1 + $0x88] sm:$0xf0]  ;;  %v1168_v3 = vor.u32 %v1737_v54, %v1165_v55  ;;  %v1825_v47 = vld [vmem:[%s2825_s1 + $0x2c4] sm:$0xf]  ;;  %v1791_v54 = vld [vmem:[%s2825_s1 + $0x1b4] sm:$0xf] }
  0x4e   :  { %1053 = vmatpush.bf16.msra.mxu2 %v1272_v58  ;;  %v1799_v58 = vld [vmem:[%s2825_s1 + $0x1f4] sm:$0xf]  ;;  %v1232_v4 = vor.u32 %v1753_v56, %v1229_v57  ;;  %v1841_v53 = vld [vmem:[%s2825_s1 + $0x344] sm:$0xf]  ;;  %v1520_v55 = vor.u32 %v1825_v47, %v1517_v48  ;;  %v1381_v56 = vld [vmem:[%s2825_s1 + $0x1b8] sm:$0xf0] }
  0x4f   :  { %1066 = vmatpush.bf16.msra.mxu3 %v1336_v1  ;;  %v1831_v1 = vld [vmem:[%s2825_s1 + $0x2f4] sm:$0xf]  ;;  %v1416_v9 = vor.u32 %v1799_v58, %v1413_v60  ;;  %v1445_v58 = vld [vmem:[%s2825_s1 + $0x238] sm:$0xf0]  ;;  %v1384_v62 = vor.u32 %v1791_v54, %v1381_v56  ;;  %v1549_v47 = vld [vmem:[%s2825_s1 + $0x308] sm:$0xf0] }
  0x50   :  { %1028 = vmatpush.bf16.msra.mxu0 %v1708_v2  ;;  %v1541_v2 = vld [vmem:[%s2825_s1 + $0x2f8] sm:$0xf0]  ;;  %v1807_v57 = vld [vmem:[%s2825_s1 + $0x234] sm:$0xf]  ;;  %v1877_v54 = vld [vmem:[%s2825_s1 + $0x464] sm:$0xf] }
  0x51   :  { %1041 = vmatpush.bf16.msra.mxu1 %v1200_v5  ;;  %v1769_v5 = vld [vmem:[%s2825_s1 + $0x104] sm:$0xf]  ;;  %v1544_v16 = vor.u32 %v1831_v1, %v1541_v2  ;;  %v1509_v60 = vld [vmem:[%s2825_s1 + $0x2b8] sm:$0xf0] }
  0x52   :  { %1054 = vmatpush.bf16.msra.mxu2 %v1264_v6  ;;  %v1293_v6 = vld [vmem:[%s2825_s1 + $0x108] sm:$0xf0]  ;;  %v1573_v1 = vld [vmem:[%s2825_s1 + $0x338] sm:$0xf0]  ;;  %v1789_v2 = vld [vmem:[%s2825_s1 + $0x1a4] sm:$0xf] }
  0x53   :  { %1067 = vmatpush.bf16.msra.mxu3 %v1328_v17  ;;  %v2543_v17 = vpack.c.b16 %v182_v63, %v182_v63  ;;  %v1448_v63 = vor.u32 %v1807_v57, %v1445_v58  ;;  %v1859_v58 = vld [vmem:[%s2825_s1 + $0x3d4] sm:$0xf] }
  0x54   :  { %1029 = vmatpush.bf16.msra.mxu0 %v1700_v18  ;;  %v1405_v18 = vld [vmem:[%s2825_s1 + $0x1e8] sm:$0xf0] }
  0x55   :  { %1042 = vmatpush.bf16.msra.mxu1 %v1192_v21  ;;  %v1296_v21 = vor.u32 %v1769_v5, %v1293_v6  ;;  %v1408_v25 = vor.u32 %v1797_v15, %v1405_v18  ;;  %v1805_v5 = vld [vmem:[%s2825_s1 + $0x224] sm:$0xf]  ;;  %v1437_v6 = vld [vmem:[%s2825_s1 + $0x228] sm:$0xf0] }
  0x56   :  { %1055 = vmatpush.bf16.msra.mxu2 %v1256_v22  ;;  %v1829_v22 = vld [vmem:[%s2825_s1 + $0x2e4] sm:$0xf]  ;;  %v1440_v15 = vor.u32 %v1805_v5, %v1437_v6  ;;  %v1565_v18 = vld [vmem:[%s2825_s1 + $0x328] sm:$0xf0]  ;;  %v1701_v5 = vld [vmem:[%s2825_s1 + $0x438] sm:$0xf0] }
  0x57   :  { %1068 = vmatpush.bf16.msra.mxu3 %v1320_v29  ;;  %v1795_v29 = vld [vmem:[%s2825_s1 + $0x1d4] sm:$0xf] }
  0x58   :  { %1030 = vmatpush.bf16.msra.mxu0 %v1692_v30  ;;  %v1536_v30 = vor.u32 %v1829_v22, %v1533_v23  ;;  %v1400_v38 = vor.u32 %v1795_v29, %v1397_v31  ;;  %v1803_v22 = vld [vmem:[%s2825_s1 + $0x214] sm:$0xf]  ;;  %v1429_v23 = vld [vmem:[%s2825_s1 + $0x218] sm:$0xf0]  ;;  %v1785_v31 = vld [vmem:[%s2825_s1 + $0x184] sm:$0xf] }
  0x59   :  { %1043 = vmatpush.bf16.msra.mxu1 %v1184_v33  ;;  %v1461_v33 = vld [vmem:[%s2825_s1 + $0x258] sm:$0xf0]  ;;  %v1432_v29 = vor.u32 %v1803_v22, %v1429_v23 }
  0x5a   :  { %1056 = vmatpush.bf16.msra.mxu2 %v1248_v34  ;;  %v1827_v34 = vld [vmem:[%s2825_s1 + $0x2d4] sm:$0xf]  ;;  %v1464_v40 = vor.u32 %v1811_v32, %v1461_v33  ;;  %v1357_v32 = vld [vmem:[%s2825_s1 + $0x188] sm:$0xf0]  ;;  %v1685_v22 = vld [vmem:[%s2825_s1 + $0x418] sm:$0xf0] }
  0x5b   :  { %1069 = vmatpush.bf16.msra.mxu3 %v1312_v44  ;;  %v1528_v44 = vor.u32 %v1827_v34, %v1525_v35  ;;  %v1801_v34 = vld [vmem:[%s2825_s1 + $0x204] sm:$0xf]  ;;  %v1421_v35 = vld [vmem:[%s2825_s1 + $0x208] sm:$0xf0] }
  0x5c   :  { %1031 = vmatpush.bf16.msra.mxu0 %v1684_v46  ;;  %v1453_v46 = vld [vmem:[%s2825_s1 + $0x248] sm:$0xf0] }
  0x5d   :  { %1044 = vmatpush.bf16.msra.mxu1 %v1176_v51 }
  0x5e   :  { %1057 = vmatpush.bf16.msra.mxu2 %v1240_v52  ;;  %v1456_v52 = vor.u32 %v1809_v45, %v1453_v46  ;;  %v1424_v45 = vor.u32 %v1801_v34, %v1421_v35  ;;  %v1833_v46 = vld [vmem:[%s2825_s1 + $0x304] sm:$0xf] }
  0x5f   :  { %1070 = vmatpush.bf16.msra.mxu3 %v1304_v59  ;;  %v1823_v59 = vld [vmem:[%s2825_s1 + $0x2b4] sm:$0xf] }
  0x60   :  { %1032 = vmatpush.bf16.msra.mxu0 %v1676_v0  ;;  %v1839_v0 = vld [vmem:[%s2825_s1 + $0x334] sm:$0xf] }
  0x61   :  { %1045 = vmatpush.bf16.msra.mxu1 %v1168_v3  ;;  %v1512_v3 = vor.u32 %v1823_v59, %v1509_v60  ;;  %v1576_v13 = vor.u32 %v1839_v0, %v1573_v1  ;;  %v1653_v59 = vld [vmem:[%s2825_s1 + $0x3d8] sm:$0xf0]  ;;  %v1875_v60 = vld [vmem:[%s2825_s1 + $0x454] sm:$0xf]  ;;  %v1645_v0 = vld [vmem:[%s2825_s1 + $0x3c8] sm:$0xf0] }
  0x62   :  { %1058 = vmatpush.bf16.msra.mxu2 %v1232_v4  ;;  %v1373_v4 = vld [vmem:[%s2825_s1 + $0x1a8] sm:$0xf0] }
  0x63   :  { %1033 = vmatmul.bf16.vlgmr.msra.gmra.mxu0 %v2543_v17  ;;  %1071 = vmatpush.bf16.msra.mxu3 %v1296_v21  ;;  %v1376_v14 = vor.u32 %v1789_v2, %v1373_v4  ;;  %v1365_v21 = vld [vmem:[%s2825_s1 + $0x198] sm:$0xf0]  ;;  %v1855_v2 = vld [vmem:[%s2825_s1 + $0x3b4] sm:$0xf] }
  0x64   :  { %1077 = vmatpush.bf16.msrb.mxu0 %v1416_v9  ;;  %1046 = vmatmul.bf16.vlgmr.msra.gmra.mxu1 %v2178_v11  ;;  %v1389_v11 = vld [vmem:[%s2825_s1 + $0x1c8] sm:$0xf0]  ;;  %v1821_v9 = vld [vmem:[%s2825_s1 + $0x2a4] sm:$0xf]  ;;  %v1368_v28 = vor.u32 %v1787_v19, %v1365_v21  ;;  %v1871_v4 = vld [vmem:[%s2825_s1 + $0x434] sm:$0xf] }
  0x65   :  { %1090 = vmatpush.bf16.msrb.mxu1 %v1480_v10  ;;  %1059 = vmatmul.bf16.vlgmr.msra.gmra.mxu2 %v2180_v12  ;;  %v1793_v12 = vld [vmem:[%s2825_s1 + $0x1c4] sm:$0xf]  ;;  %v1501_v10 = vld [vmem:[%s2825_s1 + $0x2a8] sm:$0xf0]  ;;  %v1851_v19 = vld [vmem:[%s2825_s1 + $0x394] sm:$0xf] }
  0x66   :  { %1103 = vmatpush.bf16.msrb.mxu2 %v1544_v16  ;;  %1072 = vmatmul.bf16.vlgmr.msra.gmra.mxu3 %v2171_v7  ;;  %v1392_v51 = vor.u32 %v1793_v12, %v1389_v11  ;;  %v1581_v7 = vld [vmem:[%s2825_s1 + $0x348] sm:$0xf0]  ;;  %v1837_v16 = vld [vmem:[%s2825_s1 + $0x324] sm:$0xf]  ;;  %v1504_v20 = vor.u32 %v1821_v9, %v1501_v10  ;;  %v1879_v12 = vld [vmem:[%s2825_s1 + $0x474] sm:$0xf]  ;;  %v1360_v11 = vor.u32 %v1785_v31, %v1357_v32 }
  0x67   :  { %1116 = vmatpush.bf16.msrb.mxu3 %v1608_v24  ;;  %v1584_v61 = vor.u32 %v1841_v53, %v1581_v7  ;;  %v1819_v24 = vld [vmem:[%s2825_s1 + $0x294] sm:$0xf]  ;;  %v1661_v53 = vld [vmem:[%s2825_s1 + $0x3e8] sm:$0xf0]  ;;  %v1552_v7 = vor.u32 %v1833_v46, %v1549_v47  ;;  %v1704_v9 = vor.u32 %v1871_v4, %v1701_v5  ;;  %v1853_v10 = vld [vmem:[%s2825_s1 + $0x3a4] sm:$0xf] }
  0x68   :  { %1078 = vmatpush.bf16.msrb.mxu0 %v1408_v25  ;;  %v1493_v25 = vld [vmem:[%s2825_s1 + $0x298] sm:$0xf0]  ;;  %v1867_v21 = vld [vmem:[%s2825_s1 + $0x414] sm:$0xf] }
  0x69   :  { %1091 = vmatpush.bf16.msrb.mxu1 %v1472_v26  ;;  %v1568_v26 = vor.u32 %v1837_v16, %v1565_v18  ;;  %v1496_v33 = vor.u32 %v1819_v24, %v1493_v25  ;;  %v1688_v24 = vor.u32 %v1867_v21, %v1685_v22  ;;  %v1849_v25 = vld [vmem:[%s2825_s1 + $0x384] sm:$0xf] }
  0x6a   :  { %1104 = vmatpush.bf16.msrb.mxu2 %v1536_v30  ;;  %v1557_v30 = vld [vmem:[%s2825_s1 + $0x318] sm:$0xf0] }
  0x6b   :  { %1117 = vmatpush.bf16.msrb.mxu3 %v1600_v37  ;;  %v1817_v37 = vld [vmem:[%s2825_s1 + $0x284] sm:$0xf]  ;;  %v1560_v42 = vor.u32 %v1835_v27, %v1557_v30 }
  0x6c   :  { %1079 = vmatpush.bf16.msrb.mxu0 %v1400_v38  ;;  %v1485_v38 = vld [vmem:[%s2825_s1 + $0x288] sm:$0xf0]  ;;  %v1865_v27 = vld [vmem:[%s2825_s1 + $0x404] sm:$0xf] }
  0x6d   :  { %1092 = vmatpush.bf16.msrb.mxu1 %v1464_v40  ;;  %v1863_v40 = vld [vmem:[%s2825_s1 + $0x3f4] sm:$0xf]  ;;  %v1488_v48 = vor.u32 %v1817_v37, %v1485_v38 }
  0x6e   :  { %1105 = vmatpush.bf16.msrb.mxu2 %v1528_v44  ;;  %v1733_v44 = vld [vmem:[%s2825_s1 + $0x478] sm:$0xf0] }
  0x6f   :  { %1118 = vmatpush.bf16.msrb.mxu3 %v1592_v50  ;;  %v1672_v50 = vor.u32 %v1863_v40, %v1669_v41  ;;  %v163_v41 = vld [vmem:[%s2827_s2] sm:$0x3] }
  0x70   :  { %1080 = vmatpush.bf16.msrb.mxu0 %v1392_v51  ;;  %v1736_v51 = vor.u32 %v1879_v12, %v1733_v44 }
  0x71   :  { %1093 = vmatpush.bf16.msrb.mxu1 %v1456_v52  ;;  %v1861_v52 = vld [vmem:[%s2825_s1 + $0x3e4] sm:$0xf] }
  0x72   :  { %1106 = vmatpush.bf16.msrb.mxu2 %v1520_v55  ;;  %v1725_v55 = vld [vmem:[%s2825_s1 + $0x468] sm:$0xf0]  ;;  %v1664_v56 = vor.u32 %v1861_v52, %v1661_v53 }
  0x73   :  { %1119 = vmatpush.bf16.msrb.mxu3 %v1584_v61  ;;  %v1728_v57 = vor.u32 %v1877_v54, %v1725_v55  ;;  %v1717_v61 = vld [vmem:[%s2825_s1 + $0x458] sm:$0xf0] }
  0x74   :  { %1081 = vmatpush.bf16.msrb.mxu0 %v1384_v62  ;;  %v1656_v62 = vor.u32 %v1859_v58, %v1653_v59 }
  0x75   :  { %1094 = vmatpush.bf16.msrb.mxu1 %v1448_v63  ;;  %v1720_v63 = vor.u32 %v1875_v60, %v1717_v61 }
  0x76   :  { %1107 = vmatpush.bf16.msrb.mxu2 %v1512_v3  ;;  %v1637_v3 = vld [vmem:[%s2825_s1 + $0x3b8] sm:$0xf0] }
  0x77   :  { %1120 = vmatpush.bf16.msrb.mxu3 %v1576_v13  ;;  %v1640_v6 = vor.u32 %v1855_v2, %v1637_v3  ;;  %v1629_v13 = vld [vmem:[%s2825_s1 + $0x3a8] sm:$0xf0] }
  0x78   :  { %1082 = vmatpush.bf16.msrb.mxu0 %v1376_v14  ;;  %v1869_v14 = vld [vmem:[%s2825_s1 + $0x424] sm:$0xf]  ;;  %v1632_v16 = vor.u32 %v1853_v10, %v1629_v13 }
  0x79   :  { %1095 = vmatpush.bf16.msrb.mxu1 %v1440_v15  ;;  %v1693_v15 = vld [vmem:[%s2825_s1 + $0x428] sm:$0xf0] }
  0x7a   :  { %1108 = vmatpush.bf16.msrb.mxu2 %v1504_v20  ;;  %v1696_v18 = vor.u32 %v1869_v14, %v1693_v15  ;;  %v1621_v20 = vld [vmem:[%s2825_s1 + $0x398] sm:$0xf0] }
  0x7b   :  { %1121 = vmatpush.bf16.msrb.mxu3 %v1568_v26  ;;  %v1624_v23 = vor.u32 %v1851_v19, %v1621_v20  ;;  %v1613_v26 = vld [vmem:[%s2825_s1 + $0x388] sm:$0xf0] }
  0x7c   :  { %1083 = vmatpush.bf16.msrb.mxu0 %v1368_v28  ;;  %v1677_v28 = vld [vmem:[%s2825_s1 + $0x408] sm:$0xf0] }
  0x7d   :  { %1096 = vmatpush.bf16.msrb.mxu1 %v1432_v29  ;;  %v1616_v29 = vor.u32 %v1849_v25, %v1613_v26  ;;  %v1680_v30 = vor.u32 %v1865_v27, %v1677_v28 }
  0x7e   :  { %1109 = vmatpush.bf16.msrb.mxu2 %v1496_v33 }
  0x7f   :  { %1122 = vmatpush.bf16.msrb.mxu3 %v1560_v42  ;;  %v165_v42 = vperm.slane %v163_v41, 0 }
  0x80   :  { %1084 = vmatpush.bf16.msrb.mxu0 %v1360_v11 }
  0x81   :  { %1097 = vmatpush.bf16.msrb.mxu1 %v1424_v45 }
  0x82   :  { %1110 = vmatpush.bf16.msrb.mxu2 %v1488_v48 }
  0x83   :  { %1123 = vmatpush.bf16.msrb.mxu3 %v1552_v7  ;;  %1085 = vmatmul.bf16.vlgmr.msrb.gmra.mxu0 %v2173_v8  ;;  %v1857_v8 = vld [vmem:[%s2825_s1 + $0x3c4] sm:$0xf] }
  0x84   :  { %1129 = vmatpush.bf16.msra.mxu0 %v1672_v50  ;;  %1098 = vmatmul.bf16.vlgmr.msrb.gmra.mxu1 %v2351_v36  ;;  %v1709_v36 = vld [vmem:[%s2825_s1 + $0x448] sm:$0xf0]  ;;  %v1648_v1 = vor.u32 %v1857_v8, %v1645_v0  ;;  %v166_v0 = vperm.slane %v163_v41, 1 }
  0x85   :  { %1142 = vmatpush.bf16.msra.mxu1 %v1736_v51  ;;  %1111 = vmatmul.bf16.vlgmr.msrb.gmra.mxu2 %v2361_v43  ;;  %v1873_v43 = vld [vmem:[%s2825_s1 + $0x444] sm:$0xf] }
  0x86   :  { %1124 = vmatmul.bf16.vlgmr.msrb.gmra.mxu3 %v2353_v39  ;;  %v1712_v39 = vor.u32 %v1873_v43, %v1709_v36 }
  0x88   :  { %1130 = vmatpush.bf16.msra.mxu0 %v1664_v56 }
  0x89   :  { %1143 = vmatpush.bf16.msra.mxu1 %v1728_v57 }
  0x8c   :  { %1131 = vmatpush.bf16.msra.mxu0 %v1656_v62 }
  0x8d   :  { %1144 = vmatpush.bf16.msra.mxu1 %v1720_v63 }
  0x90   :  { %1132 = vmatpush.bf16.msra.mxu0 %v1648_v1 }
  0x91   :  { %1145 = vmatpush.bf16.msra.mxu1 %v1712_v39 }
  0x94   :  { %1133 = vmatpush.bf16.msra.mxu0 %v1640_v6 }
  0x95   :  { %1146 = vmatpush.bf16.msra.mxu1 %v1704_v9 }
  0x98   :  { %1134 = vmatpush.bf16.msra.mxu0 %v1632_v16 }
  0x99   :  { %1147 = vmatpush.bf16.msra.mxu1 %v1696_v18 }
  0x9c   :  { %1135 = vmatpush.bf16.msra.mxu0 %v1624_v23 }
  0x9d   :  { %1148 = vmatpush.bf16.msra.mxu1 %v1688_v24 }
  0xa0   :  { %1136 = vmatpush.bf16.msra.mxu0 %v1616_v29  ;;  %v930_v31 = vpop.f32.mrf.mxu0 }
  0xa1   :  { %1149 = vmatpush.bf16.msra.mxu1 %v1680_v30  ;;  %v943_v32 = vpop.f32.mrf.mxu1  ;;  %v931_v12 = vadd.f32 %v930_v31, %v165_v42 }
  0xa3   :  { %1137 = vmatmul.bf16.vlgmr.msra.gmra.mxu0 %v2373_v49  ;;  %v944_v45 = vadd.f32 %v943_v32, %v931_v12 }
  0xa4   :  { %1150 = vmatmul.bf16.vlgmr.msra.gmra.mxu1 %v2543_v17 }
  0xa8   :  { %v956_v34 = vpop.f32.mrf.mxu2  ;;  %v932_v35 = vpop.f32.mrf.mxu0 }
  0xa9   :  { %v969_v33 = vpop.f32.mrf.mxu3  ;;  %v945_v37 = vpop.f32.mrf.mxu1  ;;  %v957_v46 = vadd.f32 %v956_v34, %v944_v45 }
  0xab   :  { %v970_v50 = vadd.f32 %v969_v33, %v957_v46 }
  0xb0   :  { %v958_v40 = vpop.f32.mrf.mxu2 }
  0xb1   :  { %v971_v38 = vpop.f32.mrf.mxu3 }
  0xc0   :  { %v982_v44 = vpop.f32.mrf.mxu0 }
  0xc1   :  { %v995_v11 = vpop.f32.mrf.mxu1  ;;  %v983_v52 = vadd.f32 %v982_v44, %v970_v50 }
  0xc3   :  { %v996_v7 = vadd.f32 %v995_v11, %v983_v52 }
  0xc8   :  { %v1008_v49 = vpop.f32.mrf.mxu2  ;;  %v984_v17 = vpop.f32.mrf.mxu0 }
  0xc9   :  { %v1021_v47 = vpop.f32.mrf.mxu3  ;;  %v997_v48 = vpop.f32.mrf.mxu1  ;;  %v1009_v54 = vadd.f32 %v1008_v49, %v996_v7 }
  0xcb   :  { %v1022_v55 = vadd.f32 %v1021_v47, %v1009_v54 }
  0xd0   :  { %v1010_v51 = vpop.f32.mrf.mxu2 }
  0xd1   :  { %v1023_v53 = vpop.f32.mrf.mxu3 }
  0xe0   :  { %v1034_v56 = vpop.f32.mrf.mxu0 }
  0xe1   :  { %v1035_v57 = vadd.f32 %v1034_v56, %v1022_v55  ;;  %v1047_v58 = vpop.f32.mrf.mxu1 }
  0xe2   :  { %v1048_v1 = vadd.f32 %v1047_v58, %v166_v0 }
  0xe3   :  { %1155 = vst [vmem:[%s2828_s3] sm:$0xff] %v1035_v57 }
  0xe8   :  { %v1060_v59 = vpop.f32.mrf.mxu2  ;;  %v1036_v60 = vpop.f32.mrf.mxu0 }
  0xe9   :  { %v1073_v61 = vpop.f32.mrf.mxu3  ;;  %v1049_v62 = vpop.f32.mrf.mxu1  ;;  %v1061_v2 = vadd.f32 %v1060_v59, %v1048_v1 }
  0xeb   :  { %v1074_v6 = vadd.f32 %v1073_v61, %v1061_v2 }
  0xf0   :  { %v1062_v63 = vpop.f32.mrf.mxu2 }
  0xf1   :  { %v1075_v8 = vpop.f32.mrf.mxu3 }
 0x100   :  { %v1086_v43 = vpop.f32.mrf.mxu0 }
 0x101   :  { %v1099_v36 = vpop.f32.mrf.mxu1  ;;  %v1087_v10 = vadd.f32 %v1086_v43, %v1074_v6 }
 0x103   :  { %v1100_v14 = vadd.f32 %v1099_v36, %v1087_v10 }
 0x108   :  { %v1112_v39 = vpop.f32.mrf.mxu2  ;;  %v1088_v3 = vpop.f32.mrf.mxu0 }
 0x109   :  { %v1125_v4 = vpop.f32.mrf.mxu3  ;;  %v1101_v5 = vpop.f32.mrf.mxu1  ;;  %v1113_v15 = vadd.f32 %v1112_v39, %v1100_v14 }
 0x10b   :  { %v1126_v16 = vadd.f32 %v1125_v4, %v1113_v15 }
 0x110   :  { %v1114_v9 = vpop.f32.mrf.mxu2 }
 0x111   :  { %v1127_v13 = vpop.f32.mrf.mxu3 }
 0x120   :  { %v1138_v18 = vpop.f32.mrf.mxu0 }
 0x121   :  { %v1139_v19 = vadd.f32 %v1138_v18, %v1126_v16  ;;  %v1151_v20 = vpop.f32.mrf.mxu1 }
 0x123   :  { %v1152_v21 = vadd.f32 %v1151_v20, %v1139_v19 }
 0x125   :  { %1156 = vst [vmem:[%s2828_s3 + $0x8] sm:$0xff] %v1152_v21 }
 0x128   :  { %v1140_v22 = vpop.f32.mrf.mxu0 }
 0x129   :  { %v1153_v23 = vpop.f32.mrf.mxu1 }

// kernel: facebox_extractor_forward.50
= control target key start
LH: loop header
LB: loop body
LE: loop exit
PB: predicated region body
PF: predicated region fallthrough
CT: control target
= control target key end

     0   :  { %s343_s1 = inlined_call_operand.vmem [shape: bf16[256,128], index: 1, kind: input, shape index: {}]   ;;  %s344_s2 = inlined_call_operand.vmem [shape: f32[1,128], index: 2, kind: input, shape index: {}]   ;;  %s345_s0 = inlined_call_operand.vmem [shape: bf16[8,256], index: 0, kind: input, shape index: {}]   ;;  %s346_s3 = inlined_call_operand.vmem [shape: f32[8,128], index: 3, kind: output, shape index: {}]  }
   0x1   :  { %v256_v0 = vld [vmem:[%s343_s1 + $0x38] sm:$0xff]  ;;  %v255_v2 = vld [vmem:[%s343_s1 + $0x30] sm:$0xff]  ;;  %v254_v4 = vld [vmem:[%s343_s1 + $0x28] sm:$0xff] }
   0x2   :  { %v264_v1 = vld [vmem:[%s343_s1 + $0x78] sm:$0xff]  ;;  %154 = vmatpush.bf16.msra.mxu0 %v256_v0  ;;  %v263_v3 = vld [vmem:[%s343_s1 + $0x70] sm:$0xff]  ;;  %v262_v5 = vld [vmem:[%s343_s1 + $0x68] sm:$0xff] }
   0x3   :  { %167 = vmatpush.bf16.msra.mxu1 %v264_v1  ;;  %v253_v6 = vld [vmem:[%s343_s1 + $0x20] sm:$0xff]  ;;  %v252_v8 = vld [vmem:[%s343_s1 + $0x18] sm:$0xff]  ;;  %v251_v10 = vld [vmem:[%s343_s1 + $0x10] sm:$0xff] }
   0x4   :  { %v261_v7 = vld [vmem:[%s343_s1 + $0x60] sm:$0xff]  ;;  %v260_v9 = vld [vmem:[%s343_s1 + $0x58] sm:$0xff]  ;;  %v259_v11 = vld [vmem:[%s343_s1 + $0x50] sm:$0xff] }
   0x5   :  { %v250_v12 = vld [vmem:[%s343_s1 + $0x8] sm:$0xff]  ;;  %v14_v14 = vld [vmem:[%s345_s0] sm:$0xff] }
   0x6   :  { %155 = vmatpush.bf16.msra.mxu0 %v255_v2  ;;  %v258_v13 = vld [vmem:[%s343_s1 + $0x48] sm:$0xff]  ;;  %v52_v15 = vunpack.c.l.b16 %v14_v14  ;;  %v53_v16 = vunpack.c.h.b16 %v14_v14  ;;  %v249_v17 = vld [vmem:[%s343_s1] sm:$0xff] }
   0x7   :  { %168 = vmatpush.bf16.msra.mxu1 %v263_v3  ;;  %v257_v18 = vld [vmem:[%s343_s1 + $0x40] sm:$0xff] }
   0x8   :  { %v54_v19 = vpack.c.b16 %v52_v15, %v52_v15  ;;  %v55_v20 = vpack.c.b16 %v53_v16, %v53_v16  ;;  %v265_v21 = vld [vmem:[%s344_s2] ss:$0 sm:$0xff] }
   0xa   :  { %156 = vmatpush.bf16.msra.mxu0 %v254_v4 }
   0xb   :  { %169 = vmatpush.bf16.msra.mxu1 %v262_v5 }
   0xe   :  { %157 = vmatpush.bf16.msra.mxu0 %v253_v6 }
   0xf   :  { %170 = vmatpush.bf16.msra.mxu1 %v261_v7 }
  0x12   :  { %158 = vmatpush.bf16.msra.mxu0 %v252_v8 }
  0x13   :  { %171 = vmatpush.bf16.msra.mxu1 %v260_v9 }
  0x16   :  { %159 = vmatpush.bf16.msra.mxu0 %v251_v10 }
  0x17   :  { %172 = vmatpush.bf16.msra.mxu1 %v259_v11 }
  0x1a   :  { %160 = vmatpush.bf16.msra.mxu0 %v250_v12 }
  0x1b   :  { %173 = vmatpush.bf16.msra.mxu1 %v258_v13 }
  0x1e   :  { %161 = vmatpush.bf16.msra.mxu0 %v249_v17 }
  0x1f   :  { %174 = vmatpush.bf16.msra.mxu1 %v257_v18 }
  0x21   :  { %162 = vmatmul.bf16.vlgmr.msra.gmra.mxu0 %v54_v19 }
  0x22   :  { %175 = vmatmul.bf16.vlgmr.msra.gmra.mxu1 %v55_v20 }
  0x9e   :  { %v163_v22 = vpop.f32.mrf.mxu0 }
  0x9f   :  { %v176_v23 = vpop.f32.mrf.mxu1  ;;  %v164_v24 = vadd.f32 %v265_v21, %v163_v22 }
  0xa1   :  { %v177_v25 = vadd.f32 %v176_v23, %v164_v24 }
  0xa3   :  { %180 = vst [vmem:[%s346_s3] sm:$0xff] %v177_v25 }
  0xa6   :  { %v165_v26 = vpop.f32.mrf.mxu0 }
  0xa7   :  { %v178_v27 = vpop.f32.mrf.mxu1 }

// kernel: facebox_extractor_forward.51
= control target key start
LH: loop header
LB: loop body
LE: loop exit
PB: predicated region body
PF: predicated region fallthrough
CT: control target
= control target key end

     0   :  { %vm1145_vm0 = vcmask 1041408   ;;  %s2805_s1 = inlined_call_operand.vmem [shape: bf16[1152,256], index: 1, kind: input, shape index: {}]   ;;  %s2806_s0 = inlined_call_operand.vmem [shape: bf16[2,1152], index: 0, kind: input, shape index: {}]   ;;  %s2807_s2 = inlined_call_operand.vmem [shape: f32[1,256], index: 2, kind: input, shape index: {}]   ;;  %s2808_s3 = inlined_call_operand.vmem [shape: f32[2,256], index: 3, kind: output, shape index: {}]  }
   0x1   :  { %v1211_v0 = vld [vmem:[%s2805_s1 + $0x70] sm:$0xf]  ;;  %v1744_v1 = vld [vmem:[%s2805_s1 + $0x74] sm:$0xf0]  ;;  %v1203_v11 = vld [vmem:[%s2805_s1 + $0x60] sm:$0xf] }
   0x2   :  { %v1275_v2 = vld [vmem:[%s2805_s1 + $0xf0] sm:$0xf]  ;;  %v1212_v3 = vor.u32 %v1744_v1, %v1211_v0  ;;  %v1760_v4 = vld [vmem:[%s2805_s1 + $0xf4] sm:$0xf0]  ;;  %v1742_v13 = vld [vmem:[%s2805_s1 + $0x64] sm:$0xf0] }
   0x3   :  { %v1339_v5 = vld [vmem:[%s2805_s1 + $0x170] sm:$0xf]  ;;  %v1776_v6 = vld [vmem:[%s2805_s1 + $0x174] sm:$0xf0]  ;;  %v1276_v7 = vor.u32 %v1760_v4, %v1275_v2  ;;  %v1267_v14 = vld [vmem:[%s2805_s1 + $0xe0] sm:$0xf]  ;;  %v1204_v16 = vor.u32 %v1742_v13, %v1203_v11 }
   0x4   :  { %v1340_v8 = vor.u32 %v1776_v6, %v1339_v5  ;;  %v1403_v9 = vld [vmem:[%s2805_s1 + $0x1f0] sm:$0xf]  ;;  %v1792_v10 = vld [vmem:[%s2805_s1 + $0x1f4] sm:$0xf0]  ;;  %908 = vmatpush.bf16.msra.mxu0 %v1212_v3  ;;  %v1758_v15 = vld [vmem:[%s2805_s1 + $0xe4] sm:$0xf0] }
   0x5   :  { %v1404_v12 = vor.u32 %v1792_v10, %v1403_v9  ;;  %921 = vmatpush.bf16.msra.mxu1 %v1276_v7  ;;  %v1268_v17 = vor.u32 %v1758_v15, %v1267_v14  ;;  %v1331_v18 = vld [vmem:[%s2805_s1 + $0x160] sm:$0xf]  ;;  %v1774_v19 = vld [vmem:[%s2805_s1 + $0x164] sm:$0xf0]  ;;  %v1195_v23 = vld [vmem:[%s2805_s1 + $0x50] sm:$0xf] }
   0x6   :  { %934 = vmatpush.bf16.msra.mxu2 %v1340_v8  ;;  %v1395_v20 = vld [vmem:[%s2805_s1 + $0x1e0] sm:$0xf]  ;;  %v1332_v21 = vor.u32 %v1774_v19, %v1331_v18  ;;  %v1790_v22 = vld [vmem:[%s2805_s1 + $0x1e4] sm:$0xf0]  ;;  %v1740_v24 = vld [vmem:[%s2805_s1 + $0x54] sm:$0xf0] }
   0x7   :  { %947 = vmatpush.bf16.msra.mxu3 %v1404_v12  ;;  %v1396_v25 = vor.u32 %v1790_v22, %v1395_v20  ;;  %v1259_v26 = vld [vmem:[%s2805_s1 + $0xd0] sm:$0xf]  ;;  %v1756_v27 = vld [vmem:[%s2805_s1 + $0xd4] sm:$0xf0]  ;;  %v1196_v29 = vor.u32 %v1740_v24, %v1195_v23  ;;  %v1187_v35 = vld [vmem:[%s2805_s1 + $0x40] sm:$0xf] }
   0x8   :  { %v1323_v28 = vld [vmem:[%s2805_s1 + $0x150] sm:$0xf]  ;;  %909 = vmatpush.bf16.msra.mxu0 %v1204_v16  ;;  %v1772_v30 = vld [vmem:[%s2805_s1 + $0x154] sm:$0xf0]  ;;  %v1260_v33 = vor.u32 %v1756_v27, %v1259_v26  ;;  %v1738_v36 = vld [vmem:[%s2805_s1 + $0x44] sm:$0xf0] }
   0x9   :  { %v1387_v31 = vld [vmem:[%s2805_s1 + $0x1d0] sm:$0xf]  ;;  %v1788_v32 = vld [vmem:[%s2805_s1 + $0x1d4] sm:$0xf0]  ;;  %922 = vmatpush.bf16.msra.mxu1 %v1268_v17  ;;  %v1324_v34 = vor.u32 %v1772_v30, %v1323_v28  ;;  %v1251_v37 = vld [vmem:[%s2805_s1 + $0xc0] sm:$0xf]  ;;  %v1188_v44 = vor.u32 %v1738_v36, %v1187_v35 }
   0xa   :  { %935 = vmatpush.bf16.msra.mxu2 %v1332_v21  ;;  %v1388_v38 = vor.u32 %v1788_v32, %v1387_v31  ;;  %v1754_v39 = vld [vmem:[%s2805_s1 + $0xc4] sm:$0xf0]  ;;  %v1315_v40 = vld [vmem:[%s2805_s1 + $0x140] sm:$0xf]  ;;  %v1179_v47 = vld [vmem:[%s2805_s1 + $0x30] sm:$0xf] }
   0xb   :  { %948 = vmatpush.bf16.msra.mxu3 %v1396_v25  ;;  %v1770_v41 = vld [vmem:[%s2805_s1 + $0x144] sm:$0xf0]  ;;  %v1379_v42 = vld [vmem:[%s2805_s1 + $0x1c0] sm:$0xf]  ;;  %v1252_v45 = vor.u32 %v1754_v39, %v1251_v37  ;;  %v1736_v48 = vld [vmem:[%s2805_s1 + $0x34] sm:$0xf0] }
   0xc   :  { %v1786_v43 = vld [vmem:[%s2805_s1 + $0x1c4] sm:$0xf0]  ;;  %910 = vmatpush.bf16.msra.mxu0 %v1196_v29  ;;  %v1316_v46 = vor.u32 %v1770_v41, %v1315_v40  ;;  %v1243_v49 = vld [vmem:[%s2805_s1 + $0xb0] sm:$0xf]  ;;  %v1752_v51 = vld [vmem:[%s2805_s1 + $0xb4] sm:$0xf0]  ;;  %v1180_v56 = vor.u32 %v1736_v48, %v1179_v47 }
   0xd   :  { %923 = vmatpush.bf16.msra.mxu1 %v1260_v33  ;;  %v1380_v50 = vor.u32 %v1786_v43, %v1379_v42  ;;  %v1307_v52 = vld [vmem:[%s2805_s1 + $0x130] sm:$0xf]  ;;  %v1768_v53 = vld [vmem:[%s2805_s1 + $0x134] sm:$0xf0]  ;;  %v1244_v57 = vor.u32 %v1752_v51, %v1243_v49  ;;  %v1171_v59 = vld [vmem:[%s2805_s1 + $0x20] sm:$0xf] }
   0xe   :  { %936 = vmatpush.bf16.msra.mxu2 %v1324_v34  ;;  %v1371_v54 = vld [vmem:[%s2805_s1 + $0x1b0] sm:$0xf]  ;;  %v1784_v55 = vld [vmem:[%s2805_s1 + $0x1b4] sm:$0xf0]  ;;  %v1308_v58 = vor.u32 %v1768_v53, %v1307_v52  ;;  %v1734_v60 = vld [vmem:[%s2805_s1 + $0x24] sm:$0xf0] }
   0xf   :  { %949 = vmatpush.bf16.msra.mxu3 %v1388_v38  ;;  %v1235_v61 = vld [vmem:[%s2805_s1 + $0xa0] sm:$0xf]  ;;  %v1372_v62 = vor.u32 %v1784_v55, %v1371_v54  ;;  %v1750_v63 = vld [vmem:[%s2805_s1 + $0xa4] sm:$0xf0]  ;;  %v1172_v4 = vor.u32 %v1734_v60, %v1171_v59  ;;  %v1163_v7 = vld [vmem:[%s2805_s1 + $0x10] sm:$0xf] }
  0x10   :  { %911 = vmatpush.bf16.msra.mxu0 %v1188_v44  ;;  %v1299_v0 = vld [vmem:[%s2805_s1 + $0x120] sm:$0xf]  ;;  %v1766_v1 = vld [vmem:[%s2805_s1 + $0x124] sm:$0xf0]  ;;  %v1236_v5 = vor.u32 %v1750_v63, %v1235_v61  ;;  %v1732_v8 = vld [vmem:[%s2805_s1 + $0x14] sm:$0xf0] }
  0x11   :  { %924 = vmatpush.bf16.msra.mxu1 %v1252_v45  ;;  %v1363_v2 = vld [vmem:[%s2805_s1 + $0x1a0] sm:$0xf]  ;;  %v1782_v3 = vld [vmem:[%s2805_s1 + $0x1a4] sm:$0xf0]  ;;  %v1300_v6 = vor.u32 %v1766_v1, %v1299_v0  ;;  %v1227_v9 = vld [vmem:[%s2805_s1 + $0x90] sm:$0xf]  ;;  %v1164_v16 = vor.u32 %v1732_v8, %v1163_v7 }
  0x12   :  { %937 = vmatpush.bf16.msra.mxu2 %v1316_v46  ;;  %v1364_v10 = vor.u32 %v1782_v3, %v1363_v2  ;;  %v1748_v11 = vld [vmem:[%s2805_s1 + $0x94] sm:$0xf0]  ;;  %v1291_v12 = vld [vmem:[%s2805_s1 + $0x110] sm:$0xf]  ;;  %v1155_v17 = vld [vmem:[%s2805_s1] sm:$0xf] }
  0x13   :  { %950 = vmatpush.bf16.msra.mxu3 %v1380_v50  ;;  %v1764_v13 = vld [vmem:[%s2805_s1 + $0x114] sm:$0xf0]  ;;  %v1355_v14 = vld [vmem:[%s2805_s1 + $0x190] sm:$0xf]  ;;  %v1730_v18 = vld [vmem:[%s2805_s1 + $0x4] sm:$0xf0]  ;;  %v1228_v19 = vor.u32 %v1748_v11, %v1227_v9 }
  0x14   :  { %912 = vmatpush.bf16.msra.mxu0 %v1180_v56  ;;  %v1780_v15 = vld [vmem:[%s2805_s1 + $0x194] sm:$0xf0]  ;;  %v1292_v20 = vor.u32 %v1764_v13, %v1291_v12  ;;  %v1219_v21 = vld [vmem:[%s2805_s1 + $0x80] sm:$0xf]  ;;  %v1746_v22 = vld [vmem:[%s2805_s1 + $0x84] sm:$0xf0]  ;;  %v1156_v31 = vor.u32 %v1730_v18, %v1155_v17 }
  0x15   :  { %925 = vmatpush.bf16.msra.mxu1 %v1244_v57  ;;  %v1283_v23 = vld [vmem:[%s2805_s1 + $0x100] sm:$0xf]  ;;  %v1356_v24 = vor.u32 %v1780_v15, %v1355_v14  ;;  %v1762_v25 = vld [vmem:[%s2805_s1 + $0x104] sm:$0xf0]  ;;  %v1467_v26 = vld [vmem:[%s2805_s1 + $0x270] sm:$0xf]  ;;  %v1220_v35 = vor.u32 %v1746_v22, %v1219_v21 }
  0x16   :  { %938 = vmatpush.bf16.msra.mxu2 %v1308_v58  ;;  %v1808_v27 = vld [vmem:[%s2805_s1 + $0x274] sm:$0xf0]  ;;  %v1531_v28 = vld [vmem:[%s2805_s1 + $0x2f0] sm:$0xf]  ;;  %v1347_v33 = vld [vmem:[%s2805_s1 + $0x180] sm:$0xf]  ;;  %v1284_v36 = vor.u32 %v1762_v25, %v1283_v23 }
  0x17   :  { %951 = vmatpush.bf16.msra.mxu3 %v1372_v62  ;;  %v1824_v29 = vld [vmem:[%s2805_s1 + $0x2f4] sm:$0xf0]  ;;  %v1595_v30 = vld [vmem:[%s2805_s1 + $0x370] sm:$0xf]  ;;  %v1778_v34 = vld [vmem:[%s2805_s1 + $0x184] sm:$0xf0]  ;;  %v1468_v39 = vor.u32 %v1808_v27, %v1467_v26 }
  0x18   :  { %913 = vmatpush.bf16.msra.mxu0 %v1172_v4  ;;  %v1840_v32 = vld [vmem:[%s2805_s1 + $0x374] sm:$0xf0]  ;;  %v1659_v37 = vld [vmem:[%s2805_s1 + $0x3f0] sm:$0xf]  ;;  %v1532_v40 = vor.u32 %v1824_v29, %v1531_v28  ;;  %v1459_v41 = vld [vmem:[%s2805_s1 + $0x260] sm:$0xf]  ;;  %v1348_v43 = vor.u32 %v1778_v34, %v1347_v33 }
  0x19   :  { %926 = vmatpush.bf16.msra.mxu1 %v1236_v5  ;;  %v1856_v38 = vld [vmem:[%s2805_s1 + $0x3f4] sm:$0xf0]  ;;  %v1596_v42 = vor.u32 %v1840_v32, %v1595_v30  ;;  %v1806_v44 = vld [vmem:[%s2805_s1 + $0x264] sm:$0xf0]  ;;  %v1523_v45 = vld [vmem:[%s2805_s1 + $0x2e0] sm:$0xf] }
  0x1a   :  { %939 = vmatpush.bf16.msra.mxu2 %v1300_v6  ;;  %v1822_v46 = vld [vmem:[%s2805_s1 + $0x2e4] sm:$0xf0]  ;;  %v1660_v47 = vor.u32 %v1856_v38, %v1659_v37  ;;  %v1587_v48 = vld [vmem:[%s2805_s1 + $0x360] sm:$0xf]  ;;  %v1460_v52 = vor.u32 %v1806_v44, %v1459_v41  ;;  %v1451_v54 = vld [vmem:[%s2805_s1 + $0x250] sm:$0xf] }
  0x1b   :  { %952 = vmatpush.bf16.msra.mxu3 %v1364_v10  ;;  %v1838_v49 = vld [vmem:[%s2805_s1 + $0x364] sm:$0xf0]  ;;  %v1651_v50 = vld [vmem:[%s2805_s1 + $0x3e0] sm:$0xf]  ;;  %v1524_v53 = vor.u32 %v1822_v46, %v1523_v45  ;;  %v1804_v55 = vld [vmem:[%s2805_s1 + $0x254] sm:$0xf0] }
  0x1c   :  { %914 = vmatpush.bf16.msra.mxu0 %v1164_v16  ;;  %v1854_v51 = vld [vmem:[%s2805_s1 + $0x3e4] sm:$0xf0]  ;;  %v14_v56 = vld [vmem:[%s2806_s0] sm:$0xff]  ;;  %v1588_v57 = vor.u32 %v1838_v49, %v1587_v48  ;;  %v1515_v58 = vld [vmem:[%s2805_s1 + $0x2d0] sm:$0xf]  ;;  %v1452_v1 = vor.u32 %v1804_v55, %v1451_v54 }
  0x1d   :  { %927 = vmatpush.bf16.msra.mxu1 %v1228_v19  ;;  %v1820_v59 = vld [vmem:[%s2805_s1 + $0x2d4] sm:$0xf0]  ;;  %167 = vst [vmem:[#allocation1] ss:$9 sm:$0xff] %v14_v56  ;;  %v1652_v60 = vor.u32 %v1854_v51, %v1651_v50  ;;  %v1579_v61 = vld [vmem:[%s2805_s1 + $0x350] sm:$0xf] }
  0x1e   :  { %940 = vmatpush.bf16.msra.mxu2 %v1292_v20  ;;  %v1836_v62 = vld [vmem:[%s2805_s1 + $0x354] sm:$0xf0]  ;;  %v1643_v63 = vld [vmem:[%s2805_s1 + $0x3d0] sm:$0xf]  ;;  %v1516_v2 = vor.u32 %v1820_v59, %v1515_v58  ;;  %v1443_v3 = vld [vmem:[%s2805_s1 + $0x240] sm:$0xf] }
  0x1f   :  { %953 = vmatpush.bf16.msra.mxu3 %v1356_v24  ;;  %v1852_v0 = vld [vmem:[%s2805_s1 + $0x3d4] sm:$0xf0]  ;;  %v1580_v4 = vor.u32 %v1836_v62, %v1579_v61  ;;  %v1802_v5 = vld [vmem:[%s2805_s1 + $0x244] sm:$0xf0]  ;;  %v1507_v6 = vld [vmem:[%s2805_s1 + $0x2c0] sm:$0xf] }
  0x20   :  { %915 = vmatpush.bf16.msra.mxu0 %v1156_v31  ;;  %v1818_v7 = vld [vmem:[%s2805_s1 + $0x2c4] sm:$0xf0]  ;;  %v1644_v8 = vor.u32 %v1852_v0, %v1643_v63  ;;  %v1571_v9 = vld [vmem:[%s2805_s1 + $0x340] sm:$0xf]  ;;  %v1435_v13 = vld [vmem:[%s2805_s1 + $0x230] sm:$0xf]  ;;  %v1444_v15 = vor.u32 %v1802_v5, %v1443_v3 }
  0x21   :  { %928 = vmatpush.bf16.msra.mxu1 %v1220_v35  ;;  %v1834_v10 = vld [vmem:[%s2805_s1 + $0x344] sm:$0xf0]  ;;  %v1635_v11 = vld [vmem:[%s2805_s1 + $0x3c0] sm:$0xf]  ;;  %v1800_v14 = vld [vmem:[%s2805_s1 + $0x234] sm:$0xf0]  ;;  %v1508_v16 = vor.u32 %v1818_v7, %v1507_v6 }
  0x22   :  { %941 = vmatpush.bf16.msra.mxu2 %v1284_v36  ;;  %v1850_v12 = vld [vmem:[%s2805_s1 + $0x3c4] sm:$0xf0]  ;;  %v1572_v20 = vor.u32 %v1834_v10, %v1571_v9  ;;  %v1499_v21 = vld [vmem:[%s2805_s1 + $0x2b0] sm:$0xf]  ;;  %v1816_v22 = vld [vmem:[%s2805_s1 + $0x2b4] sm:$0xf0]  ;;  %v1436_v29 = vor.u32 %v1800_v14, %v1435_v13 }
  0x23   :  { %954 = vmatpush.bf16.msra.mxu3 %v1348_v43  ;;  %v1636_v24 = vor.u32 %v1850_v12, %v1635_v11  ;;  %v1563_v25 = vld [vmem:[%s2805_s1 + $0x330] sm:$0xf]  ;;  %v1832_v26 = vld [vmem:[%s2805_s1 + $0x334] sm:$0xf0]  ;;  %v1500_v30 = vor.u32 %v1816_v22, %v1499_v21  ;;  %v1427_v31 = vld [vmem:[%s2805_s1 + $0x220] sm:$0xf] }
  0x24   :  { %960 = vmatpush.bf16.msrb.mxu0 %v1468_v39  ;;  %v2190_v17 = vld [vmem:[#allocation1 + $0x12] sm:$0xff]  ;;  %v2192_v18 = vld [vmem:[#allocation1] sm:$0xff]  ;;  %v2203_v23 = vld [vmem:[#allocation1 + $0x9] sm:$0xff]  ;;  %v1564_v32 = vor.u32 %v1832_v26, %v1563_v25 }
  0x25   :  { %973 = vmatpush.bf16.msrb.mxu1 %v1532_v40  ;;  %v2194_v19 = vld [vmem:[#allocation1 + $0x1b] sm:$0xff]  ;;  %916 = vmatmul.bf16.vlgmr.msra.gmra.mxu0 %v2192_v18  ;;  %v1627_v27 = vld [vmem:[%s2805_s1 + $0x3b0] sm:$0xf]  ;;  %v1798_v33 = vld [vmem:[%s2805_s1 + $0x224] sm:$0xf0] }
  0x26   :  { %986 = vmatpush.bf16.msrb.mxu2 %v1596_v42  ;;  %955 = vmatmul.bf16.vlgmr.msra.gmra.mxu3 %v2194_v19  ;;  %v1848_v28 = vld [vmem:[%s2805_s1 + $0x3b4] sm:$0xf0]  ;;  %v1491_v34 = vld [vmem:[%s2805_s1 + $0x2a0] sm:$0xf]  ;;  %v1814_v35 = vld [vmem:[%s2805_s1 + $0x2a4] sm:$0xf0]  ;;  %v1428_v43 = vor.u32 %v1798_v33, %v1427_v31 }
  0x27   :  { %999 = vmatpush.bf16.msrb.mxu3 %v1660_v47  ;;  %942 = vmatmul.bf16.vlgmr.msra.gmra.mxu2 %v2190_v17  ;;  %v15_v36 = vld [vmem:[%s2806_s0 + $0x8] sm:$0x1]  ;;  %v1628_v37 = vor.u32 %v1848_v28, %v1627_v27  ;;  %v1555_v38 = vld [vmem:[%s2805_s1 + $0x320] sm:$0xf]  ;;  %v1419_v42 = vld [vmem:[%s2805_s1 + $0x210] sm:$0xf]  ;;  %v1492_v44 = vor.u32 %v1814_v35, %v1491_v34 }
  0x28   :  { %961 = vmatpush.bf16.msrb.mxu0 %v1460_v52  ;;  %929 = vmatmul.bf16.vlgmr.msra.gmra.mxu1 %v2203_v23  ;;  %v1830_v39 = vld [vmem:[%s2805_s1 + $0x324] sm:$0xf0]  ;;  %v1619_v40 = vld [vmem:[%s2805_s1 + $0x3a0] sm:$0xf]  ;;  %v1796_v45 = vld [vmem:[%s2805_s1 + $0x214] sm:$0xf0] }
  0x29   :  { %974 = vmatpush.bf16.msrb.mxu1 %v1524_v53  ;;  %v1846_v41 = vld [vmem:[%s2805_s1 + $0x3a4] sm:$0xf0]  ;;  %v1483_v46 = vld [vmem:[%s2805_s1 + $0x290] sm:$0xf]  ;;  %v1812_v47 = vld [vmem:[%s2805_s1 + $0x294] sm:$0xf0]  ;;  %v1556_v48 = vor.u32 %v1830_v39, %v1555_v38  ;;  %v1420_v58 = vor.u32 %v1796_v45, %v1419_v42 }
  0x2a   :  { %987 = vmatpush.bf16.msrb.mxu2 %v1588_v57  ;;  %v1547_v49 = vld [vmem:[%s2805_s1 + $0x310] sm:$0xf]  ;;  %v1828_v50 = vld [vmem:[%s2805_s1 + $0x314] sm:$0xf0]  ;;  %v1620_v52 = vor.u32 %v1846_v41, %v1619_v40  ;;  %v2267_v53 = vld [vmem:[#allocation1 + $0x24] sm:$0xff]  ;;  %v1484_v59 = vor.u32 %v1812_v47, %v1483_v46 }
  0x2b   :  { %1000 = vmatpush.bf16.msrb.mxu3 %v1652_v60  ;;  %v2265_v51 = vld [vmem:[#allocation1 + $0x36] sm:$0xff]  ;;  %v2269_v54 = vld [vmem:[#allocation1 + $0x3f] sm:$0xff]  ;;  %v2271_v55 = vld [vmem:[#allocation1 + $0x2d] sm:$0xff]  ;;  %v1548_v63 = vor.u32 %v1828_v50, %v1547_v49 }
  0x2c   :  { %962 = vmatpush.bf16.msrb.mxu0 %v1452_v1  ;;  %v1611_v56 = vld [vmem:[%s2805_s1 + $0x390] sm:$0xf]  ;;  %v1844_v57 = vld [vmem:[%s2805_s1 + $0x394] sm:$0xf0]  ;;  %177 = vst [vmem:[#allocation1] ss:$9 sm:$0xff] %v15_v36 }
  0x2d   :  { %975 = vmatpush.bf16.msrb.mxu1 %v1516_v2  ;;  %v1411_v60 = vld [vmem:[%s2805_s1 + $0x200] sm:$0xf]  ;;  %v1794_v61 = vld [vmem:[%s2805_s1 + $0x204] sm:$0xf0]  ;;  %v1612_v3 = vor.u32 %v1844_v57, %v1611_v56  ;;  %v1872_v5 = vld [vmem:[%s2805_s1 + $0x474] sm:$0xf0] }
  0x2e   :  { %988 = vmatpush.bf16.msrb.mxu2 %v1580_v4  ;;  %v1475_v62 = vld [vmem:[%s2805_s1 + $0x280] sm:$0xf]  ;;  %v1810_v0 = vld [vmem:[%s2805_s1 + $0x284] sm:$0xf0]  ;;  %v1723_v4 = vld [vmem:[%s2805_s1 + $0x470] sm:$0xf]  ;;  %v1412_v10 = vor.u32 %v1794_v61, %v1411_v60 }
  0x2f   :  { %1001 = vmatpush.bf16.msrb.mxu3 %v1644_v8  ;;  %v1539_v1 = vld [vmem:[%s2805_s1 + $0x300] sm:$0xf]  ;;  %v1826_v2 = vld [vmem:[%s2805_s1 + $0x304] sm:$0xf0]  ;;  %v1743_v6 = vld [vmem:[%s2805_s1 + $0x74] sm:$0xf]  ;;  %v1476_v11 = vor.u32 %v1810_v0, %v1475_v62 }
  0x30   :  { %963 = vmatpush.bf16.msrb.mxu0 %v1444_v15  ;;  %v1213_v7 = vld [vmem:[%s2805_s1 + $0x78] sm:$0xf0]  ;;  %v1759_v8 = vld [vmem:[%s2805_s1 + $0xf4] sm:$0xf]  ;;  %v1603_v12 = vld [vmem:[%s2805_s1 + $0x380] sm:$0xf]  ;;  %v1540_v14 = vor.u32 %v1826_v2, %v1539_v1  ;;  %v1724_v15 = vor.u32 %v1872_v5, %v1723_v4 }
  0x31   :  { %976 = vmatpush.bf16.msrb.mxu1 %v1508_v16  ;;  %v1277_v9 = vld [vmem:[%s2805_s1 + $0xf8] sm:$0xf0]  ;;  %v1842_v13 = vld [vmem:[%s2805_s1 + $0x384] sm:$0xf0]  ;;  %v1775_v16 = vld [vmem:[%s2805_s1 + $0x174] sm:$0xf]  ;;  %v1216_v21 = vor.u32 %v1743_v6, %v1213_v7 }
  0x32   :  { %989 = vmatpush.bf16.msrb.mxu2 %v1572_v20  ;;  %v1341_v20 = vld [vmem:[%s2805_s1 + $0x178] sm:$0xf0]  ;;  %v1280_v22 = vor.u32 %v1759_v8, %v1277_v9  ;;  %v1870_v25 = vld [vmem:[%s2805_s1 + $0x464] sm:$0xf0]  ;;  %v1741_v26 = vld [vmem:[%s2805_s1 + $0x64] sm:$0xf]  ;;  %v1604_v27 = vor.u32 %v1842_v13, %v1603_v12 }
  0x33   :  { %1002 = vmatpush.bf16.msrb.mxu3 %v1636_v24  ;;  %v1715_v24 = vld [vmem:[%s2805_s1 + $0x460] sm:$0xf]  ;;  %v1205_v28 = vld [vmem:[%s2805_s1 + $0x68] sm:$0xf0]  ;;  %v1344_v31 = vor.u32 %v1775_v16, %v1341_v20  ;;  %v1773_v33 = vld [vmem:[%s2805_s1 + $0x164] sm:$0xf] }
  0x34   :  { %964 = vmatpush.bf16.msrb.mxu0 %v1436_v29  ;;  %v1757_v29 = vld [vmem:[%s2805_s1 + $0xe4] sm:$0xf]  ;;  %v1333_v34 = vld [vmem:[%s2805_s1 + $0x168] sm:$0xf0]  ;;  %v1208_v35 = vor.u32 %v1741_v26, %v1205_v28  ;;  %v1868_v38 = vld [vmem:[%s2805_s1 + $0x454] sm:$0xf0] }
  0x35   :  { %977 = vmatpush.bf16.msrb.mxu1 %v1500_v30  ;;  %v1269_v30 = vld [vmem:[%s2805_s1 + $0xe8] sm:$0xf0]  ;;  %v1739_v39 = vld [vmem:[%s2805_s1 + $0x54] sm:$0xf]  ;;  %v1197_v40 = vld [vmem:[%s2805_s1 + $0x58] sm:$0xf0] }
  0x36   :  { %990 = vmatpush.bf16.msrb.mxu2 %v1564_v32  ;;  %v1716_v32 = vor.u32 %v1870_v25, %v1715_v24  ;;  %v1272_v36 = vor.u32 %v1757_v29, %v1269_v30  ;;  %v1755_v41 = vld [vmem:[%s2805_s1 + $0xd4] sm:$0xf]  ;;  %v1261_v42 = vld [vmem:[%s2805_s1 + $0xd8] sm:$0xf0]  ;;  %v1200_v47 = vor.u32 %v1739_v39, %v1197_v40  ;;  %v1699_v49 = vld [vmem:[%s2805_s1 + $0x440] sm:$0xf] }
  0x37   :  { %1003 = vmatpush.bf16.msrb.mxu3 %v1628_v37  ;;  %v1707_v37 = vld [vmem:[%s2805_s1 + $0x450] sm:$0xf]  ;;  %v1771_v45 = vld [vmem:[%s2805_s1 + $0x154] sm:$0xf]  ;;  %v1325_v46 = vld [vmem:[%s2805_s1 + $0x158] sm:$0xf0] }
  0x38   :  { %965 = vmatpush.bf16.msrb.mxu0 %v1428_v43  ;;  %v1336_v43 = vor.u32 %v1773_v33, %v1333_v34  ;;  %v1866_v50 = vld [vmem:[%s2805_s1 + $0x444] sm:$0xf0]  ;;  %v1189_v56 = vld [vmem:[%s2805_s1 + $0x48] sm:$0xf0]  ;;  %v1753_v57 = vld [vmem:[%s2805_s1 + $0xc4] sm:$0xf] }
  0x39   :  { %978 = vmatpush.bf16.msrb.mxu1 %v1492_v44  ;;  %v1708_v44 = vor.u32 %v1868_v38, %v1707_v37  ;;  %v1700_v60 = vor.u32 %v1866_v50, %v1699_v49  ;;  %v1769_v61 = vld [vmem:[%s2805_s1 + $0x144] sm:$0xf]  ;;  %v1317_v62 = vld [vmem:[%s2805_s1 + $0x148] sm:$0xf0]  ;;  %v1691_v1 = vld [vmem:[%s2805_s1 + $0x430] sm:$0xf] }
  0x3a   :  { %991 = vmatpush.bf16.msrb.mxu2 %v1556_v48  ;;  %v1264_v48 = vor.u32 %v1755_v41, %v1261_v42  ;;  %v1864_v2 = vld [vmem:[%s2805_s1 + $0x434] sm:$0xf0]  ;;  %v1181_v4 = vld [vmem:[%s2805_s1 + $0x38] sm:$0xf0]  ;;  %v1751_v5 = vld [vmem:[%s2805_s1 + $0xb4] sm:$0xf]  ;;  %v1320_v7 = vor.u32 %v1769_v61, %v1317_v62 }
  0x3b   :  { %1004 = vmatpush.bf16.msrb.mxu3 %v1620_v52  ;;  %v1737_v52 = vld [vmem:[%s2805_s1 + $0x44] sm:$0xf]  ;;  %v1245_v6 = vld [vmem:[%s2805_s1 + $0xb8] sm:$0xf0]  ;;  %v1692_v8 = vor.u32 %v1864_v2, %v1691_v1  ;;  %v1767_v9 = vld [vmem:[%s2805_s1 + $0x134] sm:$0xf] }
  0x3c   :  { %966 = vmatpush.bf16.msrb.mxu0 %v1420_v58  ;;  %v1253_v58 = vld [vmem:[%s2805_s1 + $0xc8] sm:$0xf0]  ;;  %v1248_v12 = vor.u32 %v1751_v5, %v1245_v6  ;;  %v1683_v13 = vld [vmem:[%s2805_s1 + $0x420] sm:$0xf]  ;;  %v1749_v20 = vld [vmem:[%s2805_s1 + $0xa4] sm:$0xf] }
  0x3d   :  { %979 = vmatpush.bf16.msrb.mxu1 %v1484_v59  ;;  %v1328_v59 = vor.u32 %v1771_v45, %v1325_v46  ;;  %v1256_v0 = vor.u32 %v1753_v57, %v1253_v58  ;;  %v1173_v16 = vld [vmem:[%s2805_s1 + $0x28] sm:$0xf0]  ;;  %v1765_v25 = vld [vmem:[%s2805_s1 + $0x124] sm:$0xf]  ;;  %v1675_v29 = vld [vmem:[%s2805_s1 + $0x410] sm:$0xf] }
  0x3e   :  { %992 = vmatpush.bf16.msrb.mxu2 %v1548_v63  ;;  %v1192_v63 = vor.u32 %v1737_v52, %v1189_v56  ;;  %v1301_v26 = vld [vmem:[%s2805_s1 + $0x128] sm:$0xf0]  ;;  %v1860_v30 = vld [vmem:[%s2805_s1 + $0x414] sm:$0xf0]  ;;  %v1747_v33 = vld [vmem:[%s2805_s1 + $0x94] sm:$0xf] }
  0x3f   :  { %1005 = vmatpush.bf16.msrb.mxu3 %v1612_v3  ;;  %v1735_v3 = vld [vmem:[%s2805_s1 + $0x34] sm:$0xf]  ;;  %v1229_v34 = vld [vmem:[%s2805_s1 + $0x98] sm:$0xf0]  ;;  %v1667_v39 = vld [vmem:[%s2805_s1 + $0x400] sm:$0xf] }
  0x40   :  { %967 = vmatpush.bf16.msrb.mxu0 %v1412_v10  ;;  %v1309_v10 = vld [vmem:[%s2805_s1 + $0x138] sm:$0xf0]  ;;  %v1763_v37 = vld [vmem:[%s2805_s1 + $0x114] sm:$0xf]  ;;  %v1232_v41 = vor.u32 %v1747_v33, %v1229_v34  ;;  %v1858_v42 = vld [vmem:[%s2805_s1 + $0x404] sm:$0xf0] }
  0x41   :  { %980 = vmatpush.bf16.msrb.mxu1 %v1476_v11  ;;  %v1184_v11 = vor.u32 %v1735_v3, %v1181_v4  ;;  %v1293_v38 = vld [vmem:[%s2805_s1 + $0x118] sm:$0xf0]  ;;  %v1745_v45 = vld [vmem:[%s2805_s1 + $0x84] sm:$0xf]  ;;  %v1221_v46 = vld [vmem:[%s2805_s1 + $0x88] sm:$0xf0]  ;;  %v1668_v56 = vor.u32 %v1858_v42, %v1667_v39 }
  0x42   :  { %993 = vmatpush.bf16.msrb.mxu2 %v1540_v14  ;;  %v1862_v14 = vld [vmem:[%s2805_s1 + $0x424] sm:$0xf0]  ;;  %v1405_v49 = vld [vmem:[%s2805_s1 + $0x1f8] sm:$0xf0]  ;;  %v1807_v50 = vld [vmem:[%s2805_s1 + $0x274] sm:$0xf] }
  0x43   :  { %1006 = vmatpush.bf16.msrb.mxu3 %v1604_v27  ;;  %968 = vmatmul.bf16.vlgmr.msrb.gmra.mxu0 %v2267_v53  ;;  %v1684_v24 = vor.u32 %v1862_v14, %v1683_v13  ;;  %v1469_v52 = vld [vmem:[%s2805_s1 + $0x278] sm:$0xf0]  ;;  %v1823_v57 = vld [vmem:[%s2805_s1 + $0x2f4] sm:$0xf]  ;;  %v1761_v61 = vld [vmem:[%s2805_s1 + $0x104] sm:$0xf] }
  0x44   :  { %1012 = vmatpush.bf16.msra.mxu0 %v1724_v15  ;;  %981 = vmatmul.bf16.vlgmr.msrb.gmra.mxu1 %v2271_v55  ;;  %v1733_v15 = vld [vmem:[%s2805_s1 + $0x24] sm:$0xf]  ;;  %v1533_v58 = vld [vmem:[%s2805_s1 + $0x2f8] sm:$0xf0]  ;;  %v1285_v62 = vld [vmem:[%s2805_s1 + $0x108] sm:$0xf0] }
  0x45   :  { %1025 = vmatpush.bf16.msra.mxu1 %v1216_v21  ;;  %994 = vmatmul.bf16.vlgmr.msrb.gmra.mxu2 %v2265_v51  ;;  %v1237_v21 = vld [vmem:[%s2805_s1 + $0xa8] sm:$0xf0]  ;;  %v1176_v27 = vor.u32 %v1733_v15, %v1173_v16  ;;  %v1839_v1 = vld [vmem:[%s2805_s1 + $0x374] sm:$0xf]  ;;  %v1597_v2 = vld [vmem:[%s2805_s1 + $0x378] sm:$0xf0]  ;;  %v1536_v4 = vor.u32 %v1823_v57, %v1533_v58 }
  0x46   :  { %1038 = vmatpush.bf16.msra.mxu2 %v1280_v22  ;;  %1007 = vmatmul.bf16.vlgmr.msrb.gmra.mxu3 %v2269_v54  ;;  %v1312_v22 = vor.u32 %v1767_v9, %v1309_v10  ;;  %v1240_v28 = vor.u32 %v1749_v20, %v1237_v21  ;;  %v1789_v3 = vld [vmem:[%s2805_s1 + $0x1e4] sm:$0xf]  ;;  %v1397_v5 = vld [vmem:[%s2805_s1 + $0x1e8] sm:$0xf0]  ;;  %v1288_v9 = vor.u32 %v1761_v61, %v1285_v62  ;;  %v1787_v20 = vld [vmem:[%s2805_s1 + $0x1d4] sm:$0xf] }
  0x47   :  { %1051 = vmatpush.bf16.msra.mxu3 %v1344_v31  ;;  %v1731_v31 = vld [vmem:[%s2805_s1 + $0x14] sm:$0xf]  ;;  %v1805_v6 = vld [vmem:[%s2805_s1 + $0x264] sm:$0xf]  ;;  %v1400_v13 = vor.u32 %v1789_v3, %v1397_v5  ;;  %v1589_v16 = vld [vmem:[%s2805_s1 + $0x368] sm:$0xf0] }
  0x48   :  { %1013 = vmatpush.bf16.msra.mxu0 %v1716_v32  ;;  %v1165_v32 = vld [vmem:[%s2805_s1 + $0x18] sm:$0xf0]  ;;  %v1821_v10 = vld [vmem:[%s2805_s1 + $0x2e4] sm:$0xf]  ;;  %v1783_v42 = vld [vmem:[%s2805_s1 + $0x1b4] sm:$0xf] }
  0x49   :  { %1026 = vmatpush.bf16.msra.mxu1 %v1208_v35  ;;  %v1304_v35 = vor.u32 %v1765_v25, %v1301_v26  ;;  %v1168_v40 = vor.u32 %v1731_v31, %v1165_v32  ;;  %v1837_v15 = vld [vmem:[%s2805_s1 + $0x364] sm:$0xf]  ;;  %v1453_v25 = vld [vmem:[%s2805_s1 + $0x258] sm:$0xf0]  ;;  %v1819_v26 = vld [vmem:[%s2805_s1 + $0x2d4] sm:$0xf] }
  0x4a   :  { %1039 = vmatpush.bf16.msra.mxu2 %v1272_v36  ;;  %v1676_v36 = vor.u32 %v1860_v30, %v1675_v29  ;;  %v1835_v31 = vld [vmem:[%s2805_s1 + $0x354] sm:$0xf]  ;;  %v1581_v32 = vld [vmem:[%s2805_s1 + $0x358] sm:$0xf0]  ;;  %v1801_v34 = vld [vmem:[%s2805_s1 + $0x244] sm:$0xf] }
  0x4b   :  { %1052 = vmatpush.bf16.msra.mxu3 %v1336_v43  ;;  %v1729_v43 = vld [vmem:[%s2805_s1 + $0x4] sm:$0xf]  ;;  %v1565_v57 = vld [vmem:[%s2805_s1 + $0x338] sm:$0xf0]  ;;  %v1429_v62 = vld [vmem:[%s2805_s1 + $0x228] sm:$0xf0] }
  0x4c   :  { %1014 = vmatpush.bf16.msra.mxu0 %v1708_v44  ;;  %v1157_v44 = vld [vmem:[%s2805_s1 + $0x8] sm:$0xf0]  ;;  %v1781_v58 = vld [vmem:[%s2805_s1 + $0x1a4] sm:$0xf] }
  0x4d   :  { %1027 = vmatpush.bf16.msra.mxu1 %v1200_v47  ;;  %v1791_v47 = vld [vmem:[%s2805_s1 + $0x1f4] sm:$0xf]  ;;  %v1797_v61 = vld [vmem:[%s2805_s1 + $0x224] sm:$0xf]  ;;  %v1557_v5 = vld [vmem:[%s2805_s1 + $0x328] sm:$0xf0] }
  0x4e   :  { %1040 = vmatpush.bf16.msra.mxu2 %v1264_v48  ;;  %v1296_v48 = vor.u32 %v1763_v37, %v1293_v38  ;;  %v1509_v37 = vld [vmem:[%s2805_s1 + $0x2c8] sm:$0xf0]  ;;  %v1584_v38 = vor.u32 %v1835_v31, %v1581_v32  ;;  %v1432_v3 = vor.u32 %v1797_v61, %v1429_v62  ;;  %v1661_v31 = vld [vmem:[%s2805_s1 + $0x3f8] sm:$0xf0] }
  0x4f   :  { %1053 = vmatpush.bf16.msra.mxu3 %v1328_v59  ;;  %v1160_v59 = vor.u32 %v1729_v43, %v1157_v44  ;;  %v1373_v44 = vld [vmem:[%s2805_s1 + $0x1b8] sm:$0xf0] }
  0x50   :  { %1015 = vmatpush.bf16.msra.mxu0 %v1700_v60  ;;  %v1224_v60 = vor.u32 %v1745_v45, %v1221_v46  ;;  %v1799_v45 = vld [vmem:[%s2805_s1 + $0x234] sm:$0xf]  ;;  %v1437_v46 = vld [vmem:[%s2805_s1 + $0x238] sm:$0xf0] }
  0x51   :  { %1028 = vmatpush.bf16.msra.mxu1 %v1192_v63  ;;  %v1408_v63 = vor.u32 %v1791_v47, %v1405_v49  ;;  %v1815_v47 = vld [vmem:[%s2805_s1 + $0x2b4] sm:$0xf]  ;;  %v1693_v61 = vld [vmem:[%s2805_s1 + $0x438] sm:$0xf0] }
  0x52   :  { %1041 = vmatpush.bf16.msra.mxu2 %v1256_v0  ;;  %v1472_v0 = vor.u32 %v1807_v50, %v1469_v52  ;;  %v1376_v50 = vor.u32 %v1783_v42, %v1373_v44  ;;  %v1440_v52 = vor.u32 %v1799_v45, %v1437_v46  ;;  %v1869_v42 = vld [vmem:[%s2805_s1 + $0x464] sm:$0xf]  ;;  %v1851_v46 = vld [vmem:[%s2805_s1 + $0x3d4] sm:$0xf] }
  0x53   :  { %1054 = vmatpush.bf16.msra.mxu3 %v1320_v7  ;;  %v1461_v7 = vld [vmem:[%s2805_s1 + $0x268] sm:$0xf0] }
  0x54   :  { %1016 = vmatpush.bf16.msra.mxu0 %v1692_v8  ;;  %v2535_v8 = vld [vmem:[#allocation1] sm:$0xff]  ;;  %v1464_v14 = vor.u32 %v1805_v6, %v1461_v7  ;;  %v1779_v6 = vld [vmem:[%s2805_s1 + $0x194] sm:$0xf] }
  0x55   :  { %1029 = vmatpush.bf16.msra.mxu1 %v1184_v11  ;;  %v1525_v11 = vld [vmem:[%s2805_s1 + $0x2e8] sm:$0xf0] }
  0x56   :  { %1042 = vmatpush.bf16.msra.mxu2 %v1248_v12  ;;  %v1600_v12 = vor.u32 %v1839_v1, %v1597_v2  ;;  %v1528_v21 = vor.u32 %v1821_v10, %v1525_v11  ;;  %v1795_v10 = vld [vmem:[%s2805_s1 + $0x214] sm:$0xf]  ;;  %v1421_v11 = vld [vmem:[%s2805_s1 + $0x218] sm:$0xf0] }
  0x57   :  { %1055 = vmatpush.bf16.msra.mxu3 %v1312_v22  ;;  %v1389_v22 = vld [vmem:[%s2805_s1 + $0x1d8] sm:$0xf0] }
  0x58   :  { %1017 = vmatpush.bf16.msra.mxu0 %v1684_v24  ;;  %v1803_v24 = vld [vmem:[%s2805_s1 + $0x254] sm:$0xf]  ;;  %v1392_v29 = vor.u32 %v1787_v20, %v1389_v22  ;;  %v1424_v20 = vor.u32 %v1795_v10, %v1421_v11  ;;  %v1777_v22 = vld [vmem:[%s2805_s1 + $0x184] sm:$0xf]  ;;  %v1677_v10 = vld [vmem:[%s2805_s1 + $0x418] sm:$0xf0] }
  0x59   :  { %1030 = vmatpush.bf16.msra.mxu1 %v1176_v27  ;;  %v1517_v27 = vld [vmem:[%s2805_s1 + $0x2d8] sm:$0xf0]  ;;  %v1456_v30 = vor.u32 %v1803_v24, %v1453_v25  ;;  %v1349_v24 = vld [vmem:[%s2805_s1 + $0x188] sm:$0xf0] }
  0x5a   :  { %1043 = vmatpush.bf16.msra.mxu2 %v1240_v28  ;;  %v1592_v28 = vor.u32 %v1837_v15, %v1589_v16  ;;  %v1520_v33 = vor.u32 %v1819_v26, %v1517_v27  ;;  %v1827_v15 = vld [vmem:[%s2805_s1 + $0x314] sm:$0xf]  ;;  %v1793_v26 = vld [vmem:[%s2805_s1 + $0x204] sm:$0xf]  ;;  %v1413_v27 = vld [vmem:[%s2805_s1 + $0x208] sm:$0xf0] }
  0x5b   :  { %1056 = vmatpush.bf16.msra.mxu3 %v1304_v35  ;;  %v1445_v35 = vld [vmem:[%s2805_s1 + $0x248] sm:$0xf0] }
  0x5c   :  { %1018 = vmatpush.bf16.msra.mxu0 %v1676_v36  ;;  %v1817_v36 = vld [vmem:[%s2805_s1 + $0x2c4] sm:$0xf] }
  0x5d   :  { %1031 = vmatpush.bf16.msra.mxu1 %v1168_v40  ;;  %v1448_v40 = vor.u32 %v1801_v34, %v1445_v35  ;;  %v1512_v43 = vor.u32 %v1817_v36, %v1509_v37  ;;  %v1416_v34 = vor.u32 %v1793_v26, %v1413_v27  ;;  %v1825_v35 = vld [vmem:[%s2805_s1 + $0x304] sm:$0xf]  ;;  %v1541_v36 = vld [vmem:[%s2805_s1 + $0x308] sm:$0xf0] }
  0x5e   :  { %1044 = vmatpush.bf16.msra.mxu2 %v1232_v41  ;;  %v1833_v41 = vld [vmem:[%s2805_s1 + $0x344] sm:$0xf] }
  0x5f   :  { %1057 = vmatpush.bf16.msra.mxu3 %v1296_v48  ;;  %v1501_v48 = vld [vmem:[%s2805_s1 + $0x2b8] sm:$0xf0] }
  0x60   :  { %1019 = vmatpush.bf16.msra.mxu0 %v1668_v56  ;;  %v1831_v56 = vld [vmem:[%s2805_s1 + $0x334] sm:$0xf] }
  0x61   :  { %1032 = vmatpush.bf16.msra.mxu1 %v1160_v59  ;;  %v1504_v59 = vor.u32 %v1815_v47, %v1501_v48  ;;  %v1568_v1 = vor.u32 %v1831_v56, %v1565_v57  ;;  %v1645_v47 = vld [vmem:[%s2805_s1 + $0x3d8] sm:$0xf0]  ;;  %v1867_v48 = vld [vmem:[%s2805_s1 + $0x454] sm:$0xf]  ;;  %v1637_v56 = vld [vmem:[%s2805_s1 + $0x3c8] sm:$0xf0] }
  0x62   :  { %1045 = vmatpush.bf16.msra.mxu2 %v1224_v60  ;;  %v1365_v60 = vld [vmem:[%s2805_s1 + $0x1a8] sm:$0xf0] }
  0x63   :  { %1020 = vmatmul.bf16.vlgmr.msra.gmra.mxu0 %v2535_v8  ;;  %1058 = vmatpush.bf16.msra.mxu3 %v1288_v9  ;;  %v1368_v2 = vor.u32 %v1781_v58, %v1365_v60  ;;  %v1357_v9 = vld [vmem:[%s2805_s1 + $0x198] sm:$0xf0]  ;;  %v1847_v58 = vld [vmem:[%s2805_s1 + $0x3b4] sm:$0xf] }
  0x64   :  { %1064 = vmatpush.bf16.msrb.mxu0 %v1408_v63  ;;  %1033 = vmatmul.bf16.vlgmr.msra.gmra.mxu1 %v2192_v18  ;;  %v1381_v18 = vld [vmem:[%s2805_s1 + $0x1c8] sm:$0xf0]  ;;  %v1813_v63 = vld [vmem:[%s2805_s1 + $0x2a4] sm:$0xf]  ;;  %v1360_v16 = vor.u32 %v1779_v6, %v1357_v9  ;;  %v1863_v60 = vld [vmem:[%s2805_s1 + $0x434] sm:$0xf] }
  0x65   :  { %1077 = vmatpush.bf16.msrb.mxu1 %v1472_v0  ;;  %1046 = vmatmul.bf16.vlgmr.msra.gmra.mxu2 %v2203_v23  ;;  %v1785_v23 = vld [vmem:[%s2805_s1 + $0x1c4] sm:$0xf]  ;;  %v1493_v0 = vld [vmem:[%s2805_s1 + $0x2a8] sm:$0xf0]  ;;  %v1843_v6 = vld [vmem:[%s2805_s1 + $0x394] sm:$0xf] }
  0x66   :  { %1090 = vmatpush.bf16.msrb.mxu2 %v1536_v4  ;;  %1059 = vmatmul.bf16.vlgmr.msra.gmra.mxu3 %v2190_v17  ;;  %v1384_v39 = vor.u32 %v1785_v23, %v1381_v18  ;;  %v1573_v17 = vld [vmem:[%s2805_s1 + $0x348] sm:$0xf0]  ;;  %v1829_v4 = vld [vmem:[%s2805_s1 + $0x324] sm:$0xf]  ;;  %v1496_v7 = vor.u32 %v1813_v63, %v1493_v0  ;;  %v1871_v23 = vld [vmem:[%s2805_s1 + $0x474] sm:$0xf]  ;;  %v1352_v18 = vor.u32 %v1777_v22, %v1349_v24 }
  0x67   :  { %1103 = vmatpush.bf16.msrb.mxu3 %v1600_v12  ;;  %v1576_v49 = vor.u32 %v1833_v41, %v1573_v17  ;;  %v1811_v12 = vld [vmem:[%s2805_s1 + $0x294] sm:$0xf]  ;;  %v1653_v41 = vld [vmem:[%s2805_s1 + $0x3e8] sm:$0xf0]  ;;  %v1544_v17 = vor.u32 %v1825_v35, %v1541_v36  ;;  %v1696_v63 = vor.u32 %v1863_v60, %v1693_v61  ;;  %v1845_v0 = vld [vmem:[%s2805_s1 + $0x3a4] sm:$0xf] }
  0x68   :  { %1065 = vmatpush.bf16.msrb.mxu0 %v1400_v13  ;;  %v1485_v13 = vld [vmem:[%s2805_s1 + $0x298] sm:$0xf0]  ;;  %v1859_v9 = vld [vmem:[%s2805_s1 + $0x414] sm:$0xf]  ;;  %v160_v22 = vld [vmem:[%s2807_s2] sm:$0x3] }
  0x69   :  { %1078 = vmatpush.bf16.msrb.mxu1 %v1464_v14  ;;  %v1560_v14 = vor.u32 %v1829_v4, %v1557_v5  ;;  %v1488_v25 = vor.u32 %v1811_v12, %v1485_v13  ;;  %v1680_v12 = vor.u32 %v1859_v9, %v1677_v10  ;;  %v1841_v13 = vld [vmem:[%s2805_s1 + $0x384] sm:$0xf]  ;;  %v162_v24 = vperm.slane %v160_v22, 0 }
  0x6a   :  { %1091 = vmatpush.bf16.msrb.mxu2 %v1528_v21  ;;  %v1549_v21 = vld [vmem:[%s2805_s1 + $0x318] sm:$0xf0] }
  0x6b   :  { %1104 = vmatpush.bf16.msrb.mxu3 %v1592_v28  ;;  %v1809_v28 = vld [vmem:[%s2805_s1 + $0x284] sm:$0xf]  ;;  %v1552_v32 = vor.u32 %v1827_v15, %v1549_v21 }
  0x6c   :  { %1066 = vmatpush.bf16.msrb.mxu0 %v1392_v29  ;;  %v1477_v29 = vld [vmem:[%s2805_s1 + $0x288] sm:$0xf0]  ;;  %v1857_v15 = vld [vmem:[%s2805_s1 + $0x404] sm:$0xf] }
  0x6d   :  { %1079 = vmatpush.bf16.msrb.mxu1 %v1456_v30  ;;  %v1855_v30 = vld [vmem:[%s2805_s1 + $0x3f4] sm:$0xf]  ;;  %v1480_v37 = vor.u32 %v1809_v28, %v1477_v29 }
  0x6e   :  { %1092 = vmatpush.bf16.msrb.mxu2 %v1520_v33  ;;  %v1725_v33 = vld [vmem:[%s2805_s1 + $0x478] sm:$0xf0] }
  0x6f   :  { %1105 = vmatpush.bf16.msrb.mxu3 %v1584_v38  ;;  %v1664_v38 = vor.u32 %v1855_v30, %v1661_v31 }
  0x70   :  { %1067 = vmatpush.bf16.msrb.mxu0 %v1384_v39  ;;  %v1728_v39 = vor.u32 %v1871_v23, %v1725_v33 }
  0x71   :  { %1080 = vmatpush.bf16.msrb.mxu1 %v1448_v40  ;;  %v1853_v40 = vld [vmem:[%s2805_s1 + $0x3e4] sm:$0xf] }
  0x72   :  { %1093 = vmatpush.bf16.msrb.mxu2 %v1512_v43  ;;  %v1717_v43 = vld [vmem:[%s2805_s1 + $0x468] sm:$0xf0]  ;;  %v1656_v44 = vor.u32 %v1853_v40, %v1653_v41 }
  0x73   :  { %1106 = vmatpush.bf16.msrb.mxu3 %v1576_v49  ;;  %v1720_v45 = vor.u32 %v1869_v42, %v1717_v43  ;;  %v1709_v49 = vld [vmem:[%s2805_s1 + $0x458] sm:$0xf0] }
  0x74   :  { %1068 = vmatpush.bf16.msrb.mxu0 %v1376_v50  ;;  %v1648_v50 = vor.u32 %v1851_v46, %v1645_v47 }
  0x75   :  { %1081 = vmatpush.bf16.msrb.mxu1 %v1440_v52  ;;  %v1712_v52 = vor.u32 %v1867_v48, %v1709_v49 }
  0x76   :  { %1094 = vmatpush.bf16.msrb.mxu2 %v1504_v59  ;;  %v1629_v59 = vld [vmem:[%s2805_s1 + $0x3b8] sm:$0xf0] }
  0x77   :  { %1107 = vmatpush.bf16.msrb.mxu3 %v1568_v1  ;;  %v1632_v62 = vor.u32 %v1847_v58, %v1629_v59  ;;  %v1621_v1 = vld [vmem:[%s2805_s1 + $0x3a8] sm:$0xf0] }
  0x78   :  { %1069 = vmatpush.bf16.msrb.mxu0 %v1368_v2  ;;  %v1861_v2 = vld [vmem:[%s2805_s1 + $0x424] sm:$0xf]  ;;  %v1624_v4 = vor.u32 %v1845_v0, %v1621_v1 }
  0x79   :  { %1082 = vmatpush.bf16.msrb.mxu1 %v1432_v3  ;;  %v1685_v3 = vld [vmem:[%s2805_s1 + $0x428] sm:$0xf0] }
  0x7a   :  { %1095 = vmatpush.bf16.msrb.mxu2 %v1496_v7  ;;  %v1688_v5 = vor.u32 %v1861_v2, %v1685_v3  ;;  %v1613_v7 = vld [vmem:[%s2805_s1 + $0x398] sm:$0xf0] }
  0x7b   :  { %1108 = vmatpush.bf16.msrb.mxu3 %v1560_v14  ;;  %v1616_v11 = vor.u32 %v1843_v6, %v1613_v7  ;;  %v1605_v14 = vld [vmem:[%s2805_s1 + $0x388] sm:$0xf0] }
  0x7c   :  { %1070 = vmatpush.bf16.msrb.mxu0 %v1360_v16  ;;  %v1669_v16 = vld [vmem:[%s2805_s1 + $0x408] sm:$0xf0] }
  0x7d   :  { %1083 = vmatpush.bf16.msrb.mxu1 %v1424_v20  ;;  %v1608_v20 = vor.u32 %v1841_v13, %v1605_v14  ;;  %v1672_v21 = vor.u32 %v1857_v15, %v1669_v16 }
  0x7e   :  { %1096 = vmatpush.bf16.msrb.mxu2 %v1488_v25 }
  0x7f   :  { %1109 = vmatpush.bf16.msrb.mxu3 %v1552_v32 }
  0x80   :  { %1071 = vmatpush.bf16.msrb.mxu0 %v1352_v18 }
  0x81   :  { %1084 = vmatpush.bf16.msrb.mxu1 %v1416_v34 }
  0x82   :  { %1097 = vmatpush.bf16.msrb.mxu2 %v1480_v37 }
  0x83   :  { %1110 = vmatpush.bf16.msrb.mxu3 %v1544_v17  ;;  %1072 = vmatmul.bf16.vlgmr.msrb.gmra.mxu0 %v2194_v19  ;;  %v1849_v19 = vld [vmem:[%s2805_s1 + $0x3c4] sm:$0xf] }
  0x84   :  { %1116 = vmatpush.bf16.msra.mxu0 %v1664_v38  ;;  %1085 = vmatmul.bf16.vlgmr.msrb.gmra.mxu1 %v2267_v53  ;;  %v1701_v53 = vld [vmem:[%s2805_s1 + $0x448] sm:$0xf0]  ;;  %v1640_v57 = vor.u32 %v1849_v19, %v1637_v56  ;;  %v163_v19 = vperm.slane %v160_v22, 1 }
  0x85   :  { %1129 = vmatpush.bf16.msra.mxu1 %v1728_v39  ;;  %1098 = vmatmul.bf16.vlgmr.msrb.gmra.mxu2 %v2271_v55  ;;  %v1865_v55 = vld [vmem:[%s2805_s1 + $0x444] sm:$0xf] }
  0x86   :  { %1111 = vmatmul.bf16.vlgmr.msrb.gmra.mxu3 %v2265_v51  ;;  %v1704_v51 = vor.u32 %v1865_v55, %v1701_v53 }
  0x88   :  { %1117 = vmatpush.bf16.msra.mxu0 %v1656_v44 }
  0x89   :  { %1130 = vmatpush.bf16.msra.mxu1 %v1720_v45 }
  0x8c   :  { %1118 = vmatpush.bf16.msra.mxu0 %v1648_v50 }
  0x8d   :  { %1131 = vmatpush.bf16.msra.mxu1 %v1712_v52 }
  0x90   :  { %1119 = vmatpush.bf16.msra.mxu0 %v1640_v57 }
  0x91   :  { %1132 = vmatpush.bf16.msra.mxu1 %v1704_v51 }
  0x94   :  { %1120 = vmatpush.bf16.msra.mxu0 %v1632_v62 }
  0x95   :  { %1133 = vmatpush.bf16.msra.mxu1 %v1696_v63 }
  0x98   :  { %1121 = vmatpush.bf16.msra.mxu0 %v1624_v4 }
  0x99   :  { %1134 = vmatpush.bf16.msra.mxu1 %v1688_v5 }
  0x9c   :  { %1122 = vmatpush.bf16.msra.mxu0 %v1616_v11 }
  0x9d   :  { %1135 = vmatpush.bf16.msra.mxu1 %v1680_v12 }
  0xa0   :  { %1123 = vmatpush.bf16.msra.mxu0 %v1608_v20 }
  0xa1   :  { %1136 = vmatpush.bf16.msra.mxu1 %v1672_v21 }
  0xa2   :  { %v917_v25 = vpop.f32.mrf.mxu0 }
  0xa3   :  { %1124 = vmatmul.bf16.vlgmr.msra.gmra.mxu0 %v2269_v54  ;;  %v918_v26 = vadd.f32 %v917_v25, %v162_v24 }
  0xa4   :  { %1137 = vmatmul.bf16.vlgmr.msra.gmra.mxu1 %v2535_v8 }
  0xa5   :  { %v930_v27 = vpop.f32.mrf.mxu1 }
  0xa6   :  { %v931_v28 = vadd.f32 %v930_v27, %v918_v26 }
  0xa9   :  { %v956_v31 = vpop.f32.mrf.mxu3 }
  0xaa   :  { %v943_v29 = vpop.f32.mrf.mxu2  ;;  %v919_v32 = vpop.f32.mrf.mxu0 }
  0xab   :  { %v944_v30 = vadd.f32 %v943_v29, %v931_v28 }
  0xad   :  { %v957_v23 = vadd.f32 %v956_v31, %v944_v30  ;;  %v932_v33 = vpop.f32.mrf.mxu1 }
  0xb1   :  { %v958_v34 = vpop.f32.mrf.mxu3 }
  0xb2   :  { %v945_v18 = vpop.f32.mrf.mxu2 }
  0xc0   :  { %v969_v54 = vpop.f32.mrf.mxu0 }
  0xc1   :  { %v970_v35 = vadd.f32 %v969_v54, %v957_v23  ;;  %v982_v8 = vpop.f32.mrf.mxu1 }
  0xc3   :  { %v983_v36 = vadd.f32 %v982_v8, %v970_v35 }
  0xc8   :  { %v995_v37 = vpop.f32.mrf.mxu2  ;;  %v971_v39 = vpop.f32.mrf.mxu0 }
  0xc9   :  { %v996_v38 = vadd.f32 %v995_v37, %v983_v36  ;;  %v1008_v40 = vpop.f32.mrf.mxu3  ;;  %v984_v41 = vpop.f32.mrf.mxu1 }
  0xcb   :  { %v1009_v17 = vadd.f32 %v1008_v40, %v996_v38 }
  0xd0   :  { %v997_v42 = vpop.f32.mrf.mxu2 }
  0xd1   :  { %v1010_v43 = vpop.f32.mrf.mxu3 }
  0xe0   :  { %v1021_v44 = vpop.f32.mrf.mxu0 }
  0xe1   :  { %v1034_v45 = vpop.f32.mrf.mxu1  ;;  %v1022_v9 = vadd.f32 %v1021_v44, %v1009_v17 }
  0xe2   :  { %v1035_v53 = vadd.f32 %v1034_v45, %v163_v19 }
  0xe8   :  { %v1047_v46 = vpop.f32.mrf.mxu2  ;;  %v1023_v47 = vpop.f32.mrf.mxu0 }
  0xe9   :  { %v1060_v48 = vpop.f32.mrf.mxu3  ;;  %v1036_v49 = vpop.f32.mrf.mxu1  ;;  %v1048_v51 = vadd.f32 %v1047_v46, %v1035_v53 }
  0xeb   :  { %v1061_v61 = vadd.f32 %v1060_v48, %v1048_v51 }
  0xf0   :  { %v1049_v50 = vpop.f32.mrf.mxu2 }
  0xf1   :  { %v1062_v52 = vpop.f32.mrf.mxu3 }
 0x100   :  { %v1073_v56 = vpop.f32.mrf.mxu0 }
 0x101   :  { %v1086_v55 = vpop.f32.mrf.mxu1  ;;  %v1074_v63 = vadd.f32 %v1073_v56, %v1061_v61 }
 0x103   :  { %v1087_v1 = vadd.f32 %v1086_v55, %v1074_v63 }
 0x108   :  { %v1099_v57 = vpop.f32.mrf.mxu2  ;;  %v1075_v58 = vpop.f32.mrf.mxu0 }
 0x109   :  { %v1112_v59 = vpop.f32.mrf.mxu3  ;;  %v1088_v60 = vpop.f32.mrf.mxu1  ;;  %v1100_v2 = vadd.f32 %v1099_v57, %v1087_v1 }
 0x10b   :  { %v1113_v3 = vadd.f32 %v1112_v59, %v1100_v2 }
 0x110   :  { %v1101_v62 = vpop.f32.mrf.mxu2 }
 0x111   :  { %v1114_v0 = vpop.f32.mrf.mxu3 }
 0x120   :  { %v1125_v4 = vpop.f32.mrf.mxu0 }
 0x121   :  { %v1126_v5 = vadd.f32 %v1125_v4, %v1113_v3  ;;  %v1138_v6 = vpop.f32.mrf.mxu1 }
 0x123   :  { %v1139_v7 = vadd.f32 %v1138_v6, %v1126_v5 }
 0x125   :  { %v1144_v10 = vrot.slane %v1139_v7, 6 }
 0x127   :  { %v1146_v11 = vsel %vm1145_vm0, %v1022_v9, %v1144_v10 }
 0x128   :  { %1148 = vst [vmem:[%s2808_s3] sm:$0xf] %v1146_v11  ;;  %v1127_v12 = vpop.f32.mrf.mxu0 }
 0x129   :  { %v1140_v13 = vpop.f32.mrf.mxu1 }

</bundles_post_ra>
